<compile_context>
chip_gen: v7x
topology: tpu7x:2x2x1
jax: 0.10.0
libtpu: 0.0.40
codegen_flags: <defaults>
</compile_context>

<pallas_src>
import functools

import jax
import jax.numpy as jnp
from jax.experimental import pallas as pl
from jax.experimental.pallas import tpu as pltpu


SQRT_2_OVER_PI = 0.7978845608028654  # sqrt(2 / pi)

# Portable VMEM budget: <= v7x's 64 MiB physical, far under v5e/v6e's 128 MiB.
_VMEM_BUDGET_BYTES = 48 * 1024 * 1024


def _gelu_f32(x):
    # tanh-approximation GELU (matches the GELU nn.Module), computed in f32.
    return 0.5 * x * (1.0 + jnp.tanh(SQRT_2_OVER_PI * (x + 0.044715 * x * x * x)))


# ----------------------- fused kernel: weights resident -----------------------

def ff_resident_kernel(x_ref, w1_ref, b1_ref, w2_ref, b2_ref, o_ref):
    """grid = (row tiles,). Weights DMA'd once (constant index_maps).

    x_ref : (TM, D)  bf16 activation row tile
    w1_ref: (D, F)   bf16, resident
    b1_ref: (1, F)   f32
    w2_ref: (F, D)   bf16, resident
    b2_ref: (1, D)   f32
    o_ref : (TM, D)  output tile (lane-dense, D multiple of 128)
    """
    h = jnp.dot(x_ref[...], w1_ref[...], preferred_element_type=jnp.float32)
    h = _gelu_f32(h + b1_ref[...])
    out = jnp.dot(h.astype(jnp.bfloat16), w2_ref[...],
                  preferred_element_type=jnp.float32)
    o_ref[...] = (out + b2_ref[...]).astype(o_ref.dtype)


# ------------------- fused kernel: F-chunked fallback (big F) -----------------

def ff_chunked_kernel(x_ref, w1_ref, b1_ref, w2_ref, b2_ref, o_ref, acc_ref):
    """grid = (row tiles, F chunks). F is the reduction axis of the 2nd matmul."""
    f = pl.program_id(1)

    @pl.when(f == 0)
    def _init():
        acc_ref[...] = jnp.zeros_like(acc_ref)

    h = jnp.dot(x_ref[...], w1_ref[...], preferred_element_type=jnp.float32)
    h = _gelu_f32(h + b1_ref[...])
    acc_ref[...] += jnp.dot(h.astype(jnp.bfloat16), w2_ref[...],
                            preferred_element_type=jnp.float32)

    @pl.when(f == pl.num_programs(1) - 1)
    def _finalize():
        o_ref[...] = (acc_ref[...] + b2_ref[...]).astype(o_ref.dtype)


# --------------------------------- wrapper ------------------------------------

def _round_up(n, m):
    return ((n + m - 1) // m) * m


def _largest_divisor(n, target, multiple):
    """Largest divisor of n that is <= target and a multiple of `multiple`."""
    for cand in range(min(target, n), multiple - 1, -1):
        if n % cand == 0 and cand % multiple == 0:
            return cand
    return multiple


def _resident_vmem_bytes(tm, D, F):
    # Conservative estimate (double-buffered BlockSpec allocations + hidden tmp).
    bytes_x = 2 * tm * D * 2          # bf16 x tile
    bytes_w = 2 * (D * F + F * D) * 2  # bf16 W1 + W2
    bytes_b = 2 * (F + D) * 4
    bytes_out = 2 * tm * D * 4
    bytes_h = tm * F * (4 + 2)        # f32 hidden + bf16 copy for 2nd matmul
    return bytes_x + bytes_w + bytes_b + bytes_out + bytes_h


def _chunked_vmem_bytes(tm, tf, D, F):
    bytes_x = 2 * tm * D * 2
    bytes_w = 2 * (D * tf + tf * D) * 2
    bytes_b = 2 * (tf + D) * 4
    bytes_out = 2 * tm * D * 4
    bytes_acc = tm * D * 4
    bytes_h = tm * tf * (4 + 2)
    return bytes_x + bytes_w + bytes_b + bytes_out + bytes_acc + bytes_h


@functools.partial(jax.jit, static_argnames=("block_rows", "block_f"))
def feedforward_pallas(x, w1, b1, w2, b2, *, block_rows=512, block_f=1024):
    """FeedForward forward for x of shape (..., D) with W1:(D,4D), W2:(4D,D)."""
    orig_shape = x.shape
    D = orig_shape[-1]
    F = w1.shape[1]
    assert w1.shape == (D, F) and w2.shape == (F, D)
    assert b1.shape == (F,) and b2.shape == (D,)
    assert D % 128 == 0, "emb_dim must be a multiple of 128 (lane dimension)"
    assert F % 128 == 0, "hidden dim must be a multiple of 128 (lane dimension)"

    out_dtype = x.dtype
    x2d = x.reshape(-1, D)
    n_rows = x2d.shape[0]

    # Row tile: MXU-native when the batch is large, exact (rounded to the
    # 8-sublane multiple) when the batch is small.
    tm = min(block_rows, _round_up(n_rows, 8))
    # If the whole batch would be a single row tile, halve the tile so the
    # "parallel" row axis can shard across v7x's two TensorCores.
    if n_rows <= tm and tm >= 16 and n_rows > 8:
        tm = _round_up((tm + 1) // 2, 8)

    N = _round_up(n_rows, tm)
    if N != n_rows:
        x2d = jnp.pad(x2d, ((0, N - n_rows), (0, 0)))

    # Cast activations/weights to bf16 ONCE in the wrapper (MXU-native dtype,
    # halves HBM bytes); biases / accumulation / epilogue stay f32.
    x_bf = x2d.astype(jnp.bfloat16)
    w1_bf = w1.astype(jnp.bfloat16)
    w2_bf = w2.astype(jnp.bfloat16)
    b1_2d = b1.reshape(1, F).astype(jnp.float32)
    b2_2d = b2.reshape(1, D).astype(jnp.float32)

    if _resident_vmem_bytes(tm, D, F) <= _VMEM_BUDGET_BYTES:
        # ---- fast path: weights fully resident in VMEM, single grid axis ----
        out = pl.pallas_call(
            ff_resident_kernel,
            out_shape=jax.ShapeDtypeStruct((N, D), out_dtype),
            grid=(N // tm,),
            in_specs=[
                pl.BlockSpec((tm, D), lambda i: (i, 0)),   # x row tile
                pl.BlockSpec((D, F), lambda i: (0, 0)),    # W1, resident
                pl.BlockSpec((1, F), lambda i: (0, 0)),    # b1, resident
                pl.BlockSpec((F, D), lambda i: (0, 0)),    # W2, resident
                pl.BlockSpec((1, D), lambda i: (0, 0)),    # b2, resident
            ],
            out_specs=pl.BlockSpec((tm, D), lambda i: (i, 0)),
            compiler_params=pltpu.CompilerParams(
                dimension_semantics=("parallel",),
                vmem_limit_bytes=_VMEM_BUDGET_BYTES,
            ),
        )(x_bf, w1_bf, b1_2d, w2_bf, b2_2d)
    else:
        # ---- fallback: stream W1/W2 in F chunks with an f32 accumulator ----
        tf = _largest_divisor(F, block_f, multiple=128)
        while _chunked_vmem_bytes(tm, tf, D, F) > _VMEM_BUDGET_BYTES and tf > 128:
            tf = _largest_divisor(F, tf // 2, multiple=128)
        out = pl.pallas_call(
            ff_chunked_kernel,
            out_shape=jax.ShapeDtypeStruct((N, D), out_dtype),
            grid=(N // tm, F // tf),
            in_specs=[
                pl.BlockSpec((tm, D), lambda i, f: (i, 0)),   # x row tile
                pl.BlockSpec((D, tf), lambda i, f: (0, f)),   # W1 column chunk
                pl.BlockSpec((1, tf), lambda i, f: (0, f)),   # b1 chunk
                pl.BlockSpec((tf, D), lambda i, f: (f, 0)),   # W2 row chunk
                pl.BlockSpec((1, D), lambda i, f: (0, 0)),    # b2 (finalize)
            ],
            out_specs=pl.BlockSpec((tm, D), lambda i, f: (i, 0)),
            scratch_shapes=[pltpu.VMEM((tm, D), jnp.float32)],
            compiler_params=pltpu.CompilerParams(
                dimension_semantics=("parallel", "arbitrary"),
                vmem_limit_bytes=_VMEM_BUDGET_BYTES,
            ),
        )(x_bf, w1_bf, b1_2d, w2_bf, b2_2d)

    if N != n_rows:
        out = out[:n_rows]
    return out.reshape(orig_shape)


# ----------------------------- pure-JAX reference -----------------------------

def feedforward_ref(x, w1, b1, w2, b2):
    h = _gelu_f32(jnp.dot(x, w1, precision=jax.lax.Precision.HIGHEST) + b1)
    return jnp.dot(h, w2, precision=jax.lax.Precision.HIGHEST) + b2


# ------------------------------------ main -------------------------------------

if __name__ == "__main__":
    cfg = {"emb_dim": 768}
    D = cfg["emb_dim"]
    F = 4 * D

    key = jax.random.PRNGKey(0)
    kx, k1, k2, k3, k4 = jax.random.split(key, 5)

    # Matches the module's example usage: x = torch.rand(2, 4, 768)
    x = jax.random.uniform(kx, (2, 4, D), jnp.float32)
    w1 = 0.02 * jax.random.normal(k1, (D, F), jnp.float32)
    b1 = 0.02 * jax.random.normal(k2, (F,), jnp.float32)
    w2 = 0.02 * jax.random.normal(k3, (F, D), jnp.float32)
    b2 = 0.02 * jax.random.normal(k4, (D,), jnp.float32)

    out = jax.block_until_ready(feedforward_pallas(x, w1, b1, w2, b2))
    assert out.shape == x.shape

    # NOTE: the kernel uses bf16 MXU matmuls (f32 accumulation); the reference
    # is f32 HIGHEST, so a ~1e-3-level difference is expected and accepted.
    ref = jax.block_until_ready(feedforward_ref(x, w1, b1, w2, b2))
    if not bool(jnp.allclose(out, ref, rtol=2e-2, atol=2e-2)):
        max_err = float(jnp.max(jnp.abs(out - ref)))
        raise AssertionError(
            f"Pallas FeedForward mismatch vs reference (max abs err {max_err})")

    print("KERNEL_OK")
</pallas_src>

<mosaic_0001>
module attributes {stable_mosaic.version = 11 : i64} {
  func.func @ff_resident_kernel(%arg0: i32, %arg1: memref<8x768xbf16, #tpu.memory_space<vmem>>, %arg2: memref<768x3072xbf16, #tpu.memory_space<vmem>>, %arg3: memref<1x3072xf32, #tpu.memory_space<vmem>>, %arg4: memref<3072x768xbf16, #tpu.memory_space<vmem>>, %arg5: memref<1x768xf32, #tpu.memory_space<vmem>>, %arg6: memref<8x768xf32, #tpu.memory_space<vmem>>) attributes {dimension_semantics = [#tpu.dimension_semantics<parallel>], iteration_bounds = array<i64: 1>, scalar_prefetch = 0 : i64, scratch_operands = 0 : i64, tpu.core_type = #tpu.core_type<tc>, window_params = [{transform_indices = @transform_0, window_bounds = array<i64: 8, 768>}, {pipeline_mode = #tpu.pipeline_mode<synchronous>, transform_indices = @transform_1, window_bounds = array<i64: 768, 3072>}, {pipeline_mode = #tpu.pipeline_mode<synchronous>, transform_indices = @transform_2, window_bounds = array<i64: 1, 3072>}, {pipeline_mode = #tpu.pipeline_mode<synchronous>, transform_indices = @transform_3, window_bounds = array<i64: 3072, 768>}, {pipeline_mode = #tpu.pipeline_mode<synchronous>, transform_indices = @transform_4, window_bounds = array<i64: 1, 768>}, {transform_indices = @transform_5, window_bounds = array<i64: 8, 768>}]} {
    %c0 = arith.constant 0 : index
    %c0_0 = arith.constant 0 : index
    %0 = vector.load %arg1[%c0, %c0_0] : memref<8x768xbf16, #tpu.memory_space<vmem>>, vector<8x768xbf16>
    %c0_1 = arith.constant 0 : index
    %c0_2 = arith.constant 0 : index
    %1 = vector.load %arg2[%c0_1, %c0_2] : memref<768x3072xbf16, #tpu.memory_space<vmem>>, vector<768x3072xbf16>
    %cst = arith.constant dense<0.000000e+00> : vector<8x3072xf32>
    %2 = tpu.matmul %0, %1, %cst {dimension_numbers = #tpu.dot_dimension_numbers<[1], [0], [0], [1], [0, 0, 1, 1], [], []>} : vector<8x768xbf16>, vector<768x3072xbf16>, vector<8x3072xf32> -> vector<8x3072xf32>
    %c0_3 = arith.constant 0 : index
    %c0_4 = arith.constant 0 : index
    %3 = vector.load %arg3[%c0_3, %c0_4] : memref<1x3072xf32, #tpu.memory_space<vmem>>, vector<1x3072xf32>
    %4 = vector.broadcast %3 : vector<1x3072xf32> to vector<8x3072xf32>
    %5 = arith.addf %2, %4 : vector<8x3072xf32>
    %cst_5 = arith.constant 5.000000e-01 : f32
    %6 = vector.broadcast %cst_5 : f32 to vector<8x3072xf32>
    %7 = arith.mulf %6, %5 : vector<8x3072xf32>
    %cst_6 = arith.constant 4.471500e-02 : f32
    %8 = vector.broadcast %cst_6 : f32 to vector<8x3072xf32>
    %9 = arith.mulf %8, %5 : vector<8x3072xf32>
    %10 = arith.mulf %9, %5 : vector<8x3072xf32>
    %11 = arith.mulf %10, %5 : vector<8x3072xf32>
    %12 = arith.addf %5, %11 : vector<8x3072xf32>
    %cst_7 = arith.constant 0.797884583 : f32
    %13 = vector.broadcast %cst_7 : f32 to vector<8x3072xf32>
    %14 = arith.mulf %13, %12 : vector<8x3072xf32>
    %15 = math.tanh %14 : vector<8x3072xf32>
    %cst_8 = arith.constant 1.000000e+00 : f32
    %16 = vector.broadcast %cst_8 : f32 to vector<8x3072xf32>
    %17 = arith.addf %16, %15 : vector<8x3072xf32>
    %18 = arith.mulf %7, %17 : vector<8x3072xf32>
    %19 = arith.truncf %18 : vector<8x3072xf32> to vector<8x3072xbf16>
    %c0_9 = arith.constant 0 : index
    %c0_10 = arith.constant 0 : index
    %20 = vector.load %arg4[%c0_9, %c0_10] : memref<3072x768xbf16, #tpu.memory_space<vmem>>, vector<3072x768xbf16>
    %cst_11 = arith.constant dense<0.000000e+00> : vector<8x768xf32>
    %21 = tpu.matmul %19, %20, %cst_11 {dimension_numbers = #tpu.dot_dimension_numbers<[1], [0], [0], [1], [0, 0, 1, 1], [], []>} : vector<8x3072xbf16>, vector<3072x768xbf16>, vector<8x768xf32> -> vector<8x768xf32>
    %c0_12 = arith.constant 0 : index
    %c0_13 = arith.constant 0 : index
    %22 = vector.load %arg5[%c0_12, %c0_13] : memref<1x768xf32, #tpu.memory_space<vmem>>, vector<1x768xf32>
    %23 = vector.broadcast %22 : vector<1x768xf32> to vector<8x768xf32>
    %24 = arith.addf %21, %23 : vector<8x768xf32>
    %c0_14 = arith.constant 0 : index
    %c0_15 = arith.constant 0 : index
    %25 = vector.load %arg6[%c0_14, %c0_15] : memref<8x768xf32, #tpu.memory_space<vmem>>, vector<8x768xf32>
    tpu.vector_store %arg6[%c0_14, %c0_15], %24 {strides = array<i32>} : memref<8x768xf32, #tpu.memory_space<vmem>>, vector<8x768xf32>,
    return
  }
  func.func @transform_0(%arg0: i32) -> (i32, i32) {
    %c0_i32 = arith.constant 0 : i32
    %c0_i32_0 = arith.constant 0 : i32
    return %arg0, %c0_i32 : i32, i32
  }
  func.func @transform_1(%arg0: i32) -> (i32, i32) {
    %c0_i32 = arith.constant 0 : i32
    %c0_i32_0 = arith.constant 0 : i32
    %c0_i32_1 = arith.constant 0 : i32
    return %c0_i32, %c0_i32_0 : i32, i32
  }
  func.func @transform_2(%arg0: i32) -> (i32, i32) {
    %c0_i32 = arith.constant 0 : i32
    %c0_i32_0 = arith.constant 0 : i32
    %c0_i32_1 = arith.constant 0 : i32
    return %c0_i32, %c0_i32_0 : i32, i32
  }
  func.func @transform_3(%arg0: i32) -> (i32, i32) {
    %c0_i32 = arith.constant 0 : i32
    %c0_i32_0 = arith.constant 0 : i32
    %c0_i32_1 = arith.constant 0 : i32
    return %c0_i32, %c0_i32_0 : i32, i32
  }
  func.func @transform_4(%arg0: i32) -> (i32, i32) {
    %c0_i32 = arith.constant 0 : i32
    %c0_i32_0 = arith.constant 0 : i32
    %c0_i32_1 = arith.constant 0 : i32
    return %c0_i32, %c0_i32_0 : i32, i32
  }
  func.func @transform_5(%arg0: i32) -> (i32, i32) {
    %c0_i32 = arith.constant 0 : i32
    %c0_i32_0 = arith.constant 0 : i32
    return %arg0, %c0_i32 : i32, i32
  }
}

</mosaic_0001>

<bundles_post_ra>
// kernel: feedforward_pallas.1
= control target key start
LH: loop header
LB: loop body
LE: loop exit
PB: predicated region body
PF: predicated region fallthrough
CT: control target
= control target key end

     0   :  { %s29047_s1 = inlined_call_operand.vmem [shape: bf16[768,3072], index: 1, kind: input, shape index: {}]   ;;  %s29048_s0 = inlined_call_operand.vmem [shape: bf16[8,768], index: 0, kind: input, shape index: {}]   ;;  %s29049_s3 = inlined_call_operand.vmem [shape: bf16[3072,768], index: 3, kind: input, shape index: {}]   ;;  %s29050_s2 = inlined_call_operand.vmem [shape: f32[1,3072], index: 2, kind: input, shape index: {}]   ;;  %s29051_s4 = inlined_call_operand.vmem [shape: f32[1,768], index: 4, kind: input, shape index: {}]   ;;  %s29052_s5 = inlined_call_operand.vmem [shape: f32[8,768], index: 5, kind: output, shape index: {}]  }
   0x1   :  { %v23_v0 = vld [vmem:[%s29047_s1] sm:$0xff] }
   0x2   :  { %v35_v1 = vld [vmem:[%s29047_s1 + $0x60] sm:$0xff] }
   0x3   :  { %v27_v2 = vld [vmem:[%s29047_s1 + $0x20] sm:$0xff]  ;;  %v17235_v3 = vcombine.high %v23_v0, %v35_v1  ;;  %v17234_v5 = vcombine.low %v23_v0, %v35_v1 }
   0x4   :  { %v39_v4 = vld [vmem:[%s29047_s1 + $0x80] sm:$0xff] }
   0x5   :  { %v47_v6 = vld [vmem:[%s29047_s1 + $0xc0] sm:$0xff]  ;;  %v17243_v8 = vcombine.high %v27_v2, %v39_v4  ;;  %v17242_v9 = vcombine.low %v27_v2, %v39_v4  ;;  %7082 = vmatprep.subr.bf16.mxu1 %v17235_v3 }
   0x6   :  { %v59_v7 = vld [vmem:[%s29047_s1 + $0x120] sm:$0xff]  ;;  %7083 = vmatpush1.bf16.msra.mxu1 %v17234_v5 }
   0x7   :  { %v17259_v10 = vcombine.high %v47_v6, %v59_v7  ;;  %v51_v11 = vld [vmem:[%s29047_s1 + $0xe0] sm:$0xff]  ;;  %7574 = vmatprep.subr.bf16.mxu0 %v17243_v8  ;;  %v17258_v18 = vcombine.low %v47_v6, %v59_v7 }
   0x8   :  { %v63_v12 = vld [vmem:[%s29047_s1 + $0x140] sm:$0xff]  ;;  %7575 = vmatpush1.bf16.msra.mxu0 %v17242_v9 }
   0x9   :  { %v71_v13 = vld [vmem:[%s29047_s1 + $0x180] sm:$0xff]  ;;  %v17267_v14 = vcombine.high %v51_v11, %v63_v12  ;;  %7084 = vmatprep.subr.bf16.mxu1 %v17259_v10  ;;  %v17266_v19 = vcombine.low %v51_v11, %v63_v12 }
   0xa   :  { %v83_v15 = vld [vmem:[%s29047_s1 + $0x1e0] sm:$0xff]  ;;  %7085 = vmatpush1.bf16.msra.mxu1 %v17258_v18 }
   0xb   :  { %v75_v16 = vld [vmem:[%s29047_s1 + $0x1a0] sm:$0xff]  ;;  %v17283_v20 = vcombine.high %v71_v13, %v83_v15  ;;  %7576 = vmatprep.subr.bf16.mxu0 %v17267_v14  ;;  %v17282_v26 = vcombine.low %v71_v13, %v83_v15 }
   0xc   :  { %v87_v17 = vld [vmem:[%s29047_s1 + $0x200] sm:$0xff]  ;;  %7577 = vmatpush1.bf16.msra.mxu0 %v17266_v19 }
   0xd   :  { %v17291_v21 = vcombine.high %v75_v16, %v87_v17  ;;  %v95_v22 = vld [vmem:[%s29047_s1 + $0x240] sm:$0xff]  ;;  %7086 = vmatprep.subr.bf16.mxu1 %v17283_v20  ;;  %v17290_v27 = vcombine.low %v75_v16, %v87_v17 }
   0xe   :  { %v107_v23 = vld [vmem:[%s29047_s1 + $0x2a0] sm:$0xff]  ;;  %7087 = vmatpush1.bf16.msra.mxu1 %v17282_v26 }
   0xf   :  { %v99_v24 = vld [vmem:[%s29047_s1 + $0x260] sm:$0xff]  ;;  %v17307_v28 = vcombine.high %v95_v22, %v107_v23  ;;  %7578 = vmatprep.subr.bf16.mxu0 %v17291_v21  ;;  %v17306_v34 = vcombine.low %v95_v22, %v107_v23 }
  0x10   :  { %v111_v25 = vld [vmem:[%s29047_s1 + $0x2c0] sm:$0xff]  ;;  %7579 = vmatpush1.bf16.msra.mxu0 %v17290_v27 }
  0x11   :  { %v17315_v29 = vcombine.high %v99_v24, %v111_v25  ;;  %v119_v30 = vld [vmem:[%s29047_s1 + $0x300] sm:$0xff]  ;;  %7088 = vmatprep.subr.bf16.mxu1 %v17307_v28  ;;  %v17314_v35 = vcombine.low %v99_v24, %v111_v25 }
  0x12   :  { %v131_v31 = vld [vmem:[%s29047_s1 + $0x360] sm:$0xff]  ;;  %7089 = vmatpush1.bf16.msra.mxu1 %v17306_v34 }
  0x13   :  { %v123_v32 = vld [vmem:[%s29047_s1 + $0x320] sm:$0xff]  ;;  %v17331_v36 = vcombine.high %v119_v30, %v131_v31  ;;  %7580 = vmatprep.subr.bf16.mxu0 %v17315_v29  ;;  %v17330_v42 = vcombine.low %v119_v30, %v131_v31 }
  0x14   :  { %v135_v33 = vld [vmem:[%s29047_s1 + $0x380] sm:$0xff]  ;;  %7581 = vmatpush1.bf16.msra.mxu0 %v17314_v35 }
  0x15   :  { %v17339_v37 = vcombine.high %v123_v32, %v135_v33  ;;  %v143_v38 = vld [vmem:[%s29047_s1 + $0x3c0] sm:$0xff]  ;;  %7090 = vmatprep.subr.bf16.mxu1 %v17331_v36  ;;  %v17338_v43 = vcombine.low %v123_v32, %v135_v33 }
  0x16   :  { %v155_v39 = vld [vmem:[%s29047_s1 + $0x420] sm:$0xff]  ;;  %7091 = vmatpush1.bf16.msra.mxu1 %v17330_v42 }
  0x17   :  { %v147_v40 = vld [vmem:[%s29047_s1 + $0x3e0] sm:$0xff]  ;;  %v17355_v44 = vcombine.high %v143_v38, %v155_v39  ;;  %7582 = vmatprep.subr.bf16.mxu0 %v17339_v37  ;;  %v17354_v50 = vcombine.low %v143_v38, %v155_v39 }
  0x18   :  { %v159_v41 = vld [vmem:[%s29047_s1 + $0x440] sm:$0xff]  ;;  %7583 = vmatpush1.bf16.msra.mxu0 %v17338_v43 }
  0x19   :  { %v17363_v45 = vcombine.high %v147_v40, %v159_v41  ;;  %v167_v46 = vld [vmem:[%s29047_s1 + $0x480] sm:$0xff]  ;;  %7092 = vmatprep.subr.bf16.mxu1 %v17355_v44  ;;  %v17362_v51 = vcombine.low %v147_v40, %v159_v41 }
  0x1a   :  { %v179_v47 = vld [vmem:[%s29047_s1 + $0x4e0] sm:$0xff]  ;;  %7093 = vmatpush1.bf16.msra.mxu1 %v17354_v50 }
  0x1b   :  { %v171_v48 = vld [vmem:[%s29047_s1 + $0x4a0] sm:$0xff]  ;;  %v17379_v52 = vcombine.high %v167_v46, %v179_v47  ;;  %7584 = vmatprep.subr.bf16.mxu0 %v17363_v45  ;;  %v17378_v60 = vcombine.low %v167_v46, %v179_v47 }
  0x1c   :  { %v183_v49 = vld [vmem:[%s29047_s1 + $0x500] sm:$0xff]  ;;  %7585 = vmatpush1.bf16.msra.mxu0 %v17362_v51 }
  0x1d   :  { %v21701_v53 = vld [vmem:[%s29048_s0] sm:$0xff]  ;;  %v17387_v54 = vcombine.high %v171_v48, %v183_v49  ;;  %7094 = vmatprep.subr.bf16.mxu1 %v17379_v52  ;;  %v17386_v61 = vcombine.low %v171_v48, %v183_v49 }
  0x1e   :  { %v191_v55 = vld [vmem:[%s29047_s1 + $0x540] sm:$0xff]  ;;  %v21711_v57 = vcombine.high %v21701_v53, %v21701_v53  ;;  %7095 = vmatpush1.bf16.msra.mxu1 %v17378_v60 }
  0x1f   :  { %v203_v56 = vld [vmem:[%s29047_s1 + $0x5a0] sm:$0xff]  ;;  %7586 = vmatprep.subr.bf16.mxu0 %v17387_v54 }
  0x20   :  { %v195_v58 = vld [vmem:[%s29047_s1 + $0x560] sm:$0xff]  ;;  %7114 = vmatprep.mubr.bf16.mxu1 %v21711_v57  ;;  %v17403_v62 = vcombine.high %v191_v55, %v203_v56  ;;  %7606 = vmatprep.mubr.bf16.mxu0 %v21711_v57  ;;  %v17402_v4 = vcombine.low %v191_v55, %v203_v56 }
  0x21   :  { %v207_v59 = vld [vmem:[%s29047_s1 + $0x5c0] sm:$0xff]  ;;  %7587 = vmatpush1.bf16.msra.mxu0 %v17386_v61 }
  0x22   :  { %v17411_v63 = vcombine.high %v195_v58, %v207_v59  ;;  %v215_v0 = vld [vmem:[%s29047_s1 + $0x600] sm:$0xff]  ;;  %7096 = vmatprep.subr.bf16.mxu1 %v17403_v62  ;;  %v17410_v5 = vcombine.low %v195_v58, %v207_v59 }
  0x23   :  { %v227_v1 = vld [vmem:[%s29047_s1 + $0x660] sm:$0xff]  ;;  %7097 = vmatpush1.bf16.msra.mxu1 %v17402_v4 }
  0x24   :  { %v219_v2 = vld [vmem:[%s29047_s1 + $0x620] sm:$0xff]  ;;  %v17427_v6 = vcombine.high %v215_v0, %v227_v1  ;;  %7588 = vmatprep.subr.bf16.mxu0 %v17411_v63  ;;  %v17426_v12 = vcombine.low %v215_v0, %v227_v1 }
  0x25   :  { %v231_v3 = vld [vmem:[%s29047_s1 + $0x680] sm:$0xff]  ;;  %7589 = vmatpush1.bf16.msra.mxu0 %v17410_v5 }
  0x26   :  { %v17435_v7 = vcombine.high %v219_v2, %v231_v3  ;;  %v239_v8 = vld [vmem:[%s29047_s1 + $0x6c0] sm:$0xff]  ;;  %7098 = vmatprep.subr.bf16.mxu1 %v17427_v6  ;;  %v17434_v13 = vcombine.low %v219_v2, %v231_v3 }
  0x27   :  { %v251_v9 = vld [vmem:[%s29047_s1 + $0x720] sm:$0xff]  ;;  %7099 = vmatpush1.bf16.msra.mxu1 %v17426_v12  ;;  %v21837_v12 = vcombine.low %v21701_v53, %v21701_v53 }
  0x28   :  { %v243_v10 = vld [vmem:[%s29047_s1 + $0x6e0] sm:$0xff]  ;;  %v17451_v14 = vcombine.high %v239_v8, %v251_v9  ;;  %7590 = vmatprep.subr.bf16.mxu0 %v17435_v7  ;;  %v17450_v20 = vcombine.low %v239_v8, %v251_v9 }
  0x29   :  { %v255_v11 = vld [vmem:[%s29047_s1 + $0x740] sm:$0xff]  ;;  %7591 = vmatpush1.bf16.msra.mxu0 %v17434_v13 }
  0x2a   :  { %v17459_v15 = vcombine.high %v243_v10, %v255_v11  ;;  %v263_v16 = vld [vmem:[%s29047_s1 + $0x780] sm:$0xff]  ;;  %7100 = vmatprep.subr.bf16.mxu1 %v17451_v14  ;;  %v17458_v21 = vcombine.low %v243_v10, %v255_v11 }
  0x2b   :  { %v275_v17 = vld [vmem:[%s29047_s1 + $0x7e0] sm:$0xff]  ;;  %7101 = vmatpush1.bf16.msra.mxu1 %v17450_v20 }
  0x2c   :  { %v267_v18 = vld [vmem:[%s29047_s1 + $0x7a0] sm:$0xff]  ;;  %v17475_v22 = vcombine.high %v263_v16, %v275_v17  ;;  %7592 = vmatprep.subr.bf16.mxu0 %v17459_v15  ;;  %v17474_v28 = vcombine.low %v263_v16, %v275_v17  ;;  %v21848_v15 = vld [vmem:[%s29048_s0 + $0x8] sm:$0xff] }
  0x2d   :  { %v279_v19 = vld [vmem:[%s29047_s1 + $0x800] sm:$0xff]  ;;  %7593 = vmatpush1.bf16.msra.mxu0 %v17458_v21  ;;  %v21858_v21 = vcombine.high %v21848_v15, %v21848_v15 }
  0x2e   :  { %v17483_v23 = vcombine.high %v267_v18, %v279_v19  ;;  %v287_v24 = vld [vmem:[%s29047_s1 + $0x840] sm:$0xff]  ;;  %7102 = vmatprep.subr.bf16.mxu1 %v17475_v22  ;;  %v17482_v29 = vcombine.low %v267_v18, %v279_v19 }
  0x2f   :  { %v299_v25 = vld [vmem:[%s29047_s1 + $0x8a0] sm:$0xff]  ;;  %7103 = vmatpush1.bf16.msra.mxu1 %v17474_v28 }
  0x30   :  { %v291_v26 = vld [vmem:[%s29047_s1 + $0x860] sm:$0xff]  ;;  %v17499_v30 = vcombine.high %v287_v24, %v299_v25  ;;  %7594 = vmatprep.subr.bf16.mxu0 %v17483_v23  ;;  %v17498_v36 = vcombine.low %v287_v24, %v299_v25 }
  0x31   :  { %v303_v27 = vld [vmem:[%s29047_s1 + $0x8c0] sm:$0xff]  ;;  %7595 = vmatpush1.bf16.msra.mxu0 %v17482_v29 }
  0x32   :  { %v17507_v31 = vcombine.high %v291_v26, %v303_v27  ;;  %v311_v32 = vld [vmem:[%s29047_s1 + $0x900] sm:$0xff]  ;;  %7104 = vmatprep.subr.bf16.mxu1 %v17499_v30  ;;  %v17506_v37 = vcombine.low %v291_v26, %v303_v27 }
  0x33   :  { %v323_v33 = vld [vmem:[%s29047_s1 + $0x960] sm:$0xff]  ;;  %7105 = vmatpush1.bf16.msra.mxu1 %v17498_v36 }
  0x34   :  { %v315_v34 = vld [vmem:[%s29047_s1 + $0x920] sm:$0xff]  ;;  %v17523_v38 = vcombine.high %v311_v32, %v323_v33  ;;  %7596 = vmatprep.subr.bf16.mxu0 %v17507_v31  ;;  %v17522_v44 = vcombine.low %v311_v32, %v323_v33 }
  0x35   :  { %v327_v35 = vld [vmem:[%s29047_s1 + $0x980] sm:$0xff]  ;;  %7597 = vmatpush1.bf16.msra.mxu0 %v17506_v37 }
  0x36   :  { %v17531_v39 = vcombine.high %v315_v34, %v327_v35  ;;  %v335_v40 = vld [vmem:[%s29047_s1 + $0x9c0] sm:$0xff]  ;;  %7106 = vmatprep.subr.bf16.mxu1 %v17523_v38  ;;  %v17530_v45 = vcombine.low %v315_v34, %v327_v35 }
  0x37   :  { %v347_v41 = vld [vmem:[%s29047_s1 + $0xa20] sm:$0xff]  ;;  %7107 = vmatpush1.bf16.msra.mxu1 %v17522_v44 }
  0x38   :  { %v339_v42 = vld [vmem:[%s29047_s1 + $0x9e0] sm:$0xff]  ;;  %v17547_v46 = vcombine.high %v335_v40, %v347_v41  ;;  %7598 = vmatprep.subr.bf16.mxu0 %v17531_v39  ;;  %v17546_v52 = vcombine.low %v335_v40, %v347_v41 }
  0x39   :  { %v351_v43 = vld [vmem:[%s29047_s1 + $0xa40] sm:$0xff]  ;;  %7599 = vmatpush1.bf16.msra.mxu0 %v17530_v45 }
  0x3a   :  { %v17555_v47 = vcombine.high %v339_v42, %v351_v43  ;;  %v359_v48 = vld [vmem:[%s29047_s1 + $0xa80] sm:$0xff]  ;;  %7108 = vmatprep.subr.bf16.mxu1 %v17547_v46  ;;  %v17554_v54 = vcombine.low %v339_v42, %v351_v43 }
  0x3b   :  { %v371_v49 = vld [vmem:[%s29047_s1 + $0xae0] sm:$0xff]  ;;  %7109 = vmatpush1.bf16.msra.mxu1 %v17546_v52 }
  0x3c   :  { %v363_v50 = vld [vmem:[%s29047_s1 + $0xaa0] sm:$0xff]  ;;  %v17571_v55 = vcombine.high %v359_v48, %v371_v49  ;;  %7600 = vmatprep.subr.bf16.mxu0 %v17555_v47  ;;  %v17570_v62 = vcombine.low %v359_v48, %v371_v49 }
  0x3d   :  { %v375_v51 = vld [vmem:[%s29047_s1 + $0xb00] sm:$0xff]  ;;  %7601 = vmatpush1.bf16.msra.mxu0 %v17554_v54 }
  0x3e   :  { %v17579_v56 = vcombine.high %v363_v50, %v375_v51  ;;  %v383_v58 = vld [vmem:[%s29047_s1 + $0xb40] sm:$0xff]  ;;  %7110 = vmatprep.subr.bf16.mxu1 %v17571_v55  ;;  %v17578_v63 = vcombine.low %v363_v50, %v375_v51 }
  0x3f   :  { %v395_v59 = vld [vmem:[%s29047_s1 + $0xba0] sm:$0xff]  ;;  %7111 = vmatpush1.bf16.msra.mxu1 %v17570_v62 }
  0x40   :  { %v387_v60 = vld [vmem:[%s29047_s1 + $0xb60] sm:$0xff]  ;;  %v17595_v0 = vcombine.high %v383_v58, %v395_v59  ;;  %7602 = vmatprep.subr.bf16.mxu0 %v17579_v56  ;;  %v17594_v6 = vcombine.low %v383_v58, %v395_v59 }
  0x41   :  { %v399_v61 = vld [vmem:[%s29047_s1 + $0xbc0] sm:$0xff]  ;;  %7603 = vmatpush1.bf16.msra.mxu0 %v17578_v63 }
  0x42   :  { %v17603_v1 = vcombine.high %v387_v60, %v399_v61  ;;  %v407_v2 = vld [vmem:[%s29047_s1 + $0xc00] sm:$0xff]  ;;  %7112 = vmatprep.subr.bf16.mxu1 %v17595_v0  ;;  %v17602_v7 = vcombine.low %v387_v60, %v399_v61 }
  0x43   :  { %v419_v3 = vld [vmem:[%s29047_s1 + $0xc60] sm:$0xff]  ;;  %7113 = vmatpush1.bf16.msra.mxu1 %v17594_v6 }
  0x44   :  { %v411_v4 = vld [vmem:[%s29047_s1 + $0xc20] sm:$0xff]  ;;  %v17619_v8 = vcombine.high %v407_v2, %v419_v3  ;;  %7604 = vmatprep.subr.bf16.mxu0 %v17603_v1  ;;  %v17618_v16 = vcombine.low %v407_v2, %v419_v3 }
  0x45   :  { %v423_v5 = vld [vmem:[%s29047_s1 + $0xc80] sm:$0xff]  ;;  %7605 = vmatpush1.bf16.msra.mxu0 %v17602_v7 }
  0x46   :  { %v17627_v9 = vcombine.high %v411_v4, %v423_v5  ;;  %v431_v10 = vld [vmem:[%s29047_s1 + $0xcc0] sm:$0xff]  ;;  %7123 = vmatprep.subr.bf16.mxu1 %v17619_v8  ;;  %v17626_v17 = vcombine.low %v411_v4, %v423_v5  ;;  %7115 = vmatmul.mubr.bf16.vlgmr.msra.gmra.mrb[0].mxu1 %v21837_v12 }
  0x47   :  { %v443_v11 = vld [vmem:[%s29047_s1 + $0xd20] sm:$0xff]  ;;  %7124 = vmatpush1.bf16.msra.mxu1 %v17618_v16  ;;  %7155 = vmatprep.mubr.bf16.mxu1 %v21858_v21 }
  0x48   :  { %v435_v13 = vld [vmem:[%s29047_s1 + $0xce0] sm:$0xff]  ;;  %v17643_v53 = vcombine.high %v431_v10, %v443_v11  ;;  %7615 = vmatprep.subr.bf16.mxu0 %v17627_v9  ;;  %7607 = vmatmul.mubr.bf16.vlgmr.msra.gmra.mrb[0].mxu0 %v21837_v12  ;;  %v17642_v24 = vcombine.low %v431_v10, %v443_v11 }
  0x49   :  { %v447_v14 = vld [vmem:[%s29047_s1 + $0xd40] sm:$0xff]  ;;  %7616 = vmatpush1.bf16.msra.mxu0 %v17626_v17  ;;  %7647 = vmatprep.mubr.bf16.mxu0 %v21858_v21 }
  0x4a   :  { %v17651_v18 = vcombine.high %v435_v13, %v447_v14  ;;  %v455_v19 = vld [vmem:[%s29047_s1 + $0xd80] sm:$0xff]  ;;  %7125 = vmatprep.subr.bf16.mxu1 %v17643_v53  ;;  %v17650_v25 = vcombine.low %v435_v13, %v447_v14 }
  0x4b   :  { %v467_v20 = vld [vmem:[%s29047_s1 + $0xde0] sm:$0xff]  ;;  %7126 = vmatpush1.bf16.msra.mxu1 %v17642_v24 }
  0x4c   :  { %v459_v22 = vld [vmem:[%s29047_s1 + $0xda0] sm:$0xff]  ;;  %v17667_v26 = vcombine.high %v455_v19, %v467_v20  ;;  %7617 = vmatprep.subr.bf16.mxu0 %v17651_v18  ;;  %v17666_v32 = vcombine.low %v455_v19, %v467_v20 }
  0x4d   :  { %v471_v23 = vld [vmem:[%s29047_s1 + $0xe00] sm:$0xff]  ;;  %7618 = vmatpush1.bf16.msra.mxu0 %v17650_v25 }
  0x4e   :  { %v17675_v27 = vcombine.high %v459_v22, %v471_v23  ;;  %v479_v28 = vld [vmem:[%s29047_s1 + $0xe40] sm:$0xff]  ;;  %7127 = vmatprep.subr.bf16.mxu1 %v17667_v26  ;;  %v17674_v33 = vcombine.low %v459_v22, %v471_v23 }
  0x4f   :  { %v491_v29 = vld [vmem:[%s29047_s1 + $0xea0] sm:$0xff]  ;;  %7128 = vmatpush1.bf16.msra.mxu1 %v17666_v32 }
  0x50   :  { %v483_v30 = vld [vmem:[%s29047_s1 + $0xe60] sm:$0xff]  ;;  %v17691_v34 = vcombine.high %v479_v28, %v491_v29  ;;  %7619 = vmatprep.subr.bf16.mxu0 %v17675_v27  ;;  %v17690_v40 = vcombine.low %v479_v28, %v491_v29 }
  0x51   :  { %v495_v31 = vld [vmem:[%s29047_s1 + $0xec0] sm:$0xff]  ;;  %7620 = vmatpush1.bf16.msra.mxu0 %v17674_v33 }
  0x52   :  { %v17699_v35 = vcombine.high %v483_v30, %v495_v31  ;;  %v503_v36 = vld [vmem:[%s29047_s1 + $0xf00] sm:$0xff]  ;;  %7129 = vmatprep.subr.bf16.mxu1 %v17691_v34  ;;  %v17698_v41 = vcombine.low %v483_v30, %v495_v31 }
  0x53   :  { %v515_v37 = vld [vmem:[%s29047_s1 + $0xf60] sm:$0xff]  ;;  %7130 = vmatpush1.bf16.msra.mxu1 %v17690_v40 }
  0x54   :  { %v507_v38 = vld [vmem:[%s29047_s1 + $0xf20] sm:$0xff]  ;;  %v17715_v42 = vcombine.high %v503_v36, %v515_v37  ;;  %7621 = vmatprep.subr.bf16.mxu0 %v17699_v35  ;;  %v17714_v48 = vcombine.low %v503_v36, %v515_v37 }
  0x55   :  { %v519_v39 = vld [vmem:[%s29047_s1 + $0xf80] sm:$0xff]  ;;  %7622 = vmatpush1.bf16.msra.mxu0 %v17698_v41 }
  0x56   :  { %v17723_v43 = vcombine.high %v507_v38, %v519_v39  ;;  %v527_v44 = vld [vmem:[%s29047_s1 + $0xfc0] sm:$0xff]  ;;  %7131 = vmatprep.subr.bf16.mxu1 %v17715_v42  ;;  %v17722_v49 = vcombine.low %v507_v38, %v519_v39 }
  0x57   :  { %v539_v45 = vld [vmem:[%s29047_s1 + $0x1020] sm:$0xff]  ;;  %7132 = vmatpush1.bf16.msra.mxu1 %v17714_v48 }
  0x58   :  { %v531_v46 = vld [vmem:[%s29047_s1 + $0xfe0] sm:$0xff]  ;;  %v17739_v50 = vcombine.high %v527_v44, %v539_v45  ;;  %7623 = vmatprep.subr.bf16.mxu0 %v17723_v43  ;;  %v17738_v58 = vcombine.low %v527_v44, %v539_v45 }
  0x59   :  { %v543_v47 = vld [vmem:[%s29047_s1 + $0x1040] sm:$0xff]  ;;  %7624 = vmatpush1.bf16.msra.mxu0 %v17722_v49 }
  0x5a   :  { %v17747_v51 = vcombine.high %v531_v46, %v543_v47  ;;  %v551_v52 = vld [vmem:[%s29047_s1 + $0x1080] sm:$0xff]  ;;  %7133 = vmatprep.subr.bf16.mxu1 %v17739_v50  ;;  %v17746_v59 = vcombine.low %v531_v46, %v543_v47 }
  0x5b   :  { %v563_v54 = vld [vmem:[%s29047_s1 + $0x10e0] sm:$0xff]  ;;  %7134 = vmatpush1.bf16.msra.mxu1 %v17738_v58 }
  0x5c   :  { %v555_v55 = vld [vmem:[%s29047_s1 + $0x10a0] sm:$0xff]  ;;  %v17763_v60 = vcombine.high %v551_v52, %v563_v54  ;;  %7625 = vmatprep.subr.bf16.mxu0 %v17747_v51  ;;  %v17762_v2 = vcombine.low %v551_v52, %v563_v54 }
  0x5d   :  { %v567_v56 = vld [vmem:[%s29047_s1 + $0x1100] sm:$0xff]  ;;  %7626 = vmatpush1.bf16.msra.mxu0 %v17746_v59 }
  0x5e   :  { %v17771_v61 = vcombine.high %v555_v55, %v567_v56  ;;  %v575_v62 = vld [vmem:[%s29047_s1 + $0x1140] sm:$0xff]  ;;  %7135 = vmatprep.subr.bf16.mxu1 %v17763_v60  ;;  %v17770_v3 = vcombine.low %v555_v55, %v567_v56 }
  0x5f   :  { %v587_v63 = vld [vmem:[%s29047_s1 + $0x11a0] sm:$0xff]  ;;  %7136 = vmatpush1.bf16.msra.mxu1 %v17762_v2 }
  0x60   :  { %v579_v0 = vld [vmem:[%s29047_s1 + $0x1160] sm:$0xff]  ;;  %v17787_v4 = vcombine.high %v575_v62, %v587_v63  ;;  %7627 = vmatprep.subr.bf16.mxu0 %v17771_v61  ;;  %v17786_v10 = vcombine.low %v575_v62, %v587_v63 }
  0x61   :  { %v591_v1 = vld [vmem:[%s29047_s1 + $0x11c0] sm:$0xff]  ;;  %7628 = vmatpush1.bf16.msra.mxu0 %v17770_v3 }
  0x62   :  { %v17795_v5 = vcombine.high %v579_v0, %v591_v1  ;;  %v599_v6 = vld [vmem:[%s29047_s1 + $0x1200] sm:$0xff]  ;;  %7137 = vmatprep.subr.bf16.mxu1 %v17787_v4  ;;  %v17794_v11 = vcombine.low %v579_v0, %v591_v1 }
  0x63   :  { %v611_v7 = vld [vmem:[%s29047_s1 + $0x1260] sm:$0xff]  ;;  %7138 = vmatpush1.bf16.msra.mxu1 %v17786_v10 }
  0x64   :  { %v603_v8 = vld [vmem:[%s29047_s1 + $0x1220] sm:$0xff]  ;;  %v17811_v13 = vcombine.high %v599_v6, %v611_v7  ;;  %7629 = vmatprep.subr.bf16.mxu0 %v17795_v5  ;;  %v17810_v19 = vcombine.low %v599_v6, %v611_v7 }
  0x65   :  { %v615_v9 = vld [vmem:[%s29047_s1 + $0x1280] sm:$0xff]  ;;  %7630 = vmatpush1.bf16.msra.mxu0 %v17794_v11 }
  0x66   :  { %v17819_v14 = vcombine.high %v603_v8, %v615_v9  ;;  %v623_v16 = vld [vmem:[%s29047_s1 + $0x12c0] sm:$0xff]  ;;  %7139 = vmatprep.subr.bf16.mxu1 %v17811_v13  ;;  %v17818_v20 = vcombine.low %v603_v8, %v615_v9 }
  0x67   :  { %v635_v17 = vld [vmem:[%s29047_s1 + $0x1320] sm:$0xff]  ;;  %7140 = vmatpush1.bf16.msra.mxu1 %v17810_v19 }
  0x68   :  { %v627_v53 = vld [vmem:[%s29047_s1 + $0x12e0] sm:$0xff]  ;;  %v17835_v22 = vcombine.high %v623_v16, %v635_v17  ;;  %7631 = vmatprep.subr.bf16.mxu0 %v17819_v14  ;;  %v17834_v28 = vcombine.low %v623_v16, %v635_v17 }
  0x69   :  { %v639_v18 = vld [vmem:[%s29047_s1 + $0x1340] sm:$0xff]  ;;  %7632 = vmatpush1.bf16.msra.mxu0 %v17818_v20 }
  0x6a   :  { %v17843_v23 = vcombine.high %v627_v53, %v639_v18  ;;  %v647_v24 = vld [vmem:[%s29047_s1 + $0x1380] sm:$0xff]  ;;  %7141 = vmatprep.subr.bf16.mxu1 %v17835_v22  ;;  %v17842_v29 = vcombine.low %v627_v53, %v639_v18  ;;  %v22046_v22 = vcombine.low %v21848_v15, %v21848_v15 }
  0x6b   :  { %v659_v25 = vld [vmem:[%s29047_s1 + $0x13e0] sm:$0xff]  ;;  %7142 = vmatpush1.bf16.msra.mxu1 %v17834_v28 }
  0x6c   :  { %v651_v26 = vld [vmem:[%s29047_s1 + $0x13a0] sm:$0xff]  ;;  %v17859_v30 = vcombine.high %v647_v24, %v659_v25  ;;  %7633 = vmatprep.subr.bf16.mxu0 %v17843_v23  ;;  %v17858_v36 = vcombine.low %v647_v24, %v659_v25  ;;  %v22057_v25 = vld [vmem:[%s29048_s0 + $0x10] sm:$0xff] }
  0x6d   :  { %v663_v27 = vld [vmem:[%s29047_s1 + $0x1400] sm:$0xff]  ;;  %7634 = vmatpush1.bf16.msra.mxu0 %v17842_v29 }
  0x6e   :  { %v17867_v31 = vcombine.high %v651_v26, %v663_v27  ;;  %v671_v32 = vld [vmem:[%s29047_s1 + $0x1440] sm:$0xff]  ;;  %7143 = vmatprep.subr.bf16.mxu1 %v17859_v30  ;;  %v17866_v37 = vcombine.low %v651_v26, %v663_v27 }
  0x6f   :  { %v683_v33 = vld [vmem:[%s29047_s1 + $0x14a0] sm:$0xff]  ;;  %7144 = vmatpush1.bf16.msra.mxu1 %v17858_v36 }
  0x70   :  { %v675_v34 = vld [vmem:[%s29047_s1 + $0x1460] sm:$0xff]  ;;  %v17883_v38 = vcombine.high %v671_v32, %v683_v33  ;;  %7635 = vmatprep.subr.bf16.mxu0 %v17867_v31  ;;  %v17882_v44 = vcombine.low %v671_v32, %v683_v33  ;;  %v22067_v31 = vcombine.high %v22057_v25, %v22057_v25 }
  0x71   :  { %v687_v35 = vld [vmem:[%s29047_s1 + $0x14c0] sm:$0xff]  ;;  %7636 = vmatpush1.bf16.msra.mxu0 %v17866_v37 }
  0x72   :  { %v17891_v39 = vcombine.high %v675_v34, %v687_v35  ;;  %v695_v40 = vld [vmem:[%s29047_s1 + $0x1500] sm:$0xff]  ;;  %7145 = vmatprep.subr.bf16.mxu1 %v17883_v38  ;;  %v17890_v45 = vcombine.low %v675_v34, %v687_v35 }
  0x73   :  { %v707_v41 = vld [vmem:[%s29047_s1 + $0x1560] sm:$0xff]  ;;  %7146 = vmatpush1.bf16.msra.mxu1 %v17882_v44 }
  0x74   :  { %v699_v42 = vld [vmem:[%s29047_s1 + $0x1520] sm:$0xff]  ;;  %v17907_v46 = vcombine.high %v695_v40, %v707_v41  ;;  %7637 = vmatprep.subr.bf16.mxu0 %v17891_v39  ;;  %v17906_v52 = vcombine.low %v695_v40, %v707_v41 }
  0x75   :  { %v711_v43 = vld [vmem:[%s29047_s1 + $0x1580] sm:$0xff]  ;;  %7638 = vmatpush1.bf16.msra.mxu0 %v17890_v45 }
  0x76   :  { %v17915_v47 = vcombine.high %v699_v42, %v711_v43  ;;  %v719_v48 = vld [vmem:[%s29047_s1 + $0x15c0] sm:$0xff]  ;;  %7147 = vmatprep.subr.bf16.mxu1 %v17907_v46  ;;  %v17914_v54 = vcombine.low %v699_v42, %v711_v43 }
  0x77   :  { %v731_v49 = vld [vmem:[%s29047_s1 + $0x1620] sm:$0xff]  ;;  %7148 = vmatpush1.bf16.msra.mxu1 %v17906_v52 }
  0x78   :  { %v723_v50 = vld [vmem:[%s29047_s1 + $0x15e0] sm:$0xff]  ;;  %v17931_v55 = vcombine.high %v719_v48, %v731_v49  ;;  %7639 = vmatprep.subr.bf16.mxu0 %v17915_v47  ;;  %v17930_v62 = vcombine.low %v719_v48, %v731_v49 }
  0x79   :  { %v735_v51 = vld [vmem:[%s29047_s1 + $0x1640] sm:$0xff]  ;;  %7640 = vmatpush1.bf16.msra.mxu0 %v17914_v54 }
  0x7a   :  { %v17939_v56 = vcombine.high %v723_v50, %v735_v51  ;;  %v743_v58 = vld [vmem:[%s29047_s1 + $0x1680] sm:$0xff]  ;;  %7149 = vmatprep.subr.bf16.mxu1 %v17931_v55  ;;  %v17938_v63 = vcombine.low %v723_v50, %v735_v51 }
  0x7b   :  { %v755_v59 = vld [vmem:[%s29047_s1 + $0x16e0] sm:$0xff]  ;;  %7150 = vmatpush1.bf16.msra.mxu1 %v17930_v62 }
  0x7c   :  { %v747_v60 = vld [vmem:[%s29047_s1 + $0x16a0] sm:$0xff]  ;;  %v17955_v0 = vcombine.high %v743_v58, %v755_v59  ;;  %7641 = vmatprep.subr.bf16.mxu0 %v17939_v56  ;;  %v17954_v6 = vcombine.low %v743_v58, %v755_v59 }
  0x7d   :  { %v759_v61 = vld [vmem:[%s29047_s1 + $0x1700] sm:$0xff]  ;;  %7642 = vmatpush1.bf16.msra.mxu0 %v17938_v63 }
  0x7e   :  { %v17963_v1 = vcombine.high %v747_v60, %v759_v61  ;;  %v767_v2 = vld [vmem:[%s29047_s1 + $0x1740] sm:$0xff]  ;;  %7151 = vmatprep.subr.bf16.mxu1 %v17955_v0  ;;  %v17962_v7 = vcombine.low %v747_v60, %v759_v61 }
  0x7f   :  { %v779_v3 = vld [vmem:[%s29047_s1 + $0x17a0] sm:$0xff]  ;;  %7152 = vmatpush1.bf16.msra.mxu1 %v17954_v6 }
  0x80   :  { %v771_v4 = vld [vmem:[%s29047_s1 + $0x1760] sm:$0xff]  ;;  %v17979_v8 = vcombine.high %v767_v2, %v779_v3  ;;  %7643 = vmatprep.subr.bf16.mxu0 %v17963_v1  ;;  %v17978_v16 = vcombine.low %v767_v2, %v779_v3 }
  0x81   :  { %v783_v5 = vld [vmem:[%s29047_s1 + $0x17c0] sm:$0xff]  ;;  %7644 = vmatpush1.bf16.msra.mxu0 %v17962_v7 }
  0x82   :  { %v17987_v9 = vcombine.high %v771_v4, %v783_v5  ;;  %v791_v10 = vld [vmem:[%s29047_s1 + $0x1800] sm:$0xff]  ;;  %7153 = vmatprep.subr.bf16.mxu1 %v17979_v8  ;;  %v17986_v17 = vcombine.low %v771_v4, %v783_v5 }
  0x83   :  { %v803_v11 = vld [vmem:[%s29047_s1 + $0x1860] sm:$0xff]  ;;  %7154 = vmatpush1.bf16.msra.mxu1 %v17978_v16 }
  0x84   :  { %v795_v13 = vld [vmem:[%s29047_s1 + $0x1820] sm:$0xff]  ;;  %v18003_v53 = vcombine.high %v791_v10, %v803_v11  ;;  %7645 = vmatprep.subr.bf16.mxu0 %v17987_v9  ;;  %v18002_v26 = vcombine.low %v791_v10, %v803_v11 }
  0x85   :  { %v807_v14 = vld [vmem:[%s29047_s1 + $0x1880] sm:$0xff]  ;;  %7646 = vmatpush1.bf16.msra.mxu0 %v17986_v17 }
  0x86   :  { %v18011_v18 = vcombine.high %v795_v13, %v807_v14  ;;  %v815_v19 = vld [vmem:[%s29047_s1 + $0x18c0] sm:$0xff]  ;;  %7164 = vmatprep.subr.bf16.mxu1 %v18003_v53  ;;  %v18010_v27 = vcombine.low %v795_v13, %v807_v14  ;;  %7156 = vmatmul.mubr.bf16.vlgmr.msra.gmra.mrb[0].mxu1 %v22046_v22 }
  0x87   :  { %v827_v20 = vld [vmem:[%s29047_s1 + $0x1920] sm:$0xff]  ;;  %7165 = vmatpush1.bf16.msra.mxu1 %v18002_v26  ;;  %7196 = vmatprep.mubr.bf16.mxu1 %v22067_v31 }
  0x88   :  { %v819_v23 = vld [vmem:[%s29047_s1 + $0x18e0] sm:$0xff]  ;;  %v18027_v15 = vcombine.high %v815_v19, %v827_v20  ;;  %7656 = vmatprep.subr.bf16.mxu0 %v18011_v18  ;;  %7648 = vmatmul.mubr.bf16.vlgmr.msra.gmra.mrb[0].mxu0 %v22046_v22  ;;  %v18026_v34 = vcombine.low %v815_v19, %v827_v20 }
  0x89   :  { %v831_v24 = vld [vmem:[%s29047_s1 + $0x1940] sm:$0xff]  ;;  %7657 = vmatpush1.bf16.msra.mxu0 %v18010_v27  ;;  %7688 = vmatprep.mubr.bf16.mxu0 %v22067_v31 }
  0x8a   :  { %v18035_v28 = vcombine.high %v819_v23, %v831_v24  ;;  %v839_v29 = vld [vmem:[%s29047_s1 + $0x1980] sm:$0xff]  ;;  %7166 = vmatprep.subr.bf16.mxu1 %v18027_v15  ;;  %v18034_v35 = vcombine.low %v819_v23, %v831_v24 }
  0x8b   :  { %v851_v30 = vld [vmem:[%s29047_s1 + $0x19e0] sm:$0xff]  ;;  %7167 = vmatpush1.bf16.msra.mxu1 %v18026_v34 }
  0x8c   :  { %v843_v32 = vld [vmem:[%s29047_s1 + $0x19a0] sm:$0xff]  ;;  %v18051_v36 = vcombine.high %v839_v29, %v851_v30  ;;  %7658 = vmatprep.subr.bf16.mxu0 %v18035_v28  ;;  %v18050_v42 = vcombine.low %v839_v29, %v851_v30 }
  0x8d   :  { %v855_v33 = vld [vmem:[%s29047_s1 + $0x1a00] sm:$0xff]  ;;  %7659 = vmatpush1.bf16.msra.mxu0 %v18034_v35 }
  0x8e   :  { %v18059_v37 = vcombine.high %v843_v32, %v855_v33  ;;  %v863_v38 = vld [vmem:[%s29047_s1 + $0x1a40] sm:$0xff]  ;;  %7168 = vmatprep.subr.bf16.mxu1 %v18051_v36  ;;  %v18058_v43 = vcombine.low %v843_v32, %v855_v33 }
  0x8f   :  { %v875_v39 = vld [vmem:[%s29047_s1 + $0x1aa0] sm:$0xff]  ;;  %7169 = vmatpush1.bf16.msra.mxu1 %v18050_v42 }
  0x90   :  { %v867_v40 = vld [vmem:[%s29047_s1 + $0x1a60] sm:$0xff]  ;;  %v18075_v44 = vcombine.high %v863_v38, %v875_v39  ;;  %7660 = vmatprep.subr.bf16.mxu0 %v18059_v37  ;;  %v18074_v50 = vcombine.low %v863_v38, %v875_v39 }
  0x91   :  { %v879_v41 = vld [vmem:[%s29047_s1 + $0x1ac0] sm:$0xff]  ;;  %7661 = vmatpush1.bf16.msra.mxu0 %v18058_v43 }
  0x92   :  { %v18083_v45 = vcombine.high %v867_v40, %v879_v41  ;;  %v887_v46 = vld [vmem:[%s29047_s1 + $0x1b00] sm:$0xff]  ;;  %7170 = vmatprep.subr.bf16.mxu1 %v18075_v44  ;;  %v18082_v51 = vcombine.low %v867_v40, %v879_v41 }
  0x93   :  { %v899_v47 = vld [vmem:[%s29047_s1 + $0x1b60] sm:$0xff]  ;;  %7171 = vmatpush1.bf16.msra.mxu1 %v18074_v50 }
  0x94   :  { %v891_v48 = vld [vmem:[%s29047_s1 + $0x1b20] sm:$0xff]  ;;  %v18099_v52 = vcombine.high %v887_v46, %v899_v47  ;;  %7662 = vmatprep.subr.bf16.mxu0 %v18083_v45  ;;  %v18098_v60 = vcombine.low %v887_v46, %v899_v47 }
  0x95   :  { %v903_v49 = vld [vmem:[%s29047_s1 + $0x1b80] sm:$0xff]  ;;  %7663 = vmatpush1.bf16.msra.mxu0 %v18082_v51 }
  0x96   :  { %v18107_v54 = vcombine.high %v891_v48, %v903_v49  ;;  %v911_v55 = vld [vmem:[%s29047_s1 + $0x1bc0] sm:$0xff]  ;;  %7172 = vmatprep.subr.bf16.mxu1 %v18099_v52  ;;  %v18106_v61 = vcombine.low %v891_v48, %v903_v49 }
  0x97   :  { %v923_v56 = vld [vmem:[%s29047_s1 + $0x1c20] sm:$0xff]  ;;  %7173 = vmatpush1.bf16.msra.mxu1 %v18098_v60 }
  0x98   :  { %v915_v58 = vld [vmem:[%s29047_s1 + $0x1be0] sm:$0xff]  ;;  %v18123_v62 = vcombine.high %v911_v55, %v923_v56  ;;  %7664 = vmatprep.subr.bf16.mxu0 %v18107_v54  ;;  %v18122_v4 = vcombine.low %v911_v55, %v923_v56 }
  0x99   :  { %v927_v59 = vld [vmem:[%s29047_s1 + $0x1c40] sm:$0xff]  ;;  %7665 = vmatpush1.bf16.msra.mxu0 %v18106_v61 }
  0x9a   :  { %v18131_v63 = vcombine.high %v915_v58, %v927_v59  ;;  %v935_v0 = vld [vmem:[%s29047_s1 + $0x1c80] sm:$0xff]  ;;  %7174 = vmatprep.subr.bf16.mxu1 %v18123_v62  ;;  %v18130_v5 = vcombine.low %v915_v58, %v927_v59 }
  0x9b   :  { %v947_v1 = vld [vmem:[%s29047_s1 + $0x1ce0] sm:$0xff]  ;;  %7175 = vmatpush1.bf16.msra.mxu1 %v18122_v4 }
  0x9c   :  { %v939_v2 = vld [vmem:[%s29047_s1 + $0x1ca0] sm:$0xff]  ;;  %v18147_v6 = vcombine.high %v935_v0, %v947_v1  ;;  %7666 = vmatprep.subr.bf16.mxu0 %v18131_v63  ;;  %v18146_v13 = vcombine.low %v935_v0, %v947_v1 }
  0x9d   :  { %v951_v3 = vld [vmem:[%s29047_s1 + $0x1d00] sm:$0xff]  ;;  %7667 = vmatpush1.bf16.msra.mxu0 %v18130_v5 }
  0x9e   :  { %v18155_v7 = vcombine.high %v939_v2, %v951_v3  ;;  %v959_v8 = vld [vmem:[%s29047_s1 + $0x1d40] sm:$0xff]  ;;  %7176 = vmatprep.subr.bf16.mxu1 %v18147_v6  ;;  %v18154_v14 = vcombine.low %v939_v2, %v951_v3 }
  0x9f   :  { %v971_v9 = vld [vmem:[%s29047_s1 + $0x1da0] sm:$0xff]  ;;  %7177 = vmatpush1.bf16.msra.mxu1 %v18146_v13 }
  0xa0   :  { %v963_v10 = vld [vmem:[%s29047_s1 + $0x1d60] sm:$0xff]  ;;  %v18171_v16 = vcombine.high %v959_v8, %v971_v9  ;;  %7668 = vmatprep.subr.bf16.mxu0 %v18155_v7  ;;  %v18170_v23 = vcombine.low %v959_v8, %v971_v9 }
  0xa1   :  { %v975_v11 = vld [vmem:[%s29047_s1 + $0x1dc0] sm:$0xff]  ;;  %7669 = vmatpush1.bf16.msra.mxu0 %v18154_v14 }
  0xa2   :  { %v18179_v17 = vcombine.high %v963_v10, %v975_v11  ;;  %v983_v53 = vld [vmem:[%s29047_s1 + $0x1e00] sm:$0xff]  ;;  %7178 = vmatprep.subr.bf16.mxu1 %v18171_v16  ;;  %v18178_v24 = vcombine.low %v963_v10, %v975_v11 }
  0xa3   :  { %v995_v18 = vld [vmem:[%s29047_s1 + $0x1e60] sm:$0xff]  ;;  %7179 = vmatpush1.bf16.msra.mxu1 %v18170_v23 }
  0xa4   :  { %v987_v19 = vld [vmem:[%s29047_s1 + $0x1e20] sm:$0xff]  ;;  %v18195_v26 = vcombine.high %v983_v53, %v995_v18  ;;  %7670 = vmatprep.subr.bf16.mxu0 %v18179_v17  ;;  %v18194_v32 = vcombine.low %v983_v53, %v995_v18 }
  0xa5   :  { %v999_v20 = vld [vmem:[%s29047_s1 + $0x1e80] sm:$0xff]  ;;  %7671 = vmatpush1.bf16.msra.mxu0 %v18178_v24 }
  0xa6   :  { %v18203_v27 = vcombine.high %v987_v19, %v999_v20  ;;  %v1007_v15 = vld [vmem:[%s29047_s1 + $0x1ec0] sm:$0xff]  ;;  %7180 = vmatprep.subr.bf16.mxu1 %v18195_v26  ;;  %v18202_v33 = vcombine.low %v987_v19, %v999_v20  ;;  %v24_v26 = vld [vmem:[%s29047_s1 + $0x8] sm:$0xff] }
  0xa7   :  { %v1019_v28 = vld [vmem:[%s29047_s1 + $0x1f20] sm:$0xff]  ;;  %7181 = vmatpush1.bf16.msra.mxu1 %v18194_v32 }
  0xa8   :  { %v1011_v29 = vld [vmem:[%s29047_s1 + $0x1ee0] sm:$0xff]  ;;  %v18219_v34 = vcombine.high %v1007_v15, %v1019_v28  ;;  %7672 = vmatprep.subr.bf16.mxu0 %v18203_v27  ;;  %v18218_v40 = vcombine.low %v1007_v15, %v1019_v28  ;;  %v36_v27 = vld [vmem:[%s29047_s1 + $0x68] sm:$0xff]  ;;  %v29_v15 = vld [vmem:[%s29047_s1 + $0x30] sm:$0xff] }
  0xa9   :  { %v1023_v30 = vld [vmem:[%s29047_s1 + $0x1f40] sm:$0xff]  ;;  %7673 = vmatpush1.bf16.msra.mxu0 %v18202_v33  ;;  %v41_v28 = vld [vmem:[%s29047_s1 + $0x90] sm:$0xff]  ;;  %v17237_v32 = vcombine.high %v24_v26, %v36_v27 }
  0xaa   :  { %v18227_v35 = vcombine.high %v1011_v29, %v1023_v30  ;;  %v1031_v36 = vld [vmem:[%s29047_s1 + $0x1f80] sm:$0xff]  ;;  %7182 = vmatprep.subr.bf16.mxu1 %v18219_v34  ;;  %v18226_v41 = vcombine.low %v1011_v29, %v1023_v30  ;;  %v17247_v33 = vcombine.high %v29_v15, %v41_v28  ;;  %v48_v34 = vld [vmem:[%s29047_s1 + $0xc8] sm:$0xff] }
  0xab   :  { %v1043_v37 = vld [vmem:[%s29047_s1 + $0x1fe0] sm:$0xff]  ;;  %7183 = vmatpush1.bf16.msra.mxu1 %v18218_v40  ;;  %v17246_v40 = vcombine.low %v29_v15, %v41_v28 }
  0xac   :  { %v1035_v38 = vld [vmem:[%s29047_s1 + $0x1fa0] sm:$0xff]  ;;  %v18243_v42 = vcombine.high %v1031_v36, %v1043_v37  ;;  %7674 = vmatprep.subr.bf16.mxu0 %v18227_v35  ;;  %v18242_v48 = vcombine.low %v1031_v36, %v1043_v37  ;;  %v60_v35 = vld [vmem:[%s29047_s1 + $0x128] sm:$0xff]  ;;  %v22255_v36 = vcombine.low %v22057_v25, %v22057_v25  ;;  %v53_v37 = vld [vmem:[%s29047_s1 + $0xf0] sm:$0xff] }
  0xad   :  { %v1047_v39 = vld [vmem:[%s29047_s1 + $0x2000] sm:$0xff]  ;;  %7675 = vmatpush1.bf16.msra.mxu0 %v18226_v41  ;;  %v17261_v41 = vcombine.high %v48_v34, %v60_v35  ;;  %v72_v25 = vld [vmem:[%s29047_s1 + $0x188] sm:$0xff] }
  0xae   :  { %v18251_v43 = vcombine.high %v1035_v38, %v1047_v39  ;;  %v1055_v44 = vld [vmem:[%s29047_s1 + $0x2040] sm:$0xff]  ;;  %7184 = vmatprep.subr.bf16.mxu1 %v18243_v42  ;;  %v18250_v49 = vcombine.low %v1035_v38, %v1047_v39  ;;  %v65_v38 = vld [vmem:[%s29047_s1 + $0x150] sm:$0xff]  ;;  %v17236_v39 = vcombine.low %v24_v26, %v36_v27 }
  0xaf   :  { %v1067_v45 = vld [vmem:[%s29047_s1 + $0x20a0] sm:$0xff]  ;;  %7185 = vmatpush1.bf16.msra.mxu1 %v18242_v48  ;;  %v17271_v42 = vcombine.high %v53_v37, %v65_v38  ;;  %v197_v26 = vld [vmem:[%s29047_s1 + $0x570] sm:$0xff] }
  0xb0   :  { %v1059_v46 = vld [vmem:[%s29047_s1 + $0x2060] sm:$0xff]  ;;  %v18267_v50 = vcombine.high %v1055_v44, %v1067_v45  ;;  %7676 = vmatprep.subr.bf16.mxu0 %v18251_v43  ;;  %v18266_v58 = vcombine.low %v1055_v44, %v1067_v45  ;;  %v84_v43 = vld [vmem:[%s29047_s1 + $0x1e8] sm:$0xff]  ;;  %v77_v44 = vld [vmem:[%s29047_s1 + $0x1b0] sm:$0xff] }
  0xb1   :  { %v1071_v47 = vld [vmem:[%s29047_s1 + $0x20c0] sm:$0xff]  ;;  %7677 = vmatpush1.bf16.msra.mxu0 %v18250_v49  ;;  %v89_v45 = vld [vmem:[%s29047_s1 + $0x210] sm:$0xff]  ;;  %v17285_v48 = vcombine.high %v72_v25, %v84_v43 }
  0xb2   :  { %v18275_v51 = vcombine.high %v1059_v46, %v1071_v47  ;;  %v1079_v52 = vld [vmem:[%s29047_s1 + $0x2100] sm:$0xff]  ;;  %7186 = vmatprep.subr.bf16.mxu1 %v18267_v50  ;;  %v18274_v59 = vcombine.low %v1059_v46, %v1071_v47  ;;  %v17260_v46 = vcombine.low %v48_v34, %v60_v35  ;;  %v17270_v47 = vcombine.low %v53_v37, %v65_v38  ;;  %v96_v50 = vld [vmem:[%s29047_s1 + $0x248] sm:$0xff]  ;;  %v209_v27 = vld [vmem:[%s29047_s1 + $0x5d0] sm:$0xff] }
  0xb3   :  { %v1091_v54 = vld [vmem:[%s29047_s1 + $0x2160] sm:$0xff]  ;;  %7187 = vmatpush1.bf16.msra.mxu1 %v18266_v58  ;;  %v17295_v49 = vcombine.high %v77_v44, %v89_v45  ;;  %v221_v34 = vld [vmem:[%s29047_s1 + $0x630] sm:$0xff]  ;;  %v17414_v38 = vcombine.low %v197_v26, %v209_v27 }
  0xb4   :  { %v1083_v55 = vld [vmem:[%s29047_s1 + $0x2120] sm:$0xff]  ;;  %v18291_v60 = vcombine.high %v1079_v52, %v1091_v54  ;;  %7678 = vmatprep.subr.bf16.mxu0 %v18275_v51  ;;  %v18290_v2 = vcombine.low %v1079_v52, %v1091_v54  ;;  %v108_v51 = vld [vmem:[%s29047_s1 + $0x2a8] sm:$0xff]  ;;  %v101_v52 = vld [vmem:[%s29047_s1 + $0x270] sm:$0xff] }
  0xb5   :  { %v1095_v56 = vld [vmem:[%s29047_s1 + $0x2180] sm:$0xff]  ;;  %7679 = vmatpush1.bf16.msra.mxu0 %v18274_v59  ;;  %v113_v54 = vld [vmem:[%s29047_s1 + $0x2d0] sm:$0xff]  ;;  %v17309_v58 = vcombine.high %v96_v50, %v108_v51 }
  0xb6   :  { %v18299_v61 = vcombine.high %v1083_v55, %v1095_v56  ;;  %v1103_v62 = vld [vmem:[%s29047_s1 + $0x21c0] sm:$0xff]  ;;  %7188 = vmatprep.subr.bf16.mxu1 %v18291_v60  ;;  %v18298_v3 = vcombine.low %v1083_v55, %v1095_v56  ;;  %v17284_v55 = vcombine.low %v72_v25, %v84_v43  ;;  %v17294_v56 = vcombine.low %v77_v44, %v89_v45  ;;  %v120_v60 = vld [vmem:[%s29047_s1 + $0x308] sm:$0xff]  ;;  %v233_v35 = vld [vmem:[%s29047_s1 + $0x690] sm:$0xff] }
  0xb7   :  { %v1115_v63 = vld [vmem:[%s29047_s1 + $0x2220] sm:$0xff]  ;;  %7189 = vmatpush1.bf16.msra.mxu1 %v18290_v2  ;;  %v17319_v59 = vcombine.high %v101_v52, %v113_v54  ;;  %v245_v25 = vld [vmem:[%s29047_s1 + $0x6f0] sm:$0xff]  ;;  %v17438_v45 = vcombine.low %v221_v34, %v233_v35 }
  0xb8   :  { %v1107_v0 = vld [vmem:[%s29047_s1 + $0x21e0] sm:$0xff]  ;;  %v18315_v4 = vcombine.high %v1103_v62, %v1115_v63  ;;  %7680 = vmatprep.subr.bf16.mxu0 %v18299_v61  ;;  %v18314_v10 = vcombine.low %v1103_v62, %v1115_v63  ;;  %v132_v61 = vld [vmem:[%s29047_s1 + $0x368] sm:$0xff]  ;;  %v125_v62 = vld [vmem:[%s29047_s1 + $0x330] sm:$0xff] }
  0xb9   :  { %v1119_v1 = vld [vmem:[%s29047_s1 + $0x2240] sm:$0xff]  ;;  %7681 = vmatpush1.bf16.msra.mxu0 %v18298_v3  ;;  %v137_v63 = vld [vmem:[%s29047_s1 + $0x390] sm:$0xff]  ;;  %v17333_v2 = vcombine.high %v120_v60, %v132_v61 }
  0xba   :  { %v18323_v5 = vcombine.high %v1107_v0, %v1119_v1  ;;  %v1127_v6 = vld [vmem:[%s29047_s1 + $0x2280] sm:$0xff]  ;;  %7190 = vmatprep.subr.bf16.mxu1 %v18315_v4  ;;  %v18322_v11 = vcombine.low %v1107_v0, %v1119_v1  ;;  %v17308_v0 = vcombine.low %v96_v50, %v108_v51  ;;  %v17318_v1 = vcombine.low %v101_v52, %v113_v54  ;;  %v144_v4 = vld [vmem:[%s29047_s1 + $0x3c8] sm:$0xff]  ;;  %v257_v43 = vld [vmem:[%s29047_s1 + $0x750] sm:$0xff] }
  0xbb   :  { %v1139_v7 = vld [vmem:[%s29047_s1 + $0x22e0] sm:$0xff]  ;;  %7191 = vmatpush1.bf16.msra.mxu1 %v18314_v10  ;;  %v17343_v3 = vcombine.high %v125_v62, %v137_v63  ;;  %v269_v50 = vld [vmem:[%s29047_s1 + $0x7b0] sm:$0xff]  ;;  %v17462_v54 = vcombine.low %v245_v25, %v257_v43 }
  0xbc   :  { %v1131_v8 = vld [vmem:[%s29047_s1 + $0x22a0] sm:$0xff]  ;;  %v18339_v13 = vcombine.high %v1127_v6, %v1139_v7  ;;  %7682 = vmatprep.subr.bf16.mxu0 %v18323_v5  ;;  %v18338_v19 = vcombine.low %v1127_v6, %v1139_v7  ;;  %v156_v5 = vld [vmem:[%s29047_s1 + $0x428] sm:$0xff]  ;;  %v149_v6 = vld [vmem:[%s29047_s1 + $0x3f0] sm:$0xff] }
  0xbd   :  { %v1143_v9 = vld [vmem:[%s29047_s1 + $0x2300] sm:$0xff]  ;;  %7683 = vmatpush1.bf16.msra.mxu0 %v18322_v11  ;;  %v161_v7 = vld [vmem:[%s29047_s1 + $0x450] sm:$0xff]  ;;  %v17357_v10 = vcombine.high %v144_v4, %v156_v5 }
  0xbe   :  { %v18347_v14 = vcombine.high %v1131_v8, %v1143_v9  ;;  %v1151_v16 = vld [vmem:[%s29047_s1 + $0x2340] sm:$0xff]  ;;  %7192 = vmatprep.subr.bf16.mxu1 %v18339_v13  ;;  %v18346_v20 = vcombine.low %v1131_v8, %v1143_v9  ;;  %v17332_v8 = vcombine.low %v120_v60, %v132_v61  ;;  %v17342_v9 = vcombine.low %v125_v62, %v137_v63  ;;  %v168_v13 = vld [vmem:[%s29047_s1 + $0x488] sm:$0xff]  ;;  %v281_v51 = vld [vmem:[%s29047_s1 + $0x810] sm:$0xff] }
  0xbf   :  { %v1163_v17 = vld [vmem:[%s29047_s1 + $0x23a0] sm:$0xff]  ;;  %7193 = vmatpush1.bf16.msra.mxu1 %v18338_v19  ;;  %v17367_v11 = vcombine.high %v149_v6, %v161_v7  ;;  %v293_v60 = vld [vmem:[%s29047_s1 + $0x870] sm:$0xff]  ;;  %v17486_v63 = vcombine.low %v269_v50, %v281_v51 }
  0xc0   :  { %v1155_v53 = vld [vmem:[%s29047_s1 + $0x2360] sm:$0xff]  ;;  %v18363_v23 = vcombine.high %v1151_v16, %v1163_v17  ;;  %7684 = vmatprep.subr.bf16.mxu0 %v18347_v14  ;;  %v18362_v29 = vcombine.low %v1151_v16, %v1163_v17  ;;  %v180_v14 = vld [vmem:[%s29047_s1 + $0x4e8] sm:$0xff]  ;;  %v173_v16 = vld [vmem:[%s29047_s1 + $0x4b0] sm:$0xff] }
  0xc1   :  { %v1167_v18 = vld [vmem:[%s29047_s1 + $0x23c0] sm:$0xff]  ;;  %7685 = vmatpush1.bf16.msra.mxu0 %v18346_v20  ;;  %v185_v17 = vld [vmem:[%s29047_s1 + $0x510] sm:$0xff]  ;;  %v17381_v19 = vcombine.high %v168_v13, %v180_v14  ;;  %v17380_v15 = vcombine.low %v168_v13, %v180_v14 }
  0xc2   :  { %v18371_v24 = vcombine.high %v1155_v53, %v1167_v18  ;;  %7194 = vmatprep.subr.bf16.mxu1 %v18363_v23  ;;  %v18370_v30 = vcombine.low %v1155_v53, %v1167_v18  ;;  %v17356_v53 = vcombine.low %v144_v4, %v156_v5  ;;  %v17366_v18 = vcombine.low %v149_v6, %v161_v7  ;;  %v192_v23 = vld [vmem:[%s29047_s1 + $0x548] sm:$0xff]  ;;  %v305_v61 = vld [vmem:[%s29047_s1 + $0x8d0] sm:$0xff] }
  0xc3   :  { %7195 = vmatpush1.bf16.msra.mxu1 %v18362_v29  ;;  %v17391_v20 = vcombine.high %v173_v16, %v185_v17  ;;  %v17390_v28 = vcombine.low %v173_v16, %v185_v17  ;;  %v317_v4 = vld [vmem:[%s29047_s1 + $0x930] sm:$0xff]  ;;  %v17510_v7 = vcombine.low %v293_v60, %v305_v61 }
  0xc4   :  { %7686 = vmatprep.subr.bf16.mxu0 %v18371_v24  ;;  %7205 = vmatprep.subr.bf16.mxu1 %v17237_v32  ;;  %v204_v24 = vld [vmem:[%s29047_s1 + $0x5a8] sm:$0xff]  ;;  %v329_v5 = vld [vmem:[%s29047_s1 + $0x990] sm:$0xff] }
  0xc5   :  { %7687 = vmatpush1.bf16.msra.mxu0 %v18370_v30  ;;  %v17405_v29 = vcombine.high %v192_v23, %v204_v24  ;;  %v17415_v30 = vcombine.high %v197_v26, %v209_v27  ;;  %v216_v32 = vld [vmem:[%s29047_s1 + $0x608] sm:$0xff]  ;;  %v17404_v37 = vcombine.low %v192_v23, %v204_v24  ;;  %v341_v13 = vld [vmem:[%s29047_s1 + $0x9f0] sm:$0xff]  ;;  %v17534_v17 = vcombine.low %v317_v4, %v329_v5 }
  0xc6   :  { %7820 = vmatprep.subr.bf16.mxu0 %v17247_v33  ;;  %7197 = vmatmul.mubr.bf16.vlgmr.msra.gmra.mrb[0].mxu1 %v22255_v36  ;;  %v228_v33 = vld [vmem:[%s29047_s1 + $0x668] sm:$0xff]  ;;  %v353_v14 = vld [vmem:[%s29047_s1 + $0xa50] sm:$0xff] }
  0xc7   :  { %7206 = vmatpush1.bf16.msra.mxu1 %v17236_v39  ;;  %7237 = vmatprep.mubr.bf16.mxu1 %v21711_v57  ;;  %v17429_v39 = vcombine.high %v216_v32, %v228_v33  ;;  %v17428_v44 = vcombine.low %v216_v32, %v228_v33  ;;  %v365_v23 = vld [vmem:[%s29047_s1 + $0xab0] sm:$0xff]  ;;  %v17558_v27 = vcombine.low %v341_v13, %v353_v14 }
  0xc8   :  { %7689 = vmatmul.mubr.bf16.vlgmr.msra.gmra.mrb[0].mxu0 %v22255_v36  ;;  %7207 = vmatprep.subr.bf16.mxu1 %v17261_v41  ;;  %v240_v41 = vld [vmem:[%s29047_s1 + $0x6c8] sm:$0xff]  ;;  %v377_v24 = vld [vmem:[%s29047_s1 + $0xb10] sm:$0xff] }
  0xc9   :  { %7821 = vmatpush1.bf16.msra.mxu0 %v17246_v40  ;;  %7852 = vmatprep.mubr.bf16.mxu0 %v21711_v57  ;;  %v17439_v40 = vcombine.high %v221_v34, %v233_v35  ;;  %v389_v32 = vld [vmem:[%s29047_s1 + $0xb70] sm:$0xff]  ;;  %v17582_v35 = vcombine.low %v365_v23, %v377_v24 }
  0xca   :  { %7822 = vmatprep.subr.bf16.mxu0 %v17271_v42  ;;  %v252_v42 = vld [vmem:[%s29047_s1 + $0x728] sm:$0xff]  ;;  %v401_v33 = vld [vmem:[%s29047_s1 + $0xbd0] sm:$0xff] }
  0xcb   :  { %7208 = vmatpush1.bf16.msra.mxu1 %v17260_v46  ;;  %v17453_v46 = vcombine.high %v240_v41, %v252_v42  ;;  %v17452_v52 = vcombine.low %v240_v41, %v252_v42  ;;  %v413_v41 = vld [vmem:[%s29047_s1 + $0xc30] sm:$0xff] }
  0xcc   :  { %7209 = vmatprep.subr.bf16.mxu1 %v17285_v48  ;;  %v264_v48 = vld [vmem:[%s29047_s1 + $0x788] sm:$0xff]  ;;  %v425_v42 = vld [vmem:[%s29047_s1 + $0xc90] sm:$0xff] }
  0xcd   :  { %7823 = vmatpush1.bf16.msra.mxu0 %v17270_v47  ;;  %v17463_v47 = vcombine.high %v245_v25, %v257_v43  ;;  %v17606_v43 = vcombine.low %v389_v32, %v401_v33 }
  0xce   :  { %7824 = vmatprep.subr.bf16.mxu0 %v17295_v49  ;;  %v276_v49 = vld [vmem:[%s29047_s1 + $0x7e8] sm:$0xff] }
  0xcf   :  { %7210 = vmatpush1.bf16.msra.mxu1 %v17284_v55  ;;  %v17477_v55 = vcombine.high %v264_v48, %v276_v49  ;;  %v17476_v62 = vcombine.low %v264_v48, %v276_v49  ;;  %v437_v48 = vld [vmem:[%s29047_s1 + $0xcf0] sm:$0xff] }
  0xd0   :  { %7211 = vmatprep.subr.bf16.mxu1 %v17309_v58  ;;  %v288_v58 = vld [vmem:[%s29047_s1 + $0x848] sm:$0xff]  ;;  %v449_v49 = vld [vmem:[%s29047_s1 + $0xd50] sm:$0xff] }
  0xd1   :  { %7825 = vmatpush1.bf16.msra.mxu0 %v17294_v56  ;;  %v17487_v56 = vcombine.high %v269_v50, %v281_v51  ;;  %v17630_v51 = vcombine.low %v413_v41, %v425_v42 }
  0xd2   :  { %7826 = vmatprep.subr.bf16.mxu0 %v17319_v59  ;;  %v300_v59 = vld [vmem:[%s29047_s1 + $0x8a8] sm:$0xff] }
  0xd3   :  { %7212 = vmatpush1.bf16.msra.mxu1 %v17308_v0  ;;  %v17501_v0 = vcombine.high %v288_v58, %v300_v59  ;;  %v17500_v6 = vcombine.low %v288_v58, %v300_v59  ;;  %v461_v58 = vld [vmem:[%s29047_s1 + $0xdb0] sm:$0xff] }
  0xd4   :  { %7213 = vmatprep.subr.bf16.mxu1 %v17333_v2  ;;  %v312_v2 = vld [vmem:[%s29047_s1 + $0x908] sm:$0xff]  ;;  %v473_v59 = vld [vmem:[%s29047_s1 + $0xe10] sm:$0xff] }
  0xd5   :  { %7827 = vmatpush1.bf16.msra.mxu0 %v17318_v1  ;;  %v17511_v1 = vcombine.high %v293_v60, %v305_v61  ;;  %v17654_v61 = vcombine.low %v437_v48, %v449_v49 }
  0xd6   :  { %7828 = vmatprep.subr.bf16.mxu0 %v17343_v3  ;;  %v324_v3 = vld [vmem:[%s29047_s1 + $0x968] sm:$0xff] }
  0xd7   :  { %7214 = vmatpush1.bf16.msra.mxu1 %v17332_v8  ;;  %v17525_v8 = vcombine.high %v312_v2, %v324_v3  ;;  %v17524_v16 = vcombine.low %v312_v2, %v324_v3  ;;  %v485_v2 = vld [vmem:[%s29047_s1 + $0xe70] sm:$0xff] }
  0xd8   :  { %7215 = vmatprep.subr.bf16.mxu1 %v17357_v10  ;;  %v336_v10 = vld [vmem:[%s29047_s1 + $0x9c8] sm:$0xff]  ;;  %v497_v3 = vld [vmem:[%s29047_s1 + $0xed0] sm:$0xff] }
  0xd9   :  { %7829 = vmatpush1.bf16.msra.mxu0 %v17342_v9  ;;  %v17535_v9 = vcombine.high %v317_v4, %v329_v5  ;;  %v17678_v5 = vcombine.low %v461_v58, %v473_v59 }
  0xda   :  { %7830 = vmatprep.subr.bf16.mxu0 %v17367_v11  ;;  %v348_v11 = vld [vmem:[%s29047_s1 + $0xa28] sm:$0xff] }
  0xdb   :  { %7216 = vmatpush1.bf16.msra.mxu1 %v17356_v53  ;;  %v17549_v53 = vcombine.high %v336_v10, %v348_v11  ;;  %v17548_v26 = vcombine.low %v336_v10, %v348_v11  ;;  %v509_v10 = vld [vmem:[%s29047_s1 + $0xf30] sm:$0xff] }
  0xdc   :  { %7217 = vmatprep.subr.bf16.mxu1 %v17381_v19  ;;  %v360_v19 = vld [vmem:[%s29047_s1 + $0xa88] sm:$0xff]  ;;  %v521_v11 = vld [vmem:[%s29047_s1 + $0xf90] sm:$0xff] }
  0xdd   :  { %7831 = vmatpush1.bf16.msra.mxu0 %v17366_v18  ;;  %v17559_v18 = vcombine.high %v341_v13, %v353_v14  ;;  %v17702_v14 = vcombine.low %v485_v2, %v497_v3 }
  0xde   :  { %7832 = vmatprep.subr.bf16.mxu0 %v17391_v20  ;;  %v372_v20 = vld [vmem:[%s29047_s1 + $0xae8] sm:$0xff] }
  0xdf   :  { %7218 = vmatpush1.bf16.msra.mxu1 %v17380_v15  ;;  %v17573_v15 = vcombine.high %v360_v19, %v372_v20  ;;  %v17572_v34 = vcombine.low %v360_v19, %v372_v20  ;;  %v533_v19 = vld [vmem:[%s29047_s1 + $0xff0] sm:$0xff] }
  0xe0   :  { %7219 = vmatprep.subr.bf16.mxu1 %v17405_v29  ;;  %v384_v29 = vld [vmem:[%s29047_s1 + $0xb48] sm:$0xff]  ;;  %v545_v20 = vld [vmem:[%s29047_s1 + $0x1050] sm:$0xff] }
  0xe1   :  { %7833 = vmatpush1.bf16.msra.mxu0 %v17390_v28  ;;  %v17583_v28 = vcombine.high %v365_v23, %v377_v24  ;;  %v17726_v24 = vcombine.low %v509_v10, %v521_v11 }
  0xe2   :  { %7834 = vmatprep.subr.bf16.mxu0 %v17415_v30  ;;  %v396_v30 = vld [vmem:[%s29047_s1 + $0xba8] sm:$0xff] }
  0xe3   :  { %7220 = vmatpush1.bf16.msra.mxu1 %v17404_v37  ;;  %v17597_v37 = vcombine.high %v384_v29, %v396_v30  ;;  %v17596_v25 = vcombine.low %v384_v29, %v396_v30  ;;  %v557_v29 = vld [vmem:[%s29047_s1 + $0x10b0] sm:$0xff] }
  0xe4   :  { %7221 = vmatprep.subr.bf16.mxu1 %v17429_v39  ;;  %v408_v39 = vld [vmem:[%s29047_s1 + $0xc08] sm:$0xff]  ;;  %v569_v30 = vld [vmem:[%s29047_s1 + $0x1110] sm:$0xff] }
  0xe5   :  { %7835 = vmatpush1.bf16.msra.mxu0 %v17414_v38  ;;  %v17607_v38 = vcombine.high %v389_v32, %v401_v33  ;;  %v17750_v33 = vcombine.low %v533_v19, %v545_v20 }
  0xe6   :  { %7836 = vmatprep.subr.bf16.mxu0 %v17439_v40  ;;  %v420_v40 = vld [vmem:[%s29047_s1 + $0xc68] sm:$0xff] }
  0xe7   :  { %7222 = vmatpush1.bf16.msra.mxu1 %v17428_v44  ;;  %v17621_v44 = vcombine.high %v408_v39, %v420_v40  ;;  %v17620_v50 = vcombine.low %v408_v39, %v420_v40  ;;  %v581_v39 = vld [vmem:[%s29047_s1 + $0x1170] sm:$0xff] }
  0xe8   :  { %7223 = vmatprep.subr.bf16.mxu1 %v17453_v46  ;;  %v432_v46 = vld [vmem:[%s29047_s1 + $0xcc8] sm:$0xff]  ;;  %v593_v40 = vld [vmem:[%s29047_s1 + $0x11d0] sm:$0xff] }
  0xe9   :  { %7837 = vmatpush1.bf16.msra.mxu0 %v17438_v45  ;;  %v17631_v45 = vcombine.high %v413_v41, %v425_v42  ;;  %v17774_v42 = vcombine.low %v557_v29, %v569_v30 }
  0xea   :  { %7838 = vmatprep.subr.bf16.mxu0 %v17463_v47  ;;  %v444_v47 = vld [vmem:[%s29047_s1 + $0xd28] sm:$0xff] }
  0xeb   :  { %7224 = vmatpush1.bf16.msra.mxu1 %v17452_v52  ;;  %v17645_v52 = vcombine.high %v432_v46, %v444_v47  ;;  %v17644_v60 = vcombine.low %v432_v46, %v444_v47  ;;  %v605_v46 = vld [vmem:[%s29047_s1 + $0x1230] sm:$0xff] }
  0xec   :  { %7225 = vmatprep.subr.bf16.mxu1 %v17477_v55  ;;  %v456_v55 = vld [vmem:[%s29047_s1 + $0xd88] sm:$0xff]  ;;  %v617_v47 = vld [vmem:[%s29047_s1 + $0x1290] sm:$0xff] }
  0xed   :  { %7839 = vmatpush1.bf16.msra.mxu0 %v17462_v54  ;;  %v17655_v54 = vcombine.high %v437_v48, %v449_v49  ;;  %v17798_v49 = vcombine.low %v581_v39, %v593_v40 }
  0xee   :  { %7840 = vmatprep.subr.bf16.mxu0 %v17487_v56  ;;  %v468_v56 = vld [vmem:[%s29047_s1 + $0xde8] sm:$0xff] }
  0xef   :  { %7226 = vmatpush1.bf16.msra.mxu1 %v17476_v62  ;;  %v17669_v62 = vcombine.high %v456_v55, %v468_v56  ;;  %v17668_v4 = vcombine.low %v456_v55, %v468_v56  ;;  %v629_v55 = vld [vmem:[%s29047_s1 + $0x12f0] sm:$0xff] }
  0xf0   :  { %7227 = vmatprep.subr.bf16.mxu1 %v17501_v0  ;;  %v480_v0 = vld [vmem:[%s29047_s1 + $0xe48] sm:$0xff]  ;;  %v641_v56 = vld [vmem:[%s29047_s1 + $0x1350] sm:$0xff] }
  0xf1   :  { %7841 = vmatpush1.bf16.msra.mxu0 %v17486_v63  ;;  %v17679_v63 = vcombine.high %v461_v58, %v473_v59  ;;  %v17822_v59 = vcombine.low %v605_v46, %v617_v47 }
  0xf2   :  { %7842 = vmatprep.subr.bf16.mxu0 %v17511_v1  ;;  %v492_v1 = vld [vmem:[%s29047_s1 + $0xea8] sm:$0xff] }
  0xf3   :  { %7228 = vmatpush1.bf16.msra.mxu1 %v17500_v6  ;;  %v17693_v6 = vcombine.high %v480_v0, %v492_v1  ;;  %v17692_v13 = vcombine.low %v480_v0, %v492_v1  ;;  %v653_v0 = vld [vmem:[%s29047_s1 + $0x13b0] sm:$0xff] }
  0xf4   :  { %7229 = vmatprep.subr.bf16.mxu1 %v17525_v8  ;;  %v504_v8 = vld [vmem:[%s29047_s1 + $0xf08] sm:$0xff]  ;;  %v665_v1 = vld [vmem:[%s29047_s1 + $0x1410] sm:$0xff] }
  0xf5   :  { %7843 = vmatpush1.bf16.msra.mxu0 %v17510_v7  ;;  %v17703_v7 = vcombine.high %v485_v2, %v497_v3  ;;  %v17846_v3 = vcombine.low %v629_v55, %v641_v56 }
  0xf6   :  { %7844 = vmatprep.subr.bf16.mxu0 %v17535_v9  ;;  %v516_v9 = vld [vmem:[%s29047_s1 + $0xf68] sm:$0xff] }
  0xf7   :  { %7230 = vmatpush1.bf16.msra.mxu1 %v17524_v16  ;;  %v17717_v16 = vcombine.high %v504_v8, %v516_v9  ;;  %v17716_v23 = vcombine.low %v504_v8, %v516_v9  ;;  %v677_v8 = vld [vmem:[%s29047_s1 + $0x1470] sm:$0xff] }
  0xf8   :  { %7231 = vmatprep.subr.bf16.mxu1 %v17549_v53  ;;  %v528_v53 = vld [vmem:[%s29047_s1 + $0xfc8] sm:$0xff]  ;;  %v689_v9 = vld [vmem:[%s29047_s1 + $0x14d0] sm:$0xff] }
  0xf9   :  { %7845 = vmatpush1.bf16.msra.mxu0 %v17534_v17  ;;  %v17727_v17 = vcombine.high %v509_v10, %v521_v11  ;;  %v17870_v11 = vcombine.low %v653_v0, %v665_v1 }
  0xfa   :  { %7846 = vmatprep.subr.bf16.mxu0 %v17559_v18  ;;  %v540_v18 = vld [vmem:[%s29047_s1 + $0x1028] sm:$0xff] }
  0xfb   :  { %7232 = vmatpush1.bf16.msra.mxu1 %v17548_v26  ;;  %v17741_v26 = vcombine.high %v528_v53, %v540_v18  ;;  %v17740_v32 = vcombine.low %v528_v53, %v540_v18  ;;  %v701_v53 = vld [vmem:[%s29047_s1 + $0x1530] sm:$0xff] }
  0xfc   :  { %7233 = vmatprep.subr.bf16.mxu1 %v17573_v15  ;;  %v552_v15 = vld [vmem:[%s29047_s1 + $0x1088] sm:$0xff]  ;;  %v713_v18 = vld [vmem:[%s29047_s1 + $0x1590] sm:$0xff] }
  0xfd   :  { %7847 = vmatpush1.bf16.msra.mxu0 %v17558_v27  ;;  %v17751_v27 = vcombine.high %v533_v19, %v545_v20  ;;  %v17894_v20 = vcombine.low %v677_v8, %v689_v9 }
  0xfe   :  { %7848 = vmatprep.subr.bf16.mxu0 %v17583_v28  ;;  %v564_v28 = vld [vmem:[%s29047_s1 + $0x10e8] sm:$0xff] }
  0xff   :  { %7234 = vmatpush1.bf16.msra.mxu1 %v17572_v34  ;;  %v17765_v34 = vcombine.high %v552_v15, %v564_v28  ;;  %v17764_v41 = vcombine.low %v552_v15, %v564_v28  ;;  %v725_v15 = vld [vmem:[%s29047_s1 + $0x15f0] sm:$0xff] }
 0x100   :  { %7235 = vmatprep.subr.bf16.mxu1 %v17597_v37  ;;  %v576_v37 = vld [vmem:[%s29047_s1 + $0x1148] sm:$0xff]  ;;  %v737_v28 = vld [vmem:[%s29047_s1 + $0x1650] sm:$0xff] }
 0x101   :  { %7849 = vmatpush1.bf16.msra.mxu0 %v17582_v35  ;;  %v17775_v35 = vcombine.high %v557_v29, %v569_v30  ;;  %v17918_v30 = vcombine.low %v701_v53, %v713_v18 }
 0x102   :  { %7850 = vmatprep.subr.bf16.mxu0 %v17607_v38  ;;  %v588_v38 = vld [vmem:[%s29047_s1 + $0x11a8] sm:$0xff] }
 0x103   :  { %7236 = vmatpush1.bf16.msra.mxu1 %v17596_v25  ;;  %v17789_v25 = vcombine.high %v576_v37, %v588_v38  ;;  %v17788_v48 = vcombine.low %v576_v37, %v588_v38  ;;  %v749_v37 = vld [vmem:[%s29047_s1 + $0x16b0] sm:$0xff] }
 0x104   :  { %7246 = vmatprep.subr.bf16.mxu1 %v17621_v44  ;;  %v600_v44 = vld [vmem:[%s29047_s1 + $0x1208] sm:$0xff]  ;;  %v761_v38 = vld [vmem:[%s29047_s1 + $0x1710] sm:$0xff] }
 0x105   :  { %7851 = vmatpush1.bf16.msra.mxu0 %v17606_v43  ;;  %v17799_v43 = vcombine.high %v581_v39, %v593_v40  ;;  %v17942_v40 = vcombine.low %v725_v15, %v737_v28 }
 0x106   :  { %7861 = vmatprep.subr.bf16.mxu0 %v17631_v45  ;;  %7238 = vmatmul.mubr.bf16.vlgmr.msra.gmra.mrb[4].mxu1 %v21837_v12  ;;  %v612_v45 = vld [vmem:[%s29047_s1 + $0x1268] sm:$0xff] }
 0x107   :  { %7247 = vmatpush1.bf16.msra.mxu1 %v17620_v50  ;;  %7278 = vmatprep.mubr.bf16.mxu1 %v21858_v21  ;;  %v17813_v50 = vcombine.high %v600_v44, %v612_v45  ;;  %v17812_v58 = vcombine.low %v600_v44, %v612_v45  ;;  %v773_v44 = vld [vmem:[%s29047_s1 + $0x1770] sm:$0xff] }
 0x108   :  { %7853 = vmatmul.mubr.bf16.vlgmr.msra.gmra.mrb[4].mxu0 %v21837_v12  ;;  %7248 = vmatprep.subr.bf16.mxu1 %v17645_v52  ;;  %v624_v52 = vld [vmem:[%s29047_s1 + $0x12c8] sm:$0xff]  ;;  %v785_v45 = vld [vmem:[%s29047_s1 + $0x17d0] sm:$0xff] }
 0x109   :  { %7862 = vmatpush1.bf16.msra.mxu0 %v17630_v51  ;;  %7893 = vmatprep.mubr.bf16.mxu0 %v21858_v21  ;;  %v17823_v51 = vcombine.high %v605_v46, %v617_v47  ;;  %v17966_v47 = vcombine.low %v749_v37, %v761_v38 }
 0x10a   :  { %7863 = vmatprep.subr.bf16.mxu0 %v17655_v54  ;;  %v636_v54 = vld [vmem:[%s29047_s1 + $0x1328] sm:$0xff] }
 0x10b   :  { %7249 = vmatpush1.bf16.msra.mxu1 %v17644_v60  ;;  %v17837_v60 = vcombine.high %v624_v52, %v636_v54  ;;  %v17836_v2 = vcombine.low %v624_v52, %v636_v54  ;;  %v797_v52 = vld [vmem:[%s29047_s1 + $0x1830] sm:$0xff] }
 0x10c   :  { %7250 = vmatprep.subr.bf16.mxu1 %v17669_v62  ;;  %v648_v62 = vld [vmem:[%s29047_s1 + $0x1388] sm:$0xff]  ;;  %v809_v54 = vld [vmem:[%s29047_s1 + $0x1890] sm:$0xff] }
 0x10d   :  { %7864 = vmatpush1.bf16.msra.mxu0 %v17654_v61  ;;  %v17847_v61 = vcombine.high %v629_v55, %v641_v56  ;;  %v17990_v56 = vcombine.low %v773_v44, %v785_v45 }
 0x10e   :  { %7865 = vmatprep.subr.bf16.mxu0 %v17679_v63  ;;  %v660_v63 = vld [vmem:[%s29047_s1 + $0x13e8] sm:$0xff] }
 0x10f   :  { %7251 = vmatpush1.bf16.msra.mxu1 %v17668_v4  ;;  %v17861_v4 = vcombine.high %v648_v62, %v660_v63  ;;  %v17860_v10 = vcombine.low %v648_v62, %v660_v63  ;;  %v821_v62 = vld [vmem:[%s29047_s1 + $0x18f0] sm:$0xff] }
 0x110   :  { %7252 = vmatprep.subr.bf16.mxu1 %v17693_v6  ;;  %v672_v6 = vld [vmem:[%s29047_s1 + $0x1448] sm:$0xff]  ;;  %v833_v63 = vld [vmem:[%s29047_s1 + $0x1950] sm:$0xff] }
 0x111   :  { %7866 = vmatpush1.bf16.msra.mxu0 %v17678_v5  ;;  %v17871_v5 = vcombine.high %v653_v0, %v665_v1  ;;  %v18014_v1 = vcombine.low %v797_v52, %v809_v54 }
 0x112   :  { %7867 = vmatprep.subr.bf16.mxu0 %v17703_v7  ;;  %v684_v7 = vld [vmem:[%s29047_s1 + $0x14a8] sm:$0xff] }
 0x113   :  { %7253 = vmatpush1.bf16.msra.mxu1 %v17692_v13  ;;  %v17885_v13 = vcombine.high %v672_v6, %v684_v7  ;;  %v17884_v19 = vcombine.low %v672_v6, %v684_v7  ;;  %v845_v6 = vld [vmem:[%s29047_s1 + $0x19b0] sm:$0xff] }
 0x114   :  { %7254 = vmatprep.subr.bf16.mxu1 %v17717_v16  ;;  %v696_v16 = vld [vmem:[%s29047_s1 + $0x1508] sm:$0xff]  ;;  %v857_v7 = vld [vmem:[%s29047_s1 + $0x1a10] sm:$0xff] }
 0x115   :  { %7868 = vmatpush1.bf16.msra.mxu0 %v17702_v14  ;;  %v17895_v14 = vcombine.high %v677_v8, %v689_v9  ;;  %v18038_v9 = vcombine.low %v821_v62, %v833_v63 }
 0x116   :  { %7869 = vmatprep.subr.bf16.mxu0 %v17727_v17  ;;  %v708_v17 = vld [vmem:[%s29047_s1 + $0x1568] sm:$0xff] }
 0x117   :  { %7255 = vmatpush1.bf16.msra.mxu1 %v17716_v23  ;;  %v17909_v23 = vcombine.high %v696_v16, %v708_v17  ;;  %v17908_v29 = vcombine.low %v696_v16, %v708_v17  ;;  %v869_v16 = vld [vmem:[%s29047_s1 + $0x1a70] sm:$0xff] }
 0x118   :  { %7256 = vmatprep.subr.bf16.mxu1 %v17741_v26  ;;  %v720_v26 = vld [vmem:[%s29047_s1 + $0x15c8] sm:$0xff]  ;;  %v881_v17 = vld [vmem:[%s29047_s1 + $0x1ad0] sm:$0xff] }
 0x119   :  { %7870 = vmatpush1.bf16.msra.mxu0 %v17726_v24  ;;  %v17919_v24 = vcombine.high %v701_v53, %v713_v18  ;;  %v18062_v18 = vcombine.low %v845_v6, %v857_v7 }
 0x11a   :  { %7871 = vmatprep.subr.bf16.mxu0 %v17751_v27  ;;  %v732_v27 = vld [vmem:[%s29047_s1 + $0x1628] sm:$0xff] }
 0x11b   :  { %7257 = vmatpush1.bf16.msra.mxu1 %v17740_v32  ;;  %v17933_v32 = vcombine.high %v720_v26, %v732_v27  ;;  %v17932_v39 = vcombine.low %v720_v26, %v732_v27  ;;  %v893_v26 = vld [vmem:[%s29047_s1 + $0x1b30] sm:$0xff] }
 0x11c   :  { %7258 = vmatprep.subr.bf16.mxu1 %v17765_v34  ;;  %v744_v34 = vld [vmem:[%s29047_s1 + $0x1688] sm:$0xff]  ;;  %v905_v27 = vld [vmem:[%s29047_s1 + $0x1b90] sm:$0xff] }
 0x11d   :  { %7872 = vmatpush1.bf16.msra.mxu0 %v17750_v33  ;;  %v17943_v33 = vcombine.high %v725_v15, %v737_v28  ;;  %v18086_v28 = vcombine.low %v869_v16, %v881_v17 }
 0x11e   :  { %7873 = vmatprep.subr.bf16.mxu0 %v17775_v35  ;;  %v756_v35 = vld [vmem:[%s29047_s1 + $0x16e8] sm:$0xff] }
 0x11f   :  { %7259 = vmatpush1.bf16.msra.mxu1 %v17764_v41  ;;  %v17957_v41 = vcombine.high %v744_v34, %v756_v35  ;;  %v17956_v46 = vcombine.low %v744_v34, %v756_v35  ;;  %v917_v34 = vld [vmem:[%s29047_s1 + $0x1bf0] sm:$0xff] }
 0x120   :  { %7260 = vmatprep.subr.bf16.mxu1 %v17789_v25  ;;  %v768_v25 = vld [vmem:[%s29047_s1 + $0x1748] sm:$0xff]  ;;  %v929_v35 = vld [vmem:[%s29047_s1 + $0x1c50] sm:$0xff] }
 0x121   :  { %7874 = vmatpush1.bf16.msra.mxu0 %v17774_v42  ;;  %v17967_v42 = vcombine.high %v749_v37, %v761_v38  ;;  %v18110_v38 = vcombine.low %v893_v26, %v905_v27 }
 0x122   :  { %7875 = vmatprep.subr.bf16.mxu0 %v17799_v43  ;;  %v780_v43 = vld [vmem:[%s29047_s1 + $0x17a8] sm:$0xff] }
 0x123   :  { %7261 = vmatpush1.bf16.msra.mxu1 %v17788_v48  ;;  %v17981_v48 = vcombine.high %v768_v25, %v780_v43  ;;  %v17980_v55 = vcombine.low %v768_v25, %v780_v43  ;;  %v941_v25 = vld [vmem:[%s29047_s1 + $0x1cb0] sm:$0xff] }
 0x124   :  { %7262 = vmatprep.subr.bf16.mxu1 %v17813_v50  ;;  %v792_v50 = vld [vmem:[%s29047_s1 + $0x1808] sm:$0xff]  ;;  %v953_v43 = vld [vmem:[%s29047_s1 + $0x1d10] sm:$0xff] }
 0x125   :  { %7876 = vmatpush1.bf16.msra.mxu0 %v17798_v49  ;;  %v17991_v49 = vcombine.high %v773_v44, %v785_v45  ;;  %v18134_v45 = vcombine.low %v917_v34, %v929_v35 }
 0x126   :  { %7877 = vmatprep.subr.bf16.mxu0 %v17823_v51  ;;  %v804_v51 = vld [vmem:[%s29047_s1 + $0x1868] sm:$0xff] }
 0x127   :  { %7263 = vmatpush1.bf16.msra.mxu1 %v17812_v58  ;;  %v18005_v58 = vcombine.high %v792_v50, %v804_v51  ;;  %v18004_v0 = vcombine.low %v792_v50, %v804_v51  ;;  %v965_v50 = vld [vmem:[%s29047_s1 + $0x1d70] sm:$0xff] }
 0x128   :  { %7264 = vmatprep.subr.bf16.mxu1 %v17837_v60  ;;  %v816_v60 = vld [vmem:[%s29047_s1 + $0x18c8] sm:$0xff]  ;;  %v977_v51 = vld [vmem:[%s29047_s1 + $0x1dd0] sm:$0xff] }
 0x129   :  { %7878 = vmatpush1.bf16.msra.mxu0 %v17822_v59  ;;  %v18015_v59 = vcombine.high %v797_v52, %v809_v54  ;;  %v18158_v54 = vcombine.low %v941_v25, %v953_v43 }
 0x12a   :  { %7879 = vmatprep.subr.bf16.mxu0 %v17847_v61  ;;  %v828_v61 = vld [vmem:[%s29047_s1 + $0x1928] sm:$0xff] }
 0x12b   :  { %7265 = vmatpush1.bf16.msra.mxu1 %v17836_v2  ;;  %v18029_v2 = vcombine.high %v816_v60, %v828_v61  ;;  %v18028_v8 = vcombine.low %v816_v60, %v828_v61  ;;  %v989_v60 = vld [vmem:[%s29047_s1 + $0x1e30] sm:$0xff] }
 0x12c   :  { %7266 = vmatprep.subr.bf16.mxu1 %v17861_v4  ;;  %v840_v4 = vld [vmem:[%s29047_s1 + $0x1988] sm:$0xff]  ;;  %v1001_v61 = vld [vmem:[%s29047_s1 + $0x1e90] sm:$0xff] }
 0x12d   :  { %7880 = vmatpush1.bf16.msra.mxu0 %v17846_v3  ;;  %v18039_v3 = vcombine.high %v821_v62, %v833_v63  ;;  %v18182_v63 = vcombine.low %v965_v50, %v977_v51 }
 0x12e   :  { %7881 = vmatprep.subr.bf16.mxu0 %v17871_v5  ;;  %v852_v5 = vld [vmem:[%s29047_s1 + $0x19e8] sm:$0xff] }
 0x12f   :  { %7267 = vmatpush1.bf16.msra.mxu1 %v17860_v10  ;;  %v18053_v10 = vcombine.high %v840_v4, %v852_v5  ;;  %v18052_v53 = vcombine.low %v840_v4, %v852_v5  ;;  %v1013_v4 = vld [vmem:[%s29047_s1 + $0x1ef0] sm:$0xff] }
 0x130   :  { %7268 = vmatprep.subr.bf16.mxu1 %v17885_v13  ;;  %v864_v13 = vld [vmem:[%s29047_s1 + $0x1a48] sm:$0xff]  ;;  %v1025_v5 = vld [vmem:[%s29047_s1 + $0x1f50] sm:$0xff] }
 0x131   :  { %7882 = vmatpush1.bf16.msra.mxu0 %v17870_v11  ;;  %v18063_v11 = vcombine.high %v845_v6, %v857_v7  ;;  %v18206_v7 = vcombine.low %v989_v60, %v1001_v61 }
 0x132   :  { %7883 = vmatprep.subr.bf16.mxu0 %v17895_v14  ;;  %v876_v14 = vld [vmem:[%s29047_s1 + $0x1aa8] sm:$0xff] }
 0x133   :  { %7269 = vmatpush1.bf16.msra.mxu1 %v17884_v19  ;;  %v18077_v19 = vcombine.high %v864_v13, %v876_v14  ;;  %v18076_v15 = vcombine.low %v864_v13, %v876_v14  ;;  %v1037_v13 = vld [vmem:[%s29047_s1 + $0x1fb0] sm:$0xff] }
 0x134   :  { %7270 = vmatprep.subr.bf16.mxu1 %v17909_v23  ;;  %v888_v23 = vld [vmem:[%s29047_s1 + $0x1b08] sm:$0xff]  ;;  %v1049_v14 = vld [vmem:[%s29047_s1 + $0x2010] sm:$0xff] }
 0x135   :  { %7884 = vmatpush1.bf16.msra.mxu0 %v17894_v20  ;;  %v18087_v20 = vcombine.high %v869_v16, %v881_v17  ;;  %v18230_v17 = vcombine.low %v1013_v4, %v1025_v5 }
 0x136   :  { %7885 = vmatprep.subr.bf16.mxu0 %v17919_v24  ;;  %v900_v24 = vld [vmem:[%s29047_s1 + $0x1b68] sm:$0xff] }
 0x137   :  { %7271 = vmatpush1.bf16.msra.mxu1 %v17908_v29  ;;  %v18101_v29 = vcombine.high %v888_v23, %v900_v24  ;;  %v18100_v37 = vcombine.low %v888_v23, %v900_v24  ;;  %v1061_v23 = vld [vmem:[%s29047_s1 + $0x2070] sm:$0xff] }
 0x138   :  { %7272 = vmatprep.subr.bf16.mxu1 %v17933_v32  ;;  %v912_v32 = vld [vmem:[%s29047_s1 + $0x1bc8] sm:$0xff]  ;;  %v1073_v24 = vld [vmem:[%s29047_s1 + $0x20d0] sm:$0xff] }
 0x139   :  { %7886 = vmatpush1.bf16.msra.mxu0 %v17918_v30  ;;  %v18111_v30 = vcombine.high %v893_v26, %v905_v27  ;;  %v18254_v27 = vcombine.low %v1037_v13, %v1049_v14 }
 0x13a   :  { %7887 = vmatprep.subr.bf16.mxu0 %v17943_v33  ;;  %v924_v33 = vld [vmem:[%s29047_s1 + $0x1c28] sm:$0xff] }
 0x13b   :  { %7273 = vmatpush1.bf16.msra.mxu1 %v17932_v39  ;;  %v18125_v39 = vcombine.high %v912_v32, %v924_v33  ;;  %v18124_v44 = vcombine.low %v912_v32, %v924_v33  ;;  %v1085_v32 = vld [vmem:[%s29047_s1 + $0x2130] sm:$0xff] }
 0x13c   :  { %7274 = vmatprep.subr.bf16.mxu1 %v17957_v41  ;;  %v936_v41 = vld [vmem:[%s29047_s1 + $0x1c88] sm:$0xff]  ;;  %v1097_v33 = vld [vmem:[%s29047_s1 + $0x2190] sm:$0xff] }
 0x13d   :  { %7888 = vmatpush1.bf16.msra.mxu0 %v17942_v40  ;;  %v18135_v40 = vcombine.high %v917_v34, %v929_v35  ;;  %v18278_v35 = vcombine.low %v1061_v23, %v1073_v24 }
 0x13e   :  { %7889 = vmatprep.subr.bf16.mxu0 %v17967_v42  ;;  %v948_v42 = vld [vmem:[%s29047_s1 + $0x1ce8] sm:$0xff] }
 0x13f   :  { %7275 = vmatpush1.bf16.msra.mxu1 %v17956_v46  ;;  %v18149_v46 = vcombine.high %v936_v41, %v948_v42  ;;  %v18148_v52 = vcombine.low %v936_v41, %v948_v42  ;;  %v1109_v41 = vld [vmem:[%s29047_s1 + $0x21f0] sm:$0xff] }
 0x140   :  { %7276 = vmatprep.subr.bf16.mxu1 %v17981_v48  ;;  %v960_v48 = vld [vmem:[%s29047_s1 + $0x1d48] sm:$0xff]  ;;  %v1121_v42 = vld [vmem:[%s29047_s1 + $0x2250] sm:$0xff] }
 0x141   :  { %7890 = vmatpush1.bf16.msra.mxu0 %v17966_v47  ;;  %v18159_v47 = vcombine.high %v941_v25, %v953_v43  ;;  %v18302_v43 = vcombine.low %v1085_v32, %v1097_v33 }
 0x142   :  { %7891 = vmatprep.subr.bf16.mxu0 %v17991_v49  ;;  %v972_v49 = vld [vmem:[%s29047_s1 + $0x1da8] sm:$0xff] }
 0x143   :  { %7277 = vmatpush1.bf16.msra.mxu1 %v17980_v55  ;;  %v18173_v55 = vcombine.high %v960_v48, %v972_v49  ;;  %v18172_v62 = vcombine.low %v960_v48, %v972_v49  ;;  %v1133_v48 = vld [vmem:[%s29047_s1 + $0x22b0] sm:$0xff] }
 0x144   :  { %7287 = vmatprep.subr.bf16.mxu1 %v18005_v58  ;;  %v984_v58 = vld [vmem:[%s29047_s1 + $0x1e08] sm:$0xff]  ;;  %v1145_v49 = vld [vmem:[%s29047_s1 + $0x2310] sm:$0xff] }
 0x145   :  { %7892 = vmatpush1.bf16.msra.mxu0 %v17990_v56  ;;  %v18183_v56 = vcombine.high %v965_v50, %v977_v51  ;;  %v18326_v51 = vcombine.low %v1109_v41, %v1121_v42 }
 0x146   :  { %7902 = vmatprep.subr.bf16.mxu0 %v18015_v59  ;;  %7279 = vmatmul.mubr.bf16.vlgmr.msra.gmra.mrb[4].mxu1 %v22046_v22  ;;  %v996_v59 = vld [vmem:[%s29047_s1 + $0x1e68] sm:$0xff] }
 0x147   :  { %7288 = vmatpush1.bf16.msra.mxu1 %v18004_v0  ;;  %7319 = vmatprep.mubr.bf16.mxu1 %v22067_v31  ;;  %v18197_v0 = vcombine.high %v984_v58, %v996_v59  ;;  %v18196_v6 = vcombine.low %v984_v58, %v996_v59  ;;  %v1157_v58 = vld [vmem:[%s29047_s1 + $0x2370] sm:$0xff] }
 0x148   :  { %7894 = vmatmul.mubr.bf16.vlgmr.msra.gmra.mrb[4].mxu0 %v22046_v22  ;;  %7289 = vmatprep.subr.bf16.mxu1 %v18029_v2  ;;  %v1008_v2 = vld [vmem:[%s29047_s1 + $0x1ec8] sm:$0xff]  ;;  %v1169_v59 = vld [vmem:[%s29047_s1 + $0x23d0] sm:$0xff] }
 0x149   :  { %7903 = vmatpush1.bf16.msra.mxu0 %v18014_v1  ;;  %7934 = vmatprep.mubr.bf16.mxu0 %v22067_v31  ;;  %v18207_v1 = vcombine.high %v989_v60, %v1001_v61  ;;  %v18350_v61 = vcombine.low %v1133_v48, %v1145_v49 }
 0x14a   :  { %7904 = vmatprep.subr.bf16.mxu0 %v18039_v3  ;;  %v1020_v3 = vld [vmem:[%s29047_s1 + $0x1f28] sm:$0xff] }
 0x14b   :  { %7290 = vmatpush1.bf16.msra.mxu1 %v18028_v8  ;;  %v18221_v8 = vcombine.high %v1008_v2, %v1020_v3  ;;  %v18220_v16 = vcombine.low %v1008_v2, %v1020_v3  ;;  %v31_v2 = vld [vmem:[%s29047_s1 + $0x40] sm:$0xff] }
 0x14c   :  { %7291 = vmatprep.subr.bf16.mxu1 %v18053_v10  ;;  %v1032_v10 = vld [vmem:[%s29047_s1 + $0x1f88] sm:$0xff]  ;;  %v43_v3 = vld [vmem:[%s29047_s1 + $0xa0] sm:$0xff] }
 0x14d   :  { %7905 = vmatpush1.bf16.msra.mxu0 %v18038_v9  ;;  %v18231_v9 = vcombine.high %v1013_v4, %v1025_v5  ;;  %v18374_v5 = vcombine.low %v1157_v58, %v1169_v59 }
 0x14e   :  { %7906 = vmatprep.subr.bf16.mxu0 %v18063_v11  ;;  %v1044_v11 = vld [vmem:[%s29047_s1 + $0x1fe8] sm:$0xff] }
 0x14f   :  { %7292 = vmatpush1.bf16.msra.mxu1 %v18052_v53  ;;  %v18245_v53 = vcombine.high %v1032_v10, %v1044_v11  ;;  %v18244_v26 = vcombine.low %v1032_v10, %v1044_v11  ;;  %v55_v10 = vld [vmem:[%s29047_s1 + $0x100] sm:$0xff] }
 0x150   :  { %7293 = vmatprep.subr.bf16.mxu1 %v18077_v19  ;;  %v1056_v19 = vld [vmem:[%s29047_s1 + $0x2048] sm:$0xff]  ;;  %v67_v11 = vld [vmem:[%s29047_s1 + $0x160] sm:$0xff] }
 0x151   :  { %7907 = vmatpush1.bf16.msra.mxu0 %v18062_v18  ;;  %v18255_v18 = vcombine.high %v1037_v13, %v1049_v14  ;;  %v17250_v14 = vcombine.low %v31_v2, %v43_v3 }
 0x152   :  { %7908 = vmatprep.subr.bf16.mxu0 %v18087_v20  ;;  %v1068_v20 = vld [vmem:[%s29047_s1 + $0x20a8] sm:$0xff] }
 0x153   :  { %7294 = vmatpush1.bf16.msra.mxu1 %v18076_v15  ;;  %v18269_v15 = vcombine.high %v1056_v19, %v1068_v20  ;;  %v18268_v34 = vcombine.low %v1056_v19, %v1068_v20  ;;  %v79_v19 = vld [vmem:[%s29047_s1 + $0x1c0] sm:$0xff] }
 0x154   :  { %7295 = vmatprep.subr.bf16.mxu1 %v18101_v29  ;;  %v1080_v29 = vld [vmem:[%s29047_s1 + $0x2108] sm:$0xff]  ;;  %v91_v20 = vld [vmem:[%s29047_s1 + $0x220] sm:$0xff] }
 0x155   :  { %7909 = vmatpush1.bf16.msra.mxu0 %v18086_v28  ;;  %v18279_v28 = vcombine.high %v1061_v23, %v1073_v24  ;;  %v17274_v24 = vcombine.low %v55_v10, %v67_v11 }
 0x156   :  { %7910 = vmatprep.subr.bf16.mxu0 %v18111_v30  ;;  %v1092_v30 = vld [vmem:[%s29047_s1 + $0x2168] sm:$0xff] }
 0x157   :  { %7296 = vmatpush1.bf16.msra.mxu1 %v18100_v37  ;;  %v18293_v37 = vcombine.high %v1080_v29, %v1092_v30  ;;  %v18292_v25 = vcombine.low %v1080_v29, %v1092_v30  ;;  %v103_v29 = vld [vmem:[%s29047_s1 + $0x280] sm:$0xff] }
 0x158   :  { %7297 = vmatprep.subr.bf16.mxu1 %v18125_v39  ;;  %v1104_v39 = vld [vmem:[%s29047_s1 + $0x21c8] sm:$0xff]  ;;  %v115_v30 = vld [vmem:[%s29047_s1 + $0x2e0] sm:$0xff] }
 0x159   :  { %7911 = vmatpush1.bf16.msra.mxu0 %v18110_v38  ;;  %v18303_v38 = vcombine.high %v1085_v32, %v1097_v33  ;;  %v17298_v33 = vcombine.low %v79_v19, %v91_v20 }
 0x15a   :  { %7912 = vmatprep.subr.bf16.mxu0 %v18135_v40  ;;  %v1116_v40 = vld [vmem:[%s29047_s1 + $0x2228] sm:$0xff] }
 0x15b   :  { %7298 = vmatpush1.bf16.msra.mxu1 %v18124_v44  ;;  %v18317_v44 = vcombine.high %v1104_v39, %v1116_v40  ;;  %v18316_v50 = vcombine.low %v1104_v39, %v1116_v40  ;;  %v127_v39 = vld [vmem:[%s29047_s1 + $0x340] sm:$0xff] }
 0x15c   :  { %7299 = vmatprep.subr.bf16.mxu1 %v18149_v46  ;;  %v1128_v46 = vld [vmem:[%s29047_s1 + $0x2288] sm:$0xff]  ;;  %v139_v40 = vld [vmem:[%s29047_s1 + $0x3a0] sm:$0xff] }
 0x15d   :  { %7913 = vmatpush1.bf16.msra.mxu0 %v18134_v45  ;;  %v18327_v45 = vcombine.high %v1109_v41, %v1121_v42  ;;  %v17322_v42 = vcombine.low %v103_v29, %v115_v30 }
 0x15e   :  { %7914 = vmatprep.subr.bf16.mxu0 %v18159_v47  ;;  %v1140_v47 = vld [vmem:[%s29047_s1 + $0x22e8] sm:$0xff] }
 0x15f   :  { %7300 = vmatpush1.bf16.msra.mxu1 %v18148_v52  ;;  %v18341_v52 = vcombine.high %v1128_v46, %v1140_v47  ;;  %v18340_v60 = vcombine.low %v1128_v46, %v1140_v47  ;;  %v151_v46 = vld [vmem:[%s29047_s1 + $0x400] sm:$0xff] }
 0x160   :  { %7301 = vmatprep.subr.bf16.mxu1 %v18173_v55  ;;  %v1152_v55 = vld [vmem:[%s29047_s1 + $0x2348] sm:$0xff]  ;;  %v163_v47 = vld [vmem:[%s29047_s1 + $0x460] sm:$0xff] }
 0x161   :  { %7915 = vmatpush1.bf16.msra.mxu0 %v18158_v54  ;;  %v18351_v54 = vcombine.high %v1133_v48, %v1145_v49  ;;  %v17346_v49 = vcombine.low %v127_v39, %v139_v40 }
 0x162   :  { %7916 = vmatprep.subr.bf16.mxu0 %v18183_v56  ;;  %v1164_v56 = vld [vmem:[%s29047_s1 + $0x23a8] sm:$0xff] }
 0x163   :  { %7302 = vmatpush1.bf16.msra.mxu1 %v18172_v62  ;;  %v18365_v62 = vcombine.high %v1152_v55, %v1164_v56  ;;  %v18364_v4 = vcombine.low %v1152_v55, %v1164_v56  ;;  %v175_v55 = vld [vmem:[%s29047_s1 + $0x4c0] sm:$0xff] }
 0x164   :  { %7303 = vmatprep.subr.bf16.mxu1 %v18197_v0  ;;  %v25_v0 = vld [vmem:[%s29047_s1 + $0x10] sm:$0xff]  ;;  %v187_v56 = vld [vmem:[%s29047_s1 + $0x520] sm:$0xff] }
 0x165   :  { %7917 = vmatpush1.bf16.msra.mxu0 %v18182_v63  ;;  %v18375_v63 = vcombine.high %v1157_v58, %v1169_v59  ;;  %v17370_v59 = vcombine.low %v151_v46, %v163_v47 }
 0x166   :  { %7918 = vmatprep.subr.bf16.mxu0 %v18207_v1  ;;  %v37_v1 = vld [vmem:[%s29047_s1 + $0x70] sm:$0xff] }
 0x167   :  { %7304 = vmatpush1.bf16.msra.mxu1 %v18196_v6  ;;  %v17239_v6 = vcombine.high %v25_v0, %v37_v1  ;;  %v17238_v13 = vcombine.low %v25_v0, %v37_v1  ;;  %v205_v0 = vld [vmem:[%s29047_s1 + $0x5b0] sm:$0xff] }
 0x168   :  { %7305 = vmatprep.subr.bf16.mxu1 %v18221_v8  ;;  %v49_v8 = vld [vmem:[%s29047_s1 + $0xd0] sm:$0xff] }
 0x169   :  { %7919 = vmatpush1.bf16.msra.mxu0 %v18206_v7  ;;  %v17251_v7 = vcombine.high %v31_v2, %v43_v3  ;;  %v199_v2 = vld [vmem:[%s29047_s1 + $0x580] sm:$0xff] }
 0x16a   :  { %7920 = vmatprep.subr.bf16.mxu0 %v18231_v9  ;;  %v61_v9 = vld [vmem:[%s29047_s1 + $0x130] sm:$0xff]  ;;  %v211_v3 = vld [vmem:[%s29047_s1 + $0x5e0] sm:$0xff] }
 0x16b   :  { %7306 = vmatpush1.bf16.msra.mxu1 %v18220_v16  ;;  %v17263_v16 = vcombine.high %v49_v8, %v61_v9  ;;  %v17262_v23 = vcombine.low %v49_v8, %v61_v9  ;;  %v17394_v9 = vcombine.low %v175_v55, %v187_v56 }
 0x16c   :  { %7307 = vmatprep.subr.bf16.mxu1 %v18245_v53  ;;  %v73_v53 = vld [vmem:[%s29047_s1 + $0x190] sm:$0xff] }
 0x16d   :  { %7921 = vmatpush1.bf16.msra.mxu0 %v18230_v17  ;;  %v17275_v17 = vcombine.high %v55_v10, %v67_v11 }
 0x16e   :  { %7922 = vmatprep.subr.bf16.mxu0 %v18255_v18  ;;  %v85_v18 = vld [vmem:[%s29047_s1 + $0x1f0] sm:$0xff] }
 0x16f   :  { %7308 = vmatpush1.bf16.msra.mxu1 %v18244_v26  ;;  %v17287_v26 = vcombine.high %v73_v53, %v85_v18  ;;  %v17286_v32 = vcombine.low %v73_v53, %v85_v18  ;;  %v223_v53 = vld [vmem:[%s29047_s1 + $0x640] sm:$0xff] }
 0x170   :  { %7309 = vmatprep.subr.bf16.mxu1 %v18269_v15  ;;  %v97_v15 = vld [vmem:[%s29047_s1 + $0x250] sm:$0xff]  ;;  %v235_v18 = vld [vmem:[%s29047_s1 + $0x6a0] sm:$0xff] }
 0x171   :  { %7923 = vmatpush1.bf16.msra.mxu0 %v18254_v27  ;;  %v17299_v27 = vcombine.high %v79_v19, %v91_v20  ;;  %v17418_v20 = vcombine.low %v199_v2, %v211_v3 }
 0x172   :  { %7924 = vmatprep.subr.bf16.mxu0 %v18279_v28  ;;  %v109_v28 = vld [vmem:[%s29047_s1 + $0x2b0] sm:$0xff] }
 0x173   :  { %7310 = vmatpush1.bf16.msra.mxu1 %v18268_v34  ;;  %v17311_v34 = vcombine.high %v97_v15, %v109_v28  ;;  %v17310_v41 = vcombine.low %v97_v15, %v109_v28  ;;  %v247_v15 = vld [vmem:[%s29047_s1 + $0x700] sm:$0xff] }
 0x174   :  { %7311 = vmatprep.subr.bf16.mxu1 %v18293_v37  ;;  %v121_v37 = vld [vmem:[%s29047_s1 + $0x310] sm:$0xff]  ;;  %v259_v28 = vld [vmem:[%s29047_s1 + $0x760] sm:$0xff] }
 0x175   :  { %7925 = vmatpush1.bf16.msra.mxu0 %v18278_v35  ;;  %v17323_v35 = vcombine.high %v103_v29, %v115_v30  ;;  %v17442_v30 = vcombine.low %v223_v53, %v235_v18 }
 0x176   :  { %7926 = vmatprep.subr.bf16.mxu0 %v18303_v38  ;;  %v133_v38 = vld [vmem:[%s29047_s1 + $0x370] sm:$0xff] }
 0x177   :  { %7312 = vmatpush1.bf16.msra.mxu1 %v18292_v25  ;;  %v17335_v25 = vcombine.high %v121_v37, %v133_v38  ;;  %v17334_v48 = vcombine.low %v121_v37, %v133_v38  ;;  %v271_v37 = vld [vmem:[%s29047_s1 + $0x7c0] sm:$0xff] }
 0x178   :  { %7313 = vmatprep.subr.bf16.mxu1 %v18317_v44  ;;  %v145_v44 = vld [vmem:[%s29047_s1 + $0x3d0] sm:$0xff]  ;;  %v283_v38 = vld [vmem:[%s29047_s1 + $0x820] sm:$0xff] }
 0x179   :  { %7927 = vmatpush1.bf16.msra.mxu0 %v18302_v43  ;;  %v17347_v43 = vcombine.high %v127_v39, %v139_v40  ;;  %v17466_v40 = vcombine.low %v247_v15, %v259_v28 }
 0x17a   :  { %7928 = vmatprep.subr.bf16.mxu0 %v18327_v45  ;;  %v157_v45 = vld [vmem:[%s29047_s1 + $0x430] sm:$0xff] }
 0x17b   :  { %7314 = vmatpush1.bf16.msra.mxu1 %v18316_v50  ;;  %v17359_v50 = vcombine.high %v145_v44, %v157_v45  ;;  %v17358_v58 = vcombine.low %v145_v44, %v157_v45  ;;  %v295_v44 = vld [vmem:[%s29047_s1 + $0x880] sm:$0xff] }
 0x17c   :  { %7315 = vmatprep.subr.bf16.mxu1 %v18341_v52  ;;  %v169_v52 = vld [vmem:[%s29047_s1 + $0x490] sm:$0xff]  ;;  %v307_v45 = vld [vmem:[%s29047_s1 + $0x8e0] sm:$0xff] }
 0x17d   :  { %7929 = vmatpush1.bf16.msra.mxu0 %v18326_v51  ;;  %v17371_v51 = vcombine.high %v151_v46, %v163_v47  ;;  %v17490_v47 = vcombine.low %v271_v37, %v283_v38 }
 0x17e   :  { %7930 = vmatprep.subr.bf16.mxu0 %v18351_v54  ;;  %v181_v54 = vld [vmem:[%s29047_s1 + $0x4f0] sm:$0xff] }
 0x17f   :  { %7316 = vmatpush1.bf16.msra.mxu1 %v18340_v60  ;;  %v17383_v60 = vcombine.high %v169_v52, %v181_v54 }
 0x180   :  { %7317 = vmatprep.subr.bf16.mxu1 %v18365_v62  ;;  %v17395_v62 = vcombine.high %v175_v55, %v187_v56  ;;  %v17514_v56 = vcombine.low %v295_v44, %v307_v45 }
 0x181   :  { %7931 = vmatpush1.bf16.msra.mxu0 %v18350_v61 }
 0x182   :  { %7932 = vmatprep.subr.bf16.mxu0 %v18375_v63  ;;  %v193_v63 = vld [vmem:[%s29047_s1 + $0x550] sm:$0xff] }
 0x183   :  { %7318 = vmatpush1.bf16.msra.mxu1 %v18364_v4  ;;  %v17407_v10 = vcombine.high %v193_v63, %v205_v0  ;;  %v17406_v19 = vcombine.low %v193_v63, %v205_v0  ;;  %v343_v63 = vld [vmem:[%s29047_s1 + $0xa00] sm:$0xff] }
 0x184   :  { %7328 = vmatprep.subr.bf16.mxu1 %v17239_v6  ;;  %v17382_v6 = vcombine.low %v169_v52, %v181_v54  ;;  %v319_v52 = vld [vmem:[%s29047_s1 + $0x940] sm:$0xff] }
 0x185   :  { %7933 = vmatpush1.bf16.msra.mxu0 %v18374_v5  ;;  %v331_v54 = vld [vmem:[%s29047_s1 + $0x9a0] sm:$0xff] }
 0x186   :  { %8066 = vmatprep.subr.bf16.mxu0 %v17251_v7  ;;  %7320 = vmatmul.mubr.bf16.vlgmr.msra.gmra.mrb[4].mxu1 %v22255_v36  ;;  %v355_v0 = vld [vmem:[%s29047_s1 + $0xa60] sm:$0xff] }
 0x187   :  { %7329 = vmatpush1.bf16.msra.mxu1 %v17238_v13  ;;  %7360 = vmatprep.mubr.bf16.mxu1 %v21711_v57  ;;  %v17419_v13 = vcombine.high %v199_v2, %v211_v3  ;;  %v17538_v3 = vcombine.low %v319_v52, %v331_v54 }
 0x188   :  { %7935 = vmatmul.mubr.bf16.vlgmr.msra.gmra.mrb[4].mxu0 %v22255_v36  ;;  %7330 = vmatprep.subr.bf16.mxu1 %v17263_v16  ;;  %v229_v16 = vld [vmem:[%s29047_s1 + $0x670] sm:$0xff] }
 0x189   :  { %8067 = vmatpush1.bf16.msra.mxu0 %v17250_v14  ;;  %8098 = vmatprep.mubr.bf16.mxu0 %v21711_v57  ;;  %v217_v14 = vld [vmem:[%s29047_s1 + $0x610] sm:$0xff] }
 0x18a   :  { %8068 = vmatprep.subr.bf16.mxu0 %v17275_v17  ;;  %v17430_v29 = vcombine.low %v217_v14, %v229_v16 }
 0x18b   :  { %7331 = vmatpush1.bf16.msra.mxu1 %v17262_v23  ;;  %v17431_v23 = vcombine.high %v217_v14, %v229_v16  ;;  %v17562_v14 = vcombine.low %v343_v63, %v355_v0 }
 0x18c   :  { %7332 = vmatprep.subr.bf16.mxu1 %v17287_v26  ;;  %v241_v26 = vld [vmem:[%s29047_s1 + $0x6d0] sm:$0xff] }
 0x18d   :  { %8069 = vmatpush1.bf16.msra.mxu0 %v17274_v24  ;;  %v17443_v24 = vcombine.high %v223_v53, %v235_v18  ;;  %v385_v53 = vld [vmem:[%s29047_s1 + $0xb50] sm:$0xff] }
 0x18e   :  { %8070 = vmatprep.subr.bf16.mxu0 %v17299_v27  ;;  %v253_v27 = vld [vmem:[%s29047_s1 + $0x730] sm:$0xff] }
 0x18f   :  { %7333 = vmatpush1.bf16.msra.mxu1 %v17286_v32  ;;  %v17455_v32 = vcombine.high %v241_v26, %v253_v27  ;;  %v17454_v39 = vcombine.low %v241_v26, %v253_v27  ;;  %v397_v18 = vld [vmem:[%s29047_s1 + $0xbb0] sm:$0xff] }
 0x190   :  { %7334 = vmatprep.subr.bf16.mxu1 %v17311_v34  ;;  %v265_v34 = vld [vmem:[%s29047_s1 + $0x790] sm:$0xff]  ;;  %v17599_v26 = vcombine.high %v385_v53, %v397_v18 }
 0x191   :  { %8071 = vmatpush1.bf16.msra.mxu0 %v17298_v33  ;;  %v17467_v33 = vcombine.high %v247_v15, %v259_v28  ;;  %v409_v15 = vld [vmem:[%s29047_s1 + $0xc10] sm:$0xff] }
 0x192   :  { %8072 = vmatprep.subr.bf16.mxu0 %v17323_v35  ;;  %v277_v35 = vld [vmem:[%s29047_s1 + $0x7f0] sm:$0xff] }
 0x193   :  { %7335 = vmatpush1.bf16.msra.mxu1 %v17310_v41  ;;  %v17479_v41 = vcombine.high %v265_v34, %v277_v35  ;;  %v17478_v46 = vcombine.low %v265_v34, %v277_v35  ;;  %v421_v28 = vld [vmem:[%s29047_s1 + $0xc70] sm:$0xff] }
 0x194   :  { %7336 = vmatprep.subr.bf16.mxu1 %v17335_v25  ;;  %v289_v25 = vld [vmem:[%s29047_s1 + $0x850] sm:$0xff]  ;;  %v17623_v34 = vcombine.high %v409_v15, %v421_v28 }
 0x195   :  { %8073 = vmatpush1.bf16.msra.mxu0 %v17322_v42  ;;  %v17491_v42 = vcombine.high %v271_v37, %v283_v38  ;;  %v433_v37 = vld [vmem:[%s29047_s1 + $0xcd0] sm:$0xff] }
 0x196   :  { %8074 = vmatprep.subr.bf16.mxu0 %v17347_v43  ;;  %v301_v43 = vld [vmem:[%s29047_s1 + $0x8b0] sm:$0xff] }
 0x197   :  { %7337 = vmatpush1.bf16.msra.mxu1 %v17334_v48  ;;  %v17503_v48 = vcombine.high %v289_v25, %v301_v43  ;;  %v17502_v55 = vcombine.low %v289_v25, %v301_v43  ;;  %v445_v38 = vld [vmem:[%s29047_s1 + $0xd30] sm:$0xff] }
 0x198   :  { %7338 = vmatprep.subr.bf16.mxu1 %v17359_v50  ;;  %v313_v50 = vld [vmem:[%s29047_s1 + $0x910] sm:$0xff]  ;;  %v17647_v25 = vcombine.high %v433_v37, %v445_v38 }
 0x199   :  { %8075 = vmatpush1.bf16.msra.mxu0 %v17346_v49  ;;  %v22915_v61 = vpop.f32.mrb[0].mxu1  ;;  %v17515_v49 = vcombine.high %v295_v44, %v307_v45  ;;  %v457_v44 = vld [vmem:[%s29047_s1 + $0xd90] sm:$0xff] }
 0x19a   :  { %8076 = vmatprep.subr.bf16.mxu0 %v17371_v51  ;;  %v22923_v1 = vpop.f32.mrb[1].mxu1  ;;  %v325_v51 = vld [vmem:[%s29047_s1 + $0x970] sm:$0xff] }
 0x19b   :  { %v22931_v4 = vpop.f32.mrb[0].mxu0  ;;  %v7202_v5 = vpop.f32.mrb[2].mxu1  ;;  %7339 = vmatpush1.bf16.msra.mxu1 %v17358_v58  ;;  %v17527_v58 = vcombine.high %v313_v50, %v325_v51  ;;  %v17526_v2 = vcombine.low %v313_v50, %v325_v51  ;;  %v469_v45 = vld [vmem:[%s29047_s1 + $0xdf0] sm:$0xff] }
 0x19c   :  { %v22933_v7 = vpop.f32.mrb[1].mxu0  ;;  %v7203_v8 = vpop.f32.mrb[3].mxu1  ;;  %7340 = vmatprep.subr.bf16.mxu1 %v17383_v60  ;;  %v337_v60 = vld [vmem:[%s29047_s1 + $0x9d0] sm:$0xff]  ;;  %v17671_v50 = vcombine.high %v457_v44, %v469_v45 }
 0x19d   :  { %8077 = vmatpush1.bf16.msra.mxu0 %v17370_v59  ;;  %v7694_v11 = vpop.f32.mrb[2].mxu0  ;;  %v17539_v59 = vcombine.high %v319_v52, %v331_v54  ;;  %v361_v8 = vld [vmem:[%s29047_s1 + $0xa90] sm:$0xff] }
 0x19e   :  { %8078 = vmatprep.subr.bf16.mxu0 %v17395_v62  ;;  %v7695_v17 = vpop.f32.mrb[3].mxu0  ;;  %v349_v62 = vld [vmem:[%s29047_s1 + $0xa30] sm:$0xff]  ;;  %v379_v11 = vld [vmem:[%s29047_s1 + $0xb20] sm:$0xff] }
 0x19f   :  { %7341 = vmatpush1.bf16.msra.mxu1 %v17382_v6  ;;  %v17551_v5 = vcombine.high %v337_v60, %v349_v62  ;;  %v17563_v6 = vcombine.high %v343_v63, %v355_v0  ;;  %v481_v52 = vld [vmem:[%s29047_s1 + $0xe50] sm:$0xff] }
 0x1a0   :  { %7342 = vmatprep.subr.bf16.mxu1 %v17407_v10  ;;  %v367_v10 = vld [vmem:[%s29047_s1 + $0xac0] sm:$0xff]  ;;  %v493_v54 = vld [vmem:[%s29047_s1 + $0xeb0] sm:$0xff] }
 0x1a1   :  { %8079 = vmatpush1.bf16.msra.mxu0 %v17394_v9  ;;  %v373_v9 = vld [vmem:[%s29047_s1 + $0xaf0] sm:$0xff]  ;;  %v17587_v17 = vcombine.high %v367_v10, %v379_v11 }
 0x1a2   :  { %8080 = vmatprep.subr.bf16.mxu0 %v17419_v13  ;;  %v17550_v13 = vcombine.low %v337_v60, %v349_v62  ;;  %v17575_v16 = vcombine.high %v361_v8, %v373_v9  ;;  %v17695_v60 = vcombine.high %v481_v52, %v493_v54  ;;  %v505_v63 = vld [vmem:[%s29047_s1 + $0xf10] sm:$0xff] }
 0x1a3   :  { %7343 = vmatpush1.bf16.msra.mxu1 %v17406_v19  ;;  %v391_v19 = vld [vmem:[%s29047_s1 + $0xb80] sm:$0xff]  ;;  %v517_v0 = vld [vmem:[%s29047_s1 + $0xf70] sm:$0xff] }
 0x1a4   :  { %7344 = vmatprep.subr.bf16.mxu1 %v17431_v23  ;;  %v17574_v23 = vcombine.low %v361_v8, %v373_v9  ;;  %v17719_v8 = vcombine.high %v505_v63, %v517_v0 }
 0x1a5   :  { %8081 = vmatpush1.bf16.msra.mxu0 %v17418_v20  ;;  %v403_v20 = vld [vmem:[%s29047_s1 + $0xbe0] sm:$0xff] }
 0x1a6   :  { %8082 = vmatprep.subr.bf16.mxu0 %v17443_v24  ;;  %v17586_v24 = vcombine.low %v367_v10, %v379_v11  ;;  %v17611_v27 = vcombine.high %v391_v19, %v403_v20  ;;  %v529_v10 = vld [vmem:[%s29047_s1 + $0xfd0] sm:$0xff] }
 0x1a7   :  { %7345 = vmatpush1.bf16.msra.mxu1 %v17430_v29  ;;  %v415_v29 = vld [vmem:[%s29047_s1 + $0xc40] sm:$0xff]  ;;  %v541_v11 = vld [vmem:[%s29047_s1 + $0x1030] sm:$0xff] }
 0x1a8   :  { %7346 = vmatprep.subr.bf16.mxu1 %v17455_v32  ;;  %v17598_v32 = vcombine.low %v385_v53, %v397_v18  ;;  %v17743_v53 = vcombine.high %v529_v10, %v541_v11 }
 0x1a9   :  { %8083 = vmatpush1.bf16.msra.mxu0 %v17442_v30  ;;  %v427_v30 = vld [vmem:[%s29047_s1 + $0xca0] sm:$0xff] }
 0x1aa   :  { %8084 = vmatprep.subr.bf16.mxu0 %v17467_v33  ;;  %v17610_v33 = vcombine.low %v391_v19, %v403_v20  ;;  %v17635_v35 = vcombine.high %v415_v29, %v427_v30  ;;  %v553_v19 = vld [vmem:[%s29047_s1 + $0x1090] sm:$0xff] }
 0x1ab   :  { %7347 = vmatpush1.bf16.msra.mxu1 %v17454_v39  ;;  %v439_v39 = vld [vmem:[%s29047_s1 + $0xd00] sm:$0xff]  ;;  %v565_v20 = vld [vmem:[%s29047_s1 + $0x10f0] sm:$0xff] }
 0x1ac   :  { %7348 = vmatprep.subr.bf16.mxu1 %v17479_v41  ;;  %v17622_v41 = vcombine.low %v409_v15, %v421_v28  ;;  %v17767_v15 = vcombine.high %v553_v19, %v565_v20 }
 0x1ad   :  { %8085 = vmatpush1.bf16.msra.mxu0 %v17466_v40  ;;  %v451_v40 = vld [vmem:[%s29047_s1 + $0xd60] sm:$0xff] }
 0x1ae   :  { %8086 = vmatprep.subr.bf16.mxu0 %v17491_v42  ;;  %v17634_v42 = vcombine.low %v415_v29, %v427_v30  ;;  %v17659_v43 = vcombine.high %v439_v39, %v451_v40  ;;  %v577_v29 = vld [vmem:[%s29047_s1 + $0x1150] sm:$0xff] }
 0x1af   :  { %7349 = vmatpush1.bf16.msra.mxu1 %v17478_v46  ;;  %v463_v46 = vld [vmem:[%s29047_s1 + $0xdc0] sm:$0xff]  ;;  %v589_v30 = vld [vmem:[%s29047_s1 + $0x11b0] sm:$0xff] }
 0x1b0   :  { %7350 = vmatprep.subr.bf16.mxu1 %v17503_v48  ;;  %v17646_v48 = vcombine.low %v433_v37, %v445_v38  ;;  %v17791_v37 = vcombine.high %v577_v29, %v589_v30 }
 0x1b1   :  { %8087 = vmatpush1.bf16.msra.mxu0 %v17490_v47  ;;  %v475_v47 = vld [vmem:[%s29047_s1 + $0xe20] sm:$0xff] }
 0x1b2   :  { %8088 = vmatprep.subr.bf16.mxu0 %v17515_v49  ;;  %v17658_v49 = vcombine.low %v439_v39, %v451_v40  ;;  %v17683_v51 = vcombine.high %v463_v46, %v475_v47  ;;  %v601_v39 = vld [vmem:[%s29047_s1 + $0x1210] sm:$0xff] }
 0x1b3   :  { %7351 = vmatpush1.bf16.msra.mxu1 %v17502_v55  ;;  %v487_v55 = vld [vmem:[%s29047_s1 + $0xe80] sm:$0xff]  ;;  %v613_v40 = vld [vmem:[%s29047_s1 + $0x1270] sm:$0xff] }
 0x1b4   :  { %7352 = vmatprep.subr.bf16.mxu1 %v17527_v58  ;;  %v17670_v58 = vcombine.low %v457_v44, %v469_v45  ;;  %v17815_v44 = vcombine.high %v601_v39, %v613_v40 }
 0x1b5   :  { %8089 = vmatpush1.bf16.msra.mxu0 %v17514_v56  ;;  %v499_v56 = vld [vmem:[%s29047_s1 + $0xee0] sm:$0xff] }
 0x1b6   :  { %8090 = vmatprep.subr.bf16.mxu0 %v17539_v59  ;;  %v17682_v59 = vcombine.low %v463_v46, %v475_v47  ;;  %v17707_v62 = vcombine.high %v487_v55, %v499_v56  ;;  %v625_v46 = vld [vmem:[%s29047_s1 + $0x12d0] sm:$0xff] }
 0x1b7   :  { %7353 = vmatpush1.bf16.msra.mxu1 %v17526_v2  ;;  %v511_v2 = vld [vmem:[%s29047_s1 + $0xf40] sm:$0xff]  ;;  %v637_v47 = vld [vmem:[%s29047_s1 + $0x1330] sm:$0xff] }
 0x1b8   :  { %7354 = vmatprep.subr.bf16.mxu1 %v17551_v5  ;;  %v17694_v5 = vcombine.low %v481_v52, %v493_v54  ;;  %v17839_v52 = vcombine.high %v625_v46, %v637_v47 }
 0x1b9   :  { %8091 = vmatpush1.bf16.msra.mxu0 %v17538_v3  ;;  %v523_v3 = vld [vmem:[%s29047_s1 + $0xfa0] sm:$0xff] }
 0x1ba   :  { %8092 = vmatprep.subr.bf16.mxu0 %v17563_v6  ;;  %v17706_v6 = vcombine.low %v487_v55, %v499_v56  ;;  %v17731_v9 = vcombine.high %v511_v2, %v523_v3  ;;  %v649_v55 = vld [vmem:[%s29047_s1 + $0x1390] sm:$0xff] }
 0x1bb   :  { %7355 = vmatpush1.bf16.msra.mxu1 %v17550_v13  ;;  %v535_v13 = vld [vmem:[%s29047_s1 + $0x1000] sm:$0xff]  ;;  %v661_v56 = vld [vmem:[%s29047_s1 + $0x13f0] sm:$0xff] }
 0x1bc   :  { %7356 = vmatprep.subr.bf16.mxu1 %v17575_v16  ;;  %v17718_v16 = vcombine.low %v505_v63, %v517_v0  ;;  %v17863_v63 = vcombine.high %v649_v55, %v661_v56 }
 0x1bd   :  { %8093 = vmatpush1.bf16.msra.mxu0 %v17562_v14  ;;  %v547_v14 = vld [vmem:[%s29047_s1 + $0x1060] sm:$0xff] }
 0x1be   :  { %8094 = vmatprep.subr.bf16.mxu0 %v17587_v17  ;;  %v17730_v17 = vcombine.low %v511_v2, %v523_v3  ;;  %v17755_v18 = vcombine.high %v535_v13, %v547_v14  ;;  %v673_v2 = vld [vmem:[%s29047_s1 + $0x1450] sm:$0xff] }
 0x1bf   :  { %7357 = vmatpush1.bf16.msra.mxu1 %v17574_v23  ;;  %v559_v23 = vld [vmem:[%s29047_s1 + $0x10c0] sm:$0xff]  ;;  %v685_v3 = vld [vmem:[%s29047_s1 + $0x14b0] sm:$0xff] }
 0x1c0   :  { %7358 = vmatprep.subr.bf16.mxu1 %v17599_v26  ;;  %v17742_v26 = vcombine.low %v529_v10, %v541_v11  ;;  %v17887_v10 = vcombine.high %v673_v2, %v685_v3 }
 0x1c1   :  { %8095 = vmatpush1.bf16.msra.mxu0 %v17586_v24  ;;  %v571_v24 = vld [vmem:[%s29047_s1 + $0x1120] sm:$0xff] }
 0x1c2   :  { %8096 = vmatprep.subr.bf16.mxu0 %v17611_v27  ;;  %v17754_v27 = vcombine.low %v535_v13, %v547_v14  ;;  %v17779_v28 = vcombine.high %v559_v23, %v571_v24  ;;  %v697_v13 = vld [vmem:[%s29047_s1 + $0x1510] sm:$0xff] }
 0x1c3   :  { %7359 = vmatpush1.bf16.msra.mxu1 %v17598_v32  ;;  %v583_v32 = vld [vmem:[%s29047_s1 + $0x1180] sm:$0xff]  ;;  %v709_v14 = vld [vmem:[%s29047_s1 + $0x1570] sm:$0xff] }
 0x1c4   :  { %7369 = vmatprep.subr.bf16.mxu1 %v17623_v34  ;;  %v17766_v34 = vcombine.low %v553_v19, %v565_v20  ;;  %v17911_v19 = vcombine.high %v697_v13, %v709_v14 }
 0x1c5   :  { %8097 = vmatpush1.bf16.msra.mxu0 %v17610_v33  ;;  %v595_v33 = vld [vmem:[%s29047_s1 + $0x11e0] sm:$0xff] }
 0x1c6   :  { %8107 = vmatprep.subr.bf16.mxu0 %v17635_v35  ;;  %7361 = vmatmul.mubr.bf16.vlgmr.msra.gmra.mrb[8].mxu1 %v21837_v12  ;;  %v17778_v35 = vcombine.low %v559_v23, %v571_v24  ;;  %v17803_v38 = vcombine.high %v583_v32, %v595_v33  ;;  %v721_v23 = vld [vmem:[%s29047_s1 + $0x15d0] sm:$0xff] }
 0x1c7   :  { %7370 = vmatpush1.bf16.msra.mxu1 %v17622_v41  ;;  %7401 = vmatprep.mubr.bf16.mxu1 %v21858_v21  ;;  %v607_v41 = vld [vmem:[%s29047_s1 + $0x1240] sm:$0xff]  ;;  %v733_v24 = vld [vmem:[%s29047_s1 + $0x1630] sm:$0xff] }
 0x1c8   :  { %8099 = vmatmul.mubr.bf16.vlgmr.msra.gmra.mrb[8].mxu0 %v21837_v12  ;;  %7371 = vmatprep.subr.bf16.mxu1 %v17647_v25  ;;  %v17790_v25 = vcombine.low %v577_v29, %v589_v30  ;;  %v17935_v29 = vcombine.high %v721_v23, %v733_v24 }
 0x1c9   :  { %8108 = vmatpush1.bf16.msra.mxu0 %v17634_v42  ;;  %8139 = vmatprep.mubr.bf16.mxu0 %v21858_v21  ;;  %v619_v42 = vld [vmem:[%s29047_s1 + $0x12a0] sm:$0xff] }
 0x1ca   :  { %8109 = vmatprep.subr.bf16.mxu0 %v17659_v43  ;;  %v17802_v43 = vcombine.low %v583_v32, %v595_v33  ;;  %v17827_v45 = vcombine.high %v607_v41, %v619_v42  ;;  %v745_v32 = vld [vmem:[%s29047_s1 + $0x1690] sm:$0xff] }
 0x1cb   :  { %7372 = vmatpush1.bf16.msra.mxu1 %v17646_v48  ;;  %v631_v48 = vld [vmem:[%s29047_s1 + $0x1300] sm:$0xff]  ;;  %v757_v33 = vld [vmem:[%s29047_s1 + $0x16f0] sm:$0xff] }
 0x1cc   :  { %7373 = vmatprep.subr.bf16.mxu1 %v17671_v50  ;;  %v17814_v50 = vcombine.low %v601_v39, %v613_v40  ;;  %v17959_v39 = vcombine.high %v745_v32, %v757_v33 }
 0x1cd   :  { %8110 = vmatpush1.bf16.msra.mxu0 %v17658_v49  ;;  %v643_v49 = vld [vmem:[%s29047_s1 + $0x1360] sm:$0xff] }
 0x1ce   :  { %8111 = vmatprep.subr.bf16.mxu0 %v17683_v51  ;;  %v17826_v51 = vcombine.low %v607_v41, %v619_v42  ;;  %v17851_v54 = vcombine.high %v631_v48, %v643_v49  ;;  %v769_v41 = vld [vmem:[%s29047_s1 + $0x1750] sm:$0xff] }
 0x1cf   :  { %7374 = vmatpush1.bf16.msra.mxu1 %v17670_v58  ;;  %v655_v58 = vld [vmem:[%s29047_s1 + $0x13c0] sm:$0xff]  ;;  %v781_v42 = vld [vmem:[%s29047_s1 + $0x17b0] sm:$0xff] }
 0x1d0   :  { %7375 = vmatprep.subr.bf16.mxu1 %v17695_v60  ;;  %v17838_v60 = vcombine.low %v625_v46, %v637_v47  ;;  %v17983_v46 = vcombine.high %v769_v41, %v781_v42 }
 0x1d1   :  { %8112 = vmatpush1.bf16.msra.mxu0 %v17682_v59  ;;  %v667_v59 = vld [vmem:[%s29047_s1 + $0x1420] sm:$0xff] }
 0x1d2   :  { %8113 = vmatprep.subr.bf16.mxu0 %v17707_v62  ;;  %v17850_v62 = vcombine.low %v631_v48, %v643_v49  ;;  %v17875_v0 = vcombine.high %v655_v58, %v667_v59  ;;  %v793_v48 = vld [vmem:[%s29047_s1 + $0x1810] sm:$0xff] }
 0x1d3   :  { %7376 = vmatpush1.bf16.msra.mxu1 %v17694_v5  ;;  %v679_v5 = vld [vmem:[%s29047_s1 + $0x1480] sm:$0xff]  ;;  %v805_v49 = vld [vmem:[%s29047_s1 + $0x1870] sm:$0xff] }
 0x1d4   :  { %7377 = vmatprep.subr.bf16.mxu1 %v17719_v8  ;;  %v17862_v8 = vcombine.low %v649_v55, %v661_v56  ;;  %v18007_v55 = vcombine.high %v793_v48, %v805_v49 }
 0x1d5   :  { %8114 = vmatpush1.bf16.msra.mxu0 %v17706_v6  ;;  %v691_v6 = vld [vmem:[%s29047_s1 + $0x14e0] sm:$0xff] }
 0x1d6   :  { %8115 = vmatprep.subr.bf16.mxu0 %v17731_v9  ;;  %v17874_v9 = vcombine.low %v655_v58, %v667_v59  ;;  %v17899_v11 = vcombine.high %v679_v5, %v691_v6  ;;  %v817_v58 = vld [vmem:[%s29047_s1 + $0x18d0] sm:$0xff] }
 0x1d7   :  { %7378 = vmatpush1.bf16.msra.mxu1 %v17718_v16  ;;  %v703_v16 = vld [vmem:[%s29047_s1 + $0x1540] sm:$0xff]  ;;  %v829_v59 = vld [vmem:[%s29047_s1 + $0x1930] sm:$0xff] }
 0x1d8   :  { %7379 = vmatprep.subr.bf16.mxu1 %v17743_v53  ;;  %v17886_v53 = vcombine.low %v673_v2, %v685_v3  ;;  %v18031_v2 = vcombine.high %v817_v58, %v829_v59 }
 0x1d9   :  { %8116 = vmatpush1.bf16.msra.mxu0 %v17730_v17  ;;  %v715_v17 = vld [vmem:[%s29047_s1 + $0x15a0] sm:$0xff] }
 0x1da   :  { %8117 = vmatprep.subr.bf16.mxu0 %v17755_v18  ;;  %v17898_v18 = vcombine.low %v679_v5, %v691_v6  ;;  %v17923_v20 = vcombine.high %v703_v16, %v715_v17  ;;  %v841_v5 = vld [vmem:[%s29047_s1 + $0x1990] sm:$0xff] }
 0x1db   :  { %7380 = vmatpush1.bf16.msra.mxu1 %v17742_v26  ;;  %v727_v26 = vld [vmem:[%s29047_s1 + $0x1600] sm:$0xff]  ;;  %v853_v6 = vld [vmem:[%s29047_s1 + $0x19f0] sm:$0xff] }
 0x1dc   :  { %7381 = vmatprep.subr.bf16.mxu1 %v17767_v15  ;;  %v17910_v15 = vcombine.low %v697_v13, %v709_v14  ;;  %v18055_v13 = vcombine.high %v841_v5, %v853_v6 }
 0x1dd   :  { %8118 = vmatpush1.bf16.msra.mxu0 %v17754_v27  ;;  %v739_v27 = vld [vmem:[%s29047_s1 + $0x1660] sm:$0xff] }
 0x1de   :  { %8119 = vmatprep.subr.bf16.mxu0 %v17779_v28  ;;  %v17922_v28 = vcombine.low %v703_v16, %v715_v17  ;;  %v17947_v30 = vcombine.high %v727_v26, %v739_v27  ;;  %v865_v16 = vld [vmem:[%s29047_s1 + $0x1a50] sm:$0xff] }
 0x1df   :  { %7382 = vmatpush1.bf16.msra.mxu1 %v17766_v34  ;;  %v751_v34 = vld [vmem:[%s29047_s1 + $0x16c0] sm:$0xff]  ;;  %v877_v17 = vld [vmem:[%s29047_s1 + $0x1ab0] sm:$0xff] }
 0x1e0   :  { %7383 = vmatprep.subr.bf16.mxu1 %v17791_v37  ;;  %v17934_v37 = vcombine.low %v721_v23, %v733_v24  ;;  %v18079_v23 = vcombine.high %v865_v16, %v877_v17 }
 0x1e1   :  { %8120 = vmatpush1.bf16.msra.mxu0 %v17778_v35  ;;  %v763_v35 = vld [vmem:[%s29047_s1 + $0x1720] sm:$0xff] }
 0x1e2   :  { %8121 = vmatprep.subr.bf16.mxu0 %v17803_v38  ;;  %v17946_v38 = vcombine.low %v727_v26, %v739_v27  ;;  %v17971_v40 = vcombine.high %v751_v34, %v763_v35  ;;  %v889_v26 = vld [vmem:[%s29047_s1 + $0x1b10] sm:$0xff] }
 0x1e3   :  { %7384 = vmatpush1.bf16.msra.mxu1 %v17790_v25  ;;  %v775_v25 = vld [vmem:[%s29047_s1 + $0x1780] sm:$0xff]  ;;  %v901_v27 = vld [vmem:[%s29047_s1 + $0x1b70] sm:$0xff] }
 0x1e4   :  { %7385 = vmatprep.subr.bf16.mxu1 %v17815_v44  ;;  %v17958_v44 = vcombine.low %v745_v32, %v757_v33  ;;  %v18103_v32 = vcombine.high %v889_v26, %v901_v27 }
 0x1e5   :  { %8122 = vmatpush1.bf16.msra.mxu0 %v17802_v43  ;;  %v787_v43 = vld [vmem:[%s29047_s1 + $0x17e0] sm:$0xff] }
 0x1e6   :  { %8123 = vmatprep.subr.bf16.mxu0 %v17827_v45  ;;  %v17970_v45 = vcombine.low %v751_v34, %v763_v35  ;;  %v17995_v47 = vcombine.high %v775_v25, %v787_v43  ;;  %v913_v34 = vld [vmem:[%s29047_s1 + $0x1bd0] sm:$0xff] }
 0x1e7   :  { %7386 = vmatpush1.bf16.msra.mxu1 %v17814_v50  ;;  %v799_v50 = vld [vmem:[%s29047_s1 + $0x1840] sm:$0xff]  ;;  %v925_v35 = vld [vmem:[%s29047_s1 + $0x1c30] sm:$0xff] }
 0x1e8   :  { %7387 = vmatprep.subr.bf16.mxu1 %v17839_v52  ;;  %v17982_v52 = vcombine.low %v769_v41, %v781_v42  ;;  %v18127_v41 = vcombine.high %v913_v34, %v925_v35 }
 0x1e9   :  { %8124 = vmatpush1.bf16.msra.mxu0 %v17826_v51  ;;  %v811_v51 = vld [vmem:[%s29047_s1 + $0x18a0] sm:$0xff] }
 0x1ea   :  { %8125 = vmatprep.subr.bf16.mxu0 %v17851_v54  ;;  %v17994_v54 = vcombine.low %v775_v25, %v787_v43  ;;  %v18019_v56 = vcombine.high %v799_v50, %v811_v51  ;;  %v937_v25 = vld [vmem:[%s29047_s1 + $0x1c90] sm:$0xff] }
 0x1eb   :  { %7388 = vmatpush1.bf16.msra.mxu1 %v17838_v60  ;;  %v823_v60 = vld [vmem:[%s29047_s1 + $0x1900] sm:$0xff]  ;;  %v949_v43 = vld [vmem:[%s29047_s1 + $0x1cf0] sm:$0xff] }
 0x1ec   :  { %7389 = vmatprep.subr.bf16.mxu1 %v17863_v63  ;;  %v18006_v63 = vcombine.low %v793_v48, %v805_v49  ;;  %v18151_v48 = vcombine.high %v937_v25, %v949_v43 }
 0x1ed   :  { %8126 = vmatpush1.bf16.msra.mxu0 %v17850_v62  ;;  %v835_v62 = vld [vmem:[%s29047_s1 + $0x1960] sm:$0xff] }
 0x1ee   :  { %8127 = vmatprep.subr.bf16.mxu0 %v17875_v0  ;;  %v18018_v0 = vcombine.low %v799_v50, %v811_v51  ;;  %v18043_v3 = vcombine.high %v823_v60, %v835_v62  ;;  %v961_v50 = vld [vmem:[%s29047_s1 + $0x1d50] sm:$0xff] }
 0x1ef   :  { %7390 = vmatpush1.bf16.msra.mxu1 %v17862_v8  ;;  %v847_v8 = vld [vmem:[%s29047_s1 + $0x19c0] sm:$0xff]  ;;  %v973_v51 = vld [vmem:[%s29047_s1 + $0x1db0] sm:$0xff] }
 0x1f0   :  { %7391 = vmatprep.subr.bf16.mxu1 %v17887_v10  ;;  %v18030_v10 = vcombine.low %v817_v58, %v829_v59  ;;  %v18175_v58 = vcombine.high %v961_v50, %v973_v51 }
 0x1f1   :  { %8128 = vmatpush1.bf16.msra.mxu0 %v17874_v9  ;;  %v859_v9 = vld [vmem:[%s29047_s1 + $0x1a20] sm:$0xff] }
 0x1f2   :  { %8129 = vmatprep.subr.bf16.mxu0 %v17899_v11  ;;  %v18042_v11 = vcombine.low %v823_v60, %v835_v62  ;;  %v18067_v14 = vcombine.high %v847_v8, %v859_v9  ;;  %v985_v60 = vld [vmem:[%s29047_s1 + $0x1e10] sm:$0xff] }
 0x1f3   :  { %7392 = vmatpush1.bf16.msra.mxu1 %v17886_v53  ;;  %v871_v53 = vld [vmem:[%s29047_s1 + $0x1a80] sm:$0xff]  ;;  %v997_v62 = vld [vmem:[%s29047_s1 + $0x1e70] sm:$0xff] }
 0x1f4   :  { %7393 = vmatprep.subr.bf16.mxu1 %v17911_v19  ;;  %v18054_v19 = vcombine.low %v841_v5, %v853_v6  ;;  %v18199_v5 = vcombine.high %v985_v60, %v997_v62 }
 0x1f5   :  { %8130 = vmatpush1.bf16.msra.mxu0 %v17898_v18  ;;  %v883_v18 = vld [vmem:[%s29047_s1 + $0x1ae0] sm:$0xff] }
 0x1f6   :  { %8131 = vmatprep.subr.bf16.mxu0 %v17923_v20  ;;  %v18066_v20 = vcombine.low %v847_v8, %v859_v9  ;;  %v18091_v24 = vcombine.high %v871_v53, %v883_v18  ;;  %v1009_v8 = vld [vmem:[%s29047_s1 + $0x1ed0] sm:$0xff] }
 0x1f7   :  { %7394 = vmatpush1.bf16.msra.mxu1 %v17910_v15  ;;  %v895_v15 = vld [vmem:[%s29047_s1 + $0x1b40] sm:$0xff]  ;;  %v1021_v9 = vld [vmem:[%s29047_s1 + $0x1f30] sm:$0xff] }
 0x1f8   :  { %7395 = vmatprep.subr.bf16.mxu1 %v17935_v29  ;;  %v18078_v29 = vcombine.low %v865_v16, %v877_v17  ;;  %v18223_v16 = vcombine.high %v1009_v8, %v1021_v9 }
 0x1f9   :  { %8132 = vmatpush1.bf16.msra.mxu0 %v17922_v28  ;;  %v907_v28 = vld [vmem:[%s29047_s1 + $0x1ba0] sm:$0xff] }
 0x1fa   :  { %8133 = vmatprep.subr.bf16.mxu0 %v17947_v30  ;;  %v18090_v30 = vcombine.low %v871_v53, %v883_v18  ;;  %v18115_v33 = vcombine.high %v895_v15, %v907_v28  ;;  %v1033_v53 = vld [vmem:[%s29047_s1 + $0x1f90] sm:$0xff] }
 0x1fb   :  { %7396 = vmatpush1.bf16.msra.mxu1 %v17934_v37  ;;  %v919_v37 = vld [vmem:[%s29047_s1 + $0x1c00] sm:$0xff]  ;;  %v1045_v18 = vld [vmem:[%s29047_s1 + $0x1ff0] sm:$0xff] }
 0x1fc   :  { %7397 = vmatprep.subr.bf16.mxu1 %v17959_v39  ;;  %v18102_v39 = vcombine.low %v889_v26, %v901_v27  ;;  %v18247_v26 = vcombine.high %v1033_v53, %v1045_v18 }
 0x1fd   :  { %8134 = vmatpush1.bf16.msra.mxu0 %v17946_v38  ;;  %v931_v38 = vld [vmem:[%s29047_s1 + $0x1c60] sm:$0xff] }
 0x1fe   :  { %8135 = vmatprep.subr.bf16.mxu0 %v17971_v40  ;;  %v18114_v40 = vcombine.low %v895_v15, %v907_v28  ;;  %v18139_v42 = vcombine.high %v919_v37, %v931_v38  ;;  %v1057_v15 = vld [vmem:[%s29047_s1 + $0x2050] sm:$0xff] }
 0x1ff   :  { %7398 = vmatpush1.bf16.msra.mxu1 %v17958_v44  ;;  %v943_v44 = vld [vmem:[%s29047_s1 + $0x1cc0] sm:$0xff]  ;;  %v1069_v28 = vld [vmem:[%s29047_s1 + $0x20b0] sm:$0xff] }
 0x200   :  { %7399 = vmatprep.subr.bf16.mxu1 %v17983_v46  ;;  %v18126_v46 = vcombine.low %v913_v34, %v925_v35  ;;  %v18271_v34 = vcombine.high %v1057_v15, %v1069_v28 }
 0x201   :  { %8136 = vmatpush1.bf16.msra.mxu0 %v17970_v45  ;;  %v955_v45 = vld [vmem:[%s29047_s1 + $0x1d20] sm:$0xff] }
 0x202   :  { %8137 = vmatprep.subr.bf16.mxu0 %v17995_v47  ;;  %v18138_v47 = vcombine.low %v919_v37, %v931_v38  ;;  %v18163_v49 = vcombine.high %v943_v44, %v955_v45  ;;  %v1081_v37 = vld [vmem:[%s29047_s1 + $0x2110] sm:$0xff] }
 0x203   :  { %7400 = vmatpush1.bf16.msra.mxu1 %v17982_v52  ;;  %v967_v52 = vld [vmem:[%s29047_s1 + $0x1d80] sm:$0xff]  ;;  %v1093_v38 = vld [vmem:[%s29047_s1 + $0x2170] sm:$0xff] }
 0x204   :  { %7410 = vmatprep.subr.bf16.mxu1 %v18007_v55  ;;  %v18150_v55 = vcombine.low %v937_v25, %v949_v43  ;;  %v18295_v25 = vcombine.high %v1081_v37, %v1093_v38 }
 0x205   :  { %8138 = vmatpush1.bf16.msra.mxu0 %v17994_v54  ;;  %v979_v54 = vld [vmem:[%s29047_s1 + $0x1de0] sm:$0xff] }
 0x206   :  { %8148 = vmatprep.subr.bf16.mxu0 %v18019_v56  ;;  %7402 = vmatmul.mubr.bf16.vlgmr.msra.gmra.mrb[8].mxu1 %v22046_v22  ;;  %v18162_v56 = vcombine.low %v943_v44, %v955_v45  ;;  %v18187_v59 = vcombine.high %v967_v52, %v979_v54  ;;  %v1105_v44 = vld [vmem:[%s29047_s1 + $0x21d0] sm:$0xff] }
 0x207   :  { %7411 = vmatpush1.bf16.msra.mxu1 %v18006_v63  ;;  %7442 = vmatprep.mubr.bf16.mxu1 %v22067_v31  ;;  %v991_v63 = vld [vmem:[%s29047_s1 + $0x1e40] sm:$0xff]  ;;  %v1117_v45 = vld [vmem:[%s29047_s1 + $0x2230] sm:$0xff] }
 0x208   :  { %8140 = vmatmul.mubr.bf16.vlgmr.msra.gmra.mrb[8].mxu0 %v22046_v22  ;;  %7412 = vmatprep.subr.bf16.mxu1 %v18031_v2  ;;  %v18174_v2 = vcombine.low %v961_v50, %v973_v51  ;;  %v18319_v50 = vcombine.high %v1105_v44, %v1117_v45 }
 0x209   :  { %8149 = vmatpush1.bf16.msra.mxu0 %v18018_v0  ;;  %8180 = vmatprep.mubr.bf16.mxu0 %v22067_v31  ;;  %v1003_v0 = vld [vmem:[%s29047_s1 + $0x1ea0] sm:$0xff] }
 0x20a   :  { %8150 = vmatprep.subr.bf16.mxu0 %v18043_v3  ;;  %v18186_v3 = vcombine.low %v967_v52, %v979_v54  ;;  %v18211_v6 = vcombine.high %v991_v63, %v1003_v0  ;;  %v1129_v52 = vld [vmem:[%s29047_s1 + $0x2290] sm:$0xff] }
 0x20b   :  { %7413 = vmatpush1.bf16.msra.mxu1 %v18030_v10  ;;  %v1015_v10 = vld [vmem:[%s29047_s1 + $0x1f00] sm:$0xff]  ;;  %v1141_v54 = vld [vmem:[%s29047_s1 + $0x22f0] sm:$0xff] }
 0x20c   :  { %7414 = vmatprep.subr.bf16.mxu1 %v18055_v13  ;;  %v18198_v13 = vcombine.low %v985_v60, %v997_v62  ;;  %v18343_v60 = vcombine.high %v1129_v52, %v1141_v54 }
 0x20d   :  { %8151 = vmatpush1.bf16.msra.mxu0 %v18042_v11  ;;  %v1027_v11 = vld [vmem:[%s29047_s1 + $0x1f60] sm:$0xff] }
 0x20e   :  { %8152 = vmatprep.subr.bf16.mxu0 %v18067_v14  ;;  %v18210_v14 = vcombine.low %v991_v63, %v1003_v0  ;;  %v18235_v17 = vcombine.high %v1015_v10, %v1027_v11  ;;  %v1153_v63 = vld [vmem:[%s29047_s1 + $0x2350] sm:$0xff] }
 0x20f   :  { %7415 = vmatpush1.bf16.msra.mxu1 %v18054_v19  ;;  %v1039_v19 = vld [vmem:[%s29047_s1 + $0x1fc0] sm:$0xff]  ;;  %v1165_v0 = vld [vmem:[%s29047_s1 + $0x23b0] sm:$0xff] }
 0x210   :  { %7416 = vmatprep.subr.bf16.mxu1 %v18079_v23  ;;  %v18222_v23 = vcombine.low %v1009_v8, %v1021_v9  ;;  %v18367_v8 = vcombine.high %v1153_v63, %v1165_v0 }
 0x211   :  { %8153 = vmatpush1.bf16.msra.mxu0 %v18066_v20  ;;  %v1051_v20 = vld [vmem:[%s29047_s1 + $0x2020] sm:$0xff] }
 0x212   :  { %8154 = vmatprep.subr.bf16.mxu0 %v18091_v24  ;;  %v18234_v24 = vcombine.low %v1015_v10, %v1027_v11  ;;  %v18259_v27 = vcombine.high %v1039_v19, %v1051_v20  ;;  %v26_v10 = vld [vmem:[%s29047_s1 + $0x18] sm:$0xff] }
 0x213   :  { %7417 = vmatpush1.bf16.msra.mxu1 %v18078_v29  ;;  %v1063_v29 = vld [vmem:[%s29047_s1 + $0x2080] sm:$0xff]  ;;  %v38_v11 = vld [vmem:[%s29047_s1 + $0x78] sm:$0xff] }
 0x214   :  { %7418 = vmatprep.subr.bf16.mxu1 %v18103_v32  ;;  %v18246_v32 = vcombine.low %v1033_v53, %v1045_v18  ;;  %v17241_v53 = vcombine.high %v26_v10, %v38_v11 }
 0x215   :  { %8155 = vmatpush1.bf16.msra.mxu0 %v18090_v30  ;;  %v1075_v30 = vld [vmem:[%s29047_s1 + $0x20e0] sm:$0xff] }
 0x216   :  { %8156 = vmatprep.subr.bf16.mxu0 %v18115_v33  ;;  %v18258_v33 = vcombine.low %v1039_v19, %v1051_v20  ;;  %v18283_v35 = vcombine.high %v1063_v29, %v1075_v30  ;;  %v50_v19 = vld [vmem:[%s29047_s1 + $0xd8] sm:$0xff] }
 0x217   :  { %7419 = vmatpush1.bf16.msra.mxu1 %v18102_v39  ;;  %v1087_v39 = vld [vmem:[%s29047_s1 + $0x2140] sm:$0xff]  ;;  %v62_v20 = vld [vmem:[%s29047_s1 + $0x138] sm:$0xff] }
 0x218   :  { %7420 = vmatprep.subr.bf16.mxu1 %v18127_v41  ;;  %v18270_v41 = vcombine.low %v1057_v15, %v1069_v28  ;;  %v17265_v15 = vcombine.high %v50_v19, %v62_v20 }
 0x219   :  { %8157 = vmatpush1.bf16.msra.mxu0 %v18114_v40  ;;  %v1099_v40 = vld [vmem:[%s29047_s1 + $0x21a0] sm:$0xff] }
 0x21a   :  { %8158 = vmatprep.subr.bf16.mxu0 %v18139_v42  ;;  %v18282_v42 = vcombine.low %v1063_v29, %v1075_v30  ;;  %v18307_v43 = vcombine.high %v1087_v39, %v1099_v40  ;;  %v74_v29 = vld [vmem:[%s29047_s1 + $0x198] sm:$0xff] }
 0x21b   :  { %7421 = vmatpush1.bf16.msra.mxu1 %v18126_v46  ;;  %v1111_v46 = vld [vmem:[%s29047_s1 + $0x2200] sm:$0xff]  ;;  %v86_v30 = vld [vmem:[%s29047_s1 + $0x1f8] sm:$0xff] }
 0x21c   :  { %7422 = vmatprep.subr.bf16.mxu1 %v18151_v48  ;;  %v18294_v48 = vcombine.low %v1081_v37, %v1093_v38  ;;  %v17289_v37 = vcombine.high %v74_v29, %v86_v30 }
 0x21d   :  { %8159 = vmatpush1.bf16.msra.mxu0 %v18138_v47  ;;  %v1123_v47 = vld [vmem:[%s29047_s1 + $0x2260] sm:$0xff] }
 0x21e   :  { %8160 = vmatprep.subr.bf16.mxu0 %v18163_v49  ;;  %v18306_v49 = vcombine.low %v1087_v39, %v1099_v40  ;;  %v18331_v51 = vcombine.high %v1111_v46, %v1123_v47  ;;  %v98_v39 = vld [vmem:[%s29047_s1 + $0x258] sm:$0xff] }
 0x21f   :  { %7423 = vmatpush1.bf16.msra.mxu1 %v18150_v55  ;;  %v1135_v55 = vld [vmem:[%s29047_s1 + $0x22c0] sm:$0xff]  ;;  %v110_v40 = vld [vmem:[%s29047_s1 + $0x2b8] sm:$0xff] }
 0x220   :  { %7424 = vmatprep.subr.bf16.mxu1 %v18175_v58  ;;  %v18318_v58 = vcombine.low %v1105_v44, %v1117_v45  ;;  %v17313_v44 = vcombine.high %v98_v39, %v110_v40 }
 0x221   :  { %8161 = vmatpush1.bf16.msra.mxu0 %v18162_v56  ;;  %v1147_v56 = vld [vmem:[%s29047_s1 + $0x2320] sm:$0xff] }
 0x222   :  { %8162 = vmatprep.subr.bf16.mxu0 %v18187_v59  ;;  %v18330_v59 = vcombine.low %v1111_v46, %v1123_v47  ;;  %v18355_v62 = vcombine.high %v1135_v55, %v1147_v56  ;;  %v122_v46 = vld [vmem:[%s29047_s1 + $0x318] sm:$0xff] }
 0x223   :  { %7425 = vmatpush1.bf16.msra.mxu1 %v18174_v2  ;;  %v1159_v2 = vld [vmem:[%s29047_s1 + $0x2380] sm:$0xff]  ;;  %v134_v47 = vld [vmem:[%s29047_s1 + $0x378] sm:$0xff] }
 0x224   :  { %7426 = vmatprep.subr.bf16.mxu1 %v18199_v5  ;;  %v18342_v5 = vcombine.low %v1129_v52, %v1141_v54  ;;  %v17337_v52 = vcombine.high %v122_v46, %v134_v47 }
 0x225   :  { %8163 = vmatpush1.bf16.msra.mxu0 %v18186_v3  ;;  %v1171_v3 = vld [vmem:[%s29047_s1 + $0x23e0] sm:$0xff] }
 0x226   :  { %8164 = vmatprep.subr.bf16.mxu0 %v18211_v6  ;;  %v18354_v6 = vcombine.low %v1135_v55, %v1147_v56  ;;  %v18379_v9 = vcombine.high %v1159_v2, %v1171_v3  ;;  %v146_v55 = vld [vmem:[%s29047_s1 + $0x3d8] sm:$0xff] }
 0x227   :  { %7427 = vmatpush1.bf16.msra.mxu1 %v18198_v13  ;;  %v33_v13 = vld [vmem:[%s29047_s1 + $0x50] sm:$0xff]  ;;  %v158_v56 = vld [vmem:[%s29047_s1 + $0x438] sm:$0xff] }
 0x228   :  { %7428 = vmatprep.subr.bf16.mxu1 %v18223_v16  ;;  %v18366_v16 = vcombine.low %v1153_v63, %v1165_v0  ;;  %v17361_v63 = vcombine.high %v146_v55, %v158_v56 }
 0x229   :  { %8165 = vmatpush1.bf16.msra.mxu0 %v18210_v14  ;;  %v45_v14 = vld [vmem:[%s29047_s1 + $0xb0] sm:$0xff] }
 0x22a   :  { %8166 = vmatprep.subr.bf16.mxu0 %v18235_v17  ;;  %v18378_v17 = vcombine.low %v1159_v2, %v1171_v3  ;;  %v17255_v18 = vcombine.high %v33_v13, %v45_v14  ;;  %v170_v2 = vld [vmem:[%s29047_s1 + $0x498] sm:$0xff] }
 0x22b   :  { %7429 = vmatpush1.bf16.msra.mxu1 %v18222_v23  ;;  %v57_v23 = vld [vmem:[%s29047_s1 + $0x110] sm:$0xff]  ;;  %v182_v3 = vld [vmem:[%s29047_s1 + $0x4f8] sm:$0xff] }
 0x22c   :  { %7430 = vmatprep.subr.bf16.mxu1 %v18247_v26  ;;  %v17240_v26 = vcombine.low %v26_v10, %v38_v11  ;;  %v17385_v10 = vcombine.high %v170_v2, %v182_v3 }
 0x22d   :  { %8167 = vmatpush1.bf16.msra.mxu0 %v18234_v24  ;;  %v69_v24 = vld [vmem:[%s29047_s1 + $0x170] sm:$0xff] }
 0x22e   :  { %8168 = vmatprep.subr.bf16.mxu0 %v18259_v27  ;;  %v17254_v27 = vcombine.low %v33_v13, %v45_v14  ;;  %v17279_v28 = vcombine.high %v57_v23, %v69_v24  ;;  %v194_v14 = vld [vmem:[%s29047_s1 + $0x558] sm:$0xff] }
 0x22f   :  { %7431 = vmatpush1.bf16.msra.mxu1 %v18246_v32  ;;  %v81_v32 = vld [vmem:[%s29047_s1 + $0x1d0] sm:$0xff] }
 0x230   :  { %7432 = vmatprep.subr.bf16.mxu1 %v18271_v34  ;;  %v17264_v34 = vcombine.low %v50_v19, %v62_v20 }
 0x231   :  { %8169 = vmatpush1.bf16.msra.mxu0 %v18258_v33  ;;  %v93_v33 = vld [vmem:[%s29047_s1 + $0x230] sm:$0xff] }
 0x232   :  { %8170 = vmatprep.subr.bf16.mxu0 %v18283_v35  ;;  %v17278_v35 = vcombine.low %v57_v23, %v69_v24  ;;  %v17303_v38 = vcombine.high %v81_v32, %v93_v33  ;;  %v17384_v23 = vcombine.low %v170_v2, %v182_v3 }
 0x233   :  { %7433 = vmatpush1.bf16.msra.mxu1 %v18270_v41  ;;  %v105_v41 = vld [vmem:[%s29047_s1 + $0x290] sm:$0xff] }
 0x234   :  { %7434 = vmatprep.subr.bf16.mxu1 %v18295_v25  ;;  %v17288_v25 = vcombine.low %v74_v29, %v86_v30  ;;  %v218_v30 = vld [vmem:[%s29047_s1 + $0x618] sm:$0xff] }
 0x235   :  { %8171 = vmatpush1.bf16.msra.mxu0 %v18282_v42  ;;  %v117_v42 = vld [vmem:[%s29047_s1 + $0x2f0] sm:$0xff] }
 0x236   :  { %8172 = vmatprep.subr.bf16.mxu0 %v18307_v43  ;;  %v17302_v43 = vcombine.low %v81_v32, %v93_v33  ;;  %v17327_v45 = vcombine.high %v105_v41, %v117_v42  ;;  %v230_v32 = vld [vmem:[%s29047_s1 + $0x678] sm:$0xff] }
 0x237   :  { %7435 = vmatpush1.bf16.msra.mxu1 %v18294_v48  ;;  %v129_v48 = vld [vmem:[%s29047_s1 + $0x350] sm:$0xff] }
 0x238   :  { %7436 = vmatprep.subr.bf16.mxu1 %v18319_v50  ;;  %v17312_v50 = vcombine.low %v98_v39, %v110_v40  ;;  %v17433_v39 = vcombine.high %v218_v30, %v230_v32 }
 0x239   :  { %8173 = vmatpush1.bf16.msra.mxu0 %v18306_v49  ;;  %v141_v49 = vld [vmem:[%s29047_s1 + $0x3b0] sm:$0xff] }
 0x23a   :  { %8174 = vmatprep.subr.bf16.mxu0 %v18331_v51  ;;  %v17326_v51 = vcombine.low %v105_v41, %v117_v42  ;;  %v17351_v54 = vcombine.high %v129_v48, %v141_v49  ;;  %v242_v41 = vld [vmem:[%s29047_s1 + $0x6d8] sm:$0xff] }
 0x23b   :  { %7437 = vmatpush1.bf16.msra.mxu1 %v18318_v58  ;;  %v153_v58 = vld [vmem:[%s29047_s1 + $0x410] sm:$0xff]  ;;  %v254_v42 = vld [vmem:[%s29047_s1 + $0x738] sm:$0xff] }
 0x23c   :  { %7438 = vmatprep.subr.bf16.mxu1 %v18343_v60  ;;  %v17336_v60 = vcombine.low %v122_v46, %v134_v47  ;;  %v17457_v46 = vcombine.high %v242_v41, %v254_v42 }
 0x23d   :  { %8175 = vmatpush1.bf16.msra.mxu0 %v18330_v59  ;;  %v165_v59 = vld [vmem:[%s29047_s1 + $0x470] sm:$0xff] }
 0x23e   :  { %8176 = vmatprep.subr.bf16.mxu0 %v18355_v62  ;;  %v17350_v62 = vcombine.low %v129_v48, %v141_v49  ;;  %v17375_v0 = vcombine.high %v153_v58, %v165_v59  ;;  %v266_v48 = vld [vmem:[%s29047_s1 + $0x798] sm:$0xff] }
 0x23f   :  { %7439 = vmatpush1.bf16.msra.mxu1 %v18342_v5  ;;  %v177_v5 = vld [vmem:[%s29047_s1 + $0x4d0] sm:$0xff]  ;;  %v278_v49 = vld [vmem:[%s29047_s1 + $0x7f8] sm:$0xff] }
 0x240   :  { %7440 = vmatprep.subr.bf16.mxu1 %v18367_v8  ;;  %v17360_v8 = vcombine.low %v146_v55, %v158_v56  ;;  %v17481_v55 = vcombine.high %v266_v48, %v278_v49 }
 0x241   :  { %8177 = vmatpush1.bf16.msra.mxu0 %v18354_v6  ;;  %v189_v6 = vld [vmem:[%s29047_s1 + $0x530] sm:$0xff] }
 0x242   :  { %8178 = vmatprep.subr.bf16.mxu0 %v18379_v9  ;;  %v17374_v9 = vcombine.low %v153_v58, %v165_v59  ;;  %v17399_v13 = vcombine.high %v177_v5, %v189_v6  ;;  %v290_v58 = vld [vmem:[%s29047_s1 + $0x858] sm:$0xff] }
 0x243   :  { %7441 = vmatpush1.bf16.msra.mxu1 %v18366_v16  ;;  %v206_v16 = vld [vmem:[%s29047_s1 + $0x5b8] sm:$0xff] }
 0x244   :  { %7451 = vmatprep.subr.bf16.mxu1 %v17241_v53  ;;  %v201_v53 = vld [vmem:[%s29047_s1 + $0x590] sm:$0xff]  ;;  %v302_v59 = vld [vmem:[%s29047_s1 + $0x8b8] sm:$0xff] }
 0x245   :  { %8179 = vmatpush1.bf16.msra.mxu0 %v18378_v17  ;;  %v17505_v2 = vcombine.high %v290_v58, %v302_v59 }
 0x246   :  { %8312 = vmatprep.subr.bf16.mxu0 %v17255_v18  ;;  %7443 = vmatmul.mubr.bf16.vlgmr.msra.gmra.mrb[8].mxu1 %v22255_v36  ;;  %v213_v18 = vld [vmem:[%s29047_s1 + $0x5f0] sm:$0xff] }
 0x247   :  { %7452 = vmatpush1.bf16.msra.mxu1 %v17240_v26  ;;  %7483 = vmatprep.mubr.bf16.mxu1 %v21711_v57  ;;  %v17423_v29 = vcombine.high %v201_v53, %v213_v18 }
 0x248   :  { %8181 = vmatmul.mubr.bf16.vlgmr.msra.gmra.mrb[8].mxu0 %v22255_v36  ;;  %7453 = vmatprep.subr.bf16.mxu1 %v17265_v15  ;;  %v17409_v15 = vcombine.high %v194_v14, %v206_v16 }
 0x249   :  { %8313 = vmatpush1.bf16.msra.mxu0 %v17254_v27  ;;  %8344 = vmatprep.mubr.bf16.mxu0 %v21711_v57  ;;  %v17398_v27 = vcombine.low %v177_v5, %v189_v6  ;;  %v314_v5 = vld [vmem:[%s29047_s1 + $0x918] sm:$0xff] }
 0x24a   :  { %8314 = vmatprep.subr.bf16.mxu0 %v17279_v28  ;;  %v326_v6 = vld [vmem:[%s29047_s1 + $0x978] sm:$0xff] }
 0x24b   :  { %7454 = vmatpush1.bf16.msra.mxu1 %v17264_v34  ;;  %v225_v34 = vld [vmem:[%s29047_s1 + $0x650] sm:$0xff] }
 0x24c   :  { %7455 = vmatprep.subr.bf16.mxu1 %v17289_v37  ;;  %v17408_v37 = vcombine.low %v194_v14, %v206_v16  ;;  %v17529_v14 = vcombine.high %v314_v5, %v326_v6 }
 0x24d   :  { %8315 = vmatpush1.bf16.msra.mxu0 %v17278_v35  ;;  %v237_v35 = vld [vmem:[%s29047_s1 + $0x6b0] sm:$0xff] }
 0x24e   :  { %8316 = vmatprep.subr.bf16.mxu0 %v17303_v38  ;;  %v17422_v38 = vcombine.low %v201_v53, %v213_v18  ;;  %v17447_v40 = vcombine.high %v225_v34, %v237_v35  ;;  %v338_v53 = vld [vmem:[%s29047_s1 + $0x9d8] sm:$0xff] }
 0x24f   :  { %7456 = vmatpush1.bf16.msra.mxu1 %v17288_v25  ;;  %v249_v25 = vld [vmem:[%s29047_s1 + $0x710] sm:$0xff]  ;;  %v350_v18 = vld [vmem:[%s29047_s1 + $0xa38] sm:$0xff] }
 0x250   :  { %7457 = vmatprep.subr.bf16.mxu1 %v17313_v44  ;;  %v17432_v44 = vcombine.low %v218_v30, %v230_v32  ;;  %v374_v30 = vld [vmem:[%s29047_s1 + $0xaf8] sm:$0xff]  ;;  %v369_v32 = vld [vmem:[%s29047_s1 + $0xad0] sm:$0xff] }
 0x251   :  { %8317 = vmatpush1.bf16.msra.mxu0 %v17302_v43  ;;  %v261_v43 = vld [vmem:[%s29047_s1 + $0x770] sm:$0xff] }
 0x252   :  { %8318 = vmatprep.subr.bf16.mxu0 %v17327_v45  ;;  %v17446_v45 = vcombine.low %v225_v34, %v237_v35  ;;  %v17471_v47 = vcombine.high %v249_v25, %v261_v43  ;;  %v17552_v34 = vcombine.low %v338_v53, %v350_v18 }
 0x253   :  { %7458 = vmatpush1.bf16.msra.mxu1 %v17312_v50  ;;  %v273_v50 = vld [vmem:[%s29047_s1 + $0x7d0] sm:$0xff] }
 0x254   :  { %7459 = vmatprep.subr.bf16.mxu1 %v17337_v52  ;;  %v17456_v52 = vcombine.low %v242_v41, %v254_v42  ;;  %v393_v41 = vld [vmem:[%s29047_s1 + $0xb90] sm:$0xff] }
 0x255   :  { %8319 = vmatpush1.bf16.msra.mxu0 %v17326_v51  ;;  %v285_v51 = vld [vmem:[%s29047_s1 + $0x830] sm:$0xff] }
 0x256   :  { %8320 = vmatprep.subr.bf16.mxu0 %v17351_v54  ;;  %v17470_v54 = vcombine.low %v249_v25, %v261_v43  ;;  %v17495_v56 = vcombine.high %v273_v50, %v285_v51  ;;  %v405_v42 = vld [vmem:[%s29047_s1 + $0xbf0] sm:$0xff] }
 0x257   :  { %7460 = vmatpush1.bf16.msra.mxu1 %v17336_v60  ;;  %v297_v60 = vld [vmem:[%s29047_s1 + $0x890] sm:$0xff] }
 0x258   :  { %7461 = vmatprep.subr.bf16.mxu1 %v17361_v63  ;;  %v17480_v63 = vcombine.low %v266_v48, %v278_v49  ;;  %v417_v48 = vld [vmem:[%s29047_s1 + $0xc50] sm:$0xff] }
 0x259   :  { %8321 = vmatpush1.bf16.msra.mxu0 %v17350_v62  ;;  %v23511_v11 = vpop.f32.mrb[4].mxu1  ;;  %v309_v62 = vld [vmem:[%s29047_s1 + $0x8f0] sm:$0xff] }
 0x25a   :  { %8322 = vmatprep.subr.bf16.mxu0 %v17375_v0  ;;  %v23519_v17 = vpop.f32.mrb[5].mxu1  ;;  %v17494_v0 = vcombine.low %v273_v50, %v285_v51  ;;  %v17519_v3 = vcombine.high %v297_v60, %v309_v62  ;;  %v429_v49 = vld [vmem:[%s29047_s1 + $0xcb0] sm:$0xff]  ;;  %v17614_v51 = vcombine.low %v393_v41, %v405_v42 }
 0x25b   :  { %v23527_v19 = vpop.f32.mrb[4].mxu0  ;;  %v7325_v20 = vpop.f32.mrb[6].mxu1  ;;  %7462 = vmatpush1.bf16.msra.mxu1 %v17360_v8  ;;  %v321_v8 = vld [vmem:[%s29047_s1 + $0x950] sm:$0xff] }
 0x25c   :  { %v23529_v24 = vpop.f32.mrb[5].mxu0  ;;  %v7326_v26 = vpop.f32.mrb[7].mxu1  ;;  %7463 = vmatprep.subr.bf16.mxu1 %v17385_v10  ;;  %v17504_v10 = vcombine.low %v290_v58, %v302_v59  ;;  %v345_v20 = vld [vmem:[%s29047_s1 + $0xa10] sm:$0xff] }
 0x25d   :  { %8323 = vmatpush1.bf16.msra.mxu0 %v17374_v9  ;;  %v7940_v28 = vpop.f32.mrb[6].mxu0  ;;  %v333_v9 = vld [vmem:[%s29047_s1 + $0x9b0] sm:$0xff]  ;;  %v17528_v26 = vcombine.low %v314_v5, %v326_v6 }
 0x25e   :  { %8324 = vmatprep.subr.bf16.mxu0 %v17399_v13  ;;  %v7941_v33 = vpop.f32.mrb[7].mxu0  ;;  %v17518_v13 = vcombine.low %v297_v60, %v309_v62  ;;  %v17543_v16 = vcombine.high %v321_v8, %v333_v9  ;;  %v441_v58 = vld [vmem:[%s29047_s1 + $0xd10] sm:$0xff]  ;;  %v17638_v62 = vcombine.low %v417_v48, %v429_v49 }
 0x25f   :  { %7464 = vmatpush1.bf16.msra.mxu1 %v17384_v23  ;;  %v357_v23 = vld [vmem:[%s29047_s1 + $0xa70] sm:$0xff] }
 0x260   :  { %7465 = vmatprep.subr.bf16.mxu1 %v17409_v15  ;;  %v17553_v15 = vcombine.high %v338_v53, %v350_v18  ;;  %v17567_v28 = vcombine.high %v345_v20, %v357_v23  ;;  %v381_v33 = vld [vmem:[%s29047_s1 + $0xb30] sm:$0xff]  ;;  %v17566_v35 = vcombine.low %v345_v20, %v357_v23 }
 0x261   :  { %8325 = vmatpush1.bf16.msra.mxu0 %v17398_v27  ;;  %v17542_v27 = vcombine.low %v321_v8, %v333_v9  ;;  %v17590_v43 = vcombine.low %v369_v32, %v381_v33  ;;  %v453_v59 = vld [vmem:[%s29047_s1 + $0xd70] sm:$0xff] }
 0x262   :  { %8326 = vmatprep.subr.bf16.mxu0 %v17423_v29  ;;  %v362_v29 = vld [vmem:[%s29047_s1 + $0xa98] sm:$0xff]  ;;  %v465_v5 = vld [vmem:[%s29047_s1 + $0xdd0] sm:$0xff]  ;;  %v17662_v9 = vcombine.low %v441_v58, %v453_v59 }
 0x263   :  { %7466 = vmatpush1.bf16.msra.mxu1 %v17408_v37  ;;  %v17577_v37 = vcombine.high %v362_v29, %v374_v30  ;;  %v17576_v25 = vcombine.low %v362_v29, %v374_v30  ;;  %v477_v6 = vld [vmem:[%s29047_s1 + $0xe30] sm:$0xff] }
 0x264   :  { %7467 = vmatprep.subr.bf16.mxu1 %v17433_v39  ;;  %v386_v39 = vld [vmem:[%s29047_s1 + $0xb58] sm:$0xff]  ;;  %v489_v53 = vld [vmem:[%s29047_s1 + $0xe90] sm:$0xff]  ;;  %v17686_v23 = vcombine.low %v465_v5, %v477_v6 }
 0x265   :  { %8327 = vmatpush1.bf16.msra.mxu0 %v17422_v38  ;;  %v17591_v38 = vcombine.high %v369_v32, %v381_v33  ;;  %v501_v18 = vld [vmem:[%s29047_s1 + $0xef0] sm:$0xff] }
 0x266   :  { %8328 = vmatprep.subr.bf16.mxu0 %v17447_v40  ;;  %v398_v40 = vld [vmem:[%s29047_s1 + $0xbb8] sm:$0xff]  ;;  %v17711_v29 = vcombine.high %v489_v53, %v501_v18  ;;  %v525_v30 = vld [vmem:[%s29047_s1 + $0xfb0] sm:$0xff]  ;;  %v17710_v33 = vcombine.low %v489_v53, %v501_v18 }
 0x267   :  { %7468 = vmatpush1.bf16.msra.mxu1 %v17432_v44  ;;  %v17601_v44 = vcombine.high %v386_v39, %v398_v40  ;;  %v17600_v50 = vcombine.low %v386_v39, %v398_v40  ;;  %v549_v40 = vld [vmem:[%s29047_s1 + $0x1070] sm:$0xff] }
 0x268   :  { %7469 = vmatprep.subr.bf16.mxu1 %v17457_v46  ;;  %v410_v46 = vld [vmem:[%s29047_s1 + $0xc18] sm:$0xff] }
 0x269   :  { %8329 = vmatpush1.bf16.msra.mxu0 %v17446_v45  ;;  %v17615_v45 = vcombine.high %v393_v41, %v405_v42 }
 0x26a   :  { %8330 = vmatprep.subr.bf16.mxu0 %v17471_v47  ;;  %v422_v47 = vld [vmem:[%s29047_s1 + $0xc78] sm:$0xff] }
 0x26b   :  { %7470 = vmatpush1.bf16.msra.mxu1 %v17456_v52  ;;  %v17625_v52 = vcombine.high %v410_v46, %v422_v47  ;;  %v17624_v60 = vcombine.low %v410_v46, %v422_v47  ;;  %v573_v47 = vld [vmem:[%s29047_s1 + $0x1130] sm:$0xff] }
 0x26c   :  { %7471 = vmatprep.subr.bf16.mxu1 %v17481_v55  ;;  %v434_v55 = vld [vmem:[%s29047_s1 + $0xcd8] sm:$0xff] }
 0x26d   :  { %8331 = vmatpush1.bf16.msra.mxu0 %v17470_v54  ;;  %v17639_v54 = vcombine.high %v417_v48, %v429_v49 }
 0x26e   :  { %8332 = vmatprep.subr.bf16.mxu0 %v17495_v56  ;;  %v446_v56 = vld [vmem:[%s29047_s1 + $0xd38] sm:$0xff] }
 0x26f   :  { %7472 = vmatpush1.bf16.msra.mxu1 %v17480_v63  ;;  %v17649_v63 = vcombine.high %v434_v55, %v446_v56  ;;  %v17648_v8 = vcombine.low %v434_v55, %v446_v56  ;;  %v585_v55 = vld [vmem:[%s29047_s1 + $0x1190] sm:$0xff] }
 0x270   :  { %7473 = vmatprep.subr.bf16.mxu1 %v17505_v2  ;;  %v470_v2 = vld [vmem:[%s29047_s1 + $0xdf8] sm:$0xff]  ;;  %v597_v56 = vld [vmem:[%s29047_s1 + $0x11f0] sm:$0xff] }
 0x271   :  { %8333 = vmatpush1.bf16.msra.mxu0 %v17494_v0  ;;  %v458_v0 = vld [vmem:[%s29047_s1 + $0xd98] sm:$0xff] }
 0x272   :  { %8334 = vmatprep.subr.bf16.mxu0 %v17519_v3  ;;  %v17663_v3 = vcombine.high %v441_v58, %v453_v59  ;;  %v17672_v20 = vcombine.low %v458_v0, %v470_v2 }
 0x273   :  { %7474 = vmatpush1.bf16.msra.mxu1 %v17504_v10  ;;  %v17673_v10 = vcombine.high %v458_v0, %v470_v2  ;;  %v17807_v0 = vcombine.high %v585_v55, %v597_v56  ;;  %v609_v2 = vld [vmem:[%s29047_s1 + $0x1250] sm:$0xff] }
 0x274   :  { %7475 = vmatprep.subr.bf16.mxu1 %v17529_v14  ;;  %v494_v14 = vld [vmem:[%s29047_s1 + $0xeb8] sm:$0xff] }
 0x275   :  { %8335 = vmatpush1.bf16.msra.mxu0 %v17518_v13  ;;  %v482_v13 = vld [vmem:[%s29047_s1 + $0xe58] sm:$0xff] }
 0x276   :  { %8336 = vmatprep.subr.bf16.mxu0 %v17543_v16  ;;  %v17687_v16 = vcombine.high %v465_v5, %v477_v6  ;;  %v17696_v32 = vcombine.low %v482_v13, %v494_v14  ;;  %v17806_v6 = vcombine.low %v585_v55, %v597_v56 }
 0x277   :  { %7476 = vmatpush1.bf16.msra.mxu1 %v17528_v26  ;;  %v17697_v26 = vcombine.high %v482_v13, %v494_v14  ;;  %v633_v14 = vld [vmem:[%s29047_s1 + $0x1310] sm:$0xff] }
 0x278   :  { %7477 = vmatprep.subr.bf16.mxu1 %v17553_v15  ;;  %v518_v15 = vld [vmem:[%s29047_s1 + $0xf78] sm:$0xff] }
 0x279   :  { %8337 = vmatpush1.bf16.msra.mxu0 %v17542_v27  ;;  %v506_v27 = vld [vmem:[%s29047_s1 + $0xf18] sm:$0xff] }
 0x27a   :  { %8338 = vmatprep.subr.bf16.mxu0 %v17567_v28  ;;  %v513_v28 = vld [vmem:[%s29047_s1 + $0xf50] sm:$0xff]  ;;  %v17720_v41 = vcombine.low %v506_v27, %v518_v15 }
 0x27b   :  { %7478 = vmatpush1.bf16.msra.mxu1 %v17552_v34  ;;  %v17721_v34 = vcombine.high %v506_v27, %v518_v15  ;;  %v17735_v39 = vcombine.high %v513_v28, %v525_v30  ;;  %v17734_v42 = vcombine.low %v513_v28, %v525_v30  ;;  %v657_v27 = vld [vmem:[%s29047_s1 + $0x13d0] sm:$0xff] }
 0x27c   :  { %7479 = vmatprep.subr.bf16.mxu1 %v17577_v37  ;;  %v542_v37 = vld [vmem:[%s29047_s1 + $0x1038] sm:$0xff]  ;;  %v669_v28 = vld [vmem:[%s29047_s1 + $0x1430] sm:$0xff] }
 0x27d   :  { %8339 = vmatpush1.bf16.msra.mxu0 %v17566_v35  ;;  %v530_v35 = vld [vmem:[%s29047_s1 + $0xfd8] sm:$0xff] }
 0x27e   :  { %8340 = vmatprep.subr.bf16.mxu0 %v17591_v38  ;;  %v537_v38 = vld [vmem:[%s29047_s1 + $0x1010] sm:$0xff]  ;;  %v17744_v48 = vcombine.low %v530_v35, %v542_v37 }
 0x27f   :  { %7480 = vmatpush1.bf16.msra.mxu1 %v17576_v25  ;;  %v17745_v25 = vcombine.high %v530_v35, %v542_v37  ;;  %v17759_v46 = vcombine.high %v537_v38, %v549_v40  ;;  %v17758_v49 = vcombine.low %v537_v38, %v549_v40  ;;  %v681_v35 = vld [vmem:[%s29047_s1 + $0x1490] sm:$0xff]  ;;  %v17879_v37 = vcombine.high %v657_v27, %v669_v28 }
 0x280   :  { %7481 = vmatprep.subr.bf16.mxu1 %v17601_v44  ;;  %v566_v44 = vld [vmem:[%s29047_s1 + $0x10f8] sm:$0xff]  ;;  %v693_v38 = vld [vmem:[%s29047_s1 + $0x14f0] sm:$0xff]  ;;  %v17878_v40 = vcombine.low %v657_v27, %v669_v28 }
 0x281   :  { %8341 = vmatpush1.bf16.msra.mxu0 %v17590_v43  ;;  %v554_v43 = vld [vmem:[%s29047_s1 + $0x1098] sm:$0xff]  ;;  %v813_v27 = vld [vmem:[%s29047_s1 + $0x18b0] sm:$0xff] }
 0x282   :  { %8342 = vmatprep.subr.bf16.mxu0 %v17615_v45  ;;  %v561_v45 = vld [vmem:[%s29047_s1 + $0x10d0] sm:$0xff]  ;;  %v17768_v58 = vcombine.low %v554_v43, %v566_v44 }
 0x283   :  { %7482 = vmatpush1.bf16.msra.mxu1 %v17600_v50  ;;  %v17769_v50 = vcombine.high %v554_v43, %v566_v44  ;;  %v17782_v59 = vcombine.low %v561_v45, %v573_v47  ;;  %v705_v43 = vld [vmem:[%s29047_s1 + $0x1550] sm:$0xff]  ;;  %v17903_v44 = vcombine.high %v681_v35, %v693_v38 }
 0x284   :  { %7492 = vmatprep.subr.bf16.mxu1 %v17625_v52  ;;  %v590_v52 = vld [vmem:[%s29047_s1 + $0x11b8] sm:$0xff] }
 0x285   :  { %8343 = vmatpush1.bf16.msra.mxu0 %v17614_v51  ;;  %v578_v51 = vld [vmem:[%s29047_s1 + $0x1158] sm:$0xff] }
 0x286   :  { %8353 = vmatprep.subr.bf16.mxu0 %v17639_v54  ;;  %7484 = vmatmul.mubr.bf16.vlgmr.msra.gmra.mrb[12].mxu1 %v21837_v12  ;;  %v17783_v54 = vcombine.high %v561_v45, %v573_v47  ;;  %v17792_v5 = vcombine.low %v578_v51, %v590_v52  ;;  %v717_v45 = vld [vmem:[%s29047_s1 + $0x15b0] sm:$0xff]  ;;  %v17902_v47 = vcombine.low %v681_v35, %v693_v38  ;;  %v842_v38 = vld [vmem:[%s29047_s1 + $0x1998] sm:$0xff] }
 0x287   :  { %7493 = vmatpush1.bf16.msra.mxu1 %v17624_v60  ;;  %7524 = vmatprep.mubr.bf16.mxu1 %v21858_v21  ;;  %v17793_v60 = vcombine.high %v578_v51, %v590_v52  ;;  %v729_v51 = vld [vmem:[%s29047_s1 + $0x1610] sm:$0xff]  ;;  %v17927_v52 = vcombine.high %v705_v43, %v717_v45  ;;  %v17926_v56 = vcombine.low %v705_v43, %v717_v45 }
 0x288   :  { %8345 = vmatmul.mubr.bf16.vlgmr.msra.gmra.mrb[12].mxu0 %v21837_v12  ;;  %7494 = vmatprep.subr.bf16.mxu1 %v17649_v63  ;;  %v614_v63 = vld [vmem:[%s29047_s1 + $0x1278] sm:$0xff]  ;;  %v837_v35 = vld [vmem:[%s29047_s1 + $0x1970] sm:$0xff] }
 0x289   :  { %8354 = vmatpush1.bf16.msra.mxu0 %v17638_v62  ;;  %8385 = vmatprep.mubr.bf16.mxu0 %v21858_v21  ;;  %v602_v62 = vld [vmem:[%s29047_s1 + $0x1218] sm:$0xff]  ;;  %v861_v43 = vld [vmem:[%s29047_s1 + $0x1a30] sm:$0xff] }
 0x28a   :  { %8355 = vmatprep.subr.bf16.mxu0 %v17663_v3  ;;  %v621_v3 = vld [vmem:[%s29047_s1 + $0x12b0] sm:$0xff]  ;;  %v17816_v53 = vcombine.low %v602_v62, %v614_v63 }
 0x28b   :  { %7495 = vmatpush1.bf16.msra.mxu1 %v17648_v8  ;;  %v17817_v8 = vcombine.high %v602_v62, %v614_v63  ;;  %v17831_v13 = vcombine.high %v609_v2, %v621_v3  ;;  %v17830_v18 = vcombine.low %v609_v2, %v621_v3  ;;  %v753_v62 = vld [vmem:[%s29047_s1 + $0x16d0] sm:$0xff] }
 0x28c   :  { %7496 = vmatprep.subr.bf16.mxu1 %v17673_v10  ;;  %v638_v10 = vld [vmem:[%s29047_s1 + $0x1338] sm:$0xff] }
 0x28d   :  { %8356 = vmatpush1.bf16.msra.mxu0 %v17662_v9  ;;  %v626_v9 = vld [vmem:[%s29047_s1 + $0x12d8] sm:$0xff] }
 0x28e   :  { %8357 = vmatprep.subr.bf16.mxu0 %v17687_v16  ;;  %v645_v16 = vld [vmem:[%s29047_s1 + $0x1370] sm:$0xff] }
 0x28f   :  { %7497 = vmatpush1.bf16.msra.mxu1 %v17672_v20  ;;  %v17841_v20 = vcombine.high %v626_v9, %v638_v10  ;;  %v17855_v15 = vcombine.high %v633_v14, %v645_v16  ;;  %v17854_v30 = vcombine.low %v633_v14, %v645_v16 }
 0x290   :  { %7498 = vmatprep.subr.bf16.mxu1 %v17697_v26  ;;  %v662_v26 = vld [vmem:[%s29047_s1 + $0x13f8] sm:$0xff] }
 0x291   :  { %8358 = vmatpush1.bf16.msra.mxu0 %v17686_v23  ;;  %v650_v23 = vld [vmem:[%s29047_s1 + $0x1398] sm:$0xff] }
 0x292   :  { %8359 = vmatprep.subr.bf16.mxu0 %v17711_v29  ;;  %v17840_v29 = vcombine.low %v626_v9, %v638_v10  ;;  %v777_v9 = vld [vmem:[%s29047_s1 + $0x1790] sm:$0xff] }
 0x293   :  { %7499 = vmatpush1.bf16.msra.mxu1 %v17696_v32  ;;  %v17865_v32 = vcombine.high %v650_v23, %v662_v26 }
 0x294   :  { %7500 = vmatprep.subr.bf16.mxu1 %v17721_v34  ;;  %v686_v34 = vld [vmem:[%s29047_s1 + $0x14b8] sm:$0xff] }
 0x295   :  { %8360 = vmatpush1.bf16.msra.mxu0 %v17710_v33  ;;  %v674_v33 = vld [vmem:[%s29047_s1 + $0x1458] sm:$0xff] }
 0x296   :  { %8361 = vmatprep.subr.bf16.mxu0 %v17735_v39  ;;  %v17864_v39 = vcombine.low %v650_v23, %v662_v26  ;;  %v801_v23 = vld [vmem:[%s29047_s1 + $0x1850] sm:$0xff] }
 0x297   :  { %7501 = vmatpush1.bf16.msra.mxu1 %v17720_v41  ;;  %v17889_v41 = vcombine.high %v674_v33, %v686_v34 }
 0x298   :  { %7502 = vmatprep.subr.bf16.mxu1 %v17745_v25  ;;  %v710_v25 = vld [vmem:[%s29047_s1 + $0x1578] sm:$0xff] }
 0x299   :  { %8362 = vmatpush1.bf16.msra.mxu0 %v17734_v42  ;;  %v698_v42 = vld [vmem:[%s29047_s1 + $0x1518] sm:$0xff] }
 0x29a   :  { %8363 = vmatprep.subr.bf16.mxu0 %v17759_v46  ;;  %v17888_v46 = vcombine.low %v674_v33, %v686_v34  ;;  %v17912_v55 = vcombine.low %v698_v42, %v710_v25  ;;  %v825_v33 = vld [vmem:[%s29047_s1 + $0x1910] sm:$0xff]  ;;  %v18023_v34 = vcombine.high %v801_v23, %v813_v27 }
 0x29b   :  { %7503 = vmatpush1.bf16.msra.mxu1 %v17744_v48  ;;  %v17913_v48 = vcombine.high %v698_v42, %v710_v25  ;;  %v849_v42 = vld [vmem:[%s29047_s1 + $0x19d0] sm:$0xff]  ;;  %v18047_v25 = vcombine.high %v825_v33, %v837_v35  ;;  %v18046_v45 = vcombine.low %v825_v33, %v837_v35  ;;  %v974_v35 = vld [vmem:[%s29047_s1 + $0x1db8] sm:$0xff] }
 0x29c   :  { %7504 = vmatprep.subr.bf16.mxu1 %v17769_v50  ;;  %v734_v50 = vld [vmem:[%s29047_s1 + $0x1638] sm:$0xff] }
 0x29d   :  { %8364 = vmatpush1.bf16.msra.mxu0 %v17758_v49  ;;  %v722_v49 = vld [vmem:[%s29047_s1 + $0x15d8] sm:$0xff] }
 0x29e   :  { %8365 = vmatprep.subr.bf16.mxu0 %v17783_v54  ;;  %v741_v54 = vld [vmem:[%s29047_s1 + $0x1670] sm:$0xff]  ;;  %v17936_v2 = vcombine.low %v722_v49, %v734_v50 }
 0x29f   :  { %7505 = vmatpush1.bf16.msra.mxu1 %v17768_v58  ;;  %v17937_v58 = vcombine.high %v722_v49, %v734_v50  ;;  %v17951_v63 = vcombine.high %v729_v51, %v741_v54  ;;  %v17950_v3 = vcombine.low %v729_v51, %v741_v54  ;;  %v1181_v49 = vlaneseq  ;;  %v873_v51 = vld [vmem:[%s29047_s1 + $0x1a90] sm:$0xff] }
 0x2a0   :  { %7506 = vmatprep.subr.bf16.mxu1 %v17793_v60  ;;  %v758_v60 = vld [vmem:[%s29047_s1 + $0x16f8] sm:$0xff]  ;;  %v18071_v50 = vcombine.high %v849_v42, %v861_v43 }
 0x2a1   :  { %8366 = vmatpush1.bf16.msra.mxu0 %v17782_v59  ;;  %v746_v59 = vld [vmem:[%s29047_s1 + $0x1698] sm:$0xff] }
 0x2a2   :  { %8367 = vmatprep.subr.bf16.mxu0 %v17807_v0  ;;  %v765_v0 = vld [vmem:[%s29047_s1 + $0x1730] sm:$0xff]  ;;  %v17960_v14 = vcombine.low %v746_v59, %v758_v60 }
 0x2a3   :  { %7507 = vmatpush1.bf16.msra.mxu1 %v17792_v5  ;;  %v17961_v5 = vcombine.high %v746_v59, %v758_v60  ;;  %v17975_v10 = vcombine.high %v753_v62, %v765_v0  ;;  %v17974_v16 = vcombine.low %v753_v62, %v765_v0  ;;  %v902_v59 = vld [vmem:[%s29047_s1 + $0x1b78] sm:$0xff]  ;;  %v897_v60 = vld [vmem:[%s29047_s1 + $0x1b50] sm:$0xff]  ;;  %v23884_v62 = vshrl.u32 %v1181_v49, 7 }
 0x2a4   :  { %7508 = vmatprep.subr.bf16.mxu1 %v17817_v8  ;;  %v782_v8 = vld [vmem:[%s29047_s1 + $0x17b8] sm:$0xff]  ;;  %v909_v0 = vld [vmem:[%s29047_s1 + $0x1bb0] sm:$0xff] }
 0x2a5   :  { %8368 = vmatpush1.bf16.msra.mxu0 %v17806_v6  ;;  %v770_v6 = vld [vmem:[%s29047_s1 + $0x1758] sm:$0xff] }
 0x2a6   :  { %8369 = vmatprep.subr.bf16.mxu0 %v17831_v13  ;;  %v789_v13 = vld [vmem:[%s29047_s1 + $0x17f0] sm:$0xff] }
 0x2a7   :  { %7509 = vmatpush1.bf16.msra.mxu1 %v17816_v53  ;;  %v17985_v53 = vcombine.high %v770_v6, %v782_v8  ;;  %v17999_v26 = vcombine.high %v777_v9, %v789_v13  ;;  %v17998_v28 = vcombine.low %v777_v9, %v789_v13  ;;  %v926_v9 = vld [vmem:[%s29047_s1 + $0x1c38] sm:$0xff]  ;;  %v23904_v13 = vsub.s32 1, %v23884_v62 }
 0x2a8   :  { %7510 = vmatprep.subr.bf16.mxu1 %v17841_v20  ;;  %v806_v20 = vld [vmem:[%s29047_s1 + $0x1878] sm:$0xff] }
 0x2a9   :  { %8370 = vmatpush1.bf16.msra.mxu0 %v17830_v18  ;;  %v794_v18 = vld [vmem:[%s29047_s1 + $0x1818] sm:$0xff] }
 0x2aa   :  { %8371 = vmatprep.subr.bf16.mxu0 %v17855_v15  ;;  %v17984_v15 = vcombine.low %v770_v6, %v782_v8  ;;  %v914_v8 = vld [vmem:[%s29047_s1 + $0x1bd8] sm:$0xff] }
 0x2ab   :  { %7511 = vmatpush1.bf16.msra.mxu1 %v17840_v29  ;;  %v18009_v29 = vcombine.high %v794_v18, %v806_v20 }
 0x2ac   :  { %7512 = vmatprep.subr.bf16.mxu1 %v17865_v32  ;;  %v830_v32 = vld [vmem:[%s29047_s1 + $0x1938] sm:$0xff] }
 0x2ad   :  { %8372 = vmatpush1.bf16.msra.mxu0 %v17854_v30  ;;  %v818_v30 = vld [vmem:[%s29047_s1 + $0x18d8] sm:$0xff] }
 0x2ae   :  { %8373 = vmatprep.subr.bf16.mxu0 %v17879_v37  ;;  %v18008_v37 = vcombine.low %v794_v18, %v806_v20  ;;  %v18118_v18 = vcombine.low %v897_v60, %v909_v0  ;;  %v18129_v20 = vcombine.high %v914_v8, %v926_v9 }
 0x2af   :  { %7513 = vmatpush1.bf16.msra.mxu1 %v17864_v39  ;;  %v18022_v39 = vcombine.low %v801_v23, %v813_v27  ;;  %v938_v23 = vld [vmem:[%s29047_s1 + $0x1c98] sm:$0xff]  ;;  %v945_v27 = vld [vmem:[%s29047_s1 + $0x1cd0] sm:$0xff] }
 0x2b0   :  { %7514 = vmatprep.subr.bf16.mxu1 %v17889_v41  ;;  %v854_v41 = vld [vmem:[%s29047_s1 + $0x19f8] sm:$0xff] }
 0x2b1   :  { %8374 = vmatpush1.bf16.msra.mxu0 %v17878_v40  ;;  %v18033_v40 = vcombine.high %v818_v30, %v830_v32  ;;  %v18056_v54 = vcombine.low %v842_v38, %v854_v41 }
 0x2b2   :  { %8375 = vmatprep.subr.bf16.mxu0 %v17903_v44  ;;  %v18032_v44 = vcombine.low %v818_v30, %v830_v32  ;;  %v18128_v30 = vcombine.low %v914_v8, %v926_v9  ;;  %v1053_v8 = vld [vmem:[%s29047_s1 + $0x2030] sm:$0xff] }
 0x2b3   :  { %7515 = vmatpush1.bf16.msra.mxu1 %v17888_v46  ;;  %v18057_v46 = vcombine.high %v842_v38, %v854_v41 }
 0x2b4   :  { %7516 = vmatprep.subr.bf16.mxu1 %v17913_v48  ;;  %v878_v48 = vld [vmem:[%s29047_s1 + $0x1ab8] sm:$0xff] }
 0x2b5   :  { %8376 = vmatpush1.bf16.msra.mxu0 %v17902_v47  ;;  %v866_v47 = vld [vmem:[%s29047_s1 + $0x1a58] sm:$0xff] }
 0x2b6   :  { %8377 = vmatprep.subr.bf16.mxu0 %v17927_v52  ;;  %v885_v52 = vld [vmem:[%s29047_s1 + $0x1af0] sm:$0xff] }
 0x2b7   :  { %7517 = vmatpush1.bf16.msra.mxu1 %v17912_v55  ;;  %v18070_v55 = vcombine.low %v849_v42, %v861_v43  ;;  %v986_v43 = vld [vmem:[%s29047_s1 + $0x1e18] sm:$0xff] }
 0x2b8   :  { %7518 = vmatprep.subr.bf16.mxu1 %v17937_v58  ;;  %v890_v58 = vld [vmem:[%s29047_s1 + $0x1b18] sm:$0xff] }
 0x2b9   :  { %8378 = vmatpush1.bf16.msra.mxu0 %v17926_v56  ;;  %v18081_v56 = vcombine.high %v866_v47, %v878_v48  ;;  %v18105_v6 = vcombine.high %v890_v58, %v902_v59 }
 0x2ba   :  { %8379 = vmatprep.subr.bf16.mxu0 %v17951_v63  ;;  %v18095_v63 = vcombine.high %v873_v51, %v885_v52 }
 0x2bb   :  { %7519 = vmatpush1.bf16.msra.mxu1 %v17936_v2  ;;  %v18080_v2 = vcombine.low %v866_v47, %v878_v48  ;;  %v1005_v47 = vld [vmem:[%s29047_s1 + $0x1eb0] sm:$0xff] }
 0x2bc   :  { %7520 = vmatprep.subr.bf16.mxu1 %v17961_v5  ;;  %v18094_v5 = vcombine.low %v873_v51, %v885_v52  ;;  %v1010_v51 = vld [vmem:[%s29047_s1 + $0x1ed8] sm:$0xff] }
 0x2bd   :  { %8380 = vmatpush1.bf16.msra.mxu0 %v17950_v3  ;;  %v23892_v3 = vld [vmem:[%s29050_s2] sm:$0xff]  ;;  %v1022_v52 = vld [vmem:[%s29047_s1 + $0x1f38] sm:$0xff] }
 0x2be   :  { %8381 = vmatprep.subr.bf16.mxu0 %v17975_v10  ;;  %v921_v10 = vld [vmem:[%s29047_s1 + $0x1c10] sm:$0xff] }
 0x2bf   :  { %7521 = vmatpush1.bf16.msra.mxu1 %v17960_v14  ;;  %v18119_v14 = vcombine.high %v897_v60, %v909_v0  ;;  %v1034_v0 = vld [vmem:[%s29047_s1 + $0x1f98] sm:$0xff] }
 0x2c0   :  { %7522 = vmatprep.subr.bf16.mxu1 %v17985_v53  ;;  %v18104_v53 = vcombine.low %v890_v58, %v902_v59  ;;  %v1029_v58 = vld [vmem:[%s29047_s1 + $0x1f70] sm:$0xff] }
 0x2c1   :  { %8382 = vmatpush1.bf16.msra.mxu0 %v17974_v16  ;;  %v933_v16 = vld [vmem:[%s29047_s1 + $0x1c70] sm:$0xff] }
 0x2c2   :  { %8383 = vmatprep.subr.bf16.mxu0 %v17999_v26  ;;  %v950_v26 = vld [vmem:[%s29047_s1 + $0x1cf8] sm:$0xff]  ;;  %v18142_v32 = vcombine.low %v921_v10, %v933_v16 }
 0x2c3   :  { %7523 = vmatpush1.bf16.msra.mxu1 %v17984_v15  ;;  %v1188_v15 = vrot.slane %v23892_v3, %v23904_v13  ;;  %v18153_v33 = vcombine.high %v938_v23, %v950_v26  ;;  %v18152_v41 = vcombine.low %v938_v23, %v950_v26  ;;  %v1077_v26 = vld [vmem:[%s29047_s1 + $0x20f0] sm:$0xff] }
 0x2c4   :  { %7533 = vmatprep.subr.bf16.mxu1 %v18009_v29  ;;  %v957_v29 = vld [vmem:[%s29047_s1 + $0x1d30] sm:$0xff] }
 0x2c5   :  { %8384 = vmatpush1.bf16.msra.mxu0 %v17998_v28  ;;  %v18143_v28 = vcombine.high %v921_v10, %v933_v16  ;;  %v23933_v38 = vadd.f32 %v22923_v1, %v1188_v15  ;;  %v18166_v42 = vcombine.low %v945_v27, %v957_v29  ;;  %v998_v1 = vld [vmem:[%s29047_s1 + $0x1e78] sm:$0xff]  ;;  %v18224_v10 = vcombine.low %v1010_v51, %v1022_v52 }
 0x2c6   :  { %8394 = vmatprep.subr.bf16.mxu0 %v18023_v34  ;;  %7525 = vmatmul.mubr.bf16.vlgmr.msra.gmra.mrb[12].mxu1 %v22046_v22  ;;  %v962_v34 = vld [vmem:[%s29047_s1 + $0x1d58] sm:$0xff]  ;;  %v18200_v59 = vcombine.low %v986_v43, %v998_v1 }
 0x2c7   :  { %7534 = vmatpush1.bf16.msra.mxu1 %v18008_v37  ;;  %7565 = vmatprep.mubr.bf16.mxu1 %v22067_v31  ;;  %v969_v37 = vld [vmem:[%s29047_s1 + $0x1d90] sm:$0xff]  ;;  %v18176_v48 = vcombine.low %v962_v34, %v974_v35 }
 0x2c8   :  { %8386 = vmatmul.mubr.bf16.vlgmr.msra.gmra.mrb[12].mxu0 %v22046_v22  ;;  %7535 = vmatprep.subr.bf16.mxu1 %v18033_v40  ;;  %v981_v40 = vld [vmem:[%s29047_s1 + $0x1df0] sm:$0xff] }
 0x2c9   :  { %8395 = vmatpush1.bf16.msra.mxu0 %v18022_v39  ;;  %8426 = vmatprep.mubr.bf16.mxu0 %v22067_v31  ;;  %v18167_v39 = vcombine.high %v945_v27, %v957_v29  ;;  %v18190_v49 = vcombine.low %v969_v37, %v981_v40 }
 0x2ca   :  { %8396 = vmatprep.subr.bf16.mxu0 %v18047_v25  ;;  %v18177_v25 = vcombine.high %v962_v34, %v974_v35  ;;  %v1101_v35 = vld [vmem:[%s29047_s1 + $0x21b0] sm:$0xff] }
 0x2cb   :  { %7536 = vmatpush1.bf16.msra.mxu1 %v18032_v44  ;;  %v993_v44 = vld [vmem:[%s29047_s1 + $0x1e50] sm:$0xff] }
 0x2cc   :  { %7537 = vmatprep.subr.bf16.mxu1 %v18057_v46  ;;  %v18191_v46 = vcombine.high %v969_v37, %v981_v40  ;;  %v18214_v60 = vcombine.low %v993_v44, %v1005_v47 }
 0x2cd   :  { %8397 = vmatpush1.bf16.msra.mxu0 %v18046_v45  ;;  %v8583_v45 = vmul.f32 0.044715, %v23933_v38 }
 0x2ce   :  { %8398 = vmatprep.subr.bf16.mxu0 %v18071_v50  ;;  %v18201_v50 = vcombine.high %v986_v43, %v998_v1  ;;  %v1113_v43 = vld [vmem:[%s29047_s1 + $0x2210] sm:$0xff] }
 0x2cf   :  { %7538 = vmatpush1.bf16.msra.mxu1 %v18056_v54  ;;  %v1017_v54 = vld [vmem:[%s29047_s1 + $0x1f10] sm:$0xff] }
 0x2d0   :  { %7539 = vmatprep.subr.bf16.mxu1 %v18081_v56  ;;  %v18215_v56 = vcombine.high %v993_v44, %v1005_v47  ;;  %v1125_v44 = vld [vmem:[%s29047_s1 + $0x2270] sm:$0xff] }
 0x2d1   :  { %8399 = vmatpush1.bf16.msra.mxu0 %v18070_v55  ;;  %v8607_v55 = vmul.f32 %v23933_v38, %v8583_v45 }
 0x2d2   :  { %8400 = vmatprep.subr.bf16.mxu0 %v18095_v63  ;;  %v18225_v63 = vcombine.high %v1010_v51, %v1022_v52  ;;  %v1137_v51 = vld [vmem:[%s29047_s1 + $0x22d0] sm:$0xff] }
 0x2d3   :  { %7540 = vmatpush1.bf16.msra.mxu1 %v18080_v2  ;;  %v1046_v2 = vld [vmem:[%s29047_s1 + $0x1ff8] sm:$0xff]  ;;  %v8631_v9 = vmul.f32 %v23933_v38, %v8607_v55  ;;  %v1149_v52 = vld [vmem:[%s29047_s1 + $0x2330] sm:$0xff]  ;;  %v18334_v55 = vcombine.low %v1113_v43, %v1125_v44 }
 0x2d4   :  { %7541 = vmatprep.subr.bf16.mxu1 %v18105_v6  ;;  %v18239_v6 = vcombine.high %v1017_v54, %v1029_v58  ;;  %v18249_v16 = vcombine.high %v1034_v0, %v1046_v2  ;;  %v18248_v15 = vcombine.low %v1034_v0, %v1046_v2  ;;  %v1173_v0 = vld [vmem:[%s29047_s1 + $0x23f0] sm:$0xff] }
 0x2d5   :  { %8401 = vmatpush1.bf16.msra.mxu0 %v18094_v5  ;;  %v1041_v5 = vld [vmem:[%s29047_s1 + $0x1fd0] sm:$0xff]  ;;  %v8655_v27 = vadd.f32 %v23933_v38, %v8631_v9  ;;  %v28_v9 = vld [vmem:[%s29047_s1 + $0x28] sm:$0xff] }
 0x2d6   :  { %8402 = vmatprep.subr.bf16.mxu0 %v18119_v14  ;;  %v18238_v14 = vcombine.low %v1017_v54, %v1029_v58  ;;  %v18263_v23 = vcombine.high %v1041_v5, %v1053_v8  ;;  %v1154_v58 = vld [vmem:[%s29047_s1 + $0x2358] sm:$0xff] }
 0x2d7   :  { %7542 = vmatpush1.bf16.msra.mxu1 %v18104_v53  ;;  %v1058_v53 = vld [vmem:[%s29047_s1 + $0x2058] sm:$0xff]  ;;  %v8679_v37 = vmul.f32 0.7978846, %v8655_v27  ;;  %v52_v27 = vld [vmem:[%s29047_s1 + $0xe8] sm:$0xff] }
 0x2d8   :  { %7543 = vmatprep.subr.bf16.mxu1 %v18129_v20  ;;  %v1065_v20 = vld [vmem:[%s29047_s1 + $0x2090] sm:$0xff] }
 0x2d9   :  { %8403 = vmatpush1.bf16.msra.mxu0 %v18118_v18  ;;  %v1070_v18 = vld [vmem:[%s29047_s1 + $0x20b8] sm:$0xff]  ;;  %v18287_v34 = vcombine.high %v1065_v20, %v1077_v26  ;;  %v18286_v40 = vcombine.low %v1065_v20, %v1077_v26  ;;  %21530 = vtanh.f32 %v8679_v37  ;;  %v8559_v26 = vmul.f32 0.5, %v23933_v38  ;;  %v19807_v38 = vld [vmem:[%s29049_s3 + $0x34] ss:$24 sps:$4 sm:$0xff]  }
 0x2da   :  { %8404 = vmatprep.subr.bf16.mxu0 %v18143_v28  ;;  %v18262_v28 = vcombine.low %v1041_v5, %v1053_v8  ;;  %v18273_v29 = vcombine.high %v1058_v53, %v1070_v18 }
 0x2db   :  { %7544 = vmatpush1.bf16.msra.mxu1 %v18128_v30  ;;  %v1082_v30 = vld [vmem:[%s29047_s1 + $0x2118] sm:$0xff] }
 0x2dc   :  { %7545 = vmatprep.subr.bf16.mxu1 %v18153_v33  ;;  %v1089_v33 = vld [vmem:[%s29047_s1 + $0x2150] sm:$0xff] }
 0x2dd   :  { %8405 = vmatpush1.bf16.msra.mxu0 %v18142_v32  ;;  %v1094_v32 = vld [vmem:[%s29047_s1 + $0x2178] sm:$0xff]  ;;  %v18311_v1 = vcombine.high %v1089_v33, %v1101_v35 }
 0x2de   :  { %8406 = vmatprep.subr.bf16.mxu0 %v18167_v39  ;;  %v18272_v39 = vcombine.low %v1058_v53, %v1070_v18  ;;  %v18296_v45 = vcombine.low %v1082_v30, %v1094_v32 }
 0x2df   :  { %7546 = vmatpush1.bf16.msra.mxu1 %v18152_v41  ;;  %v18297_v41 = vcombine.high %v1082_v30, %v1094_v32  ;;  %v76_v32 = vld [vmem:[%s29047_s1 + $0x1a8] sm:$0xff] }
 0x2e0   :  { %7547 = vmatprep.subr.bf16.mxu1 %v18177_v25  ;;  %v1118_v25 = vld [vmem:[%s29047_s1 + $0x2238] sm:$0xff] }
 0x2e1   :  { %8407 = vmatpush1.bf16.msra.mxu0 %v18166_v42  ;;  %v1106_v42 = vld [vmem:[%s29047_s1 + $0x21d8] sm:$0xff] }
 0x2e2   :  { %8408 = vmatprep.subr.bf16.mxu0 %v18191_v46  ;;  %v18310_v46 = vcombine.low %v1089_v33, %v1101_v35  ;;  %v18321_v47 = vcombine.high %v1106_v42, %v1118_v25  ;;  %v18320_v54 = vcombine.low %v1106_v42, %v1118_v25  ;;  %v88_v33 = vld [vmem:[%s29047_s1 + $0x208] sm:$0xff] }
 0x2e3   :  { %7548 = vmatpush1.bf16.msra.mxu1 %v18176_v48  ;;  %v1130_v48 = vld [vmem:[%s29047_s1 + $0x2298] sm:$0xff]  ;;  %v21531_v2 = vpop.eup %21530  ;;  %v100_v42 = vld [vmem:[%s29047_s1 + $0x268] sm:$0xff] }
 0x2e4   :  { %7549 = vmatprep.subr.bf16.mxu1 %v18201_v50  ;;  %v18335_v50 = vcombine.high %v1113_v43, %v1125_v44  ;;  %v112_v25 = vld [vmem:[%s29047_s1 + $0x2c8] sm:$0xff]  ;;  %v17292_v43 = vcombine.low %v76_v32, %v88_v33 }
 0x2e5   :  { %8409 = vmatpush1.bf16.msra.mxu0 %v18190_v49  ;;  %v1142_v49 = vld [vmem:[%s29047_s1 + $0x22f8] sm:$0xff]  ;;  %v17317_v44 = vcombine.high %v100_v42, %v112_v25 }
 0x2e6   :  { %8410 = vmatprep.subr.bf16.mxu0 %v18215_v56  ;;  %v18345_v56 = vcombine.high %v1130_v48, %v1142_v49  ;;  %v18344_v5 = vcombine.low %v1130_v48, %v1142_v49  ;;  %v136_v48 = vld [vmem:[%s29047_s1 + $0x388] sm:$0xff]  ;;  %v17316_v49 = vcombine.low %v100_v42, %v112_v25 }
 0x2e7   :  { %7550 = vmatpush1.bf16.msra.mxu1 %v18200_v59  ;;  %v1166_v59 = vld [vmem:[%s29047_s1 + $0x23b8] sm:$0xff]  ;;  %v19823_v42 = vld [vmem:[%s29049_s3 + $0x150] ss:$24 sps:$4 sm:$0xff]  }
 0x2e8   :  { %7551 = vmatprep.subr.bf16.mxu1 %v18225_v63  ;;  %v18359_v63 = vcombine.high %v1137_v51, %v1149_v52  ;;  %v18369_v8 = vcombine.high %v1154_v58, %v1166_v59  ;;  %v18368_v53 = vcombine.low %v1154_v58, %v1166_v59  ;;  %v160_v58 = vld [vmem:[%s29047_s1 + $0x448] sm:$0xff] }
 0x2e9   :  { %8411 = vmatpush1.bf16.msra.mxu0 %v18214_v60  ;;  %v1161_v60 = vld [vmem:[%s29047_s1 + $0x2390] sm:$0xff] }
 0x2ea   :  { %8412 = vmatprep.subr.bf16.mxu0 %v18239_v6  ;;  %v18358_v6 = vcombine.low %v1137_v51, %v1149_v52  ;;  %v18382_v18 = vcombine.low %v1161_v60, %v1173_v0  ;;  %v19811_v51 = vld [vmem:[%s29049_s3 + $0x90] ss:$24 sps:$4 sm:$0xff]  }
 0x2eb   :  { %7552 = vmatpush1.bf16.msra.mxu1 %v18224_v10  ;;  %v18383_v10 = vcombine.high %v1161_v60, %v1173_v0 }
 0x2ec   :  { %7553 = vmatprep.subr.bf16.mxu1 %v18249_v16  ;;  %v8727_v16 = vadd.f32 1.0, %v21531_v2  ;;  %v19819_v2 = vld [vmem:[%s29049_s3 + $0xf4] ss:$24 sps:$4 sm:$0xff]  }
 0x2ed   :  { %8413 = vmatpush1.bf16.msra.mxu0 %v18238_v14  ;;  %v40_v14 = vld [vmem:[%s29047_s1 + $0x88] sm:$0xff] }
 0x2ee   :  { %8414 = vmatprep.subr.bf16.mxu0 %v18263_v23  ;;  %v17245_v20 = vcombine.high %v28_v9, %v40_v14  ;;  %v19804_v23 = vld [vmem:[%s29049_s3 + $0x4] ss:$24 sps:$4 sm:$0xff]   ;;  %v17244_v30 = vcombine.low %v28_v9, %v40_v14 }
 0x2ef   :  { %7554 = vmatpush1.bf16.msra.mxu1 %v18248_v15  ;;  %v64_v15 = vld [vmem:[%s29047_s1 + $0x148] sm:$0xff] }
 0x2f0   :  { %7555 = vmatprep.subr.bf16.mxu1 %v18273_v29  ;;  %v8751_v29 = vmul.f32 %v8727_v16, %v8559_v26  ;;  %v17268_v37 = vcombine.low %v52_v27, %v64_v15  ;;  %v196_v16 = vld [vmem:[%s29047_s1 + $0x568] sm:$0xff] }
 0x2f1   :  { %8415 = vmatpush1.bf16.msra.mxu0 %v18262_v28  ;;  %v19802_v28 = vld [vmem:[%s29049_s3] ss:$24 sps:$4 sm:$0xff]  }
 0x2f2   :  { %8416 = vmatprep.subr.bf16.mxu0 %v18287_v34  ;;  %v17269_v34 = vcombine.high %v52_v27, %v64_v15  ;;  %v24067_v35 = vpack.c.bf16 %v8751_v29, %v8751_v29 }
 0x2f3   :  { %7556 = vmatpush1.bf16.msra.mxu1 %v18272_v39  ;;  %v19805_v39 = vld [vmem:[%s29049_s3 + $0x30] ss:$24 sps:$4 sm:$0xff]  }
 0x2f4   :  { %7557 = vmatprep.subr.bf16.mxu1 %v18297_v41  ;;  %v19810_v41 = vld [vmem:[%s29049_s3 + $0x64] ss:$24 sps:$4 sm:$0xff]  }
 0x2f5   :  { %8417 = vmatpush1.bf16.msra.mxu0 %v18286_v40  ;;  %v17293_v40 = vcombine.high %v76_v32, %v88_v33  ;;  %v19825_v33 = vld [vmem:[%s29049_s3 + $0x154] ss:$24 sps:$4 sm:$0xff]  }
 0x2f6   :  { %8418 = vmatprep.subr.bf16.mxu0 %v18311_v1  ;;  %v19808_v1 = vld [vmem:[%s29049_s3 + $0x60] ss:$24 sps:$4 sm:$0xff]  }
 0x2f7   :  { %7558 = vmatpush1.bf16.msra.mxu1 %v18296_v45  ;;  %v19813_v45 = vld [vmem:[%s29049_s3 + $0x94] ss:$24 sps:$4 sm:$0xff]  }
 0x2f8   :  { %7559 = vmatprep.subr.bf16.mxu1 %v18321_v47  ;;  %v24094_v47 = vsub.s32 0, %v23884_v62 }
 0x2f9   :  { %8419 = vmatpush1.bf16.msra.mxu0 %v18310_v46  ;;  %v124_v46 = vld [vmem:[%s29047_s1 + $0x328] sm:$0xff] }
 0x2fa   :  { %8420 = vmatprep.subr.bf16.mxu0 %v18335_v50  ;;  %v24100_v50 = vsub.s32 3, %v23884_v62  ;;  %v17341_v52 = vcombine.high %v124_v46, %v136_v48  ;;  %v17340_v59 = vcombine.low %v124_v46, %v136_v48 }
 0x2fb   :  { %7560 = vmatpush1.bf16.msra.mxu1 %v18320_v54  ;;  %v19816_v54 = vld [vmem:[%s29049_s3 + $0xc4] ss:$24 sps:$4 sm:$0xff]  }
 0x2fc   :  { %7561 = vmatprep.subr.bf16.mxu1 %v18345_v56  ;;  %v1184_v56 = vrot.slane %v23892_v3, %v24094_v47  ;;  %v1196_v60 = vrot.slane %v23892_v3, %v24100_v50  ;;  %v184_v3 = vld [vmem:[%s29047_s1 + $0x508] sm:$0xff] }
 0x2fd   :  { %8421 = vmatpush1.bf16.msra.mxu0 %v18334_v55  ;;  %v148_v55 = vld [vmem:[%s29047_s1 + $0x3e8] sm:$0xff] }
 0x2fe   :  { %8422 = vmatprep.subr.bf16.mxu0 %v18359_v63  ;;  %v19814_v63 = vld [vmem:[%s29049_s3 + $0xc0] ss:$24 sps:$4 sm:$0xff]   ;;  %v17365_v0 = vcombine.high %v148_v55, %v160_v58  ;;  %v24134_v9 = vadd.f32 %v23519_v17, %v1196_v60  ;;  %v208_v17 = vld [vmem:[%s29047_s1 + $0x5c8] sm:$0xff] }
 0x2ff   :  { %7562 = vmatpush1.bf16.msra.mxu1 %v18344_v5  ;;  %v172_v5 = vld [vmem:[%s29047_s1 + $0x4a8] sm:$0xff] }
 0x300   :  { %7563 = vmatprep.subr.bf16.mxu1 %v18369_v8  ;;  %v17364_v8 = vcombine.low %v148_v55, %v160_v58  ;;  %v17389_v14 = vcombine.high %v172_v5, %v184_v3  ;;  %v17388_v27 = vcombine.low %v172_v5, %v184_v3  ;;  %v280_v55 = vld [vmem:[%s29047_s1 + $0x808] sm:$0xff] }
 0x301   :  { %8423 = vmatpush1.bf16.msra.mxu0 %v18358_v6  ;;  %v24128_v6 = vadd.f32 %v22915_v61, %v1184_v56  ;;  %v19822_v61 = vld [vmem:[%s29049_s3 + $0x124] ss:$24 sps:$4 sm:$0xff]   ;;  %v19829_v60 = vld [vmem:[%s29049_s3 + $0x1b0] ss:$24 sps:$4 sm:$0xff]  }
 0x302   :  { %8424 = vmatprep.subr.bf16.mxu0 %v18383_v10  ;;  %v19817_v10 = vld [vmem:[%s29049_s3 + $0xf0] ss:$24 sps:$4 sm:$0xff]  }
 0x303   :  { %7564 = vmatpush1.bf16.msra.mxu1 %v18368_v53  ;;  %v8582_v53 = vmul.f32 0.044715, %v24128_v6  ;;  %v304_v5 = vld [vmem:[%s29047_s1 + $0x8c8] sm:$0xff] }
 0x304   :  { %7697 = vmatprep.subr.bf16.mxu1 %v17245_v20 }
 0x305   :  { %8425 = vmatpush1.bf16.msra.mxu0 %v18382_v18 }
 0x306   :  { %15742 = vmatprep.subr.bf16.mxu0 %v19804_v23  ;;  %7566 = vmatmul.mubr.bf16.vlgmr.msra.gmra.mrb[12].mxu1 %v22255_v36 }
 0x307   :  { %7698 = vmatpush1.bf16.msra.mxu1 %v17244_v30  ;;  %7729 = vmatprep.mubr.bf16.mxu1 %v21711_v57  ;;  %v19820_v30 = vld [vmem:[%s29049_s3 + $0x120] ss:$24 sps:$4 sm:$0xff]  }
 0x308   :  { %8427 = vmatmul.mubr.bf16.vlgmr.msra.gmra.mrb[12].mxu0 %v22255_v36  ;;  %7699 = vmatprep.subr.bf16.mxu1 %v17269_v34  ;;  %v220_v34 = vld [vmem:[%s29047_s1 + $0x628] sm:$0xff] }
 0x309   :  { %15743 = vmatpush1.bf16.msra.mxu0 %v19802_v28  ;;  %15774 = vmatprep.mubr.bf16.mxu0 %v24067_v35  ;;  %v8585_v28 = vmul.f32 0.044715, %v24134_v9 }
 0x30a   :  { %15744 = vmatprep.subr.bf16.mxu0 %v19807_v38  ;;  %v17413_v38 = vcombine.high %v196_v16, %v208_v17 }
 0x30b   :  { %7700 = vmatpush1.bf16.msra.mxu1 %v17268_v37  ;;  %v232_v37 = vld [vmem:[%s29047_s1 + $0x688] sm:$0xff] }
 0x30c   :  { %7701 = vmatprep.subr.bf16.mxu1 %v17293_v40  ;;  %v8606_v40 = vmul.f32 %v24128_v6, %v8582_v53  ;;  %v17437_v25 = vcombine.high %v220_v34, %v232_v37  ;;  %v17436_v48 = vcombine.low %v220_v34, %v232_v37  ;;  %v316_v53 = vld [vmem:[%s29047_s1 + $0x928] sm:$0xff]  ;;  %v19838_v34 = vld [vmem:[%s29049_s3 + $0x240] ss:$24 sps:$4 sm:$0xff]  }
 0x30d   :  { %15745 = vmatpush1.bf16.msra.mxu0 %v19805_v39 }
 0x30e   :  { %15746 = vmatprep.subr.bf16.mxu0 %v19810_v41  ;;  %v17412_v41 = vcombine.low %v196_v16, %v208_v17  ;;  %v8630_v46 = vmul.f32 %v24128_v6, %v8606_v40  ;;  %v19837_v16 = vld [vmem:[%s29049_s3 + $0x214] ss:$24 sps:$4 sm:$0xff]  }
 0x30f   :  { %7702 = vmatpush1.bf16.msra.mxu1 %v17292_v43  ;;  %v19828_v43 = vld [vmem:[%s29049_s3 + $0x184] ss:$24 sps:$4 sm:$0xff]   ;;  %v328_v17 = vld [vmem:[%s29047_s1 + $0x988] sm:$0xff] }
 0x310   :  { %7703 = vmatprep.subr.bf16.mxu1 %v17317_v44  ;;  %v8609_v44 = vmul.f32 %v24134_v9, %v8585_v28  ;;  %v8654_v58 = vadd.f32 %v24128_v6, %v8630_v46  ;;  %v19835_v28 = vld [vmem:[%s29049_s3 + $0x210] ss:$24 sps:$4 sm:$0xff]  }
 0x311   :  { %15747 = vmatpush1.bf16.msra.mxu0 %v19808_v1  ;;  %v244_v1 = vld [vmem:[%s29047_s1 + $0x6e8] sm:$0xff] }
 0x312   :  { %15748 = vmatprep.subr.bf16.mxu0 %v19813_v45  ;;  %v256_v45 = vld [vmem:[%s29047_s1 + $0x748] sm:$0xff]  ;;  %v8633_v56 = vmul.f32 %v24134_v9, %v8609_v44 }
 0x313   :  { %7704 = vmatpush1.bf16.msra.mxu1 %v17316_v49  ;;  %v19826_v49 = vld [vmem:[%s29049_s3 + $0x180] ss:$24 sps:$4 sm:$0xff]   ;;  %v364_v40 = vld [vmem:[%s29047_s1 + $0xaa8] sm:$0xff] }
 0x314   :  { %7705 = vmatprep.subr.bf16.mxu1 %v17341_v52  ;;  %v19831_v52 = vld [vmem:[%s29049_s3 + $0x1b4] ss:$24 sps:$4 sm:$0xff]   ;;  %v8657_v3 = vadd.f32 %v24134_v9, %v8633_v56 }
 0x315   :  { %15749 = vmatpush1.bf16.msra.mxu0 %v19811_v51  ;;  %v17461_v51 = vcombine.high %v244_v1, %v256_v45  ;;  %v388_v44 = vld [vmem:[%s29047_s1 + $0xb68] sm:$0xff] }
 0x316   :  { %15750 = vmatprep.subr.bf16.mxu0 %v19816_v54  ;;  %v268_v54 = vld [vmem:[%s29047_s1 + $0x7a8] sm:$0xff] }
 0x317   :  { %7706 = vmatpush1.bf16.msra.mxu1 %v17340_v59  ;;  %v17460_v59 = vcombine.low %v244_v1, %v256_v45  ;;  %v19846_v1 = vld [vmem:[%s29049_s3 + $0x2a4] ss:$24 sps:$4 sm:$0xff]   ;;  %v400_v45 = vld [vmem:[%s29047_s1 + $0xbc8] sm:$0xff] }
 0x318   :  { %7707 = vmatprep.subr.bf16.mxu1 %v17365_v0  ;;  %v19834_v0 = vld [vmem:[%s29049_s3 + $0x1e4] ss:$24 sps:$4 sm:$0xff]   ;;  %v424_v56 = vld [vmem:[%s29047_s1 + $0xc88] sm:$0xff] }
 0x319   :  { %15751 = vmatpush1.bf16.msra.mxu0 %v19814_v63  ;;  %v24146_v18 = vpop.f32.mrb[8].mxu1  ;;  %v17485_v63 = vcombine.high %v268_v54, %v280_v55 }
 0x31a   :  { %15752 = vmatprep.subr.bf16.mxu0 %v19819_v2  ;;  %v24151_v20 = vpop.f32.mrb[9].mxu1  ;;  %v292_v2 = vld [vmem:[%s29047_s1 + $0x868] sm:$0xff] }
 0x31b   :  { %v24153_v23 = vpop.f32.mrb[8].mxu0  ;;  %v7448_v26 = vpop.f32.mrb[10].mxu1  ;;  %7708 = vmatpush1.bf16.msra.mxu1 %v17364_v8  ;;  %v17484_v8 = vcombine.low %v268_v54, %v280_v55  ;;  %v19849_v54 = vld [vmem:[%s29049_s3 + $0x2d4] ss:$24 sps:$4 sm:$0xff]  }
 0x31c   :  { %v24155_v15 = vpop.f32.mrb[9].mxu0  ;;  %v7449_v29 = vpop.f32.mrb[11].mxu1  ;;  %7709 = vmatprep.subr.bf16.mxu1 %v17389_v14  ;;  %v19832_v14 = vld [vmem:[%s29049_s3 + $0x1e0] ss:$24 sps:$4 sm:$0xff]   ;;  %v8681_v26 = vmul.f32 0.7978846, %v8657_v3 }
 0x31d   :  { %15753 = vmatpush1.bf16.msra.mxu0 %v19817_v10  ;;  %v8186_v32 = vpop.f32.mrb[10].mxu0  ;;  %v8678_v10 = vmul.f32 0.7978846, %v8654_v58  ;;  %v17533_v29 = vcombine.high %v316_v53, %v328_v17  ;;  %v412_v55 = vld [vmem:[%s29047_s1 + $0xc28] sm:$0xff]  ;;  %v8561_v3 = vmul.f32 0.5, %v24134_v9 }
 0x31e   :  { %15754 = vmatprep.subr.bf16.mxu0 %v19822_v61  ;;  %v8187_v39 = vpop.f32.mrb[11].mxu0  ;;  %v17509_v61 = vcombine.high %v292_v2, %v304_v5  ;;  %v352_v32 = vld [vmem:[%s29047_s1 + $0xa48] sm:$0xff] }
 0x31f   :  { %7710 = vmatpush1.bf16.msra.mxu1 %v17388_v27  ;;  %v17508_v27 = vcombine.low %v292_v2, %v304_v5  ;;  %21532 = vtanh.f32 %v8678_v10  ;;  %v19843_v39 = vld [vmem:[%s29049_s3 + $0x274] ss:$24 sps:$4 sm:$0xff]   ;;  %v17629_v2 = vcombine.high %v412_v55, %v424_v56  ;;  %v19852_v5 = vld [vmem:[%s29049_s3 + $0x304] ss:$24 sps:$4 sm:$0xff]  }
 0x320   :  { %7711 = vmatprep.subr.bf16.mxu1 %v17413_v38  ;;  %v340_v38 = vld [vmem:[%s29047_s1 + $0x9e8] sm:$0xff]  ;;  %21534 = vtanh.f32 %v8681_v26 }
 0x321   :  { %15755 = vmatpush1.bf16.msra.mxu0 %v19820_v30  ;;  %v19840_v30 = vld [vmem:[%s29049_s3 + $0x244] ss:$24 sps:$4 sm:$0xff]   ;;  %v17557_v37 = vcombine.high %v340_v38, %v352_v32  ;;  %v19855_v9 = vld [vmem:[%s29049_s3 + $0x334] ss:$24 sps:$4 sm:$0xff]  }
 0x322   :  { %15756 = vmatprep.subr.bf16.mxu0 %v19825_v33  ;;  %v17532_v33 = vcombine.low %v316_v53, %v328_v17  ;;  %v460_v26 = vld [vmem:[%s29047_s1 + $0xda8] sm:$0xff] }
 0x323   :  { %7712 = vmatpush1.bf16.msra.mxu1 %v17412_v41  ;;  %v376_v41 = vld [vmem:[%s29047_s1 + $0xb08] sm:$0xff] }
 0x324   :  { %7713 = vmatprep.subr.bf16.mxu1 %v17437_v25  ;;  %v19841_v25 = vld [vmem:[%s29049_s3 + $0x270] ss:$24 sps:$4 sm:$0xff]  }
 0x325   :  { %15757 = vmatpush1.bf16.msra.mxu0 %v19823_v42  ;;  %v17556_v42 = vcombine.low %v340_v38, %v352_v32  ;;  %v19858_v32 = vld [vmem:[%s29049_s3 + $0x364] ss:$24 sps:$4 sm:$0xff]  }
 0x326   :  { %15758 = vmatprep.subr.bf16.mxu0 %v19828_v43  ;;  %v17581_v43 = vcombine.high %v364_v40, %v376_v41 }
 0x327   :  { %7714 = vmatpush1.bf16.msra.mxu1 %v17436_v48 }
 0x328   :  { %7715 = vmatprep.subr.bf16.mxu1 %v17461_v51  ;;  %v19844_v51 = vld [vmem:[%s29049_s3 + $0x2a0] ss:$24 sps:$4 sm:$0xff]  }
 0x329   :  { %15759 = vmatpush1.bf16.msra.mxu0 %v19826_v49  ;;  %v21533_v46 = vpop.eup %21532  ;;  %v17580_v49 = vcombine.low %v364_v40, %v376_v41  ;;  %v19861_v41 = vld [vmem:[%s29049_s3 + $0x394] ss:$24 sps:$4 sm:$0xff]  }
 0x32a   :  { %15760 = vmatprep.subr.bf16.mxu0 %v19831_v52  ;;  %v21535_v48 = vpop.eup %21534  ;;  %v17605_v52 = vcombine.high %v388_v44, %v400_v45  ;;  %v8726_v58 = vadd.f32 1.0, %v21533_v46  ;;  %v19864_v46 = vld [vmem:[%s29049_s3 + $0x3c4] ss:$24 sps:$4 sm:$0xff]  }
 0x32b   :  { %7716 = vmatpush1.bf16.msra.mxu1 %v17460_v59  ;;  %v8729_v59 = vadd.f32 1.0, %v21535_v48  ;;  %v532_v48 = vld [vmem:[%s29047_s1 + $0xfe8] sm:$0xff] }
 0x32c   :  { %7717 = vmatprep.subr.bf16.mxu1 %v17485_v63  ;;  %v8558_v63 = vmul.f32 0.5, %v24128_v6  ;;  %v448_v6 = vld [vmem:[%s29047_s1 + $0xd48] sm:$0xff] }
 0x32d   :  { %15761 = vmatpush1.bf16.msra.mxu0 %v19829_v60  ;;  %v17604_v60 = vcombine.low %v388_v44, %v400_v45  ;;  %v19859_v44 = vld [vmem:[%s29049_s3 + $0x390] ss:$24 sps:$4 sm:$0xff]  }
 0x32e   :  { %15762 = vmatprep.subr.bf16.mxu0 %v19834_v0  ;;  %v19847_v0 = vld [vmem:[%s29049_s3 + $0x2d0] ss:$24 sps:$4 sm:$0xff]   ;;  %v8750_v10 = vmul.f32 %v8726_v58, %v8558_v63 }
 0x32f   :  { %7718 = vmatpush1.bf16.msra.mxu1 %v17484_v8  ;;  %v436_v8 = vld [vmem:[%s29047_s1 + $0xce8] sm:$0xff] }
 0x330   :  { %7719 = vmatprep.subr.bf16.mxu1 %v17509_v61  ;;  %v8753_v61 = vmul.f32 %v8729_v59, %v8561_v3  ;;  %v24292_v53 = vpack.c.bf16 %v8750_v10, %v8750_v10  ;;  %v17653_v17 = vcombine.high %v436_v8, %v448_v6  ;;  %v19867_v59 = vld [vmem:[%s29049_s3 + $0x3f4] ss:$24 sps:$4 sm:$0xff]  }
 0x331   :  { %15763 = vmatpush1.bf16.msra.mxu0 %v19832_v14  ;;  %v19850_v14 = vld [vmem:[%s29049_s3 + $0x300] ss:$24 sps:$4 sm:$0xff]   ;;  %v580_v10 = vld [vmem:[%s29047_s1 + $0x1168] sm:$0xff] }
 0x332   :  { %15764 = vmatprep.subr.bf16.mxu0 %v19837_v16  ;;  %v17628_v16 = vcombine.low %v412_v55, %v424_v56  ;;  %v19862_v56 = vld [vmem:[%s29049_s3 + $0x3c0] ss:$24 sps:$4 sm:$0xff]  }
 0x333   :  { %7720 = vmatpush1.bf16.msra.mxu1 %v17508_v27  ;;  %v472_v27 = vld [vmem:[%s29047_s1 + $0xe08] sm:$0xff] }
 0x334   :  { %7721 = vmatprep.subr.bf16.mxu1 %v17533_v29  ;;  %v17652_v29 = vcombine.low %v436_v8, %v448_v6  ;;  %v17677_v38 = vcombine.high %v460_v26, %v472_v27  ;;  %v19870_v8 = vld [vmem:[%s29049_s3 + $0x424] ss:$24 sps:$4 sm:$0xff]   ;;  %v592_v6 = vld [vmem:[%s29047_s1 + $0x11c8] sm:$0xff] }
 0x335   :  { %15765 = vmatpush1.bf16.msra.mxu0 %v19835_v28  ;;  %v24301_v28 = vpack.c.bf16 %v8753_v61, %v8753_v61  ;;  %v19868_v61 = vld [vmem:[%s29049_s3 + $0x420] ss:$24 sps:$4 sm:$0xff]  }
 0x336   :  { %15766 = vmatprep.subr.bf16.mxu0 %v19840_v30  ;;  %v19853_v30 = vld [vmem:[%s29049_s3 + $0x330] ss:$24 sps:$4 sm:$0xff]  }
 0x337   :  { %7722 = vmatpush1.bf16.msra.mxu1 %v17532_v33  ;;  %v484_v33 = vld [vmem:[%s29047_s1 + $0xe68] sm:$0xff] }
 0x338   :  { %7723 = vmatprep.subr.bf16.mxu1 %v17557_v37  ;;  %v17676_v37 = vcombine.low %v460_v26, %v472_v27  ;;  %v604_v26 = vld [vmem:[%s29047_s1 + $0x1228] sm:$0xff] }
 0x339   :  { %15767 = vmatpush1.bf16.msra.mxu0 %v19838_v34  ;;  %v496_v34 = vld [vmem:[%s29047_s1 + $0xec8] sm:$0xff] }
 0x33a   :  { %15768 = vmatprep.subr.bf16.mxu0 %v19843_v39  ;;  %v19856_v39 = vld [vmem:[%s29049_s3 + $0x360] ss:$24 sps:$4 sm:$0xff]   ;;  %v17701_v40 = vcombine.high %v484_v33, %v496_v34  ;;  %v616_v27 = vld [vmem:[%s29047_s1 + $0x1288] sm:$0xff] }
 0x33b   :  { %7724 = vmatpush1.bf16.msra.mxu1 %v17556_v42  ;;  %v508_v42 = vld [vmem:[%s29047_s1 + $0xf28] sm:$0xff] }
 0x33c   :  { %7725 = vmatprep.subr.bf16.mxu1 %v17581_v43  ;;  %v24331_v43 = vsub.s32 2, %v23884_v62 }
 0x33d   :  { %15769 = vmatpush1.bf16.msra.mxu0 %v19841_v25  ;;  %v520_v25 = vld [vmem:[%s29047_s1 + $0xf88] sm:$0xff] }
 0x33e   :  { %15770 = vmatprep.subr.bf16.mxu0 %v19846_v1  ;;  %v17700_v1 = vcombine.low %v484_v33, %v496_v34  ;;  %v17725_v45 = vcombine.high %v508_v42, %v520_v25  ;;  %v17724_v55 = vcombine.low %v508_v42, %v520_v25  ;;  %v19876_v33 = vld [vmem:[%s29049_s3 + $0x484] ss:$24 sps:$4 sm:$0xff]   ;;  %v628_v34 = vld [vmem:[%s29047_s1 + $0x12e8] sm:$0xff]  ;;  %v17820_v42 = vcombine.low %v604_v26, %v616_v27  ;;  %v19874_v25 = vld [vmem:[%s29049_s3 + $0x480] ss:$24 sps:$4 sm:$0xff]  }
 0x33f   :  { %7726 = vmatpush1.bf16.msra.mxu1 %v17580_v49  ;;  %v544_v49 = vld [vmem:[%s29047_s1 + $0x1048] sm:$0xff] }
 0x340   :  { %7727 = vmatprep.subr.bf16.mxu1 %v17605_v52  ;;  %v17749_v58 = vcombine.high %v532_v48, %v544_v49  ;;  %v17748_v3 = vcombine.low %v532_v48, %v544_v49 }
 0x341   :  { %15771 = vmatpush1.bf16.msra.mxu0 %v19844_v51  ;;  %v24348_v51 = vld [vmem:[%s29050_s2] sm:$0xff] }
 0x342   :  { %15772 = vmatprep.subr.bf16.mxu0 %v19849_v54  ;;  %v1192_v52 = vrot.slane %v24348_v51, %v24331_v43  ;;  %v24353_v54 = vsub.s32 5, %v23884_v62 }
 0x343   :  { %7728 = vmatpush1.bf16.msra.mxu1 %v17604_v60  ;;  %v556_v60 = vld [vmem:[%s29047_s1 + $0x10a8] sm:$0xff] }
 0x344   :  { %7738 = vmatprep.subr.bf16.mxu1 %v17629_v2  ;;  %v1204_v63 = vrot.slane %v24348_v51, %v24353_v54  ;;  %v19865_v2 = vld [vmem:[%s29049_s3 + $0x3f0] ss:$24 sps:$4 sm:$0xff]  }
 0x345   :  { %15773 = vmatpush1.bf16.msra.mxu0 %v19847_v0  ;;  %v568_v0 = vld [vmem:[%s29047_s1 + $0x1108] sm:$0xff] }
 0x346   :  { %15783 = vmatprep.subr.bf16.mxu0 %v19852_v5  ;;  %7730 = vmatmul.mubr.bf16.vlgmr.msra.gmra.mrb[16].mxu1 %v21837_v12  ;;  %v24373_v5 = vadd.f32 %v23511_v11, %v1192_v52  ;;  %v24385_v11 = vadd.f32 %v24151_v20, %v1204_v63  ;;  %v17797_v20 = vcombine.high %v580_v10, %v592_v6 }
 0x347   :  { %7739 = vmatpush1.bf16.msra.mxu1 %v17628_v16  ;;  %7770 = vmatprep.mubr.bf16.mxu1 %v21858_v21 }
 0x348   :  { %15775 = vmatmul.mubr.bf16.vlgmr.msra.gmra.mrb[16].mxu0 %v24292_v53  ;;  %7740 = vmatprep.subr.bf16.mxu1 %v17653_v17  ;;  %v8584_v16 = vmul.f32 0.044715, %v24373_v5  ;;  %v19873_v17 = vld [vmem:[%s29049_s3 + $0x454] ss:$24 sps:$4 sm:$0xff]  }
 0x349   :  { %15784 = vmatpush1.bf16.msra.mxu0 %v19850_v14  ;;  %15815 = vmatprep.mubr.bf16.mxu0 %v24301_v28  ;;  %v17773_v14 = vcombine.high %v556_v60, %v568_v0 }
 0x34a   :  { %15785 = vmatprep.subr.bf16.mxu0 %v19855_v9  ;;  %v17772_v9 = vcombine.low %v556_v60, %v568_v0  ;;  %v688_v60 = vld [vmem:[%s29047_s1 + $0x14c8] sm:$0xff] }
 0x34b   :  { %7741 = vmatpush1.bf16.msra.mxu1 %v17652_v29  ;;  %v8587_v29 = vmul.f32 0.044715, %v24385_v11 }
 0x34c   :  { %7742 = vmatprep.subr.bf16.mxu1 %v17677_v38  ;;  %v8608_v38 = vmul.f32 %v24373_v5, %v8584_v16 }
 0x34d   :  { %15786 = vmatpush1.bf16.msra.mxu0 %v19853_v30  ;;  %v19871_v30 = vld [vmem:[%s29049_s3 + $0x450] ss:$24 sps:$4 sm:$0xff]  }
 0x34e   :  { %15787 = vmatprep.subr.bf16.mxu0 %v19858_v32  ;;  %v17796_v32 = vcombine.low %v580_v10, %v592_v6  ;;  %v19885_v10 = vld [vmem:[%s29049_s3 + $0x514] ss:$24 sps:$4 sm:$0xff]  }
 0x34f   :  { %7743 = vmatpush1.bf16.msra.mxu1 %v17676_v37  ;;  %v17821_v37 = vcombine.high %v604_v26, %v616_v27  ;;  %v700_v6 = vld [vmem:[%s29047_s1 + $0x1528] sm:$0xff]  ;;  %v19888_v26 = vld [vmem:[%s29049_s3 + $0x544] ss:$24 sps:$4 sm:$0xff]  }
 0x350   :  { %7744 = vmatprep.subr.bf16.mxu1 %v17701_v40  ;;  %v8611_v40 = vmul.f32 %v24385_v11, %v8587_v29  ;;  %v736_v27 = vld [vmem:[%s29047_s1 + $0x1648] sm:$0xff] }
 0x351   :  { %15788 = vmatpush1.bf16.msra.mxu0 %v19856_v39  ;;  %v640_v39 = vld [vmem:[%s29047_s1 + $0x1348] sm:$0xff] }
 0x352   :  { %15789 = vmatprep.subr.bf16.mxu0 %v19861_v41  ;;  %v8632_v41 = vmul.f32 %v24373_v5, %v8608_v38  ;;  %v8635_v48 = vmul.f32 %v24385_v11, %v8611_v40  ;;  %v17844_v52 = vcombine.low %v628_v34, %v640_v39 }
 0x353   :  { %7745 = vmatpush1.bf16.msra.mxu1 %v17700_v1  ;;  %v17845_v1 = vcombine.high %v628_v34, %v640_v39  ;;  %v760_v34 = vld [vmem:[%s29047_s1 + $0x1708] sm:$0xff] }
 0x354   :  { %7746 = vmatprep.subr.bf16.mxu1 %v17725_v45  ;;  %v652_v45 = vld [vmem:[%s29047_s1 + $0x13a8] sm:$0xff]  ;;  %v8656_v49 = vadd.f32 %v24373_v5, %v8632_v41  ;;  %v8659_v63 = vadd.f32 %v24385_v11, %v8635_v48  ;;  %v19894_v41 = vld [vmem:[%s29049_s3 + $0x5a4] ss:$24 sps:$4 sm:$0xff]  }
 0x355   :  { %15790 = vmatpush1.bf16.msra.mxu0 %v19859_v44  ;;  %v19879_v44 = vld [vmem:[%s29049_s3 + $0x4b4] ss:$24 sps:$4 sm:$0xff]   ;;  %v19889_v39 = vld [vmem:[%s29049_s3 + $0x570] ss:$24 sps:$4 sm:$0xff]  }
 0x356   :  { %15791 = vmatprep.subr.bf16.mxu0 %v19864_v46  ;;  %v664_v46 = vld [vmem:[%s29047_s1 + $0x1408] sm:$0xff] }
 0x357   :  { %7747 = vmatpush1.bf16.msra.mxu1 %v17724_v55  ;;  %v19877_v55 = vld [vmem:[%s29049_s3 + $0x4b0] ss:$24 sps:$4 sm:$0xff]   ;;  %v17868_v0 = vcombine.low %v652_v45, %v664_v46 }
 0x358   :  { %7748 = vmatprep.subr.bf16.mxu1 %v17749_v58  ;;  %v19882_v58 = vld [vmem:[%s29049_s3 + $0x4e4] ss:$24 sps:$4 sm:$0xff]  }
 0x359   :  { %15792 = vmatpush1.bf16.msra.mxu0 %v19862_v56  ;;  %v17869_v56 = vcombine.high %v652_v45, %v664_v46  ;;  %v19892_v46 = vld [vmem:[%s29049_s3 + $0x5a0] ss:$24 sps:$4 sm:$0xff]  }
 0x35a   :  { %15793 = vmatprep.subr.bf16.mxu0 %v19867_v59  ;;  %v676_v59 = vld [vmem:[%s29047_s1 + $0x1468] sm:$0xff] }
 0x35b   :  { %7749 = vmatpush1.bf16.msra.mxu1 %v17748_v3  ;;  %v19880_v3 = vld [vmem:[%s29049_s3 + $0x4e0] ss:$24 sps:$4 sm:$0xff]   ;;  %v17892_v16 = vcombine.low %v676_v59, %v688_v60 }
 0x35c   :  { %7750 = vmatprep.subr.bf16.mxu1 %v17773_v14  ;;  %v712_v14 = vld [vmem:[%s29047_s1 + $0x1588] sm:$0xff] }
 0x35d   :  { %15794 = vmatpush1.bf16.msra.mxu0 %v19865_v2  ;;  %v8680_v2 = vmul.f32 0.7978846, %v8656_v49  ;;  %v17916_v29 = vcombine.low %v700_v6, %v712_v14  ;;  %v19897_v49 = vld [vmem:[%s29049_s3 + $0x5d4] ss:$24 sps:$4 sm:$0xff]  }
 0x35e   :  { %15795 = vmatprep.subr.bf16.mxu0 %v19870_v8  ;;  %v17893_v8 = vcombine.high %v676_v59, %v688_v60  ;;  %v8560_v60 = vmul.f32 0.5, %v24373_v5  ;;  %v832_v5 = vld [vmem:[%s29047_s1 + $0x1948] sm:$0xff] }
 0x35f   :  { %7751 = vmatpush1.bf16.msra.mxu1 %v17772_v9  ;;  %v19883_v9 = vld [vmem:[%s29049_s3 + $0x510] ss:$24 sps:$4 sm:$0xff]   ;;  %21536 = vtanh.f32 %v8680_v2  ;;  %v19900_v2 = vld [vmem:[%s29049_s3 + $0x604] ss:$24 sps:$4 sm:$0xff]  }
 0x360   :  { %7752 = vmatprep.subr.bf16.mxu1 %v17797_v20  ;;  %v724_v20 = vld [vmem:[%s29047_s1 + $0x15e8] sm:$0xff] }
 0x361   :  { %15796 = vmatpush1.bf16.msra.mxu0 %v19868_v61  ;;  %v8683_v61 = vmul.f32 0.7978846, %v8659_v63  ;;  %v17941_v38 = vcombine.high %v724_v20, %v736_v27  ;;  %v19895_v63 = vld [vmem:[%s29049_s3 + $0x5d0] ss:$24 sps:$4 sm:$0xff]  }
 0x362   :  { %15797 = vmatprep.subr.bf16.mxu0 %v19873_v17  ;;  %v17917_v17 = vcombine.high %v700_v6, %v712_v14  ;;  %v19898_v6 = vld [vmem:[%s29049_s3 + $0x600] ss:$24 sps:$4 sm:$0xff]  }
 0x363   :  { %7753 = vmatpush1.bf16.msra.mxu1 %v17796_v32  ;;  %21538 = vtanh.f32 %v8683_v61  ;;  %v19891_v32 = vld [vmem:[%s29049_s3 + $0x574] ss:$24 sps:$4 sm:$0xff]  }
 0x364   :  { %7754 = vmatprep.subr.bf16.mxu1 %v17821_v37  ;;  %v17940_v37 = vcombine.low %v724_v20, %v736_v27 }
 0x365   :  { %15798 = vmatpush1.bf16.msra.mxu0 %v19871_v30  ;;  %v19886_v30 = vld [vmem:[%s29049_s3 + $0x540] ss:$24 sps:$4 sm:$0xff]  }
 0x366   :  { %15799 = vmatprep.subr.bf16.mxu0 %v19876_v33  ;;  %v748_v33 = vld [vmem:[%s29047_s1 + $0x16a8] sm:$0xff] }
 0x367   :  { %7755 = vmatpush1.bf16.msra.mxu1 %v17820_v42  ;;  %v17965_v40 = vcombine.high %v748_v33, %v760_v34  ;;  %v772_v42 = vld [vmem:[%s29047_s1 + $0x1768] sm:$0xff]  ;;  %v17964_v45 = vcombine.low %v748_v33, %v760_v34 }
 0x368   :  { %7756 = vmatprep.subr.bf16.mxu1 %v17845_v1  ;;  %v880_v33 = vld [vmem:[%s29047_s1 + $0x1ac8] sm:$0xff] }
 0x369   :  { %15800 = vmatpush1.bf16.msra.mxu0 %v19874_v25  ;;  %v784_v25 = vld [vmem:[%s29047_s1 + $0x17c8] sm:$0xff]  ;;  %v21537_v1 = vpop.eup %21536 }
 0x36a   :  { %15801 = vmatprep.subr.bf16.mxu0 %v19879_v44  ;;  %v17989_v48 = vcombine.high %v772_v42, %v784_v25  ;;  %v17988_v59 = vcombine.low %v772_v42, %v784_v25  ;;  %v904_v42 = vld [vmem:[%s29047_s1 + $0x1b88] sm:$0xff] }
 0x36b   :  { %7757 = vmatpush1.bf16.msra.mxu1 %v17844_v52  ;;  %v796_v52 = vld [vmem:[%s29047_s1 + $0x1828] sm:$0xff] }
 0x36c   :  { %7758 = vmatprep.subr.bf16.mxu1 %v17869_v56  ;;  %v8728_v56 = vadd.f32 1.0, %v21537_v1  ;;  %v19907_v1 = vld [vmem:[%s29049_s3 + $0x690] ss:$24 sps:$4 sm:$0xff]  }
 0x36d   :  { %15802 = vmatpush1.bf16.msra.mxu0 %v19877_v55  ;;  %v21539_v44 = vpop.eup %21538  ;;  %v808_v55 = vld [vmem:[%s29047_s1 + $0x1888] sm:$0xff] }
 0x36e   :  { %15803 = vmatprep.subr.bf16.mxu0 %v19882_v58  ;;  %v8731_v58 = vadd.f32 1.0, %v21539_v44  ;;  %v18012_v61 = vcombine.low %v796_v52, %v808_v55 }
 0x36f   :  { %7759 = vmatpush1.bf16.msra.mxu1 %v17868_v0  ;;  %v18013_v0 = vcombine.high %v796_v52, %v808_v55 }
 0x370   :  { %7760 = vmatprep.subr.bf16.mxu1 %v17893_v8  ;;  %v820_v8 = vld [vmem:[%s29047_s1 + $0x18e8] sm:$0xff] }
 0x371   :  { %15804 = vmatpush1.bf16.msra.mxu0 %v19880_v3  ;;  %v8563_v3 = vmul.f32 0.5, %v24385_v11  ;;  %v19903_v11 = vld [vmem:[%s29049_s3 + $0x634] ss:$24 sps:$4 sm:$0xff]   ;;  %v18036_v27 = vcombine.low %v820_v8, %v832_v5 }
 0x372   :  { %15805 = vmatprep.subr.bf16.mxu0 %v19885_v10  ;;  %v8752_v10 = vmul.f32 %v8728_v56, %v8560_v60  ;;  %v19910_v56 = vld [vmem:[%s29049_s3 + $0x6c0] ss:$24 sps:$4 sm:$0xff]   ;;  %v940_v60 = vld [vmem:[%s29047_s1 + $0x1ca8] sm:$0xff] }
 0x373   :  { %7761 = vmatpush1.bf16.msra.mxu1 %v17892_v16  ;;  %v8755_v14 = vmul.f32 %v8731_v58, %v8563_v3  ;;  %v844_v16 = vld [vmem:[%s29047_s1 + $0x19a8] sm:$0xff] }
 0x374   :  { %7762 = vmatprep.subr.bf16.mxu1 %v17917_v17  ;;  %v24529_v17 = vpack.c.bf16 %v8752_v10, %v8752_v10  ;;  %v964_v10 = vld [vmem:[%s29047_s1 + $0x1d68] sm:$0xff] }
 0x375   :  { %15806 = vmatpush1.bf16.msra.mxu0 %v19883_v9  ;;  %v856_v9 = vld [vmem:[%s29047_s1 + $0x1a08] sm:$0xff]  ;;  %v24532_v20 = vpack.c.bf16 %v8755_v14, %v8755_v14  ;;  %v19916_v14 = vld [vmem:[%s29049_s3 + $0x720] ss:$24 sps:$4 sm:$0xff]  }
 0x376   :  { %15807 = vmatprep.subr.bf16.mxu0 %v19888_v26  ;;  %v18037_v26 = vcombine.high %v820_v8, %v832_v5  ;;  %v18060_v34 = vcombine.low %v844_v16, %v856_v9  ;;  %v19918_v8 = vld [vmem:[%s29049_s3 + $0x724] ss:$24 sps:$4 sm:$0xff]  }
 0x377   :  { %7763 = vmatpush1.bf16.msra.mxu1 %v17916_v29  ;;  %v19901_v29 = vld [vmem:[%s29049_s3 + $0x630] ss:$24 sps:$4 sm:$0xff]  }
 0x378   :  { %7764 = vmatprep.subr.bf16.mxu1 %v17941_v38  ;;  %v19906_v38 = vld [vmem:[%s29049_s3 + $0x664] ss:$24 sps:$4 sm:$0xff]  }
 0x379   :  { %15808 = vmatpush1.bf16.msra.mxu0 %v19886_v30  ;;  %v18061_v30 = vcombine.high %v844_v16, %v856_v9  ;;  %v988_v16 = vld [vmem:[%s29047_s1 + $0x1e28] sm:$0xff] }
 0x37a   :  { %15809 = vmatprep.subr.bf16.mxu0 %v19891_v32  ;;  %v868_v32 = vld [vmem:[%s29047_s1 + $0x1a68] sm:$0xff] }
 0x37b   :  { %7765 = vmatpush1.bf16.msra.mxu1 %v17940_v37  ;;  %v19904_v37 = vld [vmem:[%s29049_s3 + $0x660] ss:$24 sps:$4 sm:$0xff]   ;;  %v18084_v25 = vcombine.low %v868_v32, %v880_v33  ;;  %v1000_v9 = vld [vmem:[%s29047_s1 + $0x1e88] sm:$0xff] }
 0x37c   :  { %7766 = vmatprep.subr.bf16.mxu1 %v17965_v40  ;;  %v19909_v40 = vld [vmem:[%s29049_s3 + $0x694] ss:$24 sps:$4 sm:$0xff]  }
 0x37d   :  { %15810 = vmatpush1.bf16.msra.mxu0 %v19889_v39  ;;  %v18085_v39 = vcombine.high %v868_v32, %v880_v33  ;;  %v1012_v32 = vld [vmem:[%s29047_s1 + $0x1ee8] sm:$0xff] }
 0x37e   :  { %15811 = vmatprep.subr.bf16.mxu0 %v19894_v41  ;;  %v892_v41 = vld [vmem:[%s29047_s1 + $0x1b28] sm:$0xff] }
 0x37f   :  { %7767 = vmatpush1.bf16.msra.mxu1 %v17964_v45  ;;  %v18109_v44 = vcombine.high %v892_v41, %v904_v42  ;;  %v19912_v45 = vld [vmem:[%s29049_s3 + $0x6c4] ss:$24 sps:$4 sm:$0xff]   ;;  %v18108_v55 = vcombine.low %v892_v41, %v904_v42  ;;  %v1024_v33 = vld [vmem:[%s29047_s1 + $0x1f48] sm:$0xff] }
 0x380   :  { %7768 = vmatprep.subr.bf16.mxu1 %v17989_v48  ;;  %v24571_v48 = vsub.s32 4, %v23884_v62  ;;  %v19927_v41 = vld [vmem:[%s29049_s3 + $0x7b4] ss:$24 sps:$4 sm:$0xff]  }
 0x381   :  { %15812 = vmatpush1.bf16.msra.mxu0 %v19892_v46  ;;  %v916_v46 = vld [vmem:[%s29047_s1 + $0x1be8] sm:$0xff] }
 0x382   :  { %15813 = vmatprep.subr.bf16.mxu0 %v19897_v49  ;;  %v928_v49 = vld [vmem:[%s29047_s1 + $0x1c48] sm:$0xff]  ;;  %v1200_v52 = vrot.slane %v24348_v51, %v24571_v48 }
 0x383   :  { %7769 = vmatpush1.bf16.msra.mxu1 %v17988_v59  ;;  %v18133_v58 = vcombine.high %v916_v46, %v928_v49  ;;  %v19915_v59 = vld [vmem:[%s29049_s3 + $0x6f4] ss:$24 sps:$4 sm:$0xff]  }
 0x384   :  { %7779 = vmatprep.subr.bf16.mxu1 %v18013_v0  ;;  %v952_v51 = vld [vmem:[%s29047_s1 + $0x1d08] sm:$0xff]  ;;  %v18132_v0 = vcombine.low %v916_v46, %v928_v49  ;;  %v19930_v49 = vld [vmem:[%s29049_s3 + $0x7e4] ss:$24 sps:$4 sm:$0xff]  }
 0x385   :  { %15814 = vmatpush1.bf16.msra.mxu0 %v19895_v63  ;;  %v24591_v63 = vadd.f32 %v24146_v18, %v1200_v52  ;;  %v18157_v3 = vcombine.high %v940_v60, %v952_v51  ;;  %v976_v18 = vld [vmem:[%s29047_s1 + $0x1dc8] sm:$0xff] }
 0x386   :  { %15824 = vmatprep.subr.bf16.mxu0 %v19900_v2  ;;  %7771 = vmatmul.mubr.bf16.vlgmr.msra.gmra.mrb[16].mxu1 %v22046_v22  ;;  %v19913_v2 = vld [vmem:[%s29049_s3 + $0x6f0] ss:$24 sps:$4 sm:$0xff]  }
 0x387   :  { %7780 = vmatpush1.bf16.msra.mxu1 %v18012_v61  ;;  %7811 = vmatprep.mubr.bf16.mxu1 %v22067_v31  ;;  %v8586_v5 = vmul.f32 0.044715, %v24591_v63  ;;  %v18181_v61 = vcombine.high %v964_v10, %v976_v18  ;;  %v1036_v42 = vld [vmem:[%s29047_s1 + $0x1fa8] sm:$0xff] }
 0x388   :  { %15816 = vmatmul.mubr.bf16.vlgmr.msra.gmra.mrb[16].mxu0 %v24529_v17  ;;  %7781 = vmatprep.subr.bf16.mxu1 %v18037_v26  ;;  %v1060_v52 = vld [vmem:[%s29047_s1 + $0x2068] sm:$0xff] }
 0x389   :  { %15825 = vmatpush1.bf16.msra.mxu0 %v19898_v6  ;;  %15856 = vmatprep.mubr.bf16.mxu0 %v24532_v20  ;;  %v18156_v6 = vcombine.low %v940_v60, %v952_v51  ;;  %v8610_v26 = vmul.f32 %v24591_v63, %v8586_v5  ;;  %v19933_v51 = vld [vmem:[%s29049_s3 + $0x814] ss:$24 sps:$4 sm:$0xff]  }
 0x38a   :  { %15826 = vmatprep.subr.bf16.mxu0 %v19903_v11  ;;  %v19921_v11 = vld [vmem:[%s29049_s3 + $0x754] ss:$24 sps:$4 sm:$0xff]  }
 0x38b   :  { %7782 = vmatpush1.bf16.msra.mxu1 %v18036_v27  ;;  %v18180_v27 = vcombine.low %v964_v10, %v976_v18  ;;  %v19936_v18 = vld [vmem:[%s29049_s3 + $0x844] ss:$24 sps:$4 sm:$0xff]   ;;  %v1108_v5 = vld [vmem:[%s29047_s1 + $0x21e8] sm:$0xff] }
 0x38c   :  { %7783 = vmatprep.subr.bf16.mxu1 %v18061_v30  ;;  %v18205_v30 = vcombine.high %v988_v16, %v1000_v9 }
 0x38d   :  { %15827 = vmatpush1.bf16.msra.mxu0 %v19901_v29  ;;  %v19919_v29 = vld [vmem:[%s29049_s3 + $0x750] ss:$24 sps:$4 sm:$0xff]  }
 0x38e   :  { %15828 = vmatprep.subr.bf16.mxu0 %v19906_v38  ;;  %v19924_v38 = vld [vmem:[%s29049_s3 + $0x784] ss:$24 sps:$4 sm:$0xff]  }
 0x38f   :  { %7784 = vmatpush1.bf16.msra.mxu1 %v18060_v34  ;;  %v8634_v34 = vmul.f32 %v24591_v63, %v8610_v26  ;;  %v1144_v26 = vld [vmem:[%s29047_s1 + $0x2308] sm:$0xff] }
 0x390   :  { %7785 = vmatprep.subr.bf16.mxu1 %v18085_v39  ;;  %v19922_v39 = vld [vmem:[%s29049_s3 + $0x780] ss:$24 sps:$4 sm:$0xff]  }
 0x391   :  { %15829 = vmatpush1.bf16.msra.mxu0 %v19904_v37  ;;  %v18204_v37 = vcombine.low %v988_v16, %v1000_v9  ;;  %v19939_v16 = vld [vmem:[%s29049_s3 + $0x874] ss:$24 sps:$4 sm:$0xff]  }
 0x392   :  { %15830 = vmatprep.subr.bf16.mxu0 %v19909_v40  ;;  %v18229_v40 = vcombine.high %v1012_v32, %v1024_v33  ;;  %v1132_v9 = vld [vmem:[%s29047_s1 + $0x22a8] sm:$0xff] }
 0x393   :  { %7786 = vmatpush1.bf16.msra.mxu1 %v18084_v25  ;;  %v1048_v25 = vld [vmem:[%s29047_s1 + $0x2008] sm:$0xff] }
 0x394   :  { %7787 = vmatprep.subr.bf16.mxu1 %v18109_v44  ;;  %v18228_v44 = vcombine.low %v1012_v32, %v1024_v33  ;;  %v18253_v46 = vcombine.high %v1036_v42, %v1048_v25  ;;  %v1156_v32 = vld [vmem:[%s29047_s1 + $0x2368] sm:$0xff] }
 0x395   :  { %15831 = vmatpush1.bf16.msra.mxu0 %v19907_v1  ;;  %v8658_v1 = vadd.f32 %v24591_v63, %v8634_v34  ;;  %v1168_v33 = vld [vmem:[%s29047_s1 + $0x23c8] sm:$0xff] }
 0x396   :  { %15832 = vmatprep.subr.bf16.mxu0 %v19912_v45  ;;  %v19925_v45 = vld [vmem:[%s29049_s3 + $0x7b0] ss:$24 sps:$4 sm:$0xff]  }
 0x397   :  { %7788 = vmatpush1.bf16.msra.mxu1 %v18108_v55  ;;  %v1072_v55 = vld [vmem:[%s29047_s1 + $0x20c8] sm:$0xff] }
 0x398   :  { %7789 = vmatprep.subr.bf16.mxu1 %v18133_v58  ;;  %v8682_v58 = vmul.f32 0.7978846, %v8658_v1  ;;  %v18277_v60 = vcombine.high %v1060_v52, %v1072_v55 }
 0x399   :  { %15833 = vmatpush1.bf16.msra.mxu0 %v19910_v56  ;;  %v18252_v56 = vcombine.low %v1036_v42, %v1048_v25  ;;  %v30_v42 = vld [vmem:[%s29047_s1 + $0x38] sm:$0xff] }
 0x39a   :  { %15834 = vmatprep.subr.bf16.mxu0 %v19915_v59  ;;  %v19928_v59 = vld [vmem:[%s29049_s3 + $0x7e0] ss:$24 sps:$4 sm:$0xff]   ;;  %21540 = vtanh.f32 %v8682_v58 }
 0x39b   :  { %7790 = vmatpush1.bf16.msra.mxu1 %v18132_v0  ;;  %v1084_v0 = vld [vmem:[%s29047_s1 + $0x2128] sm:$0xff]  ;;  %v42_v25 = vld [vmem:[%s29047_s1 + $0x98] sm:$0xff] }
 0x39c   :  { %7791 = vmatprep.subr.bf16.mxu1 %v18157_v3  ;;  %v18276_v3 = vcombine.low %v1060_v52, %v1072_v55  ;;  %v19948_v52 = vld [vmem:[%s29049_s3 + $0x904] ss:$24 sps:$4 sm:$0xff]   ;;  %v19946_v58 = vld [vmem:[%s29049_s3 + $0x900] ss:$24 sps:$4 sm:$0xff]  }
 0x39d   :  { %15835 = vmatpush1.bf16.msra.mxu0 %v19913_v2  ;;  %v1096_v2 = vld [vmem:[%s29047_s1 + $0x2188] sm:$0xff]  ;;  %v54_v55 = vld [vmem:[%s29047_s1 + $0xf8] sm:$0xff] }
 0x39e   :  { %15836 = vmatprep.subr.bf16.mxu0 %v19918_v8  ;;  %v19931_v8 = vld [vmem:[%s29049_s3 + $0x810] ss:$24 sps:$4 sm:$0xff]   ;;  %v18301_v10 = vcombine.high %v1084_v0, %v1096_v2 }
 0x39f   :  { %7792 = vmatpush1.bf16.msra.mxu1 %v18156_v6  ;;  %v1120_v6 = vld [vmem:[%s29047_s1 + $0x2248] sm:$0xff] }
 0x3a0   :  { %7793 = vmatprep.subr.bf16.mxu1 %v18181_v61  ;;  %v19934_v61 = vld [vmem:[%s29049_s3 + $0x840] ss:$24 sps:$4 sm:$0xff]  }
 0x3a1   :  { %15837 = vmatpush1.bf16.msra.mxu0 %v19916_v14  ;;  %v18300_v14 = vcombine.low %v1084_v0, %v1096_v2  ;;  %v78_v0 = vld [vmem:[%s29047_s1 + $0x1b8] sm:$0xff] }
 0x3a2   :  { %15838 = vmatprep.subr.bf16.mxu0 %v19921_v11  ;;  %v18325_v11 = vcombine.high %v1108_v5, %v1120_v6  ;;  %v90_v2 = vld [vmem:[%s29047_s1 + $0x218] sm:$0xff] }
 0x3a3   :  { %7794 = vmatpush1.bf16.msra.mxu1 %v18180_v27  ;;  %v18324_v27 = vcombine.low %v1108_v5, %v1120_v6  ;;  %v102_v5 = vld [vmem:[%s29047_s1 + $0x278] sm:$0xff] }
 0x3a4   :  { %7795 = vmatprep.subr.bf16.mxu1 %v18205_v30  ;;  %v18349_v30 = vcombine.high %v1132_v9, %v1144_v26  ;;  %v21541_v34 = vpop.eup %21540  ;;  %v114_v6 = vld [vmem:[%s29047_s1 + $0x2d8] sm:$0xff] }
 0x3a5   :  { %15839 = vmatpush1.bf16.msra.mxu0 %v19919_v29  ;;  %v19937_v29 = vld [vmem:[%s29049_s3 + $0x870] ss:$24 sps:$4 sm:$0xff]   ;;  %v8730_v1 = vadd.f32 1.0, %v21541_v34  ;;  %v162_v34 = vld [vmem:[%s29047_s1 + $0x458] sm:$0xff] }
 0x3a6   :  { %15840 = vmatprep.subr.bf16.mxu0 %v19924_v38  ;;  %v19942_v38 = vld [vmem:[%s29049_s3 + $0x8a4] ss:$24 sps:$4 sm:$0xff]  }
 0x3a7   :  { %7796 = vmatpush1.bf16.msra.mxu1 %v18204_v37  ;;  %v18348_v37 = vcombine.low %v1132_v9, %v1144_v26  ;;  %v126_v9 = vld [vmem:[%s29047_s1 + $0x338] sm:$0xff] }
 0x3a8   :  { %7797 = vmatprep.subr.bf16.mxu1 %v18229_v40  ;;  %v18373_v40 = vcombine.high %v1156_v32, %v1168_v33  ;;  %v138_v26 = vld [vmem:[%s29047_s1 + $0x398] sm:$0xff] }
 0x3a9   :  { %15841 = vmatpush1.bf16.msra.mxu0 %v19922_v39  ;;  %v19940_v39 = vld [vmem:[%s29049_s3 + $0x8a0] ss:$24 sps:$4 sm:$0xff]  }
 0x3aa   :  { %15842 = vmatprep.subr.bf16.mxu0 %v19927_v41  ;;  %v19945_v41 = vld [vmem:[%s29049_s3 + $0x8d4] ss:$24 sps:$4 sm:$0xff]  }
 0x3ab   :  { %7798 = vmatpush1.bf16.msra.mxu1 %v18228_v44  ;;  %v18372_v44 = vcombine.low %v1156_v32, %v1168_v33  ;;  %v19960_v32 = vld [vmem:[%s29049_s3 + $0x9c4] ss:$24 sps:$4 sm:$0xff]  }
 0x3ac   :  { %7799 = vmatprep.subr.bf16.mxu1 %v18253_v46  ;;  %v19943_v46 = vld [vmem:[%s29049_s3 + $0x8d0] ss:$24 sps:$4 sm:$0xff]   ;;  %v150_v33 = vld [vmem:[%s29047_s1 + $0x3f8] sm:$0xff] }
 0x3ad   :  { %15843 = vmatpush1.bf16.msra.mxu0 %v19925_v45  ;;  %v8562_v45 = vmul.f32 0.5, %v24591_v63  ;;  %v66_v63 = vld [vmem:[%s29047_s1 + $0x158] sm:$0xff] }
 0x3ae   :  { %15844 = vmatprep.subr.bf16.mxu0 %v19930_v49  ;;  %v17249_v49 = vcombine.high %v30_v42, %v42_v25 }
 0x3af   :  { %7800 = vmatpush1.bf16.msra.mxu1 %v18252_v56  ;;  %v8754_v56 = vmul.f32 %v8730_v1, %v8562_v45  ;;  %v19963_v1 = vld [vmem:[%s29049_s3 + $0x9f4] ss:$24 sps:$4 sm:$0xff]   ;;  %v186_v45 = vld [vmem:[%s29047_s1 + $0x518] sm:$0xff] }
 0x3b0   :  { %7801 = vmatprep.subr.bf16.mxu1 %v18277_v60  ;;  %v19951_v60 = vld [vmem:[%s29049_s3 + $0x934] ss:$24 sps:$4 sm:$0xff]  }
 0x3b1   :  { %15845 = vmatpush1.bf16.msra.mxu0 %v19928_v59  ;;  %v17248_v59 = vcombine.low %v30_v42, %v42_v25  ;;  %v17344_v42 = vcombine.low %v126_v9, %v138_v26  ;;  %v24797_v25 = vsub.s32 7, %v23884_v62 }
 0x3b2   :  { %15846 = vmatprep.subr.bf16.mxu0 %v19933_v51  ;;  %v17273_v51 = vcombine.high %v54_v55, %v66_v63 }
 0x3b3   :  { %7802 = vmatpush1.bf16.msra.mxu1 %v18276_v3  ;;  %v24742_v3 = vpack.c.bf16 %v8754_v56, %v8754_v56 }
 0x3b4   :  { %7803 = vmatprep.subr.bf16.mxu1 %v18301_v10  ;;  %v17272_v10 = vcombine.low %v54_v55, %v66_v63  ;;  %v19961_v55 = vld [vmem:[%s29049_s3 + $0x9f0] ss:$24 sps:$4 sm:$0xff]   ;;  %v17368_v63 = vcombine.low %v150_v33, %v162_v34 }
 0x3b5   :  { %15847 = vmatpush1.bf16.msra.mxu0 %v19931_v8  ;;  %v19949_v8 = vld [vmem:[%s29049_s3 + $0x930] ss:$24 sps:$4 sm:$0xff]  }
 0x3b6   :  { %15848 = vmatprep.subr.bf16.mxu0 %v19936_v18  ;;  %v19954_v18 = vld [vmem:[%s29049_s3 + $0x964] ss:$24 sps:$4 sm:$0xff]  }
 0x3b7   :  { %7804 = vmatpush1.bf16.msra.mxu1 %v18300_v14  ;;  %v17297_v14 = vcombine.high %v78_v0, %v90_v2 }
 0x3b8   :  { %7805 = vmatprep.subr.bf16.mxu1 %v18325_v11  ;;  %v17296_v11 = vcombine.low %v78_v0, %v90_v2 }
 0x3b9   :  { %15849 = vmatpush1.bf16.msra.mxu0 %v19934_v61  ;;  %v19952_v61 = vld [vmem:[%s29049_s3 + $0x960] ss:$24 sps:$4 sm:$0xff]  }
 0x3ba   :  { %15850 = vmatprep.subr.bf16.mxu0 %v19939_v16  ;;  %v19957_v16 = vld [vmem:[%s29049_s3 + $0x994] ss:$24 sps:$4 sm:$0xff]  }
 0x3bb   :  { %7806 = vmatpush1.bf16.msra.mxu1 %v18324_v27  ;;  %v24774_v27 = vld [vmem:[%s29050_s2 + $0x8] sm:$0xff] }
 0x3bc   :  { %7807 = vmatprep.subr.bf16.mxu1 %v18349_v30  ;;  %v19955_v30 = vld [vmem:[%s29049_s3 + $0x990] ss:$24 sps:$4 sm:$0xff]  }
 0x3bd   :  { %15851 = vmatpush1.bf16.msra.mxu0 %v19937_v29  ;;  %v17321_v29 = vcombine.high %v102_v5, %v114_v6 }
 0x3be   :  { %15852 = vmatprep.subr.bf16.mxu0 %v19942_v38  ;;  %v17320_v38 = vcombine.low %v102_v5, %v114_v6 }
 0x3bf   :  { %7808 = vmatpush1.bf16.msra.mxu1 %v18348_v37  ;;  %v17345_v37 = vcombine.high %v126_v9, %v138_v26 }
 0x3c0   :  { %7809 = vmatprep.subr.bf16.mxu1 %v18373_v40  ;;  %v19958_v40 = vld [vmem:[%s29049_s3 + $0x9c0] ss:$24 sps:$4 sm:$0xff]  }
 0x3c1   :  { %15853 = vmatpush1.bf16.msra.mxu0 %v19940_v39  ;;  %v1220_v39 = vrot.slane %v24774_v27, %v23904_v13 }
 0x3c2   :  { %15854 = vmatprep.subr.bf16.mxu0 %v19945_v41  ;;  %v24794_v41 = vsub.s32 6, %v23884_v62  ;;  %v21579_v62 = vld [vmem:[%s29050_s2] sm:$0xff] }
 0x3c3   :  { %7810 = vmatpush1.bf16.msra.mxu1 %v18372_v44  ;;  %v174_v44 = vld [vmem:[%s29047_s1 + $0x4b8] sm:$0xff]  ;;  %v1212_v56 = vrot.slane %v21579_v62, %v24797_v25 }
 0x3c4   :  { %7943 = vmatprep.subr.bf16.mxu1 %v17249_v49  ;;  %v24809_v49 = vadd.f32 %v22933_v7, %v1220_v39  ;;  %v19966_v7 = vld [vmem:[%s29049_s3 + $0xa24] ss:$24 sps:$4 sm:$0xff]  }
 0x3c5   :  { %15855 = vmatpush1.bf16.msra.mxu0 %v19943_v46  ;;  %v17369_v46 = vcombine.high %v150_v33, %v162_v34  ;;  %v19967_v34 = vld [vmem:[%s29049_s3 + $0xa50] ss:$24 sps:$4 sm:$0xff]  }
 0x3c6   :  { %15865 = vmatprep.subr.bf16.mxu0 %v19948_v52  ;;  %7812 = vmatmul.mubr.bf16.vlgmr.msra.gmra.mrb[16].mxu1 %v22255_v36  ;;  %v1208_v52 = vrot.slane %v21579_v62, %v24794_v41 }
 0x3c7   :  { %7944 = vmatpush1.bf16.msra.mxu1 %v17248_v59  ;;  %7975 = vmatprep.mubr.bf16.mxu1 %v21711_v57  ;;  %v210_v59 = vld [vmem:[%s29047_s1 + $0x5d8] sm:$0xff] }
 0x3c8   :  { %15857 = vmatmul.mubr.bf16.vlgmr.msra.gmra.mrb[16].mxu0 %v24742_v3  ;;  %7945 = vmatprep.subr.bf16.mxu1 %v17273_v51  ;;  %v8591_v51 = vmul.f32 0.044715, %v24809_v49 }
 0x3c9   :  { %15866 = vmatpush1.bf16.msra.mxu0 %v19946_v58  ;;  %v198_v58 = vld [vmem:[%s29047_s1 + $0x578] sm:$0xff] }
 0x3ca   :  { %15867 = vmatprep.subr.bf16.mxu0 %v19951_v60  ;;  %v17393_v60 = vcombine.high %v174_v44, %v186_v45  ;;  %v17417_v26 = vcombine.high %v198_v58, %v210_v59  ;;  %v17416_v39 = vcombine.low %v198_v58, %v210_v59 }
 0x3cb   :  { %7946 = vmatpush1.bf16.msra.mxu1 %v17272_v10  ;;  %v19964_v10 = vld [vmem:[%s29049_s3 + $0xa20] ss:$24 sps:$4 sm:$0xff]  }
 0x3cc   :  { %7947 = vmatprep.subr.bf16.mxu1 %v17297_v14  ;;  %v17392_v14 = vcombine.low %v174_v44, %v186_v45 }
 0x3cd   :  { %15868 = vmatpush1.bf16.msra.mxu0 %v19949_v8 }
 0x3ce   :  { %15869 = vmatprep.subr.bf16.mxu0 %v19954_v18 }
 0x3cf   :  { %7948 = vmatpush1.bf16.msra.mxu1 %v17296_v11 }
 0x3d0   :  { %7949 = vmatprep.subr.bf16.mxu1 %v17321_v29 }
 0x3d1   :  { %15870 = vmatpush1.bf16.msra.mxu0 %v19952_v61  ;;  %v19969_v61 = vld [vmem:[%s29049_s3 + $0xa54] ss:$24 sps:$4 sm:$0xff]  }
 0x3d2   :  { %15871 = vmatprep.subr.bf16.mxu0 %v19957_v16 }
 0x3d3   :  { %7950 = vmatpush1.bf16.msra.mxu1 %v17320_v38  ;;  %v222_v38 = vld [vmem:[%s29047_s1 + $0x638] sm:$0xff] }
 0x3d4   :  { %7951 = vmatprep.subr.bf16.mxu1 %v17345_v37 }
 0x3d5   :  { %15872 = vmatpush1.bf16.msra.mxu0 %v19955_v30 }
 0x3d6   :  { %15873 = vmatprep.subr.bf16.mxu0 %v19960_v32  ;;  %v234_v32 = vld [vmem:[%s29047_s1 + $0x698] sm:$0xff] }
 0x3d7   :  { %7952 = vmatpush1.bf16.msra.mxu1 %v17344_v42  ;;  %v246_v42 = vld [vmem:[%s29047_s1 + $0x6f8] sm:$0xff]  ;;  %v17441_v45 = vcombine.high %v222_v38, %v234_v32 }
 0x3d8   :  { %7953 = vmatprep.subr.bf16.mxu1 %v17369_v46  ;;  %v8615_v46 = vmul.f32 %v24809_v49, %v8591_v51 }
 0x3d9   :  { %15874 = vmatpush1.bf16.msra.mxu0 %v19958_v40  ;;  %v7567_v0 = vpop.f32.mrb[12].mxu1  ;;  %v19972_v40 = vld [vmem:[%s29049_s3 + $0xa84] ss:$24 sps:$4 sm:$0xff]  }
 0x3da   :  { %15875 = vmatprep.subr.bf16.mxu0 %v19963_v1  ;;  %v24829_v2 = vadd.f32 %v7567_v0, %v1208_v52  ;;  %v7569_v8 = vpop.f32.mrb[13].mxu1  ;;  %v258_v1 = vld [vmem:[%s29047_s1 + $0x758] sm:$0xff]  ;;  %v8639_v0 = vmul.f32 %v24809_v49, %v8615_v46 }
 0x3db   :  { %v24834_v18 = vpop.f32.mrb[12].mxu0  ;;  %v24836_v5 = vadd.f32 %v7569_v8, %v1212_v56  ;;  %v7571_v6 = vpop.f32.mrb[14].mxu1  ;;  %7954 = vmatpush1.bf16.msra.mxu1 %v17368_v63  ;;  %v19970_v52 = vld [vmem:[%s29049_s3 + $0xa80] ss:$24 sps:$4 sm:$0xff]   ;;  %v19975_v56 = vld [vmem:[%s29049_s3 + $0xab4] ss:$24 sps:$4 sm:$0xff]   ;;  %v17465_v59 = vcombine.high %v246_v42, %v258_v1 }
 0x3dc   :  { %v24841_v11 = vpop.f32.mrb[13].mxu0  ;;  %v8588_v16 = vmul.f32 0.044715, %v24829_v2  ;;  %v7572_v9 = vpop.f32.mrb[15].mxu1  ;;  %7955 = vmatprep.subr.bf16.mxu1 %v17393_v60  ;;  %v270_v63 = vld [vmem:[%s29047_s1 + $0x7b8] sm:$0xff] }
 0x3dd   :  { %15876 = vmatpush1.bf16.msra.mxu0 %v19961_v55  ;;  %v8432_v29 = vpop.f32.mrb[14].mxu0  ;;  %v8589_v30 = vmul.f32 0.044715, %v24836_v5  ;;  %v17440_v55 = vcombine.low %v222_v38, %v234_v32  ;;  %v282_v60 = vld [vmem:[%s29047_s1 + $0x818] sm:$0xff]  ;;  %v19973_v8 = vld [vmem:[%s29049_s3 + $0xab0] ss:$24 sps:$4 sm:$0xff]  }
 0x3de   :  { %15877 = vmatprep.subr.bf16.mxu0 %v19966_v7  ;;  %v8433_v33 = vpop.f32.mrb[15].mxu0  ;;  %v8612_v44 = vmul.f32 %v24829_v2, %v8588_v16  ;;  %v19978_v6 = vld [vmem:[%s29049_s3 + $0xae4] ss:$24 sps:$4 sm:$0xff]   ;;  %v17489_v9 = vcombine.high %v270_v63, %v282_v60  ;;  %v19976_v29 = vld [vmem:[%s29049_s3 + $0xae0] ss:$24 sps:$4 sm:$0xff]  }
 0x3df   :  { %v8613_v37 = vmul.f32 %v24836_v5, %v8589_v30  ;;  %7956 = vmatpush1.bf16.msra.mxu1 %v17392_v14  ;;  %v294_v14 = vld [vmem:[%s29047_s1 + $0x878] sm:$0xff]  ;;  %v17488_v30 = vcombine.low %v270_v63, %v282_v60  ;;  %v19981_v38 = vld [vmem:[%s29049_s3 + $0xb14] ss:$24 sps:$4 sm:$0xff]  }
 0x3e0   :  { %7957 = vmatprep.subr.bf16.mxu1 %v17417_v26  ;;  %v8636_v58 = vmul.f32 %v24829_v2, %v8612_v44  ;;  %v8663_v26 = vadd.f32 %v24809_v49, %v8639_v0  ;;  %v318_v32 = vld [vmem:[%s29047_s1 + $0x938] sm:$0xff] }
 0x3e1   :  { %15878 = vmatpush1.bf16.msra.mxu0 %v19964_v10  ;;  %v8637_v62 = vmul.f32 %v24836_v5, %v8613_v37  ;;  %v17464_v10 = vcombine.low %v246_v42, %v258_v1  ;;  %v330_v33 = vld [vmem:[%s29047_s1 + $0x998] sm:$0xff]  ;;  %v19979_v42 = vld [vmem:[%s29049_s3 + $0xb10] ss:$24 sps:$4 sm:$0xff]  }
 0x3e2   :  { %15879 = vmatprep.subr.bf16.mxu0 %v19969_v61  ;;  %v306_v61 = vld [vmem:[%s29047_s1 + $0x8d8] sm:$0xff]  ;;  %v8660_v16 = vadd.f32 %v24829_v2, %v8636_v58  ;;  %v17537_v44 = vcombine.high %v318_v32, %v330_v33  ;;  %v17536_v63 = vcombine.low %v318_v32, %v330_v33 }
 0x3e3   :  { %7958 = vmatpush1.bf16.msra.mxu1 %v17416_v39  ;;  %v8661_v7 = vadd.f32 %v24836_v5, %v8637_v62  ;;  %v8687_v39 = vmul.f32 0.7978846, %v8663_v26  ;;  %v19984_v1 = vld [vmem:[%s29049_s3 + $0xb44] ss:$24 sps:$4 sm:$0xff]  }
 0x3e4   :  { %7959 = vmatprep.subr.bf16.mxu1 %v17441_v45  ;;  %v8684_v37 = vmul.f32 0.7978846, %v8660_v16  ;;  %v342_v45 = vld [vmem:[%s29047_s1 + $0x9f8] sm:$0xff] }
 0x3e5   :  { %15880 = vmatpush1.bf16.msra.mxu0 %v19967_v34  ;;  %v8685_v51 = vmul.f32 0.7978846, %v8661_v7  ;;  %v17513_v34 = vcombine.high %v294_v14, %v306_v61  ;;  %v354_v46 = vld [vmem:[%s29047_s1 + $0xa58] sm:$0xff]  ;;  %v19987_v7 = vld [vmem:[%s29049_s3 + $0xb74] ss:$24 sps:$4 sm:$0xff]  }
 0x3e6   :  { %15881 = vmatprep.subr.bf16.mxu0 %v19972_v40  ;;  %v17512_v40 = vcombine.low %v294_v14, %v306_v61  ;;  %v366_v58 = vld [vmem:[%s29047_s1 + $0xab8] sm:$0xff]  ;;  %v17560_v0 = vcombine.low %v342_v45, %v354_v46 }
 0x3e7   :  { %7960 = vmatpush1.bf16.msra.mxu1 %v17440_v55  ;;  %21542 = vtanh.f32 %v8685_v51  ;;  %v8565_v55 = vmul.f32 0.5, %v24836_v5  ;;  %v17561_v5 = vcombine.high %v342_v45, %v354_v46  ;;  %v402_v61 = vld [vmem:[%s29047_s1 + $0xbd8] sm:$0xff] }
 0x3e8   :  { %7961 = vmatprep.subr.bf16.mxu1 %v17465_v59  ;;  %21544 = vtanh.f32 %v8684_v37  ;;  %v378_v59 = vld [vmem:[%s29047_s1 + $0xb18] sm:$0xff]  ;;  %v8567_v37 = vmul.f32 0.5, %v24809_v49 }
 0x3e9   :  { %15882 = vmatpush1.bf16.msra.mxu0 %v19970_v52  ;;  %21546 = vtanh.f32 %v8687_v39  ;;  %v19982_v52 = vld [vmem:[%s29049_s3 + $0xb40] ss:$24 sps:$4 sm:$0xff]   ;;  %v17585_v14 = vcombine.high %v366_v58, %v378_v59  ;;  %v17584_v26 = vcombine.low %v366_v58, %v378_v59 }
 0x3ea   :  { %15883 = vmatprep.subr.bf16.mxu0 %v19975_v56  ;;  %v426_v33 = vld [vmem:[%s29047_s1 + $0xc98] sm:$0xff] }
 0x3eb   :  { %7962 = vmatpush1.bf16.msra.mxu1 %v17464_v10  ;;  %v19990_v10 = vld [vmem:[%s29049_s3 + $0xba4] ss:$24 sps:$4 sm:$0xff]  }
 0x3ec   :  { %7963 = vmatprep.subr.bf16.mxu1 %v17489_v9  ;;  %v438_v49 = vld [vmem:[%s29047_s1 + $0xcf8] sm:$0xff] }
 0x3ed   :  { %15884 = vmatpush1.bf16.msra.mxu0 %v19973_v8  ;;  %v19985_v8 = vld [vmem:[%s29049_s3 + $0xb70] ss:$24 sps:$4 sm:$0xff]   ;;  %v450_v46 = vld [vmem:[%s29047_s1 + $0xd58] sm:$0xff] }
 0x3ee   :  { %15885 = vmatprep.subr.bf16.mxu0 %v19978_v6  ;;  %v390_v6 = vld [vmem:[%s29047_s1 + $0xb78] sm:$0xff]  ;;  %v17657_v59 = vcombine.high %v438_v49, %v450_v46 }
 0x3ef   :  { %7964 = vmatpush1.bf16.msra.mxu1 %v17488_v30  ;;  %v19993_v30 = vld [vmem:[%s29049_s3 + $0xbd4] ss:$24 sps:$4 sm:$0xff]   ;;  %v17609_v32 = vcombine.high %v390_v6, %v402_v61 }
 0x3f0   :  { %7965 = vmatprep.subr.bf16.mxu1 %v17513_v34 }
 0x3f1   :  { %15886 = vmatpush1.bf16.msra.mxu0 %v19976_v29  ;;  %v21543_v62 = vpop.eup %21542  ;;  %v19988_v29 = vld [vmem:[%s29049_s3 + $0xba0] ss:$24 sps:$4 sm:$0xff]  }
 0x3f2   :  { %15887 = vmatprep.subr.bf16.mxu0 %v19981_v38  ;;  %v8733_v56 = vadd.f32 1.0, %v21543_v62  ;;  %v21545_v16 = vpop.eup %21544  ;;  %v414_v38 = vld [vmem:[%s29047_s1 + $0xc38] sm:$0xff] }
 0x3f3   :  { %7966 = vmatpush1.bf16.msra.mxu1 %v17512_v40  ;;  %v21547_v9 = vpop.eup %21546  ;;  %v8732_v34 = vadd.f32 1.0, %v21545_v16  ;;  %v17608_v40 = vcombine.low %v390_v6, %v402_v61  ;;  %v17633_v45 = vcombine.high %v414_v38, %v426_v33  ;;  %v20000_v16 = vld [vmem:[%s29049_s3 + $0xc60] ss:$24 sps:$4 sm:$0xff]  }
 0x3f4   :  { %7967 = vmatprep.subr.bf16.mxu1 %v17537_v44  ;;  %v8757_v60 = vmul.f32 %v8733_v56, %v8565_v55  ;;  %v8735_v39 = vadd.f32 1.0, %v21547_v9  ;;  %v19996_v44 = vld [vmem:[%s29049_s3 + $0xc04] ss:$24 sps:$4 sm:$0xff]   ;;  %v17632_v55 = vcombine.low %v414_v38, %v426_v33  ;;  %v19999_v56 = vld [vmem:[%s29049_s3 + $0xc34] ss:$24 sps:$4 sm:$0xff]  }
 0x3f5   :  { %15888 = vmatpush1.bf16.msra.mxu0 %v19979_v42  ;;  %v19991_v42 = vld [vmem:[%s29049_s3 + $0xbd0] ss:$24 sps:$4 sm:$0xff]   ;;  %v20005_v9 = vld [vmem:[%s29049_s3 + $0xc94] ss:$24 sps:$4 sm:$0xff]   ;;  %v20008_v33 = vld [vmem:[%s29049_s3 + $0xcc4] ss:$24 sps:$4 sm:$0xff]  }
 0x3f6   :  { %15889 = vmatprep.subr.bf16.mxu0 %v19984_v1  ;;  %v24933_v51 = vpack.c.bf16 %v8757_v60, %v8757_v60  ;;  %v8564_v1 = vmul.f32 0.5, %v24829_v2  ;;  %v19994_v2 = vld [vmem:[%s29049_s3 + $0xc00] ss:$24 sps:$4 sm:$0xff]  }
 0x3f7   :  { %7968 = vmatpush1.bf16.msra.mxu1 %v17536_v63  ;;  %v462_v63 = vld [vmem:[%s29047_s1 + $0xdb8] sm:$0xff] }
 0x3f8   :  { %15897 = vmatprep.mubr.bf16.mxu0 %v24933_v51  ;;  %7969 = vmatprep.subr.bf16.mxu1 %v17561_v5  ;;  %v8756_v62 = vmul.f32 %v8732_v34, %v8564_v1  ;;  %v17656_v5 = vcombine.low %v438_v49, %v450_v46  ;;  %v534_v34 = vld [vmem:[%s29047_s1 + $0xff8] sm:$0xff]  ;;  %v20011_v1 = vld [vmem:[%s29049_s3 + $0xcf4] ss:$24 sps:$4 sm:$0xff]  }
 0x3f9   :  { %15890 = vmatpush1.bf16.msra.mxu0 %v19982_v52  ;;  %v8759_v52 = vmul.f32 %v8735_v39, %v8567_v37  ;;  %v546_v39 = vld [vmem:[%s29047_s1 + $0x1058] sm:$0xff] }
 0x3fa   :  { %15891 = vmatprep.subr.bf16.mxu0 %v19987_v7  ;;  %v474_v7 = vld [vmem:[%s29047_s1 + $0xe18] sm:$0xff]  ;;  %v24986_v58 = vpack.c.bf16 %v8756_v62, %v8756_v62  ;;  %v17753_v49 = vcombine.high %v534_v34, %v546_v39  ;;  %v20009_v62 = vld [vmem:[%s29049_s3 + $0xcf0] ss:$24 sps:$4 sm:$0xff]  }
 0x3fb   :  { %7970 = vmatpush1.bf16.msra.mxu1 %v17560_v0  ;;  %v24989_v60 = vpack.c.bf16 %v8759_v52, %v8759_v52  ;;  %v19997_v0 = vld [vmem:[%s29049_s3 + $0xc30] ss:$24 sps:$4 sm:$0xff]   ;;  %v17681_v6 = vcombine.high %v462_v63, %v474_v7  ;;  %v17680_v61 = vcombine.low %v462_v63, %v474_v7  ;;  %v570_v46 = vld [vmem:[%s29047_s1 + $0x1118] sm:$0xff] }
 0x3fc   :  { %7971 = vmatprep.subr.bf16.mxu1 %v17585_v14  ;;  %v498_v14 = vld [vmem:[%s29047_s1 + $0xed8] sm:$0xff] }
 0x3fd   :  { %15892 = vmatpush1.bf16.msra.mxu0 %v19985_v8  ;;  %v20002_v8 = vld [vmem:[%s29049_s3 + $0xc64] ss:$24 sps:$4 sm:$0xff]   ;;  %v20012_v7 = vld [vmem:[%s29049_s3 + $0xd20] ss:$24 sps:$4 sm:$0xff]  }
 0x3fe   :  { %15893 = vmatprep.subr.bf16.mxu0 %v19990_v10  ;;  %v486_v10 = vld [vmem:[%s29047_s1 + $0xe78] sm:$0xff] }
 0x3ff   :  { %7972 = vmatpush1.bf16.msra.mxu1 %v17584_v26  ;;  %v510_v26 = vld [vmem:[%s29047_s1 + $0xf38] sm:$0xff]  ;;  %v17704_v38 = vcombine.low %v486_v10, %v498_v14 }
 0x400   :  { %7973 = vmatprep.subr.bf16.mxu1 %v17609_v32  ;;  %v20003_v32 = vld [vmem:[%s29049_s3 + $0xc90] ss:$24 sps:$4 sm:$0xff]   ;;  %v20014_v52 = vld [vmem:[%s29049_s3 + $0xd24] ss:$24 sps:$4 sm:$0xff]  }
 0x401   :  { %15894 = vmatpush1.bf16.msra.mxu0 %v19988_v29  ;;  %v17705_v29 = vcombine.high %v486_v10, %v498_v14  ;;  %v618_v10 = vld [vmem:[%s29047_s1 + $0x1298] sm:$0xff] }
 0x402   :  { %15895 = vmatprep.subr.bf16.mxu0 %v19993_v30  ;;  %v522_v30 = vld [vmem:[%s29047_s1 + $0xf98] sm:$0xff] }
 0x403   :  { %7974 = vmatpush1.bf16.msra.mxu1 %v17608_v40  ;;  %v17729_v37 = vcombine.high %v510_v26, %v522_v30  ;;  %v17728_v40 = vcombine.low %v510_v26, %v522_v30 }
 0x404   :  { %7984 = vmatprep.subr.bf16.mxu1 %v17633_v45  ;;  %v1216_v45 = vrot.slane %v24774_v27, %v24094_v47  ;;  %v582_v27 = vld [vmem:[%s29047_s1 + $0x1178] sm:$0xff] }
 0x405   :  { %15896 = vmatpush1.bf16.msra.mxu0 %v19991_v42  ;;  %v20006_v42 = vld [vmem:[%s29049_s3 + $0xcc0] ss:$24 sps:$4 sm:$0xff]  }
 0x406   :  { %15906 = vmatprep.subr.bf16.mxu0 %v19996_v44  ;;  %7976 = vmatmul.mubr.bf16.vlgmr.msra.gmra.mrb[20].mxu1 %v21837_v12  ;;  %v558_v44 = vld [vmem:[%s29047_s1 + $0x10b8] sm:$0xff] }
 0x407   :  { %7985 = vmatpush1.bf16.msra.mxu1 %v17632_v55  ;;  %8016 = vmatprep.mubr.bf16.mxu1 %v21858_v21  ;;  %v594_v55 = vld [vmem:[%s29047_s1 + $0x11d8] sm:$0xff]  ;;  %v17777_v63 = vcombine.high %v558_v44, %v570_v46 }
 0x408   :  { %15898 = vmatmul.mubr.bf16.vlgmr.msra.gmra.mrb[16].mxu0 %v24986_v58  ;;  %7986 = vmatprep.subr.bf16.mxu1 %v17657_v59  ;;  %v17776_v59 = vcombine.low %v558_v44, %v570_v46  ;;  %v17800_v14 = vcombine.low %v582_v27, %v594_v55  ;;  %v678_v44 = vld [vmem:[%s29047_s1 + $0x1478] sm:$0xff] }
 0x409   :  { %15907 = vmatpush1.bf16.msra.mxu0 %v19994_v2  ;;  %15938 = vmatprep.mubr.bf16.mxu0 %v24989_v60  ;;  %v17752_v2 = vcombine.low %v534_v34, %v546_v39  ;;  %v666_v39 = vld [vmem:[%s29047_s1 + $0x1418] sm:$0xff] }
 0x40a   :  { %15908 = vmatprep.subr.bf16.mxu0 %v19999_v56  ;;  %v25057_v56 = vadd.f32 %v22931_v4, %v1216_v45  ;;  %v690_v46 = vld [vmem:[%s29047_s1 + $0x14d8] sm:$0xff] }
 0x40b   :  { %7987 = vmatpush1.bf16.msra.mxu1 %v17656_v5  ;;  %v20017_v5 = vld [vmem:[%s29049_s3 + $0xd54] ss:$24 sps:$4 sm:$0xff]  }
 0x40c   :  { %7988 = vmatprep.subr.bf16.mxu1 %v17681_v6  ;;  %v8590_v4 = vmul.f32 0.044715, %v25057_v56  ;;  %v20015_v6 = vld [vmem:[%s29049_s3 + $0xd50] ss:$24 sps:$4 sm:$0xff]  }
 0x40d   :  { %15909 = vmatpush1.bf16.msra.mxu0 %v19997_v0  ;;  %v606_v0 = vld [vmem:[%s29047_s1 + $0x1238] sm:$0xff] }
 0x40e   :  { %15910 = vmatprep.subr.bf16.mxu0 %v20002_v8  ;;  %v17801_v8 = vcombine.high %v582_v27, %v594_v55  ;;  %v17825_v26 = vcombine.high %v606_v0, %v618_v10  ;;  %v17824_v30 = vcombine.low %v606_v0, %v618_v10  ;;  %v702_v27 = vld [vmem:[%s29047_s1 + $0x1538] sm:$0xff]  ;;  %v17897_v55 = vcombine.high %v678_v44, %v690_v46 }
 0x40f   :  { %7989 = vmatpush1.bf16.msra.mxu1 %v17680_v61  ;;  %v20020_v61 = vld [vmem:[%s29049_s3 + $0xd84] ss:$24 sps:$4 sm:$0xff]  }
 0x410   :  { %7990 = vmatprep.subr.bf16.mxu1 %v17705_v29  ;;  %v642_v29 = vld [vmem:[%s29047_s1 + $0x1358] sm:$0xff] }
 0x411   :  { %15911 = vmatpush1.bf16.msra.mxu0 %v20000_v16  ;;  %v630_v16 = vld [vmem:[%s29047_s1 + $0x12f8] sm:$0xff] }
 0x412   :  { %15912 = vmatprep.subr.bf16.mxu0 %v20005_v9  ;;  %v8614_v9 = vmul.f32 %v25057_v56, %v8590_v4  ;;  %v20032_v0 = vld [vmem:[%s29049_s3 + $0xe44] ss:$24 sps:$4 sm:$0xff]  }
 0x413   :  { %7991 = vmatpush1.bf16.msra.mxu1 %v17704_v38  ;;  %v20018_v38 = vld [vmem:[%s29049_s3 + $0xd80] ss:$24 sps:$4 sm:$0xff]  }
 0x414   :  { %7992 = vmatprep.subr.bf16.mxu1 %v17729_v37  ;;  %v8638_v34 = vmul.f32 %v25057_v56, %v8614_v9  ;;  %v17849_v37 = vcombine.high %v630_v16, %v642_v29  ;;  %v726_v4 = vld [vmem:[%s29047_s1 + $0x15f8] sm:$0xff] }
 0x415   :  { %15913 = vmatpush1.bf16.msra.mxu0 %v20003_v32  ;;  %v20023_v32 = vld [vmem:[%s29049_s3 + $0xdb4] ss:$24 sps:$4 sm:$0xff]   ;;  %v738_v10 = vld [vmem:[%s29047_s1 + $0x1658] sm:$0xff] }
 0x416   :  { %15914 = vmatprep.subr.bf16.mxu0 %v20008_v33  ;;  %v654_v33 = vld [vmem:[%s29047_s1 + $0x13b8] sm:$0xff]  ;;  %v8662_v45 = vadd.f32 %v25057_v56, %v8638_v34  ;;  %v17945_v9 = vcombine.high %v726_v4, %v738_v10 }
 0x417   :  { %7993 = vmatpush1.bf16.msra.mxu1 %v17728_v40  ;;  %v17848_v40 = vcombine.low %v630_v16, %v642_v29  ;;  %v750_v16 = vld [vmem:[%s29047_s1 + $0x16b8] sm:$0xff]  ;;  %v20033_v29 = vld [vmem:[%s29049_s3 + $0xe70] ss:$24 sps:$4 sm:$0xff]  }
 0x418   :  { %7994 = vmatprep.subr.bf16.mxu1 %v17753_v49  ;;  %v17873_v49 = vcombine.high %v654_v33, %v666_v39  ;;  %v786_v34 = vld [vmem:[%s29047_s1 + $0x17d8] sm:$0xff] }
 0x419   :  { %15915 = vmatpush1.bf16.msra.mxu0 %v20006_v42  ;;  %v20021_v42 = vld [vmem:[%s29049_s3 + $0xdb0] ss:$24 sps:$4 sm:$0xff]  }
 0x41a   :  { %15916 = vmatprep.subr.bf16.mxu0 %v20011_v1  ;;  %v20026_v1 = vld [vmem:[%s29049_s3 + $0xde4] ss:$24 sps:$4 sm:$0xff]  }
 0x41b   :  { %7995 = vmatpush1.bf16.msra.mxu1 %v17752_v2  ;;  %v20024_v2 = vld [vmem:[%s29049_s3 + $0xde0] ss:$24 sps:$4 sm:$0xff]  }
 0x41c   :  { %7996 = vmatprep.subr.bf16.mxu1 %v17777_v63  ;;  %v714_v63 = vld [vmem:[%s29047_s1 + $0x1598] sm:$0xff] }
 0x41d   :  { %15917 = vmatpush1.bf16.msra.mxu0 %v20009_v62  ;;  %v17872_v62 = vcombine.low %v654_v33, %v666_v39  ;;  %v774_v33 = vld [vmem:[%s29047_s1 + $0x1778] sm:$0xff] }
 0x41e   :  { %15918 = vmatprep.subr.bf16.mxu0 %v20014_v52  ;;  %v20029_v52 = vld [vmem:[%s29049_s3 + $0xe14] ss:$24 sps:$4 sm:$0xff]   ;;  %v20036_v39 = vld [vmem:[%s29049_s3 + $0xea0] ss:$24 sps:$4 sm:$0xff]  }
 0x41f   :  { %7997 = vmatpush1.bf16.msra.mxu1 %v17776_v59  ;;  %v17896_v59 = vcombine.low %v678_v44, %v690_v46  ;;  %v810_v44 = vld [vmem:[%s29047_s1 + $0x1898] sm:$0xff] }
 0x420   :  { %7998 = vmatprep.subr.bf16.mxu1 %v17801_v8  ;;  %v17921_v8 = vcombine.high %v702_v27, %v714_v63 }
 0x421   :  { %15919 = vmatpush1.bf16.msra.mxu0 %v20012_v7  ;;  %v8686_v7 = vmul.f32 0.7978846, %v8662_v45  ;;  %v17993_v45 = vcombine.high %v774_v33, %v786_v34 }
 0x422   :  { %15920 = vmatprep.subr.bf16.mxu0 %v20017_v5  ;;  %v20027_v5 = vld [vmem:[%s29049_s3 + $0xe10] ss:$24 sps:$4 sm:$0xff]  }
 0x423   :  { %7999 = vmatpush1.bf16.msra.mxu1 %v17800_v14  ;;  %21548 = vtanh.f32 %v8686_v7  ;;  %v20030_v14 = vld [vmem:[%s29049_s3 + $0xe40] ss:$24 sps:$4 sm:$0xff]  }
 0x424   :  { %8000 = vmatprep.subr.bf16.mxu1 %v17825_v26  ;;  %v762_v26 = vld [vmem:[%s29047_s1 + $0x1718] sm:$0xff] }
 0x425   :  { %15921 = vmatpush1.bf16.msra.mxu0 %v20015_v6  ;;  %v17920_v6 = vcombine.low %v702_v27, %v714_v63  ;;  %v834_v27 = vld [vmem:[%s29047_s1 + $0x1958] sm:$0xff] }
 0x426   :  { %15922 = vmatprep.subr.bf16.mxu0 %v20020_v61  ;;  %v20035_v61 = vld [vmem:[%s29049_s3 + $0xe74] ss:$24 sps:$4 sm:$0xff]  }
 0x427   :  { %8001 = vmatpush1.bf16.msra.mxu1 %v17824_v30  ;;  %v17944_v30 = vcombine.low %v726_v4, %v738_v10  ;;  %v20047_v4 = vld [vmem:[%s29049_s3 + $0xf34] ss:$24 sps:$4 sm:$0xff]  }
 0x428   :  { %8002 = vmatprep.subr.bf16.mxu1 %v17849_v37 }
 0x429   :  { %15923 = vmatpush1.bf16.msra.mxu0 %v20018_v38  ;;  %v20038_v38 = vld [vmem:[%s29049_s3 + $0xea4] ss:$24 sps:$4 sm:$0xff]  }
 0x42a   :  { %15924 = vmatprep.subr.bf16.mxu0 %v20023_v32  ;;  %v17969_v32 = vcombine.high %v750_v16, %v762_v26 }
 0x42b   :  { %8003 = vmatpush1.bf16.msra.mxu1 %v17848_v40  ;;  %v17968_v40 = vcombine.low %v750_v16, %v762_v26  ;;  %v20045_v16 = vld [vmem:[%s29049_s3 + $0xf30] ss:$24 sps:$4 sm:$0xff]  }
 0x42c   :  { %8004 = vmatprep.subr.bf16.mxu1 %v17873_v49  ;;  %v8566_v49 = vmul.f32 0.5, %v25057_v56 }
 0x42d   :  { %15925 = vmatpush1.bf16.msra.mxu0 %v20021_v42  ;;  %v21549_v37 = vpop.eup %21548  ;;  %v20041_v42 = vld [vmem:[%s29049_s3 + $0xed4] ss:$24 sps:$4 sm:$0xff]  }
 0x42e   :  { %15926 = vmatprep.subr.bf16.mxu0 %v20026_v1  ;;  %v798_v1 = vld [vmem:[%s29047_s1 + $0x1838] sm:$0xff]  ;;  %v8734_v46 = vadd.f32 1.0, %v21549_v37 }
 0x42f   :  { %8005 = vmatpush1.bf16.msra.mxu1 %v17872_v62  ;;  %v20039_v62 = vld [vmem:[%s29049_s3 + $0xed0] ss:$24 sps:$4 sm:$0xff]   ;;  %v18017_v56 = vcombine.high %v798_v1, %v810_v44  ;;  %v18016_v7 = vcombine.low %v798_v1, %v810_v44  ;;  %v20056_v1 = vld [vmem:[%s29049_s3 + $0xfc4] ss:$24 sps:$4 sm:$0xff]  }
 0x430   :  { %8006 = vmatprep.subr.bf16.mxu1 %v17897_v55  ;;  %v20044_v55 = vld [vmem:[%s29049_s3 + $0xf04] ss:$24 sps:$4 sm:$0xff]   ;;  %v8758_v63 = vmul.f32 %v8734_v46, %v8566_v49 }
 0x431   :  { %15927 = vmatpush1.bf16.msra.mxu0 %v20024_v2  ;;  %v17992_v2 = vcombine.low %v774_v33, %v786_v34  ;;  %v20053_v33 = vld [vmem:[%s29049_s3 + $0xf94] ss:$24 sps:$4 sm:$0xff]   ;;  %v942_v49 = vld [vmem:[%s29047_s1 + $0x1cb8] sm:$0xff] }
 0x432   :  { %15928 = vmatprep.subr.bf16.mxu0 %v20029_v52  ;;  %v822_v52 = vld [vmem:[%s29047_s1 + $0x18f8] sm:$0xff]  ;;  %v25196_v10 = vpack.c.bf16 %v8758_v63, %v8758_v63  ;;  %v20057_v63 = vld [vmem:[%s29049_s3 + $0xff0] ss:$24 sps:$4 sm:$0xff]  }
 0x433   :  { %8007 = vmatpush1.bf16.msra.mxu1 %v17896_v59  ;;  %v846_v59 = vld [vmem:[%s29047_s1 + $0x19b8] sm:$0xff] }
 0x434   :  { %8008 = vmatprep.subr.bf16.mxu1 %v17921_v8  ;;  %v18041_v8 = vcombine.high %v822_v52, %v834_v27  ;;  %v954_v46 = vld [vmem:[%s29047_s1 + $0x1d18] sm:$0xff] }
 0x435   :  { %15929 = vmatpush1.bf16.msra.mxu0 %v20027_v5  ;;  %v858_v5 = vld [vmem:[%s29047_s1 + $0x1a18] sm:$0xff] }
 0x436   :  { %15930 = vmatprep.subr.bf16.mxu0 %v20032_v0  ;;  %v20042_v0 = vld [vmem:[%s29049_s3 + $0xf00] ss:$24 sps:$4 sm:$0xff]   ;;  %v18065_v26 = vcombine.high %v846_v59, %v858_v5 }
 0x437   :  { %8009 = vmatpush1.bf16.msra.mxu1 %v17920_v6  ;;  %v18040_v6 = vcombine.low %v822_v52, %v834_v27 }
 0x438   :  { %8010 = vmatprep.subr.bf16.mxu1 %v17945_v9  ;;  %v20050_v9 = vld [vmem:[%s29049_s3 + $0xf64] ss:$24 sps:$4 sm:$0xff]  }
 0x439   :  { %15931 = vmatpush1.bf16.msra.mxu0 %v20030_v14  ;;  %v870_v14 = vld [vmem:[%s29047_s1 + $0x1a78] sm:$0xff] }
 0x43a   :  { %15932 = vmatprep.subr.bf16.mxu0 %v20035_v61  ;;  %v882_v61 = vld [vmem:[%s29047_s1 + $0x1ad8] sm:$0xff] }
 0x43b   :  { %8011 = vmatpush1.bf16.msra.mxu1 %v17944_v30  ;;  %v894_v30 = vld [vmem:[%s29047_s1 + $0x1b38] sm:$0xff]  ;;  %v18089_v34 = vcombine.high %v870_v14, %v882_v61  ;;  %v18088_v37 = vcombine.low %v870_v14, %v882_v61 }
 0x43c   :  { %8012 = vmatprep.subr.bf16.mxu1 %v17969_v32  ;;  %v20048_v32 = vld [vmem:[%s29049_s3 + $0xf60] ss:$24 sps:$4 sm:$0xff]  }
 0x43d   :  { %15933 = vmatpush1.bf16.msra.mxu0 %v20033_v29  ;;  %v18064_v29 = vcombine.low %v846_v59, %v858_v5  ;;  %v18161_v59 = vcombine.high %v942_v49, %v954_v46  ;;  %v18160_v5 = vcombine.low %v942_v49, %v954_v46 }
 0x43e   :  { %15934 = vmatprep.subr.bf16.mxu0 %v20038_v38  ;;  %v906_v38 = vld [vmem:[%s29047_s1 + $0x1b98] sm:$0xff] }
 0x43f   :  { %8013 = vmatpush1.bf16.msra.mxu1 %v17968_v40  ;;  %v930_v40 = vld [vmem:[%s29047_s1 + $0x1c58] sm:$0xff]  ;;  %v18113_v44 = vcombine.high %v894_v30, %v906_v38 }
 0x440   :  { %8014 = vmatprep.subr.bf16.mxu1 %v17993_v45  ;;  %v18112_v45 = vcombine.low %v894_v30, %v906_v38 }
 0x441   :  { %15935 = vmatpush1.bf16.msra.mxu0 %v20036_v39  ;;  %v918_v39 = vld [vmem:[%s29047_s1 + $0x1bf8] sm:$0xff] }
 0x442   :  { %15936 = vmatprep.subr.bf16.mxu0 %v20041_v42  ;;  %v20051_v42 = vld [vmem:[%s29049_s3 + $0xf90] ss:$24 sps:$4 sm:$0xff]   ;;  %v18137_v52 = vcombine.high %v918_v39, %v930_v40  ;;  %v18136_v27 = vcombine.low %v918_v39, %v930_v40 }
 0x443   :  { %8015 = vmatpush1.bf16.msra.mxu1 %v17992_v2  ;;  %v20059_v2 = vld [vmem:[%s29049_s3 + $0xff4] ss:$24 sps:$4 sm:$0xff]  }
 0x444   :  { %8025 = vmatprep.subr.bf16.mxu1 %v18017_v56  ;;  %v978_v56 = vld [vmem:[%s29047_s1 + $0x1dd8] sm:$0xff] }
 0x445   :  { %15937 = vmatpush1.bf16.msra.mxu0 %v20039_v62  ;;  %v20054_v62 = vld [vmem:[%s29049_s3 + $0xfc0] ss:$24 sps:$4 sm:$0xff]  }
 0x446   :  { %15947 = vmatprep.subr.bf16.mxu0 %v20044_v55  ;;  %8017 = vmatmul.mubr.bf16.vlgmr.msra.gmra.mrb[20].mxu1 %v22046_v22  ;;  %v966_v55 = vld [vmem:[%s29047_s1 + $0x1d78] sm:$0xff] }
 0x447   :  { %8026 = vmatpush1.bf16.msra.mxu1 %v18016_v7  ;;  %8057 = vmatprep.mubr.bf16.mxu1 %v22067_v31  ;;  %v20062_v7 = vld [vmem:[%s29049_s3 + $0x1024] ss:$24 sps:$4 sm:$0xff]   ;;  %v18185_v14 = vcombine.high %v966_v55, %v978_v56  ;;  %v18184_v61 = vcombine.low %v966_v55, %v978_v56 }
 0x448   :  { %15939 = vmatmul.mubr.bf16.vlgmr.msra.gmra.mrb[16].mxu0 %v25196_v10  ;;  %8027 = vmatprep.subr.bf16.mxu1 %v18041_v8  ;;  %v20060_v8 = vld [vmem:[%s29049_s3 + $0x1020] ss:$24 sps:$4 sm:$0xff]  }
 0x449   :  { %15948 = vmatpush1.bf16.msra.mxu0 %v20042_v0  ;;  %v990_v0 = vld [vmem:[%s29047_s1 + $0x1e38] sm:$0xff] }
 0x44a   :  { %15949 = vmatprep.subr.bf16.mxu0 %v20047_v4  ;;  %v1002_v4 = vld [vmem:[%s29047_s1 + $0x1e98] sm:$0xff] }
 0x44b   :  { %8028 = vmatpush1.bf16.msra.mxu1 %v18040_v6  ;;  %v20065_v6 = vld [vmem:[%s29049_s3 + $0x1054] ss:$24 sps:$4 sm:$0xff]   ;;  %v18209_v30 = vcombine.high %v990_v0, %v1002_v4  ;;  %v18208_v38 = vcombine.low %v990_v0, %v1002_v4 }
 0x44c   :  { %8029 = vmatprep.subr.bf16.mxu1 %v18065_v26  ;;  %v20063_v26 = vld [vmem:[%s29049_s3 + $0x1050] ss:$24 sps:$4 sm:$0xff]  }
 0x44d   :  { %15950 = vmatpush1.bf16.msra.mxu0 %v20045_v16  ;;  %v1014_v16 = vld [vmem:[%s29047_s1 + $0x1ef8] sm:$0xff] }
 0x44e   :  { %15951 = vmatprep.subr.bf16.mxu0 %v20050_v9  ;;  %v1026_v9 = vld [vmem:[%s29047_s1 + $0x1f58] sm:$0xff] }
 0x44f   :  { %8030 = vmatpush1.bf16.msra.mxu1 %v18064_v29  ;;  %v20068_v29 = vld [vmem:[%s29049_s3 + $0x1084] ss:$24 sps:$4 sm:$0xff]   ;;  %v18233_v39 = vcombine.high %v1014_v16, %v1026_v9  ;;  %v18232_v40 = vcombine.low %v1014_v16, %v1026_v9  ;;  %v20081_v9 = vld [vmem:[%s29049_s3 + $0x1170] ss:$24 sps:$4 sm:$0xff]  }
 0x450   :  { %8031 = vmatprep.subr.bf16.mxu1 %v18089_v34  ;;  %v20066_v34 = vld [vmem:[%s29049_s3 + $0x1080] ss:$24 sps:$4 sm:$0xff]  }
 0x451   :  { %15952 = vmatpush1.bf16.msra.mxu0 %v20048_v32  ;;  %v1038_v32 = vld [vmem:[%s29047_s1 + $0x1fb8] sm:$0xff] }
 0x452   :  { %15953 = vmatprep.subr.bf16.mxu0 %v20053_v33  ;;  %v1050_v33 = vld [vmem:[%s29047_s1 + $0x2018] sm:$0xff] }
 0x453   :  { %8032 = vmatpush1.bf16.msra.mxu1 %v18088_v37  ;;  %v20071_v37 = vld [vmem:[%s29049_s3 + $0x10b4] ss:$24 sps:$4 sm:$0xff]   ;;  %v18257_v49 = vcombine.high %v1038_v32, %v1050_v33  ;;  %v18256_v46 = vcombine.low %v1038_v32, %v1050_v33  ;;  %v20086_v32 = vld [vmem:[%s29049_s3 + $0x11a4] ss:$24 sps:$4 sm:$0xff]  }
 0x454   :  { %8033 = vmatprep.subr.bf16.mxu1 %v18113_v44  ;;  %v20069_v44 = vld [vmem:[%s29049_s3 + $0x10b0] ss:$24 sps:$4 sm:$0xff]  }
 0x455   :  { %15954 = vmatpush1.bf16.msra.mxu0 %v20051_v42  ;;  %v1062_v42 = vld [vmem:[%s29047_s1 + $0x2078] sm:$0xff] }
 0x456   :  { %15955 = vmatprep.subr.bf16.mxu0 %v20056_v1  ;;  %v1074_v1 = vld [vmem:[%s29047_s1 + $0x20d8] sm:$0xff] }
 0x457   :  { %8034 = vmatpush1.bf16.msra.mxu1 %v18112_v45  ;;  %v20074_v45 = vld [vmem:[%s29049_s3 + $0x10e4] ss:$24 sps:$4 sm:$0xff]   ;;  %v18281_v55 = vcombine.high %v1062_v42, %v1074_v1  ;;  %v18280_v56 = vcombine.low %v1062_v42, %v1074_v1 }
 0x458   :  { %8035 = vmatprep.subr.bf16.mxu1 %v18137_v52  ;;  %v20072_v52 = vld [vmem:[%s29049_s3 + $0x10e0] ss:$24 sps:$4 sm:$0xff]  }
 0x459   :  { %15956 = vmatpush1.bf16.msra.mxu0 %v20054_v62  ;;  %v1086_v62 = vld [vmem:[%s29047_s1 + $0x2138] sm:$0xff] }
 0x45a   :  { %15957 = vmatprep.subr.bf16.mxu0 %v20059_v2  ;;  %v1098_v2 = vld [vmem:[%s29047_s1 + $0x2198] sm:$0xff] }
 0x45b   :  { %8036 = vmatpush1.bf16.msra.mxu1 %v18136_v27  ;;  %v20077_v27 = vld [vmem:[%s29049_s3 + $0x1114] ss:$24 sps:$4 sm:$0xff]   ;;  %v18305_v0 = vcombine.high %v1086_v62, %v1098_v2  ;;  %v18304_v4 = vcombine.low %v1086_v62, %v1098_v2 }
 0x45c   :  { %8037 = vmatprep.subr.bf16.mxu1 %v18161_v59  ;;  %v20075_v59 = vld [vmem:[%s29049_s3 + $0x1110] ss:$24 sps:$4 sm:$0xff]  }
 0x45d   :  { %15958 = vmatpush1.bf16.msra.mxu0 %v20057_v63  ;;  %v1110_v63 = vld [vmem:[%s29047_s1 + $0x21f8] sm:$0xff] }
 0x45e   :  { %15959 = vmatprep.subr.bf16.mxu0 %v20062_v7  ;;  %v1122_v7 = vld [vmem:[%s29047_s1 + $0x2258] sm:$0xff] }
 0x45f   :  { %8038 = vmatpush1.bf16.msra.mxu1 %v18160_v5  ;;  %v20080_v5 = vld [vmem:[%s29049_s3 + $0x1144] ss:$24 sps:$4 sm:$0xff]   ;;  %v18329_v16 = vcombine.high %v1110_v63, %v1122_v7 }
 0x460   :  { %8039 = vmatprep.subr.bf16.mxu1 %v18185_v14  ;;  %v20078_v14 = vld [vmem:[%s29049_s3 + $0x1140] ss:$24 sps:$4 sm:$0xff]  }
 0x461   :  { %15960 = vmatpush1.bf16.msra.mxu0 %v20060_v8  ;;  %v1134_v8 = vld [vmem:[%s29047_s1 + $0x22b8] sm:$0xff] }
 0x462   :  { %15961 = vmatprep.subr.bf16.mxu0 %v20065_v6  ;;  %v1146_v6 = vld [vmem:[%s29047_s1 + $0x2318] sm:$0xff] }
 0x463   :  { %8040 = vmatpush1.bf16.msra.mxu1 %v18184_v61  ;;  %v20083_v61 = vld [vmem:[%s29049_s3 + $0x1174] ss:$24 sps:$4 sm:$0xff]   ;;  %v18352_v33 = vcombine.low %v1134_v8, %v1146_v6 }
 0x464   :  { %8041 = vmatprep.subr.bf16.mxu1 %v18209_v30  ;;  %v18353_v30 = vcombine.high %v1134_v8, %v1146_v6  ;;  %v128_v6 = vld [vmem:[%s29047_s1 + $0x348] sm:$0xff] }
 0x465   :  { %15962 = vmatpush1.bf16.msra.mxu0 %v20063_v26  ;;  %v18328_v26 = vcombine.low %v1110_v63, %v1122_v7 }
 0x466   :  { %15963 = vmatprep.subr.bf16.mxu0 %v20068_v29  ;;  %v1158_v29 = vld [vmem:[%s29047_s1 + $0x2378] sm:$0xff] }
 0x467   :  { %8042 = vmatpush1.bf16.msra.mxu1 %v18208_v38  ;;  %v1170_v38 = vld [vmem:[%s29047_s1 + $0x23d8] sm:$0xff] }
 0x468   :  { %8043 = vmatprep.subr.bf16.mxu1 %v18233_v39  ;;  %v20084_v39 = vld [vmem:[%s29049_s3 + $0x11a0] ss:$24 sps:$4 sm:$0xff]   ;;  %v18377_v42 = vcombine.high %v1158_v29, %v1170_v38  ;;  %v18376_v1 = vcombine.low %v1158_v29, %v1170_v38 }
 0x469   :  { %15964 = vmatpush1.bf16.msra.mxu0 %v20066_v34  ;;  %v32_v34 = vld [vmem:[%s29047_s1 + $0x48] sm:$0xff] }
 0x46a   :  { %15965 = vmatprep.subr.bf16.mxu0 %v20071_v37  ;;  %v44_v37 = vld [vmem:[%s29047_s1 + $0xa8] sm:$0xff] }
 0x46b   :  { %8044 = vmatpush1.bf16.msra.mxu1 %v18232_v40  ;;  %v20089_v40 = vld [vmem:[%s29049_s3 + $0x11d4] ss:$24 sps:$4 sm:$0xff]   ;;  %v17253_v62 = vcombine.high %v32_v34, %v44_v37  ;;  %v17252_v2 = vcombine.low %v32_v34, %v44_v37 }
 0x46c   :  { %8045 = vmatprep.subr.bf16.mxu1 %v18257_v49  ;;  %v20087_v49 = vld [vmem:[%s29049_s3 + $0x11d0] ss:$24 sps:$4 sm:$0xff]  }
 0x46d   :  { %15966 = vmatpush1.bf16.msra.mxu0 %v20069_v44  ;;  %v56_v44 = vld [vmem:[%s29047_s1 + $0x108] sm:$0xff] }
 0x46e   :  { %15967 = vmatprep.subr.bf16.mxu0 %v20074_v45  ;;  %v68_v45 = vld [vmem:[%s29047_s1 + $0x168] sm:$0xff] }
 0x46f   :  { %8046 = vmatpush1.bf16.msra.mxu1 %v18256_v46  ;;  %v20092_v46 = vld [vmem:[%s29049_s3 + $0x1204] ss:$24 sps:$4 sm:$0xff]   ;;  %v17276_v7 = vcombine.low %v56_v44, %v68_v45 }
 0x470   :  { %8047 = vmatprep.subr.bf16.mxu1 %v18281_v55  ;;  %v17277_v55 = vcombine.high %v56_v44, %v68_v45 }
 0x471   :  { %15968 = vmatpush1.bf16.msra.mxu0 %v20072_v52  ;;  %v80_v52 = vld [vmem:[%s29047_s1 + $0x1c8] sm:$0xff] }
 0x472   :  { %15969 = vmatprep.subr.bf16.mxu0 %v20077_v27  ;;  %v92_v27 = vld [vmem:[%s29047_s1 + $0x228] sm:$0xff] }
 0x473   :  { %8048 = vmatpush1.bf16.msra.mxu1 %v18280_v56  ;;  %v25391_v56 = vld [vmem:[%s29050_s2 + $0x8] sm:$0xff]  ;;  %v17300_v8 = vcombine.low %v80_v52, %v92_v27 }
 0x474   :  { %8049 = vmatprep.subr.bf16.mxu1 %v18305_v0  ;;  %v1236_v63 = vrot.slane %v25391_v56, %v24353_v54  ;;  %v17301_v0 = vcombine.high %v80_v52, %v92_v27  ;;  %v1224_v37 = vrot.slane %v25391_v56, %v24331_v43 }
 0x475   :  { %15970 = vmatpush1.bf16.msra.mxu0 %v20075_v59  ;;  %v104_v59 = vld [vmem:[%s29047_s1 + $0x288] sm:$0xff] }
 0x476   :  { %15971 = vmatprep.subr.bf16.mxu0 %v20080_v5  ;;  %v116_v5 = vld [vmem:[%s29047_s1 + $0x2e8] sm:$0xff] }
 0x477   :  { %8050 = vmatpush1.bf16.msra.mxu1 %v18304_v4  ;;  %v25403_v4 = vadd.f32 %v23529_v24, %v1236_v63  ;;  %v152_v24 = vld [vmem:[%s29047_s1 + $0x408] sm:$0xff] }
 0x478   :  { %8051 = vmatprep.subr.bf16.mxu1 %v18329_v16 }
 0x479   :  { %15972 = vmatpush1.bf16.msra.mxu0 %v20078_v14  ;;  %v140_v14 = vld [vmem:[%s29047_s1 + $0x3a8] sm:$0xff]  ;;  %v8595_v16 = vmul.f32 0.044715, %v25403_v4 }
 0x47a   :  { %15973 = vmatprep.subr.bf16.mxu0 %v20083_v61  ;;  %v17325_v61 = vcombine.high %v104_v59, %v116_v5  ;;  %v17349_v29 = vcombine.high %v128_v6, %v140_v14  ;;  %v17348_v38 = vcombine.low %v128_v6, %v140_v14 }
 0x47b   :  { %8052 = vmatpush1.bf16.msra.mxu1 %v18328_v26  ;;  %v164_v26 = vld [vmem:[%s29047_s1 + $0x468] sm:$0xff] }
 0x47c   :  { %8053 = vmatprep.subr.bf16.mxu1 %v18353_v30  ;;  %v8619_v30 = vmul.f32 %v25403_v4, %v8595_v16  ;;  %v17373_v34 = vcombine.high %v152_v24, %v164_v26  ;;  %v248_v16 = vld [vmem:[%s29047_s1 + $0x708] sm:$0xff] }
 0x47d   :  { %15974 = vmatpush1.bf16.msra.mxu0 %v20081_v9  ;;  %v17324_v9 = vcombine.low %v104_v59, %v116_v5 }
 0x47e   :  { %15975 = vmatprep.subr.bf16.mxu0 %v20086_v32  ;;  %v176_v32 = vld [vmem:[%s29047_s1 + $0x4c8] sm:$0xff]  ;;  %v8643_v44 = vmul.f32 %v25403_v4, %v8619_v30 }
 0x47f   :  { %8054 = vmatpush1.bf16.msra.mxu1 %v18352_v33  ;;  %v188_v33 = vld [vmem:[%s29047_s1 + $0x528] sm:$0xff] }
 0x480   :  { %8055 = vmatprep.subr.bf16.mxu1 %v18377_v42  ;;  %v200_v42 = vld [vmem:[%s29047_s1 + $0x588] sm:$0xff]  ;;  %v17397_v45 = vcombine.high %v176_v32, %v188_v33  ;;  %v17396_v27 = vcombine.low %v176_v32, %v188_v33  ;;  %v8667_v63 = vadd.f32 %v25403_v4, %v8643_v44 }
 0x481   :  { %15976 = vmatpush1.bf16.msra.mxu0 %v20084_v39  ;;  %v1228_v39 = vrot.slane %v25391_v56, %v24100_v50  ;;  %v272_v33 = vld [vmem:[%s29047_s1 + $0x7c8] sm:$0xff] }
 0x482   :  { %15977 = vmatprep.subr.bf16.mxu0 %v20089_v40  ;;  %v17372_v40 = vcombine.low %v152_v24, %v164_v26  ;;  %v8691_v24 = vmul.f32 0.7978846, %v8667_v63  ;;  %v296_v44 = vld [vmem:[%s29047_s1 + $0x888] sm:$0xff] }
 0x483   :  { %8056 = vmatpush1.bf16.msra.mxu1 %v18376_v1  ;;  %v212_v1 = vld [vmem:[%s29047_s1 + $0x5e8] sm:$0xff] }
 0x484   :  { %8189 = vmatprep.subr.bf16.mxu1 %v17253_v62  ;;  %v17421_v5 = vcombine.high %v200_v42, %v212_v1  ;;  %21550 = vtanh.f32 %v8691_v24 }
 0x485   :  { %15978 = vmatpush1.bf16.msra.mxu0 %v20087_v49 }
 0x486   :  { %15988 = vmatprep.subr.bf16.mxu0 %v20092_v46  ;;  %8058 = vmatmul.mubr.bf16.vlgmr.msra.gmra.mrb[20].mxu1 %v22255_v36 }
 0x487   :  { %8190 = vmatpush1.bf16.msra.mxu1 %v17252_v2  ;;  %8221 = vmatprep.mubr.bf16.mxu1 %v21711_v57 }
 0x488   :  { %8191 = vmatprep.subr.bf16.mxu1 %v17277_v55  ;;  %v224_v55 = vld [vmem:[%s29047_s1 + $0x648] sm:$0xff] }
 0x48b   :  { %8192 = vmatpush1.bf16.msra.mxu1 %v17276_v7 }
 0x48c   :  { %8193 = vmatprep.subr.bf16.mxu1 %v17301_v0  ;;  %v236_v0 = vld [vmem:[%s29047_s1 + $0x6a8] sm:$0xff] }
 0x48d   :  { %v17444_v32 = vcombine.low %v224_v55, %v236_v0 }
 0x48e   :  { %v21551_v63 = vpop.eup %21550 }
 0x48f   :  { %8194 = vmatpush1.bf16.msra.mxu1 %v17300_v8 }
 0x490   :  { %8195 = vmatprep.subr.bf16.mxu1 %v17325_v61  ;;  %v17420_v61 = vcombine.low %v200_v42, %v212_v1 }
 0x493   :  { %8196 = vmatpush1.bf16.msra.mxu1 %v17324_v9  ;;  %v260_v9 = vld [vmem:[%s29047_s1 + $0x768] sm:$0xff] }
 0x494   :  { %8197 = vmatprep.subr.bf16.mxu1 %v17349_v29  ;;  %v17445_v29 = vcombine.high %v224_v55, %v236_v0  ;;  %v17468_v1 = vcombine.low %v248_v16, %v260_v9 }
 0x497   :  { %8198 = vmatpush1.bf16.msra.mxu1 %v17348_v38 }
 0x498   :  { %8199 = vmatprep.subr.bf16.mxu1 %v17373_v34  ;;  %v284_v34 = vld [vmem:[%s29047_s1 + $0x828] sm:$0xff] }
 0x499   :  { %v7813_v49 = vpop.f32.mrb[16].mxu1 }
 0x49a   :  { %v19548_v46 = vadd.f32 %v7813_v49, %v1224_v37  ;;  %v7815_v62 = vpop.f32.mrb[17].mxu1  ;;  %v17493_v49 = vcombine.high %v272_v33, %v284_v34 }
 0x49b   :  { %v19549_v2 = vadd.f32 %v7815_v62, %v1228_v39  ;;  %v7817_v52 = vpop.f32.mrb[18].mxu1  ;;  %8200 = vmatpush1.bf16.msra.mxu1 %v17372_v40  ;;  %v17469_v39 = vcombine.high %v248_v16, %v260_v9  ;;  %v17492_v62 = vcombine.low %v272_v33, %v284_v34  ;;  %v356_v9 = vld [vmem:[%s29047_s1 + $0xa68] sm:$0xff] }
 0x49c   :  { %v8592_v7 = vmul.f32 0.044715, %v19548_v46  ;;  %v7818_v59 = vpop.f32.mrb[19].mxu1  ;;  %8201 = vmatprep.subr.bf16.mxu1 %v17397_v45  ;;  %v308_v45 = vld [vmem:[%s29047_s1 + $0x8e8] sm:$0xff] }
 0x49d   :  { %v8593_v8 = vmul.f32 0.044715, %v19549_v2  ;;  %v320_v52 = vld [vmem:[%s29047_s1 + $0x948] sm:$0xff]  ;;  %v17517_v55 = vcombine.high %v296_v44, %v308_v45  ;;  %v8569_v24 = vmul.f32 0.5, %v19549_v2 }
 0x49e   :  { %v8616_v6 = vmul.f32 %v19548_v46, %v8592_v7  ;;  %v17516_v7 = vcombine.low %v296_v44, %v308_v45  ;;  %v344_v59 = vld [vmem:[%s29047_s1 + $0xa08] sm:$0xff] }
 0x49f   :  { %v8617_v14 = vmul.f32 %v19549_v2, %v8593_v8  ;;  %8202 = vmatpush1.bf16.msra.mxu1 %v17396_v27  ;;  %v332_v27 = vld [vmem:[%s29047_s1 + $0x9a8] sm:$0xff]  ;;  %v8571_v8 = vmul.f32 0.5, %v25403_v4 }
 0x4a0   :  { %v8640_v26 = vmul.f32 %v19548_v46, %v8616_v6  ;;  %8203 = vmatprep.subr.bf16.mxu1 %v17421_v5  ;;  %v17541_v0 = vcombine.high %v320_v52, %v332_v27  ;;  %v8739_v6 = vadd.f32 1.0, %v21551_v63  ;;  %v368_v4 = vld [vmem:[%s29047_s1 + $0xac8] sm:$0xff] }
 0x4a1   :  { %v8641_v30 = vmul.f32 %v19549_v2, %v8617_v14  ;;  %v392_v44 = vld [vmem:[%s29047_s1 + $0xb88] sm:$0xff] }
 0x4a2   :  { %v8664_v38 = vadd.f32 %v19548_v46, %v8640_v26  ;;  %v8763_v33 = vmul.f32 %v8739_v6, %v8571_v8  ;;  %v404_v45 = vld [vmem:[%s29047_s1 + $0xbe8] sm:$0xff] }
 0x4a3   :  { %8204 = vmatpush1.bf16.msra.mxu1 %v17420_v61  ;;  %v8665_v37 = vadd.f32 %v19549_v2, %v8641_v30  ;;  %v8568_v61 = vmul.f32 0.5, %v19548_v46  ;;  %v380_v46 = vld [vmem:[%s29047_s1 + $0xb28] sm:$0xff]  ;;  %v20090_v2 = vld [vmem:[%s29049_s3 + $0x1200] ss:$24 sps:$4 sm:$0xff]  }
 0x4a4   :  { %8205 = vmatprep.subr.bf16.mxu1 %v17445_v29  ;;  %v8688_v40 = vmul.f32 0.7978846, %v8664_v38  ;;  %v17540_v29 = vcombine.low %v320_v52, %v332_v27  ;;  %v20098_v52 = vld [vmem:[%s29049_s3 + $0x1264] ss:$24 sps:$4 sm:$0xff]   ;;  %v17613_v27 = vcombine.high %v392_v44, %v404_v45  ;;  %v428_v63 = vld [vmem:[%s29047_s1 + $0xca8] sm:$0xff] }
 0x4a5   :  { %v8689_v42 = vmul.f32 0.7978846, %v8665_v37  ;;  %v440_v8 = vld [vmem:[%s29047_s1 + $0xd08] sm:$0xff] }
 0x4a6   :  { %21552 = vtanh.f32 %v8688_v40  ;;  %v20095_v40 = vld [vmem:[%s29049_s3 + $0x1234] ss:$24 sps:$4 sm:$0xff]  }
 0x4a7   :  { %8206 = vmatpush1.bf16.msra.mxu1 %v17444_v32  ;;  %21554 = vtanh.f32 %v8689_v42  ;;  %v17565_v32 = vcombine.high %v344_v59, %v356_v9  ;;  %v25491_v42 = vpack.c.bf16 %v8763_v33, %v8763_v33  ;;  %v452_v6 = vld [vmem:[%s29047_s1 + $0xd68] sm:$0xff] }
 0x4a8   :  { %8207 = vmatprep.subr.bf16.mxu1 %v17469_v39  ;;  %v17564_v39 = vcombine.low %v344_v59, %v356_v9  ;;  %v17612_v59 = vcombine.low %v392_v44, %v404_v45  ;;  %v17661_v9 = vcombine.high %v440_v8, %v452_v6  ;;  %v512_v44 = vld [vmem:[%s29047_s1 + $0xf48] sm:$0xff] }
 0x4ab   :  { %8208 = vmatpush1.bf16.msra.mxu1 %v17468_v1  ;;  %v17589_v1 = vcombine.high %v368_v4, %v380_v46 }
 0x4ac   :  { %8209 = vmatprep.subr.bf16.mxu1 %v17493_v49  ;;  %v20093_v49 = vld [vmem:[%s29049_s3 + $0x1230] ss:$24 sps:$4 sm:$0xff]  }
 0x4af   :  { %8210 = vmatpush1.bf16.msra.mxu1 %v17492_v62  ;;  %v17588_v62 = vcombine.low %v368_v4, %v380_v46  ;;  %v500_v4 = vld [vmem:[%s29047_s1 + $0xee8] sm:$0xff] }
 0x4b0   :  { %v21553_v5 = vpop.eup %21552  ;;  %8211 = vmatprep.subr.bf16.mxu1 %v17517_v55  ;;  %v416_v55 = vld [vmem:[%s29047_s1 + $0xc48] sm:$0xff] }
 0x4b1   :  { %v21555_v14 = vpop.eup %21554  ;;  %v8736_v16 = vadd.f32 1.0, %v21553_v5  ;;  %v20101_v5 = vld [vmem:[%s29049_s3 + $0x1294] ss:$24 sps:$4 sm:$0xff]  }
 0x4b2   :  { %v8737_v26 = vadd.f32 1.0, %v21555_v14  ;;  %v20099_v14 = vld [vmem:[%s29049_s3 + $0x1290] ss:$24 sps:$4 sm:$0xff]  }
 0x4b3   :  { %8212 = vmatpush1.bf16.msra.mxu1 %v17516_v7  ;;  %v8760_v30 = vmul.f32 %v8736_v16, %v8568_v61  ;;  %v20096_v7 = vld [vmem:[%s29049_s3 + $0x1260] ss:$24 sps:$4 sm:$0xff]   ;;  %v17636_v61 = vcombine.low %v416_v55, %v428_v63  ;;  %v20104_v16 = vld [vmem:[%s29049_s3 + $0x12c4] ss:$24 sps:$4 sm:$0xff]  }
 0x4b4   :  { %8213 = vmatprep.subr.bf16.mxu1 %v17541_v0  ;;  %v8761_v38 = vmul.f32 %v8737_v26, %v8569_v24  ;;  %v17637_v0 = vcombine.high %v416_v55, %v428_v63  ;;  %v464_v24 = vld [vmem:[%s29047_s1 + $0xdc8] sm:$0xff] }
 0x4b5   :  { %v25485_v37 = vpack.c.bf16 %v8760_v30, %v8760_v30  ;;  %v476_v26 = vld [vmem:[%s29047_s1 + $0xe28] sm:$0xff]  ;;  %v20102_v30 = vld [vmem:[%s29049_s3 + $0x12c0] ss:$24 sps:$4 sm:$0xff]  }
 0x4b6   :  { %v25480_v34 = vpack.c.bf16 %v8761_v38, %v8761_v38  ;;  %v17660_v38 = vcombine.low %v440_v8, %v452_v6  ;;  %v17685_v33 = vcombine.high %v464_v24, %v476_v26  ;;  %v536_v55 = vld [vmem:[%s29047_s1 + $0x1008] sm:$0xff] }
 0x4b7   :  { %8214 = vmatpush1.bf16.msra.mxu1 %v17540_v29  ;;  %v1232_v29 = vrot.slane %v25391_v56, %v24571_v48  ;;  %v488_v56 = vld [vmem:[%s29047_s1 + $0xe88] sm:$0xff] }
 0x4b8   :  { %15979 = vmatprep.mubr.bf16.mxu0 %v25480_v34  ;;  %8215 = vmatprep.subr.bf16.mxu1 %v17565_v32  ;;  %v20107_v32 = vld [vmem:[%s29049_s3 + $0x12f4] ss:$24 sps:$4 sm:$0xff]  }
 0x4b9   :  { %15980 = vmatmul.mubr.bf16.vlgmr.msra.gmra.mrb[16].mxu0 %v25485_v37  ;;  %v25554_v46 = vadd.f32 %v23527_v19, %v1232_v29  ;;  %v524_v19 = vld [vmem:[%s29047_s1 + $0xfa8] sm:$0xff] }
 0x4ba   :  { %15989 = vmatpush1.bf16.msra.mxu0 %v20090_v2  ;;  %16020 = vmatprep.mubr.bf16.mxu0 %v25491_v42  ;;  %v20105_v2 = vld [vmem:[%s29049_s3 + $0x12f0] ss:$24 sps:$4 sm:$0xff]  }
 0x4bb   :  { %8216 = vmatpush1.bf16.msra.mxu1 %v17564_v39  ;;  %15990 = vmatprep.subr.bf16.mxu0 %v20095_v40  ;;  %v17684_v39 = vcombine.low %v464_v24, %v476_v26  ;;  %v20110_v40 = vld [vmem:[%s29049_s3 + $0x1324] ss:$24 sps:$4 sm:$0xff]   ;;  %v8594_v45 = vmul.f32 0.044715, %v25554_v46  ;;  %v548_v63 = vld [vmem:[%s29047_s1 + $0x1068] sm:$0xff] }
 0x4bc   :  { %8217 = vmatprep.subr.bf16.mxu1 %v17589_v1  ;;  %v17709_v1 = vcombine.high %v488_v56, %v500_v4  ;;  %v17757_v8 = vcombine.high %v536_v55, %v548_v63  ;;  %v560_v6 = vld [vmem:[%s29047_s1 + $0x10c8] sm:$0xff] }
 0x4bd   :  { %v20119_v24 = vld [vmem:[%s29049_s3 + $0x13b4] ss:$24 sps:$4 sm:$0xff]  }
 0x4be   :  { %15991 = vmatpush1.bf16.msra.mxu0 %v20093_v49  ;;  %v20108_v49 = vld [vmem:[%s29049_s3 + $0x1320] ss:$24 sps:$4 sm:$0xff]   ;;  %v584_v29 = vld [vmem:[%s29047_s1 + $0x1188] sm:$0xff] }
 0x4bf   :  { %8218 = vmatpush1.bf16.msra.mxu1 %v17588_v62  ;;  %15992 = vmatprep.subr.bf16.mxu0 %v20098_v52  ;;  %v17708_v62 = vcombine.low %v488_v56, %v500_v4  ;;  %v20113_v52 = vld [vmem:[%s29049_s3 + $0x1354] ss:$24 sps:$4 sm:$0xff]   ;;  %v20122_v56 = vld [vmem:[%s29049_s3 + $0x13e4] ss:$24 sps:$4 sm:$0xff]  }
 0x4c0   :  { %8219 = vmatprep.subr.bf16.mxu1 %v17613_v27  ;;  %v17733_v27 = vcombine.high %v512_v44, %v524_v19 }
 0x4c2   :  { %15993 = vmatpush1.bf16.msra.mxu0 %v20096_v7  ;;  %v8618_v7 = vmul.f32 %v25554_v46, %v8594_v45 }
 0x4c3   :  { %8220 = vmatpush1.bf16.msra.mxu1 %v17612_v59  ;;  %15994 = vmatprep.subr.bf16.mxu0 %v20101_v5  ;;  %v20111_v59 = vld [vmem:[%s29049_s3 + $0x1350] ss:$24 sps:$4 sm:$0xff]   ;;  %v17732_v5 = vcombine.low %v512_v44, %v524_v19  ;;  %v20125_v19 = vld [vmem:[%s29049_s3 + $0x1414] ss:$24 sps:$4 sm:$0xff]  }
 0x4c4   :  { %8230 = vmatprep.subr.bf16.mxu1 %v17637_v0  ;;  %v20116_v0 = vld [vmem:[%s29049_s3 + $0x1384] ss:$24 sps:$4 sm:$0xff]  }
 0x4c6   :  { %15995 = vmatpush1.bf16.msra.mxu0 %v20099_v14  ;;  %8222 = vmatmul.mubr.bf16.vlgmr.msra.gmra.mrb[24].mxu1 %v21837_v12  ;;  %v572_v14 = vld [vmem:[%s29047_s1 + $0x1128] sm:$0xff] }
 0x4c7   :  { %8231 = vmatpush1.bf16.msra.mxu1 %v17636_v61  ;;  %15996 = vmatprep.subr.bf16.mxu0 %v20104_v16  ;;  %v8642_v61 = vmul.f32 %v25554_v46, %v8618_v7  ;;  %v20114_v16 = vld [vmem:[%s29049_s3 + $0x1380] ss:$24 sps:$4 sm:$0xff]   ;;  %v17781_v26 = vcombine.high %v560_v6, %v572_v14  ;;  %v656_v7 = vld [vmem:[%s29047_s1 + $0x13c8] sm:$0xff] }
 0x4c8   :  { %8232 = vmatprep.subr.bf16.mxu1 %v17661_v9  ;;  %8262 = vmatprep.mubr.bf16.mxu1 %v21858_v21  ;;  %v17756_v9 = vcombine.low %v536_v55, %v548_v63  ;;  %v20128_v55 = vld [vmem:[%s29049_s3 + $0x1444] ss:$24 sps:$4 sm:$0xff]  }
 0x4ca   :  { %15997 = vmatpush1.bf16.msra.mxu0 %v20102_v30  ;;  %v596_v30 = vld [vmem:[%s29047_s1 + $0x11e8] sm:$0xff] }
 0x4cb   :  { %8233 = vmatpush1.bf16.msra.mxu1 %v17660_v38  ;;  %15998 = vmatprep.subr.bf16.mxu0 %v20107_v32  ;;  %v8666_v38 = vadd.f32 %v25554_v46, %v8642_v61  ;;  %v20117_v32 = vld [vmem:[%s29049_s3 + $0x13b0] ss:$24 sps:$4 sm:$0xff]   ;;  %v17805_v4 = vcombine.high %v584_v29, %v596_v30  ;;  %v17804_v44 = vcombine.low %v584_v29, %v596_v30 }
 0x4cc   :  { %8234 = vmatprep.subr.bf16.mxu1 %v17685_v33  ;;  %v17780_v33 = vcombine.low %v560_v6, %v572_v14  ;;  %v680_v14 = vld [vmem:[%s29047_s1 + $0x1488] sm:$0xff] }
 0x4cd   :  { %v692_v61 = vld [vmem:[%s29047_s1 + $0x14e8] sm:$0xff] }
 0x4ce   :  { %15999 = vmatpush1.bf16.msra.mxu0 %v20105_v2  ;;  %v608_v2 = vld [vmem:[%s29047_s1 + $0x1248] sm:$0xff]  ;;  %v17901_v29 = vcombine.high %v680_v14, %v692_v61 }
 0x4cf   :  { %8235 = vmatpush1.bf16.msra.mxu1 %v17684_v39  ;;  %16000 = vmatprep.subr.bf16.mxu0 %v20110_v40  ;;  %v620_v39 = vld [vmem:[%s29047_s1 + $0x12a8] sm:$0xff]  ;;  %v20120_v40 = vld [vmem:[%s29049_s3 + $0x13e0] ss:$24 sps:$4 sm:$0xff]  }
 0x4d0   :  { %8236 = vmatprep.subr.bf16.mxu1 %v17709_v1  ;;  %v8690_v1 = vmul.f32 0.7978846, %v8666_v38  ;;  %v17829_v45 = vcombine.high %v608_v2, %v620_v39  ;;  %v704_v30 = vld [vmem:[%s29047_s1 + $0x1548] sm:$0xff] }
 0x4d1   :  { %v716_v38 = vld [vmem:[%s29047_s1 + $0x15a8] sm:$0xff] }
 0x4d2   :  { %16001 = vmatpush1.bf16.msra.mxu0 %v20108_v49  ;;  %v632_v49 = vld [vmem:[%s29047_s1 + $0x1308] sm:$0xff]  ;;  %21556 = vtanh.f32 %v8690_v1 }
 0x4d3   :  { %8237 = vmatpush1.bf16.msra.mxu1 %v17708_v62  ;;  %16002 = vmatprep.subr.bf16.mxu0 %v20113_v52  ;;  %v644_v62 = vld [vmem:[%s29047_s1 + $0x1368] sm:$0xff] }
 0x4d4   :  { %8238 = vmatprep.subr.bf16.mxu1 %v17733_v27  ;;  %v20123_v52 = vld [vmem:[%s29049_s3 + $0x1410] ss:$24 sps:$4 sm:$0xff]   ;;  %v17828_v27 = vcombine.low %v608_v2, %v620_v39  ;;  %v17853_v63 = vcombine.high %v632_v49, %v644_v62  ;;  %v17925_v39 = vcombine.high %v704_v30, %v716_v38 }
 0x4d5   :  { %v740_v1 = vld [vmem:[%s29047_s1 + $0x1668] sm:$0xff] }
 0x4d6   :  { %16003 = vmatpush1.bf16.msra.mxu0 %v20111_v59  ;;  %v668_v59 = vld [vmem:[%s29047_s1 + $0x1428] sm:$0xff] }
 0x4d7   :  { %8239 = vmatpush1.bf16.msra.mxu1 %v17732_v5  ;;  %16004 = vmatprep.subr.bf16.mxu0 %v20116_v0  ;;  %v20126_v5 = vld [vmem:[%s29049_s3 + $0x1440] ss:$24 sps:$4 sm:$0xff]   ;;  %v17852_v0 = vcombine.low %v632_v49, %v644_v62  ;;  %v17877_v6 = vcombine.high %v656_v7, %v668_v59  ;;  %v752_v62 = vld [vmem:[%s29047_s1 + $0x16c8] sm:$0xff] }
 0x4d8   :  { %8240 = vmatprep.subr.bf16.mxu1 %v17757_v8  ;;  %v20131_v8 = vld [vmem:[%s29049_s3 + $0x1474] ss:$24 sps:$4 sm:$0xff]  }
 0x4da   :  { %16005 = vmatpush1.bf16.msra.mxu0 %v20114_v16  ;;  %v20129_v16 = vld [vmem:[%s29049_s3 + $0x1470] ss:$24 sps:$4 sm:$0xff]  }
 0x4db   :  { %8241 = vmatpush1.bf16.msra.mxu1 %v17756_v9  ;;  %16006 = vmatprep.subr.bf16.mxu0 %v20119_v24  ;;  %v17876_v9 = vcombine.low %v656_v7, %v668_v59  ;;  %v20134_v24 = vld [vmem:[%s29049_s3 + $0x14a4] ss:$24 sps:$4 sm:$0xff]   ;;  %v20143_v7 = vld [vmem:[%s29049_s3 + $0x1534] ss:$24 sps:$4 sm:$0xff]  }
 0x4dc   :  { %8242 = vmatprep.subr.bf16.mxu1 %v17781_v26  ;;  %v21557_v26 = vpop.eup %21556 }
 0x4dd   :  { %v8738_v2 = vadd.f32 1.0, %v21557_v26 }
 0x4de   :  { %16007 = vmatpush1.bf16.msra.mxu0 %v20117_v32  ;;  %v20132_v32 = vld [vmem:[%s29049_s3 + $0x14a0] ss:$24 sps:$4 sm:$0xff]  }
 0x4df   :  { %8243 = vmatpush1.bf16.msra.mxu1 %v17780_v33  ;;  %16008 = vmatprep.subr.bf16.mxu0 %v20122_v56  ;;  %v17900_v33 = vcombine.low %v680_v14, %v692_v61  ;;  %v20137_v56 = vld [vmem:[%s29049_s3 + $0x14d4] ss:$24 sps:$4 sm:$0xff]   ;;  %v20146_v14 = vld [vmem:[%s29049_s3 + $0x1564] ss:$24 sps:$4 sm:$0xff]  }
 0x4e0   :  { %8244 = vmatprep.subr.bf16.mxu1 %v17805_v4  ;;  %v8570_v4 = vmul.f32 0.5, %v25554_v46 }
 0x4e2   :  { %16009 = vmatpush1.bf16.msra.mxu0 %v20120_v40  ;;  %v728_v40 = vld [vmem:[%s29047_s1 + $0x1608] sm:$0xff]  ;;  %v8762_v46 = vmul.f32 %v8738_v2, %v8570_v4  ;;  %v20152_v2 = vld [vmem:[%s29049_s3 + $0x15c4] ss:$24 sps:$4 sm:$0xff]  }
 0x4e3   :  { %8245 = vmatpush1.bf16.msra.mxu1 %v17804_v44  ;;  %16010 = vmatprep.subr.bf16.mxu0 %v20125_v19  ;;  %v20135_v44 = vld [vmem:[%s29049_s3 + $0x14d0] ss:$24 sps:$4 sm:$0xff]   ;;  %v17924_v19 = vcombine.low %v704_v30, %v716_v38  ;;  %v17949_v49 = vcombine.high %v728_v40, %v740_v1 }
 0x4e4   :  { %8246 = vmatprep.subr.bf16.mxu1 %v17829_v45  ;;  %v20140_v45 = vld [vmem:[%s29049_s3 + $0x1504] ss:$24 sps:$4 sm:$0xff]   ;;  %v824_v38 = vld [vmem:[%s29047_s1 + $0x1908] sm:$0xff] }
 0x4e6   :  { %16011 = vmatpush1.bf16.msra.mxu0 %v20123_v52  ;;  %v764_v52 = vld [vmem:[%s29047_s1 + $0x1728] sm:$0xff] }
 0x4e7   :  { %8247 = vmatpush1.bf16.msra.mxu1 %v17828_v27  ;;  %16012 = vmatprep.subr.bf16.mxu0 %v20128_v55  ;;  %v20138_v27 = vld [vmem:[%s29049_s3 + $0x1500] ss:$24 sps:$4 sm:$0xff]   ;;  %v25696_v55 = vpack.c.bf16 %v8762_v46, %v8762_v46  ;;  %v17973_v59 = vcombine.high %v752_v62, %v764_v52 }
 0x4e8   :  { %8248 = vmatprep.subr.bf16.mxu1 %v17853_v63  ;;  %v17948_v63 = vcombine.low %v728_v40, %v740_v1  ;;  %v860_v40 = vld [vmem:[%s29047_s1 + $0x1a28] sm:$0xff]  ;;  %v20150_v1 = vld [vmem:[%s29049_s3 + $0x15c0] ss:$24 sps:$4 sm:$0xff]  }
 0x4ea   :  { %16013 = vmatpush1.bf16.msra.mxu0 %v20126_v5  ;;  %v776_v5 = vld [vmem:[%s29047_s1 + $0x1788] sm:$0xff] }
 0x4eb   :  { %8249 = vmatpush1.bf16.msra.mxu1 %v17852_v0  ;;  %16014 = vmatprep.subr.bf16.mxu0 %v20131_v8  ;;  %v788_v0 = vld [vmem:[%s29047_s1 + $0x17e8] sm:$0xff] }
 0x4ec   :  { %8250 = vmatprep.subr.bf16.mxu1 %v17877_v6  ;;  %v20141_v8 = vld [vmem:[%s29049_s3 + $0x1530] ss:$24 sps:$4 sm:$0xff]   ;;  %v17972_v6 = vcombine.low %v752_v62, %v764_v52  ;;  %v17997_v61 = vcombine.high %v776_v5, %v788_v0  ;;  %v17996_v26 = vcombine.low %v776_v5, %v788_v0  ;;  %v20156_v5 = vld [vmem:[%s29049_s3 + $0x1620] ss:$24 sps:$4 sm:$0xff]  }
 0x4ed   :  { %v20153_v62 = vld [vmem:[%s29049_s3 + $0x15f0] ss:$24 sps:$4 sm:$0xff]  }
 0x4ee   :  { %16015 = vmatpush1.bf16.msra.mxu0 %v20129_v16  ;;  %v800_v16 = vld [vmem:[%s29047_s1 + $0x1848] sm:$0xff] }
 0x4ef   :  { %8251 = vmatpush1.bf16.msra.mxu1 %v17876_v9  ;;  %16016 = vmatprep.subr.bf16.mxu0 %v20134_v24  ;;  %v812_v9 = vld [vmem:[%s29047_s1 + $0x18a8] sm:$0xff]  ;;  %v20144_v24 = vld [vmem:[%s29049_s3 + $0x1560] ss:$24 sps:$4 sm:$0xff]  }
 0x4f0   :  { %8252 = vmatprep.subr.bf16.mxu1 %v17901_v29  ;;  %v20149_v29 = vld [vmem:[%s29049_s3 + $0x1594] ss:$24 sps:$4 sm:$0xff]   ;;  %v18021_v30 = vcombine.high %v800_v16, %v812_v9 }
 0x4f2   :  { %16017 = vmatpush1.bf16.msra.mxu0 %v20132_v32  ;;  %v836_v32 = vld [vmem:[%s29047_s1 + $0x1968] sm:$0xff] }
 0x4f3   :  { %8253 = vmatpush1.bf16.msra.mxu1 %v17900_v33  ;;  %16018 = vmatprep.subr.bf16.mxu0 %v20137_v56  ;;  %v20147_v33 = vld [vmem:[%s29049_s3 + $0x1590] ss:$24 sps:$4 sm:$0xff]   ;;  %v18020_v56 = vcombine.low %v800_v16, %v812_v9  ;;  %v18045_v4 = vcombine.high %v824_v38, %v836_v32 }
 0x4f4   :  { %8254 = vmatprep.subr.bf16.mxu1 %v17925_v39  ;;  %v848_v39 = vld [vmem:[%s29047_s1 + $0x19c8] sm:$0xff] }
 0x4f5   :  { %v18069_v46 = vcombine.high %v848_v39, %v860_v40  ;;  %v18068_v52 = vcombine.low %v848_v39, %v860_v40  ;;  %v20159_v16 = vld [vmem:[%s29049_s3 + $0x1650] ss:$24 sps:$4 sm:$0xff]  }
 0x4f6   :  { %16019 = vmatpush1.bf16.msra.mxu0 %v20135_v44  ;;  %v18044_v44 = vcombine.low %v824_v38, %v836_v32  ;;  %v20162_v38 = vld [vmem:[%s29049_s3 + $0x1680] ss:$24 sps:$4 sm:$0xff]   ;;  %v20165_v39 = vld [vmem:[%s29049_s3 + $0x16b0] ss:$24 sps:$4 sm:$0xff]  }
 0x4f7   :  { %8255 = vmatpush1.bf16.msra.mxu1 %v17924_v19  ;;  %16029 = vmatprep.subr.bf16.mxu0 %v20140_v45  ;;  %v20155_v19 = vld [vmem:[%s29049_s3 + $0x15f4] ss:$24 sps:$4 sm:$0xff]  }
 0x4f8   :  { %8256 = vmatprep.subr.bf16.mxu1 %v17949_v49  ;;  %v872_v45 = vld [vmem:[%s29047_s1 + $0x1a88] sm:$0xff] }
 0x4f9   :  { %16021 = vmatmul.mubr.bf16.vlgmr.msra.gmra.mrb[16].mxu0 %v25696_v55  ;;  %v884_v49 = vld [vmem:[%s29047_s1 + $0x1ae8] sm:$0xff] }
 0x4fa   :  { %16030 = vmatpush1.bf16.msra.mxu0 %v20138_v27  ;;  %v20158_v27 = vld [vmem:[%s29049_s3 + $0x1624] ss:$24 sps:$4 sm:$0xff]   ;;  %v18092_v0 = vcombine.low %v872_v45, %v884_v49 }
 0x4fb   :  { %8257 = vmatpush1.bf16.msra.mxu1 %v17948_v63  ;;  %16031 = vmatprep.subr.bf16.mxu0 %v20143_v7  ;;  %v18093_v63 = vcombine.high %v872_v45, %v884_v49  ;;  %v896_v7 = vld [vmem:[%s29047_s1 + $0x1b48] sm:$0xff]  ;;  %v20168_v45 = vld [vmem:[%s29049_s3 + $0x16e0] ss:$24 sps:$4 sm:$0xff]  }
 0x4fc   :  { %8258 = vmatprep.subr.bf16.mxu1 %v17973_v59  ;;  %v908_v59 = vld [vmem:[%s29047_s1 + $0x1ba8] sm:$0xff] }
 0x4fd   :  { %v18116_v9 = vcombine.low %v896_v7, %v908_v59 }
 0x4fe   :  { %16032 = vmatpush1.bf16.msra.mxu0 %v20141_v8  ;;  %v20161_v8 = vld [vmem:[%s29049_s3 + $0x1654] ss:$24 sps:$4 sm:$0xff]  }
 0x4ff   :  { %8259 = vmatpush1.bf16.msra.mxu1 %v17972_v6  ;;  %16033 = vmatprep.subr.bf16.mxu0 %v20146_v14  ;;  %v18117_v6 = vcombine.high %v896_v7, %v908_v59  ;;  %v920_v14 = vld [vmem:[%s29047_s1 + $0x1c08] sm:$0xff] }
 0x500   :  { %8260 = vmatprep.subr.bf16.mxu1 %v17997_v61  ;;  %v932_v61 = vld [vmem:[%s29047_s1 + $0x1c68] sm:$0xff] }
 0x501   :  { %v18140_v32 = vcombine.low %v920_v14, %v932_v61  ;;  %v20171_v7 = vld [vmem:[%s29049_s3 + $0x1710] ss:$24 sps:$4 sm:$0xff]  }
 0x502   :  { %16034 = vmatpush1.bf16.msra.mxu0 %v20144_v24  ;;  %v20164_v24 = vld [vmem:[%s29049_s3 + $0x1684] ss:$24 sps:$4 sm:$0xff]  }
 0x503   :  { %8261 = vmatpush1.bf16.msra.mxu1 %v17996_v26  ;;  %16035 = vmatprep.subr.bf16.mxu0 %v20149_v29  ;;  %v18141_v26 = vcombine.high %v920_v14, %v932_v61  ;;  %v944_v29 = vld [vmem:[%s29047_s1 + $0x1cc8] sm:$0xff]  ;;  %v20174_v14 = vld [vmem:[%s29049_s3 + $0x1740] ss:$24 sps:$4 sm:$0xff]  }
 0x504   :  { %8271 = vmatprep.subr.bf16.mxu1 %v18021_v30  ;;  %v956_v30 = vld [vmem:[%s29047_s1 + $0x1d28] sm:$0xff] }
 0x505   :  { %v18164_v40 = vcombine.low %v944_v29, %v956_v30 }
 0x506   :  { %8263 = vmatmul.mubr.bf16.vlgmr.msra.gmra.mrb[24].mxu1 %v22046_v22  ;;  %16036 = vmatpush1.bf16.msra.mxu0 %v20147_v33  ;;  %v20167_v33 = vld [vmem:[%s29049_s3 + $0x16b4] ss:$24 sps:$4 sm:$0xff]  }
 0x507   :  { %8272 = vmatpush1.bf16.msra.mxu1 %v18020_v56  ;;  %8303 = vmatprep.mubr.bf16.mxu1 %v22067_v31  ;;  %v18165_v56 = vcombine.high %v944_v29, %v956_v30  ;;  %v20177_v29 = vld [vmem:[%s29049_s3 + $0x1770] ss:$24 sps:$4 sm:$0xff]  }
 0x508   :  { %8273 = vmatprep.subr.bf16.mxu1 %v18045_v4  ;;  %16037 = vmatprep.subr.bf16.mxu0 %v20152_v2  ;;  %v968_v4 = vld [vmem:[%s29047_s1 + $0x1d88] sm:$0xff] }
 0x509   :  { %v980_v2 = vld [vmem:[%s29047_s1 + $0x1de8] sm:$0xff] }
 0x50a   :  { %16038 = vmatpush1.bf16.msra.mxu0 %v20150_v1  ;;  %v20170_v1 = vld [vmem:[%s29049_s3 + $0x16e4] ss:$24 sps:$4 sm:$0xff]   ;;  %v18188_v49 = vcombine.low %v968_v4, %v980_v2 }
 0x50b   :  { %8274 = vmatpush1.bf16.msra.mxu1 %v18044_v44  ;;  %16039 = vmatprep.subr.bf16.mxu0 %v20155_v19  ;;  %v18189_v44 = vcombine.high %v968_v4, %v980_v2  ;;  %v992_v19 = vld [vmem:[%s29047_s1 + $0x1e48] sm:$0xff]  ;;  %v20180_v4 = vld [vmem:[%s29049_s3 + $0x17a0] ss:$24 sps:$4 sm:$0xff]  }
 0x50c   :  { %8275 = vmatprep.subr.bf16.mxu1 %v18069_v46  ;;  %v1004_v46 = vld [vmem:[%s29047_s1 + $0x1ea8] sm:$0xff] }
 0x50d   :  { %v18212_v59 = vcombine.low %v992_v19, %v1004_v46 }
 0x50e   :  { %16040 = vmatpush1.bf16.msra.mxu0 %v20153_v62  ;;  %v20173_v62 = vld [vmem:[%s29049_s3 + $0x1714] ss:$24 sps:$4 sm:$0xff]  }
 0x50f   :  { %8276 = vmatpush1.bf16.msra.mxu1 %v18068_v52  ;;  %16041 = vmatprep.subr.bf16.mxu0 %v20158_v27  ;;  %v18213_v52 = vcombine.high %v992_v19, %v1004_v46  ;;  %v1016_v27 = vld [vmem:[%s29047_s1 + $0x1f08] sm:$0xff] }
 0x510   :  { %8277 = vmatprep.subr.bf16.mxu1 %v18093_v63  ;;  %v1028_v63 = vld [vmem:[%s29047_s1 + $0x1f68] sm:$0xff] }
 0x511   :  { %v18236_v61 = vcombine.low %v1016_v27, %v1028_v63  ;;  %v20183_v19 = vld [vmem:[%s29049_s3 + $0x17d0] ss:$24 sps:$4 sm:$0xff]  }
 0x512   :  { %16042 = vmatpush1.bf16.msra.mxu0 %v20156_v5  ;;  %v20176_v5 = vld [vmem:[%s29049_s3 + $0x1744] ss:$24 sps:$4 sm:$0xff]  }
 0x513   :  { %8278 = vmatpush1.bf16.msra.mxu1 %v18092_v0  ;;  %16043 = vmatprep.subr.bf16.mxu0 %v20161_v8  ;;  %v18237_v0 = vcombine.high %v1016_v27, %v1028_v63  ;;  %v1040_v8 = vld [vmem:[%s29047_s1 + $0x1fc8] sm:$0xff] }
 0x514   :  { %8279 = vmatprep.subr.bf16.mxu1 %v18117_v6  ;;  %v1052_v6 = vld [vmem:[%s29047_s1 + $0x2028] sm:$0xff] }
 0x515   :  { %v18260_v30 = vcombine.low %v1040_v8, %v1052_v6 }
 0x516   :  { %16044 = vmatpush1.bf16.msra.mxu0 %v20159_v16  ;;  %v20179_v16 = vld [vmem:[%s29049_s3 + $0x1774] ss:$24 sps:$4 sm:$0xff]  }
 0x517   :  { %8280 = vmatpush1.bf16.msra.mxu1 %v18116_v9  ;;  %16045 = vmatprep.subr.bf16.mxu0 %v20164_v24  ;;  %v18261_v9 = vcombine.high %v1040_v8, %v1052_v6  ;;  %v1064_v24 = vld [vmem:[%s29047_s1 + $0x2088] sm:$0xff]  ;;  %v34_v8 = vld [vmem:[%s29047_s1 + $0x58] sm:$0xff] }
 0x518   :  { %8281 = vmatprep.subr.bf16.mxu1 %v18141_v26  ;;  %v1076_v26 = vld [vmem:[%s29047_s1 + $0x20e8] sm:$0xff]  ;;  %v46_v6 = vld [vmem:[%s29047_s1 + $0xb8] sm:$0xff] }
 0x519   :  { %v18284_v2 = vcombine.low %v1064_v24, %v1076_v26 }
 0x51a   :  { %16046 = vmatpush1.bf16.msra.mxu0 %v20162_v38  ;;  %v20182_v38 = vld [vmem:[%s29049_s3 + $0x17a4] ss:$24 sps:$4 sm:$0xff]  }
 0x51b   :  { %8282 = vmatpush1.bf16.msra.mxu1 %v18140_v32  ;;  %16047 = vmatprep.subr.bf16.mxu0 %v20167_v33  ;;  %v18285_v32 = vcombine.high %v1064_v24, %v1076_v26  ;;  %v1088_v33 = vld [vmem:[%s29047_s1 + $0x2148] sm:$0xff]  ;;  %v17256_v24 = vcombine.low %v34_v8, %v46_v6  ;;  %v25911_v26 = vld [vmem:[%s29050_s2 + $0x10] sm:$0xff] }
 0x51c   :  { %8283 = vmatprep.subr.bf16.mxu1 %v18165_v56  ;;  %v1100_v56 = vld [vmem:[%s29047_s1 + $0x21a8] sm:$0xff] }
 0x51d   :  { %v18308_v46 = vcombine.low %v1088_v33, %v1100_v56 }
 0x51e   :  { %16048 = vmatpush1.bf16.msra.mxu0 %v20165_v39  ;;  %v20185_v39 = vld [vmem:[%s29049_s3 + $0x17d4] ss:$24 sps:$4 sm:$0xff]  }
 0x51f   :  { %8284 = vmatpush1.bf16.msra.mxu1 %v18164_v40  ;;  %16049 = vmatprep.subr.bf16.mxu0 %v20170_v1  ;;  %v18309_v40 = vcombine.high %v1088_v33, %v1100_v56  ;;  %v1112_v1 = vld [vmem:[%s29047_s1 + $0x2208] sm:$0xff] }
 0x520   :  { %8285 = vmatprep.subr.bf16.mxu1 %v18189_v44  ;;  %v1124_v44 = vld [vmem:[%s29047_s1 + $0x2268] sm:$0xff] }
 0x521   :  { %v18332_v27 = vcombine.low %v1112_v1, %v1124_v44 }
 0x522   :  { %16050 = vmatpush1.bf16.msra.mxu0 %v20168_v45  ;;  %v20188_v45 = vld [vmem:[%s29049_s3 + $0x1804] ss:$24 sps:$4 sm:$0xff]  }
 0x523   :  { %8286 = vmatpush1.bf16.msra.mxu1 %v18188_v49  ;;  %16051 = vmatprep.subr.bf16.mxu0 %v20173_v62  ;;  %v18333_v49 = vcombine.high %v1112_v1, %v1124_v44  ;;  %v1136_v62 = vld [vmem:[%s29047_s1 + $0x22c8] sm:$0xff]  ;;  %v142_v44 = vld [vmem:[%s29047_s1 + $0x3b8] sm:$0xff] }
 0x524   :  { %8287 = vmatprep.subr.bf16.mxu1 %v18213_v52  ;;  %v1148_v52 = vld [vmem:[%s29047_s1 + $0x2328] sm:$0xff] }
 0x525   :  { %v18357_v63 = vcombine.high %v1136_v62, %v1148_v52 }
 0x526   :  { %16052 = vmatpush1.bf16.msra.mxu0 %v20171_v7  ;;  %v1160_v7 = vld [vmem:[%s29047_s1 + $0x2388] sm:$0xff] }
 0x527   :  { %8288 = vmatpush1.bf16.msra.mxu1 %v18212_v59  ;;  %16053 = vmatprep.subr.bf16.mxu0 %v20176_v5  ;;  %v1172_v59 = vld [vmem:[%s29047_s1 + $0x23e8] sm:$0xff]  ;;  %v18356_v5 = vcombine.low %v1136_v62, %v1148_v52 }
 0x528   :  { %8289 = vmatprep.subr.bf16.mxu1 %v18237_v0  ;;  %v18381_v0 = vcombine.high %v1160_v7, %v1172_v59 }
 0x52a   :  { %16054 = vmatpush1.bf16.msra.mxu0 %v20174_v14  ;;  %v18380_v14 = vcombine.low %v1160_v7, %v1172_v59  ;;  %v190_v7 = vld [vmem:[%s29047_s1 + $0x538] sm:$0xff]  ;;  %v21581_v59 = vld [vmem:[%s29050_s2 + $0x8] sm:$0xff] }
 0x52b   :  { %8290 = vmatpush1.bf16.msra.mxu1 %v18236_v61  ;;  %16055 = vmatprep.subr.bf16.mxu0 %v20179_v16  ;;  %v17257_v61 = vcombine.high %v34_v8, %v46_v6  ;;  %v58_v16 = vld [vmem:[%s29047_s1 + $0x118] sm:$0xff] }
 0x52c   :  { %8291 = vmatprep.subr.bf16.mxu1 %v18261_v9  ;;  %v70_v9 = vld [vmem:[%s29047_s1 + $0x178] sm:$0xff] }
 0x52d   :  { %v17280_v33 = vcombine.low %v58_v16, %v70_v9 }
 0x52e   :  { %16056 = vmatpush1.bf16.msra.mxu0 %v20177_v29  ;;  %v17281_v29 = vcombine.high %v58_v16, %v70_v9  ;;  %v202_v16 = vld [vmem:[%s29047_s1 + $0x598] sm:$0xff] }
 0x52f   :  { %8292 = vmatpush1.bf16.msra.mxu1 %v18260_v30  ;;  %16057 = vmatprep.subr.bf16.mxu0 %v20182_v38  ;;  %v82_v30 = vld [vmem:[%s29047_s1 + $0x1d8] sm:$0xff] }
 0x530   :  { %8293 = vmatprep.subr.bf16.mxu1 %v18285_v32  ;;  %v94_v38 = vld [vmem:[%s29047_s1 + $0x238] sm:$0xff]  ;;  %v1252_v32 = vrot.slane %v25911_v26, %v23904_v13 }
 0x531   :  { %v17305_v56 = vcombine.high %v82_v30, %v94_v38  ;;  %v214_v9 = vld [vmem:[%s29047_s1 + $0x5f8] sm:$0xff] }
 0x532   :  { %16058 = vmatpush1.bf16.msra.mxu0 %v20180_v4  ;;  %v106_v4 = vld [vmem:[%s29047_s1 + $0x298] sm:$0xff] }
 0x533   :  { %8294 = vmatpush1.bf16.msra.mxu1 %v18284_v2  ;;  %16059 = vmatprep.subr.bf16.mxu0 %v20185_v39  ;;  %v118_v2 = vld [vmem:[%s29047_s1 + $0x2f8] sm:$0xff]  ;;  %v25930_v39 = vadd.f32 %v24155_v15, %v1252_v32 }
 0x534   :  { %8295 = vmatprep.subr.bf16.mxu1 %v18309_v40  ;;  %v17304_v40 = vcombine.low %v82_v30, %v94_v38  ;;  %v17329_v1 = vcombine.high %v106_v4, %v118_v2  ;;  %v154_v15 = vld [vmem:[%s29047_s1 + $0x418] sm:$0xff] }
 0x536   :  { %16060 = vmatpush1.bf16.msra.mxu0 %v20183_v19  ;;  %v8599_v19 = vmul.f32 0.044715, %v25930_v39 }
 0x537   :  { %8296 = vmatpush1.bf16.msra.mxu1 %v18308_v46  ;;  %16070 = vmatprep.subr.bf16.mxu0 %v20188_v45  ;;  %v17328_v46 = vcombine.low %v106_v4, %v118_v2  ;;  %v17425_v2 = vcombine.high %v202_v16, %v214_v9 }
 0x538   :  { %8297 = vmatprep.subr.bf16.mxu1 %v18333_v49  ;;  %v166_v49 = vld [vmem:[%s29047_s1 + $0x478] sm:$0xff]  ;;  %v8623_v62 = vmul.f32 %v25930_v39, %v8599_v19 }
 0x539   :  { %v17376_v8 = vcombine.low %v154_v15, %v166_v49 }
 0x53a   :  { %v8647_v6 = vmul.f32 %v25930_v39, %v8623_v62  ;;  %v250_v62 = vld [vmem:[%s29047_s1 + $0x718] sm:$0xff] }
 0x53b   :  { %8298 = vmatpush1.bf16.msra.mxu1 %v18332_v27  ;;  %v17377_v27 = vcombine.high %v154_v15, %v166_v49 }
 0x53c   :  { %8299 = vmatprep.subr.bf16.mxu1 %v18357_v63  ;;  %v178_v63 = vld [vmem:[%s29047_s1 + $0x4d8] sm:$0xff] }
 0x53d   :  { %v17400_v32 = vcombine.low %v178_v63, %v190_v7 }
 0x53f   :  { %8300 = vmatpush1.bf16.msra.mxu1 %v18356_v5  ;;  %v1240_v5 = vrot.slane %v21581_v59, %v24794_v41 }
 0x540   :  { %8301 = vmatprep.subr.bf16.mxu1 %v18381_v0  ;;  %v1244_v0 = vrot.slane %v21581_v59, %v24797_v25 }
 0x543   :  { %8302 = vmatpush1.bf16.msra.mxu1 %v18380_v14  ;;  %v17401_v14 = vcombine.high %v178_v63, %v190_v7 }
 0x544   :  { %8435 = vmatprep.subr.bf16.mxu1 %v17257_v61 }
 0x546   :  { %8304 = vmatmul.mubr.bf16.vlgmr.msra.gmra.mrb[24].mxu1 %v22255_v36 }
 0x547   :  { %8436 = vmatpush1.bf16.msra.mxu1 %v17256_v24  ;;  %8467 = vmatprep.mubr.bf16.mxu1 %v21711_v57  ;;  %v130_v57 = vld [vmem:[%s29047_s1 + $0x358] sm:$0xff] }
 0x548   :  { %8437 = vmatprep.subr.bf16.mxu1 %v17281_v29  ;;  %v17353_v45 = vcombine.high %v130_v57, %v142_v44  ;;  %v17352_v52 = vcombine.low %v130_v57, %v142_v44  ;;  %v238_v57 = vld [vmem:[%s29047_s1 + $0x6b8] sm:$0xff] }
 0x54b   :  { %8438 = vmatpush1.bf16.msra.mxu1 %v17280_v33  ;;  %v8671_v33 = vadd.f32 %v25930_v39, %v8647_v6  ;;  %v286_v6 = vld [vmem:[%s29047_s1 + $0x838] sm:$0xff] }
 0x54c   :  { %8439 = vmatprep.subr.bf16.mxu1 %v17305_v56 }
 0x54f   :  { %8440 = vmatpush1.bf16.msra.mxu1 %v17304_v40 }
 0x550   :  { %8441 = vmatprep.subr.bf16.mxu1 %v17329_v1  ;;  %v226_v1 = vld [vmem:[%s29047_s1 + $0x658] sm:$0xff] }
 0x551   :  { %v17449_v49 = vcombine.high %v226_v1, %v238_v57  ;;  %v17448_v7 = vcombine.low %v226_v1, %v238_v57  ;;  %v8575_v57 = vmul.f32 0.5, %v25930_v39 }
 0x553   :  { %8442 = vmatpush1.bf16.msra.mxu1 %v17328_v46  ;;  %v17424_v46 = vcombine.low %v202_v16, %v214_v9  ;;  %v298_v9 = vld [vmem:[%s29047_s1 + $0x898] sm:$0xff] }
 0x554   :  { %8443 = vmatprep.subr.bf16.mxu1 %v17353_v45  ;;  %v8695_v45 = vmul.f32 0.7978846, %v8671_v33 }
 0x556   :  { %21558 = vtanh.f32 %v8695_v45 }
 0x557   :  { %8444 = vmatpush1.bf16.msra.mxu1 %v17352_v52  ;;  %v262_v52 = vld [vmem:[%s29047_s1 + $0x778] sm:$0xff] }
 0x558   :  { %8445 = vmatprep.subr.bf16.mxu1 %v17377_v27 }
 0x559   :  { %v8059_v61 = vpop.f32.mrb[20].mxu1 }
 0x55a   :  { %v19552_v24 = vadd.f32 %v8059_v61, %v1240_v5  ;;  %v8061_v29 = vpop.f32.mrb[21].mxu1  ;;  %v17473_v5 = vcombine.high %v250_v62, %v262_v52  ;;  %v17472_v61 = vcombine.low %v250_v62, %v262_v52 }
 0x55b   :  { %v19553_v30 = vadd.f32 %v8061_v29, %v1244_v0  ;;  %v8063_v38 = vpop.f32.mrb[22].mxu1  ;;  %8446 = vmatpush1.bf16.msra.mxu1 %v17376_v8  ;;  %v274_v8 = vld [vmem:[%s29047_s1 + $0x7d8] sm:$0xff] }
 0x55c   :  { %v8596_v56 = vmul.f32 0.044715, %v19552_v24  ;;  %v8064_v4 = vpop.f32.mrb[23].mxu1  ;;  %8447 = vmatprep.subr.bf16.mxu1 %v17401_v14  ;;  %v17497_v16 = vcombine.high %v274_v8, %v286_v6  ;;  %v310_v29 = vld [vmem:[%s29047_s1 + $0x8f8] sm:$0xff]  ;;  %v17496_v38 = vcombine.low %v274_v8, %v286_v6 }
 0x55d   :  { %v8597_v40 = vmul.f32 0.044715, %v19553_v30  ;;  %v334_v4 = vld [vmem:[%s29047_s1 + $0x9b8] sm:$0xff]  ;;  %v8573_v62 = vmul.f32 0.5, %v19553_v30 }
 0x55e   :  { %v8620_v44 = vmul.f32 %v19552_v24, %v8596_v56  ;;  %v322_v56 = vld [vmem:[%s29047_s1 + $0x958] sm:$0xff] }
 0x55f   :  { %v8621_v19 = vmul.f32 %v19553_v30, %v8597_v40  ;;  %8448 = vmatpush1.bf16.msra.mxu1 %v17400_v32  ;;  %v17521_v32 = vcombine.high %v298_v9, %v310_v29  ;;  %v17545_v1 = vcombine.high %v322_v56, %v334_v4 }
 0x560   :  { %v8644_v15 = vmul.f32 %v19552_v24, %v8620_v44  ;;  %8449 = vmatprep.subr.bf16.mxu1 %v17425_v2  ;;  %v21559_v33 = vpop.eup %21558  ;;  %v17520_v2 = vcombine.low %v298_v9, %v310_v29  ;;  %v394_v9 = vld [vmem:[%s29047_s1 + $0xb98] sm:$0xff] }
 0x561   :  { %v8645_v27 = vmul.f32 %v19553_v30, %v8621_v19  ;;  %v8743_v44 = vadd.f32 1.0, %v21559_v33  ;;  %v406_v29 = vld [vmem:[%s29047_s1 + $0xbf8] sm:$0xff] }
 0x562   :  { %v8668_v63 = vadd.f32 %v19552_v24, %v8644_v15  ;;  %v346_v15 = vld [vmem:[%s29047_s1 + $0xa18] sm:$0xff] }
 0x563   :  { %8450 = vmatpush1.bf16.msra.mxu1 %v17424_v46  ;;  %v8669_v59 = vadd.f32 %v19553_v30, %v8645_v27  ;;  %v8572_v46 = vmul.f32 0.5, %v19552_v24  ;;  %v17544_v27 = vcombine.low %v322_v56, %v334_v4  ;;  %v370_v24 = vld [vmem:[%s29047_s1 + $0xad8] sm:$0xff]  ;;  %v17617_v56 = vcombine.high %v394_v9, %v406_v29 }
 0x564   :  { %8451 = vmatprep.subr.bf16.mxu1 %v17449_v49  ;;  %v8692_v0 = vmul.f32 0.7978846, %v8668_v63  ;;  %v358_v49 = vld [vmem:[%s29047_s1 + $0xa78] sm:$0xff] }
 0x565   :  { %v8693_v14 = vmul.f32 0.7978846, %v8669_v59  ;;  %v17569_v39 = vcombine.high %v346_v15, %v358_v49  ;;  %v8767_v59 = vmul.f32 %v8743_v44, %v8575_v57  ;;  %v20186_v30 = vld [vmem:[%s29049_s3 + $0x1800] ss:$24 sps:$4 sm:$0xff]   ;;  %v17568_v6 = vcombine.low %v346_v15, %v358_v49  ;;  %v20194_v33 = vld [vmem:[%s29049_s3 + $0x1864] ss:$24 sps:$4 sm:$0xff]  }
 0x566   :  { %21560 = vtanh.f32 %v8692_v0  ;;  %v418_v4 = vld [vmem:[%s29047_s1 + $0xc58] sm:$0xff]  ;;  %v20197_v57 = vld [vmem:[%s29049_s3 + $0x1894] ss:$24 sps:$4 sm:$0xff]  }
 0x567   :  { %8452 = vmatpush1.bf16.msra.mxu1 %v17448_v7  ;;  %21562 = vtanh.f32 %v8693_v14  ;;  %v20191_v14 = vld [vmem:[%s29049_s3 + $0x1834] ss:$24 sps:$4 sm:$0xff]   ;;  %v20200_v49 = vld [vmem:[%s29049_s3 + $0x18c4] ss:$24 sps:$4 sm:$0xff]  }
 0x568   :  { %8453 = vmatprep.subr.bf16.mxu1 %v17473_v5  ;;  %v382_v5 = vld [vmem:[%s29047_s1 + $0xb38] sm:$0xff] }
 0x56b   :  { %8454 = vmatpush1.bf16.msra.mxu1 %v17472_v61  ;;  %v26019_v61 = vpack.c.bf16 %v8767_v59, %v8767_v59  ;;  %v20203_v59 = vld [vmem:[%s29049_s3 + $0x18f4] ss:$24 sps:$4 sm:$0xff]  }
 0x56c   :  { %8455 = vmatprep.subr.bf16.mxu1 %v17497_v16  ;;  %v17593_v16 = vcombine.high %v370_v24, %v382_v5 }
 0x56f   :  { %8456 = vmatpush1.bf16.msra.mxu1 %v17496_v38  ;;  %v20189_v38 = vld [vmem:[%s29049_s3 + $0x1830] ss:$24 sps:$4 sm:$0xff]  }
 0x570   :  { %v21561_v40 = vpop.eup %21560  ;;  %8457 = vmatprep.subr.bf16.mxu1 %v17521_v32  ;;  %v17592_v32 = vcombine.low %v370_v24, %v382_v5  ;;  %v490_v5 = vld [vmem:[%s29047_s1 + $0xe98] sm:$0xff] }
 0x571   :  { %v21563_v19 = vpop.eup %21562  ;;  %v8740_v45 = vadd.f32 1.0, %v21561_v40  ;;  %v20192_v40 = vld [vmem:[%s29049_s3 + $0x1860] ss:$24 sps:$4 sm:$0xff]  }
 0x572   :  { %v8741_v52 = vadd.f32 1.0, %v21563_v19  ;;  %v442_v19 = vld [vmem:[%s29047_s1 + $0xd18] sm:$0xff] }
 0x573   :  { %8458 = vmatpush1.bf16.msra.mxu1 %v17520_v2  ;;  %v8764_v63 = vmul.f32 %v8740_v45, %v8572_v46  ;;  %v430_v2 = vld [vmem:[%s29047_s1 + $0xcb8] sm:$0xff]  ;;  %v20195_v45 = vld [vmem:[%s29049_s3 + $0x1890] ss:$24 sps:$4 sm:$0xff]  }
 0x574   :  { %8459 = vmatprep.subr.bf16.mxu1 %v17545_v1  ;;  %v8765_v7 = vmul.f32 %v8741_v52, %v8573_v62  ;;  %v17616_v1 = vcombine.low %v394_v9, %v406_v29  ;;  %v17641_v44 = vcombine.high %v418_v4, %v430_v2  ;;  %v454_v46 = vld [vmem:[%s29047_s1 + $0xd78] sm:$0xff]  ;;  %v17640_v15 = vcombine.low %v418_v4, %v430_v2 }
 0x575   :  { %v26013_v8 = vpack.c.bf16 %v8764_v63, %v8764_v63  ;;  %v17665_v62 = vcombine.high %v442_v19, %v454_v46  ;;  %v466_v52 = vld [vmem:[%s29047_s1 + $0xdd8] sm:$0xff]  ;;  %v1248_v63 = vrot.slane %v25911_v26, %v24094_v47 }
 0x576   :  { %v26008_v0 = vpack.c.bf16 %v8765_v7, %v8765_v7  ;;  %v20198_v7 = vld [vmem:[%s29049_s3 + $0x18c0] ss:$24 sps:$4 sm:$0xff]  }
 0x577   :  { %8460 = vmatpush1.bf16.msra.mxu1 %v17544_v27  ;;  %v478_v27 = vld [vmem:[%s29047_s1 + $0xe38] sm:$0xff] }
 0x578   :  { %16061 = vmatprep.mubr.bf16.mxu0 %v26008_v0  ;;  %8461 = vmatprep.subr.bf16.mxu1 %v17569_v39  ;;  %v17664_v39 = vcombine.low %v442_v19, %v454_v46  ;;  %v17689_v24 = vcombine.high %v466_v52, %v478_v27  ;;  %v514_v9 = vld [vmem:[%s29047_s1 + $0xf58] sm:$0xff] }
 0x579   :  { %16062 = vmatmul.mubr.bf16.vlgmr.msra.gmra.mrb[16].mxu0 %v26013_v8  ;;  %v538_v4 = vld [vmem:[%s29047_s1 + $0x1018] sm:$0xff] }
 0x57a   :  { %16071 = vmatpush1.bf16.msra.mxu0 %v20186_v30  ;;  %16102 = vmatprep.mubr.bf16.mxu0 %v26019_v61  ;;  %v26082_v30 = vadd.f32 %v24153_v23, %v1248_v63  ;;  %v526_v23 = vld [vmem:[%s29047_s1 + $0xfb8] sm:$0xff] }
 0x57b   :  { %8462 = vmatpush1.bf16.msra.mxu1 %v17568_v6  ;;  %16072 = vmatprep.subr.bf16.mxu0 %v20191_v14  ;;  %v20201_v6 = vld [vmem:[%s29049_s3 + $0x18f0] ss:$24 sps:$4 sm:$0xff]   ;;  %v17688_v14 = vcombine.low %v466_v52, %v478_v27  ;;  %v550_v2 = vld [vmem:[%s29047_s1 + $0x1078] sm:$0xff]  ;;  %v20215_v52 = vld [vmem:[%s29049_s3 + $0x19b4] ss:$24 sps:$4 sm:$0xff]  }
 0x57c   :  { %8463 = vmatprep.subr.bf16.mxu1 %v17593_v16  ;;  %v8598_v29 = vmul.f32 0.044715, %v26082_v30  ;;  %v17761_v19 = vcombine.high %v538_v4, %v550_v2  ;;  %v562_v46 = vld [vmem:[%s29047_s1 + $0x10d8] sm:$0xff] }
 0x57d   :  { %v586_v63 = vld [vmem:[%s29047_s1 + $0x1198] sm:$0xff] }
 0x57e   :  { %16073 = vmatpush1.bf16.msra.mxu0 %v20189_v38  ;;  %v20204_v38 = vld [vmem:[%s29049_s3 + $0x1920] ss:$24 sps:$4 sm:$0xff]  }
 0x57f   :  { %8464 = vmatpush1.bf16.msra.mxu1 %v17592_v32  ;;  %16074 = vmatprep.subr.bf16.mxu0 %v20194_v33  ;;  %v20209_v33 = vld [vmem:[%s29049_s3 + $0x1954] ss:$24 sps:$4 sm:$0xff]  }
 0x580   :  { %8465 = vmatprep.subr.bf16.mxu1 %v17617_v56  ;;  %v17737_v56 = vcombine.high %v514_v9, %v526_v23 }
 0x582   :  { %16075 = vmatpush1.bf16.msra.mxu0 %v20192_v40  ;;  %v8622_v40 = vmul.f32 %v26082_v30, %v8598_v29 }
 0x583   :  { %8466 = vmatpush1.bf16.msra.mxu1 %v17616_v1  ;;  %16076 = vmatprep.subr.bf16.mxu0 %v20197_v57  ;;  %v20207_v1 = vld [vmem:[%s29049_s3 + $0x1950] ss:$24 sps:$4 sm:$0xff]   ;;  %v17736_v57 = vcombine.low %v514_v9, %v526_v23  ;;  %v20221_v23 = vld [vmem:[%s29049_s3 + $0x1a14] ss:$24 sps:$4 sm:$0xff]  }
 0x584   :  { %8476 = vmatprep.subr.bf16.mxu1 %v17641_v44  ;;  %v20212_v44 = vld [vmem:[%s29049_s3 + $0x1984] ss:$24 sps:$4 sm:$0xff]  }
 0x586   :  { %16077 = vmatpush1.bf16.msra.mxu0 %v20195_v45  ;;  %8468 = vmatmul.mubr.bf16.vlgmr.msra.gmra.mrb[28].mxu1 %v21837_v12  ;;  %v502_v12 = vld [vmem:[%s29047_s1 + $0xef8] sm:$0xff] }
 0x587   :  { %8477 = vmatpush1.bf16.msra.mxu1 %v17640_v15  ;;  %16078 = vmatprep.subr.bf16.mxu0 %v20200_v49  ;;  %v17713_v16 = vcombine.high %v490_v5, %v502_v12  ;;  %v17712_v32 = vcombine.low %v490_v5, %v502_v12  ;;  %v574_v45 = vld [vmem:[%s29047_s1 + $0x1138] sm:$0xff]  ;;  %v8646_v15 = vmul.f32 %v26082_v30, %v8622_v40 }
 0x588   :  { %8478 = vmatprep.subr.bf16.mxu1 %v17665_v62  ;;  %8508 = vmatprep.mubr.bf16.mxu1 %v21858_v21  ;;  %v20206_v21 = vld [vmem:[%s29049_s3 + $0x1924] ss:$24 sps:$4 sm:$0xff]   ;;  %v20210_v49 = vld [vmem:[%s29049_s3 + $0x1980] ss:$24 sps:$4 sm:$0xff]   ;;  %v17760_v62 = vcombine.low %v538_v4, %v550_v2  ;;  %v17785_v27 = vcombine.high %v562_v46, %v574_v45 }
 0x589   :  { %v20218_v5 = vld [vmem:[%s29049_s3 + $0x19e4] ss:$24 sps:$4 sm:$0xff]  }
 0x58a   :  { %16079 = vmatpush1.bf16.msra.mxu0 %v20198_v7  ;;  %v598_v7 = vld [vmem:[%s29047_s1 + $0x11f8] sm:$0xff] }
 0x58b   :  { %8479 = vmatpush1.bf16.msra.mxu1 %v17664_v39  ;;  %16080 = vmatprep.subr.bf16.mxu0 %v20203_v59  ;;  %v8670_v39 = vadd.f32 %v26082_v30, %v8646_v15  ;;  %v20213_v59 = vld [vmem:[%s29049_s3 + $0x19b0] ss:$24 sps:$4 sm:$0xff]   ;;  %v17809_v12 = vcombine.high %v586_v63, %v598_v7  ;;  %v17808_v9 = vcombine.low %v586_v63, %v598_v7  ;;  %v20224_v4 = vld [vmem:[%s29049_s3 + $0x1a44] ss:$24 sps:$4 sm:$0xff]  }
 0x58c   :  { %8480 = vmatprep.subr.bf16.mxu1 %v17689_v24  ;;  %v17784_v24 = vcombine.low %v562_v46, %v574_v45  ;;  %v658_v40 = vld [vmem:[%s29047_s1 + $0x13d8] sm:$0xff] }
 0x58d   :  { %v682_v45 = vld [vmem:[%s29047_s1 + $0x1498] sm:$0xff] }
 0x58e   :  { %16081 = vmatpush1.bf16.msra.mxu0 %v20201_v6  ;;  %v610_v6 = vld [vmem:[%s29047_s1 + $0x1258] sm:$0xff] }
 0x58f   :  { %8481 = vmatpush1.bf16.msra.mxu1 %v17688_v14  ;;  %16082 = vmatprep.subr.bf16.mxu0 %v20206_v21  ;;  %v622_v14 = vld [vmem:[%s29047_s1 + $0x12b8] sm:$0xff] }
 0x590   :  { %8482 = vmatprep.subr.bf16.mxu1 %v17713_v16  ;;  %v20216_v21 = vld [vmem:[%s29049_s3 + $0x19e0] ss:$24 sps:$4 sm:$0xff]   ;;  %v8694_v16 = vmul.f32 0.7978846, %v8670_v39  ;;  %v17833_v29 = vcombine.high %v610_v6, %v622_v14 }
 0x591   :  { %v694_v15 = vld [vmem:[%s29047_s1 + $0x14f8] sm:$0xff] }
 0x592   :  { %16083 = vmatpush1.bf16.msra.mxu0 %v20204_v38  ;;  %v634_v38 = vld [vmem:[%s29047_s1 + $0x1318] sm:$0xff]  ;;  %21564 = vtanh.f32 %v8694_v16  ;;  %v17905_v63 = vcombine.high %v682_v45, %v694_v15 }
 0x593   :  { %8483 = vmatpush1.bf16.msra.mxu1 %v17712_v32  ;;  %16084 = vmatprep.subr.bf16.mxu0 %v20209_v33  ;;  %v646_v32 = vld [vmem:[%s29047_s1 + $0x1378] sm:$0xff]  ;;  %v20219_v33 = vld [vmem:[%s29049_s3 + $0x1a10] ss:$24 sps:$4 sm:$0xff]  }
 0x594   :  { %8484 = vmatprep.subr.bf16.mxu1 %v17737_v56  ;;  %v17832_v56 = vcombine.low %v610_v6, %v622_v14  ;;  %v17857_v2 = vcombine.high %v634_v38, %v646_v32  ;;  %v706_v7 = vld [vmem:[%s29047_s1 + $0x1558] sm:$0xff] }
 0x595   :  { %v718_v39 = vld [vmem:[%s29047_s1 + $0x15b8] sm:$0xff] }
 0x596   :  { %16085 = vmatpush1.bf16.msra.mxu0 %v20207_v1  ;;  %v670_v1 = vld [vmem:[%s29047_s1 + $0x1438] sm:$0xff]  ;;  %v17929_v14 = vcombine.high %v706_v7, %v718_v39 }
 0x597   :  { %8485 = vmatpush1.bf16.msra.mxu1 %v17736_v57  ;;  %16086 = vmatprep.subr.bf16.mxu0 %v20212_v44  ;;  %v20222_v57 = vld [vmem:[%s29049_s3 + $0x1a40] ss:$24 sps:$4 sm:$0xff]   ;;  %v17856_v44 = vcombine.low %v634_v38, %v646_v32  ;;  %v17881_v46 = vcombine.high %v658_v40, %v670_v1 }
 0x598   :  { %8486 = vmatprep.subr.bf16.mxu1 %v17761_v19  ;;  %v20227_v19 = vld [vmem:[%s29049_s3 + $0x1a74] ss:$24 sps:$4 sm:$0xff]   ;;  %v742_v16 = vld [vmem:[%s29047_s1 + $0x1678] sm:$0xff] }
 0x599   :  { %v754_v32 = vld [vmem:[%s29047_s1 + $0x16d8] sm:$0xff] }
 0x59a   :  { %16087 = vmatpush1.bf16.msra.mxu0 %v20210_v49  ;;  %v20225_v49 = vld [vmem:[%s29049_s3 + $0x1a70] ss:$24 sps:$4 sm:$0xff]  }
 0x59b   :  { %8487 = vmatpush1.bf16.msra.mxu1 %v17760_v62  ;;  %16088 = vmatprep.subr.bf16.mxu0 %v20215_v52  ;;  %v17880_v62 = vcombine.low %v658_v40, %v670_v1  ;;  %v20230_v52 = vld [vmem:[%s29049_s3 + $0x1aa4] ss:$24 sps:$4 sm:$0xff]   ;;  %v20239_v40 = vld [vmem:[%s29049_s3 + $0x1b34] ss:$24 sps:$4 sm:$0xff]  }
 0x59c   :  { %8488 = vmatprep.subr.bf16.mxu1 %v17785_v27  ;;  %v21565_v27 = vpop.eup %21564 }
 0x59d   :  { %v8742_v6 = vadd.f32 1.0, %v21565_v27 }
 0x59e   :  { %16089 = vmatpush1.bf16.msra.mxu0 %v20213_v59  ;;  %v20228_v59 = vld [vmem:[%s29049_s3 + $0x1aa0] ss:$24 sps:$4 sm:$0xff]  }
 0x59f   :  { %8489 = vmatpush1.bf16.msra.mxu1 %v17784_v24  ;;  %16090 = vmatprep.subr.bf16.mxu0 %v20218_v5  ;;  %v17904_v24 = vcombine.low %v682_v45, %v694_v15  ;;  %v20233_v5 = vld [vmem:[%s29049_s3 + $0x1ad4] ss:$24 sps:$4 sm:$0xff]   ;;  %v20242_v45 = vld [vmem:[%s29049_s3 + $0x1b64] ss:$24 sps:$4 sm:$0xff]  }
 0x5a0   :  { %8490 = vmatprep.subr.bf16.mxu1 %v17809_v12  ;;  %v8574_v12 = vmul.f32 0.5, %v26082_v30 }
 0x5a2   :  { %16091 = vmatpush1.bf16.msra.mxu0 %v20216_v21  ;;  %v730_v21 = vld [vmem:[%s29047_s1 + $0x1618] sm:$0xff]  ;;  %v8766_v30 = vmul.f32 %v8742_v6, %v8574_v12 }
 0x5a3   :  { %8491 = vmatpush1.bf16.msra.mxu1 %v17808_v9  ;;  %16092 = vmatprep.subr.bf16.mxu0 %v20221_v23  ;;  %v20231_v9 = vld [vmem:[%s29049_s3 + $0x1ad0] ss:$24 sps:$4 sm:$0xff]   ;;  %v17928_v23 = vcombine.low %v706_v7, %v718_v39  ;;  %v17953_v38 = vcombine.high %v730_v21, %v742_v16  ;;  %v826_v39 = vld [vmem:[%s29047_s1 + $0x1918] sm:$0xff] }
 0x5a4   :  { %8492 = vmatprep.subr.bf16.mxu1 %v17833_v29  ;;  %v20236_v29 = vld [vmem:[%s29049_s3 + $0x1b04] ss:$24 sps:$4 sm:$0xff]  }
 0x5a5   :  { %v20251_v6 = vld [vmem:[%s29049_s3 + $0x1bc4] ss:$24 sps:$4 sm:$0xff]  }
 0x5a6   :  { %16093 = vmatpush1.bf16.msra.mxu0 %v20219_v33  ;;  %v766_v33 = vld [vmem:[%s29047_s1 + $0x1738] sm:$0xff] }
 0x5a7   :  { %8493 = vmatpush1.bf16.msra.mxu1 %v17832_v56  ;;  %16094 = vmatprep.subr.bf16.mxu0 %v20224_v4  ;;  %v20234_v56 = vld [vmem:[%s29049_s3 + $0x1b00] ss:$24 sps:$4 sm:$0xff]   ;;  %v26224_v4 = vpack.c.bf16 %v8766_v30, %v8766_v30  ;;  %v17977_v1 = vcombine.high %v754_v32, %v766_v33 }
 0x5a8   :  { %8494 = vmatprep.subr.bf16.mxu1 %v17857_v2  ;;  %v17952_v2 = vcombine.low %v730_v21, %v742_v16  ;;  %v862_v21 = vld [vmem:[%s29047_s1 + $0x1a38] sm:$0xff] }
 0x5a9   :  { %v20249_v16 = vld [vmem:[%s29049_s3 + $0x1bc0] ss:$24 sps:$4 sm:$0xff]  }
 0x5aa   :  { %16095 = vmatpush1.bf16.msra.mxu0 %v20222_v57  ;;  %v778_v57 = vld [vmem:[%s29047_s1 + $0x1798] sm:$0xff] }
 0x5ab   :  { %8495 = vmatpush1.bf16.msra.mxu1 %v17856_v44  ;;  %16096 = vmatprep.subr.bf16.mxu0 %v20227_v19  ;;  %v790_v44 = vld [vmem:[%s29047_s1 + $0x17f8] sm:$0xff]  ;;  %v20237_v19 = vld [vmem:[%s29049_s3 + $0x1b30] ss:$24 sps:$4 sm:$0xff]  }
 0x5ac   :  { %8496 = vmatprep.subr.bf16.mxu1 %v17881_v46  ;;  %v17976_v46 = vcombine.low %v754_v32, %v766_v33  ;;  %v18001_v15 = vcombine.high %v778_v57, %v790_v44  ;;  %v18000_v27 = vcombine.low %v778_v57, %v790_v44  ;;  %v20263_v32 = vld [vmem:[%s29049_s3 + $0x1c24] ss:$24 sps:$4 sm:$0xff]   ;;  %v20269_v57 = vld [vmem:[%s29049_s3 + $0x1c54] ss:$24 sps:$4 sm:$0xff]  }
 0x5ae   :  { %16097 = vmatpush1.bf16.msra.mxu0 %v20225_v49  ;;  %v802_v49 = vld [vmem:[%s29047_s1 + $0x1858] sm:$0xff] }
 0x5af   :  { %8497 = vmatpush1.bf16.msra.mxu1 %v17880_v62  ;;  %16098 = vmatprep.subr.bf16.mxu0 %v20230_v52  ;;  %v814_v62 = vld [vmem:[%s29047_s1 + $0x18b8] sm:$0xff] }
 0x5b0   :  { %8498 = vmatprep.subr.bf16.mxu1 %v17905_v63  ;;  %v20240_v52 = vld [vmem:[%s29049_s3 + $0x1b60] ss:$24 sps:$4 sm:$0xff]   ;;  %v20245_v63 = vld [vmem:[%s29049_s3 + $0x1b94] ss:$24 sps:$4 sm:$0xff]   ;;  %v18025_v7 = vcombine.high %v802_v49, %v814_v62 }
 0x5b2   :  { %16099 = vmatpush1.bf16.msra.mxu0 %v20228_v59  ;;  %v838_v59 = vld [vmem:[%s29047_s1 + $0x1978] sm:$0xff] }
 0x5b3   :  { %8499 = vmatpush1.bf16.msra.mxu1 %v17904_v24  ;;  %16100 = vmatprep.subr.bf16.mxu0 %v20233_v5  ;;  %v20243_v24 = vld [vmem:[%s29049_s3 + $0x1b90] ss:$24 sps:$4 sm:$0xff]   ;;  %v18024_v5 = vcombine.low %v802_v49, %v814_v62  ;;  %v18049_v12 = vcombine.high %v826_v39, %v838_v59  ;;  %v20275_v49 = vld [vmem:[%s29049_s3 + $0x1c84] ss:$24 sps:$4 sm:$0xff]  }
 0x5b4   :  { %8500 = vmatprep.subr.bf16.mxu1 %v17929_v14  ;;  %v850_v14 = vld [vmem:[%s29047_s1 + $0x19d8] sm:$0xff] }
 0x5b5   :  { %v18073_v30 = vcombine.high %v850_v14, %v862_v21 }
 0x5b6   :  { %16101 = vmatpush1.bf16.msra.mxu0 %v20231_v9  ;;  %v18048_v9 = vcombine.low %v826_v39, %v838_v59  ;;  %v20281_v39 = vld [vmem:[%s29049_s3 + $0x1cb4] ss:$24 sps:$4 sm:$0xff]  }
 0x5b7   :  { %8501 = vmatpush1.bf16.msra.mxu1 %v17928_v23  ;;  %16111 = vmatprep.subr.bf16.mxu0 %v20236_v29  ;;  %v20257_v23 = vld [vmem:[%s29049_s3 + $0x1bf4] ss:$24 sps:$4 sm:$0xff]   ;;  %v886_v29 = vld [vmem:[%s29047_s1 + $0x1af8] sm:$0xff] }
 0x5b8   :  { %8502 = vmatprep.subr.bf16.mxu1 %v17953_v38  ;;  %v18072_v38 = vcombine.low %v850_v14, %v862_v21  ;;  %v20287_v14 = vld [vmem:[%s29049_s3 + $0x1ce4] ss:$24 sps:$4 sm:$0xff]  }
 0x5b9   :  { %16103 = vmatmul.mubr.bf16.vlgmr.msra.gmra.mrb[16].mxu0 %v26224_v4 }
 0x5ba   :  { %16112 = vmatpush1.bf16.msra.mxu0 %v20234_v56  ;;  %v898_v56 = vld [vmem:[%s29047_s1 + $0x1b58] sm:$0xff] }
 0x5bb   :  { %8503 = vmatpush1.bf16.msra.mxu1 %v17952_v2  ;;  %16113 = vmatprep.subr.bf16.mxu0 %v20239_v40  ;;  %v910_v2 = vld [vmem:[%s29047_s1 + $0x1bb8] sm:$0xff] }
 0x5bc   :  { %8504 = vmatprep.subr.bf16.mxu1 %v17977_v1  ;;  %v20261_v40 = vld [vmem:[%s29049_s3 + $0x1c20] ss:$24 sps:$4 sm:$0xff]   ;;  %v18121_v44 = vcombine.high %v898_v56, %v910_v2 }
 0x5be   :  { %16114 = vmatpush1.bf16.msra.mxu0 %v20237_v19  ;;  %v922_v19 = vld [vmem:[%s29047_s1 + $0x1c18] sm:$0xff] }
 0x5bf   :  { %8505 = vmatpush1.bf16.msra.mxu1 %v17976_v46  ;;  %16115 = vmatprep.subr.bf16.mxu0 %v20242_v45  ;;  %v934_v46 = vld [vmem:[%s29047_s1 + $0x1c78] sm:$0xff]  ;;  %v20267_v45 = vld [vmem:[%s29049_s3 + $0x1c50] ss:$24 sps:$4 sm:$0xff]  }
 0x5c0   :  { %8506 = vmatprep.subr.bf16.mxu1 %v18001_v15  ;;  %v18120_v15 = vcombine.low %v898_v56, %v910_v2  ;;  %v18145_v62 = vcombine.high %v922_v19, %v934_v46  ;;  %v20299_v56 = vld [vmem:[%s29049_s3 + $0x1d44] ss:$24 sps:$4 sm:$0xff]  }
 0x5c2   :  { %16116 = vmatpush1.bf16.msra.mxu0 %v20240_v52  ;;  %v946_v52 = vld [vmem:[%s29047_s1 + $0x1cd8] sm:$0xff] }
 0x5c3   :  { %8507 = vmatpush1.bf16.msra.mxu1 %v18000_v27  ;;  %16117 = vmatprep.subr.bf16.mxu0 %v20245_v63  ;;  %v958_v27 = vld [vmem:[%s29047_s1 + $0x1d38] sm:$0xff] }
 0x5c4   :  { %8517 = vmatprep.subr.bf16.mxu1 %v18025_v7  ;;  %v20273_v63 = vld [vmem:[%s29049_s3 + $0x1c80] ss:$24 sps:$4 sm:$0xff]   ;;  %v18144_v7 = vcombine.low %v922_v19, %v934_v46  ;;  %v18169_v59 = vcombine.high %v946_v52, %v958_v27  ;;  %v20305_v19 = vld [vmem:[%s29049_s3 + $0x1d74] ss:$24 sps:$4 sm:$0xff]  }
 0x5c6   :  { %8509 = vmatmul.mubr.bf16.vlgmr.msra.gmra.mrb[28].mxu1 %v22046_v22  ;;  %16118 = vmatpush1.bf16.msra.mxu0 %v20243_v24  ;;  %v874_v22 = vld [vmem:[%s29047_s1 + $0x1a98] sm:$0xff] }
 0x5c7   :  { %8518 = vmatpush1.bf16.msra.mxu1 %v18024_v5  ;;  %8549 = vmatprep.mubr.bf16.mxu1 %v22067_v31  ;;  %v20255_v31 = vld [vmem:[%s29049_s3 + $0x1bf0] ss:$24 sps:$4 sm:$0xff]   ;;  %v18097_v33 = vcombine.high %v874_v22, %v886_v29  ;;  %v18096_v1 = vcombine.low %v874_v22, %v886_v29  ;;  %v970_v24 = vld [vmem:[%s29047_s1 + $0x1d98] sm:$0xff]  ;;  %v20293_v22 = vld [vmem:[%s29049_s3 + $0x1d14] ss:$24 sps:$4 sm:$0xff]  }
 0x5c8   :  { %8519 = vmatprep.subr.bf16.mxu1 %v18049_v12  ;;  %16119 = vmatprep.subr.bf16.mxu0 %v20251_v6  ;;  %v982_v5 = vld [vmem:[%s29047_s1 + $0x1df8] sm:$0xff]  ;;  %v20279_v12 = vld [vmem:[%s29049_s3 + $0x1cb0] ss:$24 sps:$4 sm:$0xff]   ;;  %v18168_v6 = vcombine.low %v946_v52, %v958_v27 }
 0x5c9   :  { %v18193_v21 = vcombine.high %v970_v24, %v982_v5  ;;  %v20311_v52 = vld [vmem:[%s29049_s3 + $0x1da4] ss:$24 sps:$4 sm:$0xff]  }
 0x5ca   :  { %16120 = vmatpush1.bf16.msra.mxu0 %v20249_v16  ;;  %v994_v16 = vld [vmem:[%s29047_s1 + $0x1e58] sm:$0xff] }
 0x5cb   :  { %8520 = vmatpush1.bf16.msra.mxu1 %v18048_v9  ;;  %16121 = vmatprep.subr.bf16.mxu0 %v20257_v23  ;;  %v1006_v9 = vld [vmem:[%s29047_s1 + $0x1eb8] sm:$0xff] }
 0x5cc   :  { %8521 = vmatprep.subr.bf16.mxu1 %v18073_v30  ;;  %v20285_v23 = vld [vmem:[%s29049_s3 + $0x1ce0] ss:$24 sps:$4 sm:$0xff]   ;;  %v18192_v30 = vcombine.low %v970_v24, %v982_v5  ;;  %v18217_v29 = vcombine.high %v994_v16, %v1006_v9  ;;  %v20317_v24 = vld [vmem:[%s29049_s3 + $0x1dd4] ss:$24 sps:$4 sm:$0xff]  }
 0x5ce   :  { %16122 = vmatpush1.bf16.msra.mxu0 %v20255_v31  ;;  %v1018_v31 = vld [vmem:[%s29047_s1 + $0x1f18] sm:$0xff] }
 0x5cf   :  { %8522 = vmatpush1.bf16.msra.mxu1 %v18072_v38  ;;  %16123 = vmatprep.subr.bf16.mxu0 %v20263_v32  ;;  %v1030_v38 = vld [vmem:[%s29047_s1 + $0x1f78] sm:$0xff]  ;;  %v20291_v32 = vld [vmem:[%s29049_s3 + $0x1d10] ss:$24 sps:$4 sm:$0xff]  }
 0x5d0   :  { %8523 = vmatprep.subr.bf16.mxu1 %v18097_v33  ;;  %v18216_v33 = vcombine.low %v994_v16, %v1006_v9  ;;  %v18241_v2 = vcombine.high %v1018_v31, %v1030_v38  ;;  %v20323_v16 = vld [vmem:[%s29049_s3 + $0x1e04] ss:$24 sps:$4 sm:$0xff]  }
 0x5d2   :  { %16124 = vmatpush1.bf16.msra.mxu0 %v20261_v40  ;;  %v1042_v40 = vld [vmem:[%s29047_s1 + $0x1fd8] sm:$0xff] }
 0x5d3   :  { %8524 = vmatpush1.bf16.msra.mxu1 %v18096_v1  ;;  %16125 = vmatprep.subr.bf16.mxu0 %v20269_v57  ;;  %v1054_v1 = vld [vmem:[%s29047_s1 + $0x2038] sm:$0xff] }
 0x5d4   :  { %8525 = vmatprep.subr.bf16.mxu1 %v18121_v44  ;;  %v20297_v57 = vld [vmem:[%s29049_s3 + $0x1d40] ss:$24 sps:$4 sm:$0xff]   ;;  %v18240_v44 = vcombine.low %v1018_v31, %v1030_v38  ;;  %v18265_v46 = vcombine.high %v1042_v40, %v1054_v1 }
 0x5d5   :  { %v1162_v31 = vld [vmem:[%s29047_s1 + $0x2398] sm:$0xff] }
 0x5d6   :  { %16126 = vmatpush1.bf16.msra.mxu0 %v20267_v45  ;;  %v1066_v45 = vld [vmem:[%s29047_s1 + $0x2098] sm:$0xff] }
 0x5d7   :  { %8526 = vmatpush1.bf16.msra.mxu1 %v18120_v15  ;;  %16127 = vmatprep.subr.bf16.mxu0 %v20275_v49  ;;  %v1078_v15 = vld [vmem:[%s29047_s1 + $0x20f8] sm:$0xff]  ;;  %v20303_v49 = vld [vmem:[%s29049_s3 + $0x1d70] ss:$24 sps:$4 sm:$0xff]  }
 0x5d8   :  { %8527 = vmatprep.subr.bf16.mxu1 %v18145_v62  ;;  %v18264_v62 = vcombine.low %v1042_v40, %v1054_v1  ;;  %v18289_v27 = vcombine.high %v1066_v45, %v1078_v15  ;;  %v1174_v38 = vld [vmem:[%s29047_s1 + $0x23f8] sm:$0xff]  ;;  %v20246_v40 = vld [vmem:[%s29049_s3 + $0x8] ss:$24 sps:$4 sm:$0xff]  }
 0x5d9   :  { %v20254_v1 = vld [vmem:[%s29049_s3 + $0x3c] ss:$24 sps:$4 sm:$0xff]  }
 0x5da   :  { %16128 = vmatpush1.bf16.msra.mxu0 %v20273_v63  ;;  %v1090_v63 = vld [vmem:[%s29047_s1 + $0x2158] sm:$0xff] }
 0x5db   :  { %8528 = vmatpush1.bf16.msra.mxu1 %v18144_v7  ;;  %16129 = vmatprep.subr.bf16.mxu0 %v20281_v39  ;;  %v1102_v7 = vld [vmem:[%s29047_s1 + $0x21b8] sm:$0xff] }
 0x5dc   :  { %8529 = vmatprep.subr.bf16.mxu1 %v18169_v59  ;;  %v20309_v39 = vld [vmem:[%s29049_s3 + $0x1da0] ss:$24 sps:$4 sm:$0xff]   ;;  %v18288_v59 = vcombine.low %v1066_v45, %v1078_v15  ;;  %v18313_v5 = vcombine.high %v1090_v63, %v1102_v7  ;;  %v20266_v45 = vld [vmem:[%s29049_s3 + $0x9c] ss:$24 sps:$4 sm:$0xff]  }
 0x5de   :  { %16130 = vmatpush1.bf16.msra.mxu0 %v20279_v12  ;;  %v1114_v12 = vld [vmem:[%s29047_s1 + $0x2218] sm:$0xff] }
 0x5df   :  { %8530 = vmatpush1.bf16.msra.mxu1 %v18168_v6  ;;  %16131 = vmatprep.subr.bf16.mxu0 %v20287_v14  ;;  %v1126_v6 = vld [vmem:[%s29047_s1 + $0x2278] sm:$0xff]  ;;  %v20315_v14 = vld [vmem:[%s29049_s3 + $0x1dd0] ss:$24 sps:$4 sm:$0xff]  }
 0x5e0   :  { %8531 = vmatprep.subr.bf16.mxu1 %v18193_v21  ;;  %v18312_v21 = vcombine.low %v1090_v63, %v1102_v7  ;;  %v18337_v9 = vcombine.high %v1114_v12, %v1126_v6  ;;  %v1256_v63 = vrot.slane %v25911_v26, %v24331_v43  ;;  %v1260_v7 = vrot.slane %v25911_v26, %v24100_v50 }
 0x5e2   :  { %16132 = vmatpush1.bf16.msra.mxu0 %v20285_v23  ;;  %v1138_v23 = vld [vmem:[%s29047_s1 + $0x22d8] sm:$0xff] }
 0x5e3   :  { %8532 = vmatpush1.bf16.msra.mxu1 %v18192_v30  ;;  %16133 = vmatprep.subr.bf16.mxu0 %v20293_v22  ;;  %v1150_v30 = vld [vmem:[%s29047_s1 + $0x2338] sm:$0xff]  ;;  %v18336_v22 = vcombine.low %v1114_v12, %v1126_v6 }
 0x5e4   :  { %8533 = vmatprep.subr.bf16.mxu1 %v18217_v29  ;;  %v18361_v29 = vcombine.high %v1138_v23, %v1150_v30 }
 0x5e6   :  { %16134 = vmatpush1.bf16.msra.mxu0 %v20291_v32  ;;  %v18360_v32 = vcombine.low %v1138_v23, %v1150_v30  ;;  %v20290_v30 = vld [vmem:[%s29049_s3 + $0x15c] ss:$24 sps:$4 sm:$0xff]  }
 0x5e7   :  { %8534 = vmatpush1.bf16.msra.mxu1 %v18216_v33  ;;  %16135 = vmatprep.subr.bf16.mxu0 %v20299_v56  ;;  %v18385_v33 = vcombine.high %v1162_v31, %v1174_v38  ;;  %v18384_v56 = vcombine.low %v1162_v31, %v1174_v38  ;;  %v20288_v38 = vld [vmem:[%s29049_s3 + $0x158] ss:$24 sps:$4 sm:$0xff]  }
 0x5e8   :  { %8535 = vmatprep.subr.bf16.mxu1 %v18241_v2  ;;  %v20248_v2 = vld [vmem:[%s29049_s3 + $0xc] ss:$24 sps:$4 sm:$0xff]  }
 0x5ea   :  { %16136 = vmatpush1.bf16.msra.mxu0 %v20297_v57  ;;  %v1268_v57 = vrot.slane %v25911_v26, %v24353_v54  ;;  %v20282_v26 = vld [vmem:[%s29049_s3 + $0x128] ss:$24 sps:$4 sm:$0xff]  }
 0x5eb   :  { %8536 = vmatpush1.bf16.msra.mxu1 %v18240_v44  ;;  %16137 = vmatprep.subr.bf16.mxu0 %v20305_v19  ;;  %v20252_v44 = vld [vmem:[%s29049_s3 + $0x38] ss:$24 sps:$4 sm:$0xff]   ;;  %v20260_v19 = vld [vmem:[%s29049_s3 + $0x6c] ss:$24 sps:$4 sm:$0xff]  }
 0x5ec   :  { %8537 = vmatprep.subr.bf16.mxu1 %v18265_v46  ;;  %v26444_v46 = vadd.f32 %v24841_v11, %v1268_v57  ;;  %v20272_v11 = vld [vmem:[%s29049_s3 + $0xcc] ss:$24 sps:$4 sm:$0xff]  }
 0x5ee   :  { %16138 = vmatpush1.bf16.msra.mxu0 %v20303_v49  ;;  %v8603_v15 = vmul.f32 0.044715, %v26444_v46  ;;  %v20264_v49 = vld [vmem:[%s29049_s3 + $0x98] ss:$24 sps:$4 sm:$0xff]  }
 0x5ef   :  { %8538 = vmatpush1.bf16.msra.mxu1 %v18264_v62  ;;  %16139 = vmatprep.subr.bf16.mxu0 %v20311_v52  ;;  %v20270_v52 = vld [vmem:[%s29049_s3 + $0xc8] ss:$24 sps:$4 sm:$0xff]  }
 0x5f0   :  { %8539 = vmatprep.subr.bf16.mxu1 %v18289_v27  ;;  %v8627_v62 = vmul.f32 %v26444_v46, %v8603_v15  ;;  %v20278_v27 = vld [vmem:[%s29049_s3 + $0xfc] ss:$24 sps:$4 sm:$0xff]   ;;  %v20308_v15 = vld [vmem:[%s29049_s3 + $0x1ec] ss:$24 sps:$4 sm:$0xff]  }
 0x5f2   :  { %16140 = vmatpush1.bf16.msra.mxu0 %v20309_v39  ;;  %v20276_v39 = vld [vmem:[%s29049_s3 + $0xf8] ss:$24 sps:$4 sm:$0xff]  }
 0x5f3   :  { %8540 = vmatpush1.bf16.msra.mxu1 %v18288_v59  ;;  %16141 = vmatprep.subr.bf16.mxu0 %v20317_v24  ;;  %v8651_v59 = vmul.f32 %v26444_v46, %v8627_v62  ;;  %v20284_v24 = vld [vmem:[%s29049_s3 + $0x12c] ss:$24 sps:$4 sm:$0xff]  }
 0x5f4   :  { %8541 = vmatprep.subr.bf16.mxu1 %v18313_v5 }
 0x5f6   :  { %16142 = vmatpush1.bf16.msra.mxu0 %v20315_v14 }
 0x5f7   :  { %8542 = vmatpush1.bf16.msra.mxu1 %v18312_v21  ;;  %16152 = vmatprep.subr.bf16.mxu0 %v20323_v16  ;;  %v8675_v16 = vadd.f32 %v26444_v46, %v8651_v59 }
 0x5f8   :  { %8543 = vmatprep.subr.bf16.mxu1 %v18337_v9 }
 0x5fb   :  { %8544 = vmatpush1.bf16.msra.mxu1 %v18336_v22 }
 0x5fc   :  { %8545 = vmatprep.subr.bf16.mxu1 %v18361_v29 }
 0x5ff   :  { %8546 = vmatpush1.bf16.msra.mxu1 %v18360_v32  ;;  %v8699_v32 = vmul.f32 0.7978846, %v8675_v16 }
 0x600   :  { %8547 = vmatprep.subr.bf16.mxu1 %v18385_v33 }
 0x601   :  { %21566 = vtanh.f32 %v8699_v32  ;;  %v20327_v32 = vld [vmem:[%s29049_s3 + $0x1e30] ss:$24 sps:$4 sm:$0xff]  }
 0x603   :  { %8548 = vmatpush1.bf16.msra.mxu1 %v18384_v56  ;;  %v20296_v56 = vld [vmem:[%s29049_s3 + $0x18c] ss:$24 sps:$4 sm:$0xff]  }
 0x604   :  { %16234 = vmatprep.subr.bf16.mxu1 %v20248_v2 }
 0x606   :  { %8550 = vmatmul.mubr.bf16.vlgmr.msra.gmra.mrb[28].mxu1 %v22255_v36  ;;  %v20258_v36 = vld [vmem:[%s29049_s3 + $0x68] ss:$24 sps:$4 sm:$0xff]  }
 0x607   :  { %16235 = vmatpush1.bf16.msra.mxu1 %v20246_v40  ;;  %16266 = vmatprep.mubr.bf16.mxu1 %v24067_v35 }
 0x608   :  { %16236 = vmatprep.subr.bf16.mxu1 %v20254_v1  ;;  %v20294_v1 = vld [vmem:[%s29049_s3 + $0x188] ss:$24 sps:$4 sm:$0xff]  }
 0x60b   :  { %16237 = vmatpush1.bf16.msra.mxu1 %v20252_v44  ;;  %v20302_v44 = vld [vmem:[%s29049_s3 + $0x1bc] ss:$24 sps:$4 sm:$0xff]   ;;  %v21567_v62 = vpop.eup %21566 }
 0x60c   :  { %16238 = vmatprep.subr.bf16.mxu1 %v20260_v19 }
 0x60f   :  { %16239 = vmatpush1.bf16.msra.mxu1 %v20258_v36 }
 0x610   :  { %16240 = vmatprep.subr.bf16.mxu1 %v20266_v45  ;;  %v20300_v45 = vld [vmem:[%s29049_s3 + $0x1b8] ss:$24 sps:$4 sm:$0xff]  }
 0x613   :  { %16241 = vmatpush1.bf16.msra.mxu1 %v20264_v49  ;;  %v20306_v49 = vld [vmem:[%s29049_s3 + $0x1e8] ss:$24 sps:$4 sm:$0xff]  }
 0x614   :  { %16242 = vmatprep.subr.bf16.mxu1 %v20272_v11  ;;  %v20314_v11 = vld [vmem:[%s29049_s3 + $0x21c] ss:$24 sps:$4 sm:$0xff]  }
 0x617   :  { %16243 = vmatpush1.bf16.msra.mxu1 %v20270_v52  ;;  %v20312_v52 = vld [vmem:[%s29049_s3 + $0x218] ss:$24 sps:$4 sm:$0xff]  }
 0x618   :  { %16244 = vmatprep.subr.bf16.mxu1 %v20278_v27 }
 0x619   :  { %v8305_v5 = vpop.f32.mrb[24].mxu1 }
 0x61a   :  { %v19556_v12 = vadd.f32 %v8305_v5, %v1256_v63  ;;  %v8307_v6 = vpop.f32.mrb[25].mxu1  ;;  %v20320_v63 = vld [vmem:[%s29049_s3 + $0x24c] ss:$24 sps:$4 sm:$0xff]  }
 0x61b   :  { %v19557_v14 = vadd.f32 %v8307_v6, %v1260_v7  ;;  %v8309_v21 = vpop.f32.mrb[26].mxu1  ;;  %16245 = vmatpush1.bf16.msra.mxu1 %v20276_v39  ;;  %v8579_v7 = vmul.f32 0.5, %v26444_v46  ;;  %v8747_v39 = vadd.f32 1.0, %v21567_v62  ;;  %v20345_v62 = vld [vmem:[%s29049_s3 + $0x1ec0] ss:$24 sps:$4 sm:$0xff]  }
 0x61c   :  { %v8600_v9 = vmul.f32 0.044715, %v19556_v12  ;;  %v8310_v23 = vpop.f32.mrb[27].mxu1  ;;  %16246 = vmatprep.subr.bf16.mxu1 %v20284_v24  ;;  %v8576_v24 = vmul.f32 0.5, %v19556_v12 }
 0x61d   :  { %v8601_v22 = vmul.f32 0.044715, %v19557_v14  ;;  %v8577_v6 = vmul.f32 0.5, %v19557_v14  ;;  %v8771_v23 = vmul.f32 %v8747_v39, %v8579_v7  ;;  %v20351_v39 = vld [vmem:[%s29049_s3 + $0x1ef0] ss:$24 sps:$4 sm:$0xff]  }
 0x61e   :  { %v8624_v29 = vmul.f32 %v19556_v12, %v8600_v9 }
 0x61f   :  { %v8625_v31 = vmul.f32 %v19557_v14, %v8601_v22  ;;  %16247 = vmatpush1.bf16.msra.mxu1 %v20282_v26  ;;  %v20318_v26 = vld [vmem:[%s29049_s3 + $0x248] ss:$24 sps:$4 sm:$0xff]   ;;  %v20324_v22 = vld [vmem:[%s29049_s3 + $0x278] ss:$24 sps:$4 sm:$0xff]  }
 0x620   :  { %v8648_v33 = vmul.f32 %v19556_v12, %v8624_v29  ;;  %16248 = vmatprep.subr.bf16.mxu1 %v20290_v30  ;;  %v20326_v30 = vld [vmem:[%s29049_s3 + $0x27c] ss:$24 sps:$4 sm:$0xff]  }
 0x621   :  { %v8649_v2 = vmul.f32 %v19557_v14, %v8625_v31  ;;  %v20329_v29 = vld [vmem:[%s29049_s3 + $0x1e34] ss:$24 sps:$4 sm:$0xff]   ;;  %v26535_v31 = vpack.c.bf16 %v8771_v23, %v8771_v23  ;;  %v20363_v23 = vld [vmem:[%s29049_s3 + $0x1f50] ss:$24 sps:$4 sm:$0xff]  }
 0x622   :  { %v8672_v40 = vadd.f32 %v19556_v12, %v8648_v33  ;;  %v20321_v12 = vld [vmem:[%s29049_s3 + $0x1e00] ss:$24 sps:$4 sm:$0xff]  }
 0x623   :  { %16249 = vmatpush1.bf16.msra.mxu1 %v20288_v38  ;;  %v8673_v57 = vadd.f32 %v19557_v14, %v8649_v2  ;;  %v20332_v38 = vld [vmem:[%s29049_s3 + $0x2ac] ss:$24 sps:$4 sm:$0xff]   ;;  %v20330_v33 = vld [vmem:[%s29049_s3 + $0x2a8] ss:$24 sps:$4 sm:$0xff]   ;;  %v20338_v2 = vld [vmem:[%s29049_s3 + $0x2dc] ss:$24 sps:$4 sm:$0xff]  }
 0x624   :  { %16250 = vmatprep.subr.bf16.mxu1 %v20296_v56  ;;  %v8696_v19 = vmul.f32 0.7978846, %v8672_v40  ;;  %v20335_v56 = vld [vmem:[%s29049_s3 + $0x1e64] ss:$24 sps:$4 sm:$0xff]   ;;  %v20333_v40 = vld [vmem:[%s29049_s3 + $0x1e60] ss:$24 sps:$4 sm:$0xff]  }
 0x625   :  { %v8697_v36 = vmul.f32 0.7978846, %v8673_v57  ;;  %v20341_v57 = vld [vmem:[%s29049_s3 + $0x1e94] ss:$24 sps:$4 sm:$0xff]  }
 0x626   :  { %21568 = vtanh.f32 %v8696_v19  ;;  %v20339_v19 = vld [vmem:[%s29049_s3 + $0x1e90] ss:$24 sps:$4 sm:$0xff]  }
 0x627   :  { %16251 = vmatpush1.bf16.msra.mxu1 %v20294_v1  ;;  %21570 = vtanh.f32 %v8697_v36  ;;  %v20336_v1 = vld [vmem:[%s29049_s3 + $0x2d8] ss:$24 sps:$4 sm:$0xff]   ;;  %v20342_v36 = vld [vmem:[%s29049_s3 + $0x308] ss:$24 sps:$4 sm:$0xff]  }
 0x628   :  { %16252 = vmatprep.subr.bf16.mxu1 %v20302_v44  ;;  %v20344_v44 = vld [vmem:[%s29049_s3 + $0x30c] ss:$24 sps:$4 sm:$0xff]  }
 0x62b   :  { %16253 = vmatpush1.bf16.msra.mxu1 %v20300_v45  ;;  %v20347_v45 = vld [vmem:[%s29049_s3 + $0x1ec4] ss:$24 sps:$4 sm:$0xff]  }
 0x62c   :  { %16254 = vmatprep.subr.bf16.mxu1 %v20308_v15  ;;  %v20350_v15 = vld [vmem:[%s29049_s3 + $0x33c] ss:$24 sps:$4 sm:$0xff]  }
 0x62f   :  { %16255 = vmatpush1.bf16.msra.mxu1 %v20306_v49  ;;  %v26581_v49 = vld [vmem:[%s29050_s2 + $0x10] sm:$0xff] }
 0x630   :  { %v21569_v27 = vpop.eup %21568  ;;  %16256 = vmatprep.subr.bf16.mxu1 %v20314_v11  ;;  %v1264_v11 = vrot.slane %v26581_v49, %v24571_v48 }
 0x631   :  { %v21571_v59 = vpop.eup %21570  ;;  %v8744_v5 = vadd.f32 1.0, %v21569_v27  ;;  %v20353_v27 = vld [vmem:[%s29049_s3 + $0x1ef4] ss:$24 sps:$4 sm:$0xff]  }
 0x632   :  { %v8745_v21 = vadd.f32 1.0, %v21571_v59  ;;  %v26600_v7 = vadd.f32 %v24834_v18, %v1264_v11  ;;  %v20354_v59 = vld [vmem:[%s29049_s3 + $0x368] ss:$24 sps:$4 sm:$0xff]   ;;  %v20362_v18 = vld [vmem:[%s29049_s3 + $0x39c] ss:$24 sps:$4 sm:$0xff]  }
 0x633   :  { %16257 = vmatpush1.bf16.msra.mxu1 %v20312_v52  ;;  %v8768_v16 = vmul.f32 %v8744_v5, %v8576_v24  ;;  %v20348_v52 = vld [vmem:[%s29049_s3 + $0x338] ss:$24 sps:$4 sm:$0xff]   ;;  %v20359_v24 = vld [vmem:[%s29049_s3 + $0x1f24] ss:$24 sps:$4 sm:$0xff]  }
 0x634   :  { %16258 = vmatprep.subr.bf16.mxu1 %v20320_v63  ;;  %v8769_v9 = vmul.f32 %v8745_v21, %v8577_v6  ;;  %v20356_v63 = vld [vmem:[%s29049_s3 + $0x36c] ss:$24 sps:$4 sm:$0xff]   ;;  %v8602_v5 = vmul.f32 0.044715, %v26600_v7  ;;  %v20357_v6 = vld [vmem:[%s29049_s3 + $0x1f20] ss:$24 sps:$4 sm:$0xff]  }
 0x635   :  { %v26526_v14 = vpack.c.bf16 %v8768_v16, %v8768_v16  ;;  %v20360_v21 = vld [vmem:[%s29049_s3 + $0x398] ss:$24 sps:$4 sm:$0xff]   ;;  %v20368_v16 = vld [vmem:[%s29049_s3 + $0x3cc] ss:$24 sps:$4 sm:$0xff]  }
 0x636   :  { %v26521_v46 = vpack.c.bf16 %v8769_v9, %v8769_v9  ;;  %v8626_v9 = vmul.f32 %v26600_v7, %v8602_v5  ;;  %v20392_v11 = vld [vmem:[%s29049_s3 + $0x48c] ss:$24 sps:$4 sm:$0xff]   ;;  %v20399_v5 = vld [vmem:[%s29049_s3 + $0x2070] ss:$24 sps:$4 sm:$0xff]  }
 0x637   :  { %16259 = vmatpush1.bf16.msra.mxu1 %v20318_v26  ;;  %v20365_v26 = vld [vmem:[%s29049_s3 + $0x1f54] ss:$24 sps:$4 sm:$0xff]  }
 0x638   :  { %16143 = vmatprep.mubr.bf16.mxu0 %v26521_v46  ;;  %16260 = vmatprep.subr.bf16.mxu1 %v20326_v30  ;;  %v20366_v30 = vld [vmem:[%s29049_s3 + $0x3c8] ss:$24 sps:$4 sm:$0xff]  }
 0x639   :  { %16144 = vmatmul.mubr.bf16.vlgmr.msra.gmra.mrb[16].mxu0 %v26526_v14 }
 0x63a   :  { %16153 = vmatpush1.bf16.msra.mxu0 %v20321_v12  ;;  %16184 = vmatprep.mubr.bf16.mxu0 %v26535_v31  ;;  %v20371_v12 = vld [vmem:[%s29049_s3 + $0x1f84] ss:$24 sps:$4 sm:$0xff]  }
 0x63b   :  { %16261 = vmatpush1.bf16.msra.mxu1 %v20324_v22  ;;  %16154 = vmatprep.subr.bf16.mxu0 %v20329_v29  ;;  %v20374_v22 = vld [vmem:[%s29049_s3 + $0x3fc] ss:$24 sps:$4 sm:$0xff]   ;;  %v8650_v29 = vmul.f32 %v26600_v7, %v8626_v9  ;;  %v20405_v9 = vld [vmem:[%s29049_s3 + $0x20a0] ss:$24 sps:$4 sm:$0xff]  }
 0x63c   :  { %16262 = vmatprep.subr.bf16.mxu1 %v20332_v38  ;;  %v20369_v38 = vld [vmem:[%s29049_s3 + $0x1f80] ss:$24 sps:$4 sm:$0xff]  }
 0x63e   :  { %16155 = vmatpush1.bf16.msra.mxu0 %v20327_v32  ;;  %v20372_v32 = vld [vmem:[%s29049_s3 + $0x3f8] ss:$24 sps:$4 sm:$0xff]  }
 0x63f   :  { %16263 = vmatpush1.bf16.msra.mxu1 %v20330_v33  ;;  %16156 = vmatprep.subr.bf16.mxu0 %v20335_v56  ;;  %v20377_v33 = vld [vmem:[%s29049_s3 + $0x1fb4] ss:$24 sps:$4 sm:$0xff]  }
 0x640   :  { %16264 = vmatprep.subr.bf16.mxu1 %v20338_v2  ;;  %v20380_v56 = vld [vmem:[%s29049_s3 + $0x42c] ss:$24 sps:$4 sm:$0xff]   ;;  %v8674_v2 = vadd.f32 %v26600_v7, %v8650_v29 }
 0x641   :  { %v20416_v29 = vld [vmem:[%s29049_s3 + $0x54c] ss:$24 sps:$4 sm:$0xff]  }
 0x642   :  { %16157 = vmatpush1.bf16.msra.mxu0 %v20333_v40  ;;  %v20375_v40 = vld [vmem:[%s29049_s3 + $0x1fb0] ss:$24 sps:$4 sm:$0xff]  }
 0x643   :  { %16265 = vmatpush1.bf16.msra.mxu1 %v20336_v1  ;;  %16158 = vmatprep.subr.bf16.mxu0 %v20341_v57  ;;  %v20378_v1 = vld [vmem:[%s29049_s3 + $0x428] ss:$24 sps:$4 sm:$0xff]   ;;  %v20383_v57 = vld [vmem:[%s29049_s3 + $0x1fe4] ss:$24 sps:$4 sm:$0xff]  }
 0x644   :  { %16275 = vmatprep.subr.bf16.mxu1 %v20344_v44  ;;  %v20386_v44 = vld [vmem:[%s29049_s3 + $0x45c] ss:$24 sps:$4 sm:$0xff]  }
 0x646   :  { %16159 = vmatpush1.bf16.msra.mxu0 %v20339_v19  ;;  %16267 = vmatmul.mubr.bf16.vlgmr.msra.gmra.mrb[32].mxu1 %v24292_v53  ;;  %v20381_v19 = vld [vmem:[%s29049_s3 + $0x1fe0] ss:$24 sps:$4 sm:$0xff]  }
 0x647   :  { %16276 = vmatpush1.bf16.msra.mxu1 %v20342_v36  ;;  %16307 = vmatprep.mubr.bf16.mxu1 %v24301_v28  ;;  %v8698_v36 = vmul.f32 0.7978846, %v8674_v2  ;;  %v20465_v2 = vld [vmem:[%s29049_s3 + $0x2100] ss:$24 sps:$4 sm:$0xff]  }
 0x648   :  { %16160 = vmatprep.subr.bf16.mxu0 %v20347_v45  ;;  %16277 = vmatprep.subr.bf16.mxu1 %v20350_v15  ;;  %v20384_v45 = vld [vmem:[%s29049_s3 + $0x458] ss:$24 sps:$4 sm:$0xff]   ;;  %v20389_v15 = vld [vmem:[%s29049_s3 + $0x2014] ss:$24 sps:$4 sm:$0xff]  }
 0x649   :  { %21572 = vtanh.f32 %v8698_v36  ;;  %v20420_v36 = vld [vmem:[%s29049_s3 + $0x5a8] ss:$24 sps:$4 sm:$0xff]  }
 0x64a   :  { %16161 = vmatpush1.bf16.msra.mxu0 %v20345_v62  ;;  %v20387_v62 = vld [vmem:[%s29049_s3 + $0x2010] ss:$24 sps:$4 sm:$0xff]  }
 0x64b   :  { %16278 = vmatpush1.bf16.msra.mxu1 %v20348_v52  ;;  %16162 = vmatprep.subr.bf16.mxu0 %v20353_v27  ;;  %v20390_v52 = vld [vmem:[%s29049_s3 + $0x488] ss:$24 sps:$4 sm:$0xff]   ;;  %v20395_v27 = vld [vmem:[%s29049_s3 + $0x2044] ss:$24 sps:$4 sm:$0xff]  }
 0x64c   :  { %16279 = vmatprep.subr.bf16.mxu1 %v20356_v63  ;;  %v20398_v63 = vld [vmem:[%s29049_s3 + $0x4bc] ss:$24 sps:$4 sm:$0xff]  }
 0x64e   :  { %16163 = vmatpush1.bf16.msra.mxu0 %v20351_v39  ;;  %v20393_v39 = vld [vmem:[%s29049_s3 + $0x2040] ss:$24 sps:$4 sm:$0xff]  }
 0x64f   :  { %16280 = vmatpush1.bf16.msra.mxu1 %v20354_v59  ;;  %16164 = vmatprep.subr.bf16.mxu0 %v20359_v24  ;;  %v20396_v59 = vld [vmem:[%s29049_s3 + $0x4b8] ss:$24 sps:$4 sm:$0xff]   ;;  %v20401_v24 = vld [vmem:[%s29049_s3 + $0x2074] ss:$24 sps:$4 sm:$0xff]  }
 0x650   :  { %16281 = vmatprep.subr.bf16.mxu1 %v20362_v18  ;;  %v20404_v18 = vld [vmem:[%s29049_s3 + $0x4ec] ss:$24 sps:$4 sm:$0xff]  }
 0x652   :  { %16165 = vmatpush1.bf16.msra.mxu0 %v20357_v6  ;;  %v20402_v6 = vld [vmem:[%s29049_s3 + $0x4e8] ss:$24 sps:$4 sm:$0xff]  }
 0x653   :  { %16282 = vmatpush1.bf16.msra.mxu1 %v20360_v21  ;;  %16166 = vmatprep.subr.bf16.mxu0 %v20365_v26  ;;  %v20407_v21 = vld [vmem:[%s29049_s3 + $0x20a4] ss:$24 sps:$4 sm:$0xff]   ;;  %v21573_v26 = vpop.eup %21572 }
 0x654   :  { %16283 = vmatprep.subr.bf16.mxu1 %v20368_v16  ;;  %v20410_v16 = vld [vmem:[%s29049_s3 + $0x51c] ss:$24 sps:$4 sm:$0xff]  }
 0x656   :  { %16167 = vmatpush1.bf16.msra.mxu0 %v20363_v23  ;;  %v20408_v23 = vld [vmem:[%s29049_s3 + $0x518] ss:$24 sps:$4 sm:$0xff]  }
 0x657   :  { %16284 = vmatpush1.bf16.msra.mxu1 %v20366_v30  ;;  %16168 = vmatprep.subr.bf16.mxu0 %v20371_v12  ;;  %v20413_v30 = vld [vmem:[%s29049_s3 + $0x20d4] ss:$24 sps:$4 sm:$0xff]   ;;  %v8578_v12 = vmul.f32 0.5, %v26600_v7  ;;  %v20467_v7 = vld [vmem:[%s29049_s3 + $0x2104] ss:$24 sps:$4 sm:$0xff]  }
 0x658   :  { %16285 = vmatprep.subr.bf16.mxu1 %v20374_v22  ;;  %v8746_v22 = vadd.f32 1.0, %v21573_v26  ;;  %v20495_v26 = vld [vmem:[%s29049_s3 + $0x21f0] ss:$24 sps:$4 sm:$0xff]  }
 0x65a   :  { %16169 = vmatpush1.bf16.msra.mxu0 %v20369_v38  ;;  %v20411_v38 = vld [vmem:[%s29049_s3 + $0x20d0] ss:$24 sps:$4 sm:$0xff]  }
 0x65b   :  { %16286 = vmatpush1.bf16.msra.mxu1 %v20372_v32  ;;  %16170 = vmatprep.subr.bf16.mxu0 %v20377_v33  ;;  %v20414_v32 = vld [vmem:[%s29049_s3 + $0x548] ss:$24 sps:$4 sm:$0xff]   ;;  %v8770_v33 = vmul.f32 %v8746_v22, %v8578_v12  ;;  %v20435_v12 = vld [vmem:[%s29049_s3 + $0x698] ss:$24 sps:$4 sm:$0xff]   ;;  %v20509_v22 = vld [vmem:[%s29049_s3 + $0x2254] ss:$24 sps:$4 sm:$0xff]  }
 0x65c   :  { %16287 = vmatprep.subr.bf16.mxu1 %v20380_v56  ;;  %v20419_v56 = vld [vmem:[%s29049_s3 + $0x57c] ss:$24 sps:$4 sm:$0xff]  }
 0x65e   :  { %16171 = vmatpush1.bf16.msra.mxu0 %v20375_v40  ;;  %v26742_v40 = vpack.c.bf16 %v8770_v33, %v8770_v33  ;;  %v20515_v33 = vld [vmem:[%s29049_s3 + $0x2284] ss:$24 sps:$4 sm:$0xff]  }
 0x65f   :  { %16288 = vmatpush1.bf16.msra.mxu1 %v20378_v1  ;;  %16172 = vmatprep.subr.bf16.mxu0 %v20383_v57  ;;  %v20417_v1 = vld [vmem:[%s29049_s3 + $0x578] ss:$24 sps:$4 sm:$0xff]   ;;  %v20473_v57 = vld [vmem:[%s29049_s3 + $0x2134] ss:$24 sps:$4 sm:$0xff]  }
 0x660   :  { %16289 = vmatprep.subr.bf16.mxu1 %v20386_v44  ;;  %v20422_v44 = vld [vmem:[%s29049_s3 + $0x5ac] ss:$24 sps:$4 sm:$0xff]  }
 0x662   :  { %16173 = vmatpush1.bf16.msra.mxu0 %v20381_v19  ;;  %v20471_v19 = vld [vmem:[%s29049_s3 + $0x2130] ss:$24 sps:$4 sm:$0xff]  }
 0x663   :  { %16290 = vmatpush1.bf16.msra.mxu1 %v20384_v45  ;;  %16174 = vmatprep.subr.bf16.mxu0 %v20389_v15  ;;  %v20479_v45 = vld [vmem:[%s29049_s3 + $0x2164] ss:$24 sps:$4 sm:$0xff]  }
 0x664   :  { %16291 = vmatprep.subr.bf16.mxu1 %v20392_v11  ;;  %v20425_v15 = vld [vmem:[%s29049_s3 + $0x5dc] ss:$24 sps:$4 sm:$0xff]   ;;  %v20477_v11 = vld [vmem:[%s29049_s3 + $0x2160] ss:$24 sps:$4 sm:$0xff]  }
 0x666   :  { %16175 = vmatpush1.bf16.msra.mxu0 %v20387_v62  ;;  %v20423_v62 = vld [vmem:[%s29049_s3 + $0x5d8] ss:$24 sps:$4 sm:$0xff]  }
 0x667   :  { %16292 = vmatpush1.bf16.msra.mxu1 %v20390_v52  ;;  %16176 = vmatprep.subr.bf16.mxu0 %v20395_v27  ;;  %v20485_v52 = vld [vmem:[%s29049_s3 + $0x2194] ss:$24 sps:$4 sm:$0xff]  }
 0x668   :  { %16293 = vmatprep.subr.bf16.mxu1 %v20398_v63  ;;  %v20428_v27 = vld [vmem:[%s29049_s3 + $0x60c] ss:$24 sps:$4 sm:$0xff]   ;;  %v20483_v63 = vld [vmem:[%s29049_s3 + $0x2190] ss:$24 sps:$4 sm:$0xff]  }
 0x66a   :  { %16177 = vmatpush1.bf16.msra.mxu0 %v20393_v39  ;;  %v20426_v39 = vld [vmem:[%s29049_s3 + $0x608] ss:$24 sps:$4 sm:$0xff]  }
 0x66b   :  { %16294 = vmatpush1.bf16.msra.mxu1 %v20396_v59  ;;  %16178 = vmatprep.subr.bf16.mxu0 %v20401_v24  ;;  %v20431_v59 = vld [vmem:[%s29049_s3 + $0x63c] ss:$24 sps:$4 sm:$0xff]  }
 0x66c   :  { %16295 = vmatprep.subr.bf16.mxu1 %v20404_v18  ;;  %v20491_v24 = vld [vmem:[%s29049_s3 + $0x21c4] ss:$24 sps:$4 sm:$0xff]   ;;  %v20489_v18 = vld [vmem:[%s29049_s3 + $0x21c0] ss:$24 sps:$4 sm:$0xff]  }
 0x66e   :  { %16179 = vmatpush1.bf16.msra.mxu0 %v20399_v5  ;;  %v20429_v5 = vld [vmem:[%s29049_s3 + $0x638] ss:$24 sps:$4 sm:$0xff]  }
 0x66f   :  { %16296 = vmatpush1.bf16.msra.mxu1 %v20402_v6  ;;  %16180 = vmatprep.subr.bf16.mxu0 %v20407_v21  ;;  %v20497_v6 = vld [vmem:[%s29049_s3 + $0x21f4] ss:$24 sps:$4 sm:$0xff]  }
 0x670   :  { %16297 = vmatprep.subr.bf16.mxu1 %v20410_v16  ;;  %v20434_v21 = vld [vmem:[%s29049_s3 + $0x66c] ss:$24 sps:$4 sm:$0xff]   ;;  %v20432_v16 = vld [vmem:[%s29049_s3 + $0x668] ss:$24 sps:$4 sm:$0xff]  }
 0x672   :  { %16181 = vmatpush1.bf16.msra.mxu0 %v20405_v9  ;;  %v20503_v9 = vld [vmem:[%s29049_s3 + $0x2224] ss:$24 sps:$4 sm:$0xff]  }
 0x673   :  { %16298 = vmatpush1.bf16.msra.mxu1 %v20408_v23  ;;  %16182 = vmatprep.subr.bf16.mxu0 %v20413_v30  ;;  %v20437_v23 = vld [vmem:[%s29049_s3 + $0x69c] ss:$24 sps:$4 sm:$0xff]   ;;  %v20501_v30 = vld [vmem:[%s29049_s3 + $0x2220] ss:$24 sps:$4 sm:$0xff]  }
 0x674   :  { %16299 = vmatprep.subr.bf16.mxu1 %v20416_v29  ;;  %v20440_v29 = vld [vmem:[%s29049_s3 + $0x6cc] ss:$24 sps:$4 sm:$0xff]  }
 0x676   :  { %16183 = vmatpush1.bf16.msra.mxu0 %v20411_v38  ;;  %v20507_v38 = vld [vmem:[%s29049_s3 + $0x2250] ss:$24 sps:$4 sm:$0xff]  }
 0x677   :  { %16300 = vmatpush1.bf16.msra.mxu1 %v20414_v32  ;;  %16193 = vmatprep.subr.bf16.mxu0 %v20467_v7  ;;  %v20438_v32 = vld [vmem:[%s29049_s3 + $0x6c8] ss:$24 sps:$4 sm:$0xff]   ;;  %v20443_v7 = vld [vmem:[%s29049_s3 + $0x6fc] ss:$24 sps:$4 sm:$0xff]  }
 0x678   :  { %16301 = vmatprep.subr.bf16.mxu1 %v20419_v56  ;;  %v20513_v56 = vld [vmem:[%s29049_s3 + $0x2280] ss:$24 sps:$4 sm:$0xff]  }
 0x679   :  { %16185 = vmatmul.mubr.bf16.vlgmr.msra.gmra.mrb[16].mxu0 %v26742_v40 }
 0x67a   :  { %16194 = vmatpush1.bf16.msra.mxu0 %v20465_v2  ;;  %v20441_v2 = vld [vmem:[%s29049_s3 + $0x6f8] ss:$24 sps:$4 sm:$0xff]  }
 0x67b   :  { %16302 = vmatpush1.bf16.msra.mxu1 %v20417_v1  ;;  %16195 = vmatprep.subr.bf16.mxu0 %v20473_v57  ;;  %v20521_v1 = vld [vmem:[%s29049_s3 + $0x22b4] ss:$24 sps:$4 sm:$0xff]  }
 0x67c   :  { %16303 = vmatprep.subr.bf16.mxu1 %v20422_v44  ;;  %v20446_v57 = vld [vmem:[%s29049_s3 + $0x72c] ss:$24 sps:$4 sm:$0xff]   ;;  %v20519_v44 = vld [vmem:[%s29049_s3 + $0x22b0] ss:$24 sps:$4 sm:$0xff]  }
 0x67e   :  { %16196 = vmatpush1.bf16.msra.mxu0 %v20471_v19  ;;  %v20444_v19 = vld [vmem:[%s29049_s3 + $0x728] ss:$24 sps:$4 sm:$0xff]  }
 0x67f   :  { %16304 = vmatpush1.bf16.msra.mxu1 %v20420_v36  ;;  %16197 = vmatprep.subr.bf16.mxu0 %v20479_v45  ;;  %v20527_v36 = vld [vmem:[%s29049_s3 + $0x22e4] ss:$24 sps:$4 sm:$0xff]  }
 0x680   :  { %16305 = vmatprep.subr.bf16.mxu1 %v20425_v15  ;;  %v20449_v45 = vld [vmem:[%s29049_s3 + $0x75c] ss:$24 sps:$4 sm:$0xff]   ;;  %v20525_v15 = vld [vmem:[%s29049_s3 + $0x22e0] ss:$24 sps:$4 sm:$0xff]  }
 0x682   :  { %16198 = vmatpush1.bf16.msra.mxu0 %v20477_v11  ;;  %v20447_v11 = vld [vmem:[%s29049_s3 + $0x758] ss:$24 sps:$4 sm:$0xff]  }
 0x683   :  { %16306 = vmatpush1.bf16.msra.mxu1 %v20423_v62  ;;  %16199 = vmatprep.subr.bf16.mxu0 %v20485_v52  ;;  %v20533_v62 = vld [vmem:[%s29049_s3 + $0x2314] ss:$24 sps:$4 sm:$0xff]  }
 0x684   :  { %16316 = vmatprep.subr.bf16.mxu1 %v20428_v27  ;;  %v20452_v52 = vld [vmem:[%s29049_s3 + $0x78c] ss:$24 sps:$4 sm:$0xff]   ;;  %v20531_v27 = vld [vmem:[%s29049_s3 + $0x2310] ss:$24 sps:$4 sm:$0xff]  }
 0x686   :  { %16308 = vmatmul.mubr.bf16.vlgmr.msra.gmra.mrb[32].mxu1 %v24529_v17  ;;  %16200 = vmatpush1.bf16.msra.mxu0 %v20483_v63  ;;  %v20450_v63 = vld [vmem:[%s29049_s3 + $0x788] ss:$24 sps:$4 sm:$0xff]  }
 0x687   :  { %16317 = vmatpush1.bf16.msra.mxu1 %v20426_v39  ;;  %16348 = vmatprep.mubr.bf16.mxu1 %v24532_v20  ;;  %v20539_v39 = vld [vmem:[%s29049_s3 + $0x2344] ss:$24 sps:$4 sm:$0xff]  }
 0x688   :  { %16318 = vmatprep.subr.bf16.mxu1 %v20431_v59  ;;  %16201 = vmatprep.subr.bf16.mxu0 %v20491_v24  ;;  %v20455_v59 = vld [vmem:[%s29049_s3 + $0x7bc] ss:$24 sps:$4 sm:$0xff]   ;;  %v20537_v24 = vld [vmem:[%s29049_s3 + $0x2340] ss:$24 sps:$4 sm:$0xff]  }
 0x68a   :  { %16202 = vmatpush1.bf16.msra.mxu0 %v20489_v18  ;;  %v20453_v18 = vld [vmem:[%s29049_s3 + $0x7b8] ss:$24 sps:$4 sm:$0xff]  }
 0x68b   :  { %16319 = vmatpush1.bf16.msra.mxu1 %v20429_v5  ;;  %16203 = vmatprep.subr.bf16.mxu0 %v20497_v6  ;;  %v20545_v5 = vld [vmem:[%s29049_s3 + $0x2374] ss:$24 sps:$4 sm:$0xff]  }
 0x68c   :  { %16320 = vmatprep.subr.bf16.mxu1 %v20434_v21  ;;  %v20458_v6 = vld [vmem:[%s29049_s3 + $0x7ec] ss:$24 sps:$4 sm:$0xff]   ;;  %v20543_v21 = vld [vmem:[%s29049_s3 + $0x2370] ss:$24 sps:$4 sm:$0xff]  }
 0x68e   :  { %16204 = vmatpush1.bf16.msra.mxu0 %v20495_v26  ;;  %v20456_v26 = vld [vmem:[%s29049_s3 + $0x7e8] ss:$24 sps:$4 sm:$0xff]  }
 0x68f   :  { %16321 = vmatpush1.bf16.msra.mxu1 %v20432_v16  ;;  %16205 = vmatprep.subr.bf16.mxu0 %v20503_v9  ;;  %v20551_v16 = vld [vmem:[%s29049_s3 + $0x23a4] ss:$24 sps:$4 sm:$0xff]  }
 0x690   :  { %16322 = vmatprep.subr.bf16.mxu1 %v20437_v23  ;;  %v20461_v9 = vld [vmem:[%s29049_s3 + $0x81c] ss:$24 sps:$4 sm:$0xff]   ;;  %v20549_v23 = vld [vmem:[%s29049_s3 + $0x23a0] ss:$24 sps:$4 sm:$0xff]  }
 0x692   :  { %16206 = vmatpush1.bf16.msra.mxu0 %v20501_v30  ;;  %v20459_v30 = vld [vmem:[%s29049_s3 + $0x818] ss:$24 sps:$4 sm:$0xff]  }
 0x693   :  { %16323 = vmatpush1.bf16.msra.mxu1 %v20435_v12  ;;  %16207 = vmatprep.subr.bf16.mxu0 %v20509_v22  ;;  %v20557_v12 = vld [vmem:[%s29049_s3 + $0x23d4] ss:$24 sps:$4 sm:$0xff]  }
 0x694   :  { %16324 = vmatprep.subr.bf16.mxu1 %v20440_v29  ;;  %v20464_v22 = vld [vmem:[%s29049_s3 + $0x84c] ss:$24 sps:$4 sm:$0xff]   ;;  %v20555_v29 = vld [vmem:[%s29049_s3 + $0x23d0] ss:$24 sps:$4 sm:$0xff]  }
 0x696   :  { %16208 = vmatpush1.bf16.msra.mxu0 %v20507_v38  ;;  %v20462_v38 = vld [vmem:[%s29049_s3 + $0x848] ss:$24 sps:$4 sm:$0xff]  }
 0x697   :  { %16325 = vmatpush1.bf16.msra.mxu1 %v20438_v32  ;;  %16209 = vmatprep.subr.bf16.mxu0 %v20515_v33  ;;  %v20563_v32 = vld [vmem:[%s29049_s3 + $0x14] ss:$24 sps:$4 sm:$0xff]  }
 0x698   :  { %16326 = vmatprep.subr.bf16.mxu1 %v20443_v7  ;;  %v20470_v33 = vld [vmem:[%s29049_s3 + $0x87c] ss:$24 sps:$4 sm:$0xff]   ;;  %v20468_v7 = vld [vmem:[%s29049_s3 + $0x878] ss:$24 sps:$4 sm:$0xff]  }
 0x69a   :  { %16210 = vmatpush1.bf16.msra.mxu0 %v20513_v56  ;;  %v20476_v56 = vld [vmem:[%s29049_s3 + $0x8ac] ss:$24 sps:$4 sm:$0xff]  }
 0x69b   :  { %16327 = vmatpush1.bf16.msra.mxu1 %v20441_v2  ;;  %16211 = vmatprep.subr.bf16.mxu0 %v20521_v1  ;;  %v20474_v2 = vld [vmem:[%s29049_s3 + $0x8a8] ss:$24 sps:$4 sm:$0xff]   ;;  %v20482_v1 = vld [vmem:[%s29049_s3 + $0x8dc] ss:$24 sps:$4 sm:$0xff]  }
 0x69c   :  { %16328 = vmatprep.subr.bf16.mxu1 %v20446_v57  ;;  %v20480_v57 = vld [vmem:[%s29049_s3 + $0x8d8] ss:$24 sps:$4 sm:$0xff]  }
 0x69e   :  { %16212 = vmatpush1.bf16.msra.mxu0 %v20519_v44  ;;  %v20488_v44 = vld [vmem:[%s29049_s3 + $0x90c] ss:$24 sps:$4 sm:$0xff]  }
 0x69f   :  { %16329 = vmatpush1.bf16.msra.mxu1 %v20444_v19  ;;  %16213 = vmatprep.subr.bf16.mxu0 %v20527_v36  ;;  %v20486_v19 = vld [vmem:[%s29049_s3 + $0x908] ss:$24 sps:$4 sm:$0xff]   ;;  %v20494_v36 = vld [vmem:[%s29049_s3 + $0x93c] ss:$24 sps:$4 sm:$0xff]  }
 0x6a0   :  { %16330 = vmatprep.subr.bf16.mxu1 %v20449_v45  ;;  %v20492_v45 = vld [vmem:[%s29049_s3 + $0x938] ss:$24 sps:$4 sm:$0xff]  }
 0x6a2   :  { %16214 = vmatpush1.bf16.msra.mxu0 %v20525_v15  ;;  %v20500_v15 = vld [vmem:[%s29049_s3 + $0x96c] ss:$24 sps:$4 sm:$0xff]  }
 0x6a3   :  { %16331 = vmatpush1.bf16.msra.mxu1 %v20447_v11  ;;  %16215 = vmatprep.subr.bf16.mxu0 %v20533_v62  ;;  %v20498_v11 = vld [vmem:[%s29049_s3 + $0x968] ss:$24 sps:$4 sm:$0xff]   ;;  %v20506_v62 = vld [vmem:[%s29049_s3 + $0x99c] ss:$24 sps:$4 sm:$0xff]  }
 0x6a4   :  { %16332 = vmatprep.subr.bf16.mxu1 %v20452_v52  ;;  %v20504_v52 = vld [vmem:[%s29049_s3 + $0x998] ss:$24 sps:$4 sm:$0xff]  }
 0x6a6   :  { %16216 = vmatpush1.bf16.msra.mxu0 %v20531_v27  ;;  %v20512_v27 = vld [vmem:[%s29049_s3 + $0x9cc] ss:$24 sps:$4 sm:$0xff]  }
 0x6a7   :  { %16333 = vmatpush1.bf16.msra.mxu1 %v20450_v63  ;;  %16217 = vmatprep.subr.bf16.mxu0 %v20539_v39  ;;  %v20510_v63 = vld [vmem:[%s29049_s3 + $0x9c8] ss:$24 sps:$4 sm:$0xff]   ;;  %v20518_v39 = vld [vmem:[%s29049_s3 + $0x9fc] ss:$24 sps:$4 sm:$0xff]  }
 0x6a8   :  { %16334 = vmatprep.subr.bf16.mxu1 %v20455_v59  ;;  %v1272_v59 = vrot.slane %v26581_v49, %v24794_v41  ;;  %v20522_v41 = vld [vmem:[%s29049_s3 + $0xa28] ss:$24 sps:$4 sm:$0xff]  }
 0x6aa   :  { %16218 = vmatpush1.bf16.msra.mxu0 %v20537_v24  ;;  %v1276_v24 = vrot.slane %v26581_v49, %v24797_v25 }
 0x6ab   :  { %16335 = vmatpush1.bf16.msra.mxu1 %v20453_v18  ;;  %16219 = vmatprep.subr.bf16.mxu0 %v20545_v5  ;;  %v20516_v18 = vld [vmem:[%s29049_s3 + $0x9f8] ss:$24 sps:$4 sm:$0xff]   ;;  %v20524_v5 = vld [vmem:[%s29049_s3 + $0xa2c] ss:$24 sps:$4 sm:$0xff]  }
 0x6ac   :  { %16336 = vmatprep.subr.bf16.mxu1 %v20458_v6 }
 0x6ae   :  { %16220 = vmatpush1.bf16.msra.mxu0 %v20543_v21 }
 0x6af   :  { %16337 = vmatpush1.bf16.msra.mxu1 %v20456_v26  ;;  %16221 = vmatprep.subr.bf16.mxu0 %v20551_v16 }
 0x6b0   :  { %16338 = vmatprep.subr.bf16.mxu1 %v20461_v9 }
 0x6b2   :  { %16222 = vmatpush1.bf16.msra.mxu0 %v20549_v23  ;;  %v20530_v23 = vld [vmem:[%s29049_s3 + $0xa5c] ss:$24 sps:$4 sm:$0xff]  }
 0x6b3   :  { %16339 = vmatpush1.bf16.msra.mxu1 %v20459_v30  ;;  %16223 = vmatprep.subr.bf16.mxu0 %v20557_v12 }
 0x6b4   :  { %16340 = vmatprep.subr.bf16.mxu1 %v20464_v22 }
 0x6b6   :  { %16224 = vmatpush1.bf16.msra.mxu0 %v20555_v29  ;;  %v20528_v29 = vld [vmem:[%s29049_s3 + $0xa58] ss:$24 sps:$4 sm:$0xff]  }
 0x6b7   :  { %16341 = vmatpush1.bf16.msra.mxu1 %v20462_v38  ;;  %16726 = vmatprep.subr.bf16.mxu0 %v20563_v32  ;;  %v20536_v32 = vld [vmem:[%s29049_s3 + $0xa8c] ss:$24 sps:$4 sm:$0xff]  }
 0x6b8   :  { %16342 = vmatprep.subr.bf16.mxu1 %v20470_v33 }
 0x6bb   :  { %16343 = vmatpush1.bf16.msra.mxu1 %v20468_v7 }
 0x6bc   :  { %16344 = vmatprep.subr.bf16.mxu1 %v20476_v56  ;;  %v20534_v56 = vld [vmem:[%s29049_s3 + $0xa88] ss:$24 sps:$4 sm:$0xff]  }
 0x6bf   :  { %16345 = vmatpush1.bf16.msra.mxu1 %v20474_v2 }
 0x6c0   :  { %16346 = vmatprep.subr.bf16.mxu1 %v20482_v1  ;;  %v20542_v1 = vld [vmem:[%s29049_s3 + $0xabc] ss:$24 sps:$4 sm:$0xff]  }
 0x6c3   :  { %16347 = vmatpush1.bf16.msra.mxu1 %v20480_v57 }
 0x6c4   :  { %16357 = vmatprep.subr.bf16.mxu1 %v20488_v44 }
 0x6c6   :  { %16349 = vmatmul.mubr.bf16.vlgmr.msra.gmra.mrb[32].mxu1 %v24742_v3 }
 0x6c7   :  { %16358 = vmatpush1.bf16.msra.mxu1 %v20486_v19  ;;  %16389 = vmatprep.mubr.bf16.mxu1 %v24933_v51  ;;  %v20540_v19 = vld [vmem:[%s29049_s3 + $0xab8] ss:$24 sps:$4 sm:$0xff]  }
 0x6c8   :  { %16359 = vmatprep.subr.bf16.mxu1 %v20494_v36  ;;  %v20548_v36 = vld [vmem:[%s29049_s3 + $0xaec] ss:$24 sps:$4 sm:$0xff]  }
 0x6cb   :  { %16360 = vmatpush1.bf16.msra.mxu1 %v20492_v45  ;;  %v20546_v45 = vld [vmem:[%s29049_s3 + $0xae8] ss:$24 sps:$4 sm:$0xff]  }
 0x6cc   :  { %16361 = vmatprep.subr.bf16.mxu1 %v20500_v15  ;;  %v20554_v15 = vld [vmem:[%s29049_s3 + $0xb1c] ss:$24 sps:$4 sm:$0xff]  }
 0x6cf   :  { %16362 = vmatpush1.bf16.msra.mxu1 %v20498_v11  ;;  %v20552_v11 = vld [vmem:[%s29049_s3 + $0xb18] ss:$24 sps:$4 sm:$0xff]  }
 0x6d0   :  { %16363 = vmatprep.subr.bf16.mxu1 %v20506_v62 }
 0x6d3   :  { %16364 = vmatpush1.bf16.msra.mxu1 %v20504_v52  ;;  %v20560_v52 = vld [vmem:[%s29049_s3 + $0xb4c] ss:$24 sps:$4 sm:$0xff]  }
 0x6d4   :  { %16365 = vmatprep.subr.bf16.mxu1 %v20512_v27 }
 0x6d7   :  { %16366 = vmatpush1.bf16.msra.mxu1 %v20510_v63 }
 0x6d8   :  { %16367 = vmatprep.subr.bf16.mxu1 %v20518_v39 }
 0x6d9   :  { %v8551_v6 = vpop.f32.mrb[28].mxu1 }
 0x6da   :  { %v19560_v21 = vadd.f32 %v8551_v6, %v1272_v59  ;;  %v8553_v26 = vpop.f32.mrb[29].mxu1 }
 0x6db   :  { %v19561_v16 = vadd.f32 %v8553_v26, %v1276_v24  ;;  %v8555_v9 = vpop.f32.mrb[30].mxu1  ;;  %16368 = vmatpush1.bf16.msra.mxu1 %v20516_v18  ;;  %v20558_v18 = vld [vmem:[%s29049_s3 + $0xb48] ss:$24 sps:$4 sm:$0xff]   ;;  %v20566_v26 = vld [vmem:[%s29049_s3 + $0xb7c] ss:$24 sps:$4 sm:$0xff]  }
 0x6dc   :  { %v8604_v25 = vmul.f32 0.044715, %v19560_v21  ;;  %v8556_v49 = vpop.f32.mrb[31].mxu1  ;;  %16369 = vmatprep.subr.bf16.mxu1 %v20524_v5  ;;  %v8580_v63 = vmul.f32 0.5, %v19560_v21 }
 0x6dd   :  { %v8605_v30 = vmul.f32 0.044715, %v19561_v16  ;;  %v8581_v59 = vmul.f32 0.5, %v19561_v16  ;;  %v20572_v49 = vld [vmem:[%s29049_s3 + $0xbac] ss:$24 sps:$4 sm:$0xff]  }
 0x6de   :  { %v8628_v12 = vmul.f32 %v19560_v21, %v8604_v25  ;;  %v20569_v25 = vld [vmem:[%s29049_s3 + $0x44] ss:$24 sps:$4 sm:$0xff]  }
 0x6df   :  { %v8629_v22 = vmul.f32 %v19561_v16, %v8605_v30  ;;  %16370 = vmatpush1.bf16.msra.mxu1 %v20522_v41  ;;  %v20564_v41 = vld [vmem:[%s29049_s3 + $0xb78] ss:$24 sps:$4 sm:$0xff]   ;;  %v20570_v30 = vld [vmem:[%s29049_s3 + $0xba8] ss:$24 sps:$4 sm:$0xff]  }
 0x6e0   :  { %v8652_v38 = vmul.f32 %v19560_v21, %v8628_v12  ;;  %16371 = vmatprep.subr.bf16.mxu1 %v20530_v23  ;;  %v20567_v23 = vld [vmem:[%s29049_s3 + $0x40] ss:$24 sps:$4 sm:$0xff]   ;;  %v20575_v12 = vld [vmem:[%s29049_s3 + $0x74] ss:$24 sps:$4 sm:$0xff]  }
 0x6e1   :  { %v8653_v33 = vmul.f32 %v19561_v16, %v8629_v22  ;;  %v20578_v22 = vld [vmem:[%s29049_s3 + $0xbdc] ss:$24 sps:$4 sm:$0xff]  }
 0x6e2   :  { %v8676_v7 = vadd.f32 %v19560_v21, %v8652_v38  ;;  %v20561_v21 = vld [vmem:[%s29049_s3 + $0x10] ss:$24 sps:$4 sm:$0xff]   ;;  %v20581_v38 = vld [vmem:[%s29049_s3 + $0xa4] ss:$24 sps:$4 sm:$0xff]  }
 0x6e3   :  { %16372 = vmatpush1.bf16.msra.mxu1 %v20528_v29  ;;  %v8677_v2 = vadd.f32 %v19561_v16, %v8653_v33  ;;  %v20576_v29 = vld [vmem:[%s29049_s3 + $0xbd8] ss:$24 sps:$4 sm:$0xff]  }
 0x6e4   :  { %16373 = vmatprep.subr.bf16.mxu1 %v20536_v32  ;;  %v8700_v57 = vmul.f32 0.7978846, %v8676_v7  ;;  %v20584_v32 = vld [vmem:[%s29049_s3 + $0xc0c] ss:$24 sps:$4 sm:$0xff]   ;;  %v20579_v33 = vld [vmem:[%s29049_s3 + $0xa0] ss:$24 sps:$4 sm:$0xff]  }
 0x6e5   :  { %v8701_v44 = vmul.f32 0.7978846, %v8677_v2  ;;  %v20582_v7 = vld [vmem:[%s29049_s3 + $0xc08] ss:$24 sps:$4 sm:$0xff]   ;;  %v20590_v2 = vld [vmem:[%s29049_s3 + $0xc3c] ss:$24 sps:$4 sm:$0xff]  }
 0x6e6   :  { %21574 = vtanh.f32 %v8700_v57  ;;  %v20588_v57 = vld [vmem:[%s29049_s3 + $0xc38] ss:$24 sps:$4 sm:$0xff]  }
 0x6e7   :  { %16374 = vmatpush1.bf16.msra.mxu1 %v20534_v56  ;;  %21576 = vtanh.f32 %v8701_v44  ;;  %v20587_v56 = vld [vmem:[%s29049_s3 + $0xd4] ss:$24 sps:$4 sm:$0xff]   ;;  %v20593_v44 = vld [vmem:[%s29049_s3 + $0x104] ss:$24 sps:$4 sm:$0xff]  }
 0x6e8   :  { %16375 = vmatprep.subr.bf16.mxu1 %v20542_v1  ;;  %v20585_v1 = vld [vmem:[%s29049_s3 + $0xd0] ss:$24 sps:$4 sm:$0xff]  }
 0x6eb   :  { %16376 = vmatpush1.bf16.msra.mxu1 %v20540_v19  ;;  %v20596_v19 = vld [vmem:[%s29049_s3 + $0xc6c] ss:$24 sps:$4 sm:$0xff]  }
 0x6ec   :  { %16377 = vmatprep.subr.bf16.mxu1 %v20548_v36  ;;  %v20591_v36 = vld [vmem:[%s29049_s3 + $0x100] ss:$24 sps:$4 sm:$0xff]  }
 0x6ef   :  { %16378 = vmatpush1.bf16.msra.mxu1 %v20546_v45  ;;  %v20594_v45 = vld [vmem:[%s29049_s3 + $0xc68] ss:$24 sps:$4 sm:$0xff]  }
 0x6f0   :  { %v21575_v62 = vpop.eup %21574  ;;  %16379 = vmatprep.subr.bf16.mxu1 %v20554_v15  ;;  %v20599_v15 = vld [vmem:[%s29049_s3 + $0x134] ss:$24 sps:$4 sm:$0xff]  }
 0x6f1   :  { %v21577_v27 = vpop.eup %21576  ;;  %v8748_v39 = vadd.f32 1.0, %v21575_v62  ;;  %v20597_v62 = vld [vmem:[%s29049_s3 + $0x130] ss:$24 sps:$4 sm:$0xff]  }
 0x6f2   :  { %v8749_v24 = vadd.f32 1.0, %v21577_v27  ;;  %v20605_v27 = vld [vmem:[%s29049_s3 + $0x164] ss:$24 sps:$4 sm:$0xff]  }
 0x6f3   :  { %16380 = vmatpush1.bf16.msra.mxu1 %v20552_v11  ;;  %v8772_v5 = vmul.f32 %v8748_v39, %v8580_v63  ;;  %v20602_v11 = vld [vmem:[%s29049_s3 + $0xc9c] ss:$24 sps:$4 sm:$0xff]   ;;  %v20608_v63 = vld [vmem:[%s29049_s3 + $0xccc] ss:$24 sps:$4 sm:$0xff]   ;;  %v20603_v39 = vld [vmem:[%s29049_s3 + $0x160] ss:$24 sps:$4 sm:$0xff]  }
 0x6f4   :  { %16381 = vmatprep.subr.bf16.mxu1 %v20560_v52  ;;  %v8773_v6 = vmul.f32 %v8749_v24, %v8581_v59  ;;  %v20600_v52 = vld [vmem:[%s29049_s3 + $0xc98] ss:$24 sps:$4 sm:$0xff]   ;;  %v20606_v59 = vld [vmem:[%s29049_s3 + $0xcc8] ss:$24 sps:$4 sm:$0xff]   ;;  %v20611_v24 = vld [vmem:[%s29049_s3 + $0x194] ss:$24 sps:$4 sm:$0xff]  }
 0x6f5   :  { %v27043_v16 = vpack.c.bf16 %v8772_v5, %v8772_v5  ;;  %v20609_v5 = vld [vmem:[%s29049_s3 + $0x190] ss:$24 sps:$4 sm:$0xff]  }
 0x6f6   :  { %v27038_v9 = vpack.c.bf16 %v8773_v6, %v8773_v6  ;;  %v20612_v6 = vld [vmem:[%s29049_s3 + $0xcf8] ss:$24 sps:$4 sm:$0xff]  }
 0x6f7   :  { %16382 = vmatpush1.bf16.msra.mxu1 %v20558_v18  ;;  %v20614_v18 = vld [vmem:[%s29049_s3 + $0xcfc] ss:$24 sps:$4 sm:$0xff]  }
 0x6f8   :  { %16225 = vmatprep.mubr.bf16.mxu0 %v27038_v9  ;;  %16383 = vmatprep.subr.bf16.mxu1 %v20566_v26  ;;  %v20617_v26 = vld [vmem:[%s29049_s3 + $0x1c4] ss:$24 sps:$4 sm:$0xff]  }
 0x6f9   :  { %16226 = vmatmul.mubr.bf16.vlgmr.msra.gmra.mrb[16].mxu0 %v27043_v16 }
 0x6fa   :  { %16727 = vmatpush1.bf16.msra.mxu0 %v20561_v21  ;;  %16758 = vmatprep.mubr.bf16.mxu0 %v24067_v35  ;;  %v20573_v35 = vld [vmem:[%s29049_s3 + $0x70] ss:$24 sps:$4 sm:$0xff]   ;;  %v20620_v21 = vld [vmem:[%s29049_s3 + $0xd2c] ss:$24 sps:$4 sm:$0xff]  }
 0x6fb   :  { %16384 = vmatpush1.bf16.msra.mxu1 %v20564_v41  ;;  %16728 = vmatprep.subr.bf16.mxu0 %v20569_v25  ;;  %v20615_v41 = vld [vmem:[%s29049_s3 + $0x1c0] ss:$24 sps:$4 sm:$0xff]  }
 0x6fc   :  { %16385 = vmatprep.subr.bf16.mxu1 %v20572_v49  ;;  %v20618_v25 = vld [vmem:[%s29049_s3 + $0xd28] ss:$24 sps:$4 sm:$0xff]   ;;  %v20623_v49 = vld [vmem:[%s29049_s3 + $0x1f4] ss:$24 sps:$4 sm:$0xff]  }
 0x6fe   :  { %16729 = vmatpush1.bf16.msra.mxu0 %v20567_v23  ;;  %v20626_v23 = vld [vmem:[%s29049_s3 + $0xd5c] ss:$24 sps:$4 sm:$0xff]  }
 0x6ff   :  { %16386 = vmatpush1.bf16.msra.mxu1 %v20570_v30  ;;  %16730 = vmatprep.subr.bf16.mxu0 %v20575_v12  ;;  %v20621_v30 = vld [vmem:[%s29049_s3 + $0x1f0] ss:$24 sps:$4 sm:$0xff]  }
 0x700   :  { %16387 = vmatprep.subr.bf16.mxu1 %v20578_v22  ;;  %v20624_v12 = vld [vmem:[%s29049_s3 + $0xd58] ss:$24 sps:$4 sm:$0xff]   ;;  %v20629_v22 = vld [vmem:[%s29049_s3 + $0x224] ss:$24 sps:$4 sm:$0xff]  }
 0x702   :  { %16731 = vmatpush1.bf16.msra.mxu0 %v20573_v35  ;;  %v20632_v35 = vld [vmem:[%s29049_s3 + $0xd8c] ss:$24 sps:$4 sm:$0xff]  }
 0x703   :  { %16388 = vmatpush1.bf16.msra.mxu1 %v20576_v29  ;;  %16732 = vmatprep.subr.bf16.mxu0 %v20581_v38  ;;  %v20627_v29 = vld [vmem:[%s29049_s3 + $0x220] ss:$24 sps:$4 sm:$0xff]  }
 0x704   :  { %16398 = vmatprep.subr.bf16.mxu1 %v20584_v32  ;;  %v20630_v38 = vld [vmem:[%s29049_s3 + $0xd88] ss:$24 sps:$4 sm:$0xff]   ;;  %v20635_v32 = vld [vmem:[%s29049_s3 + $0x254] ss:$24 sps:$4 sm:$0xff]  }
 0x706   :  { %16733 = vmatpush1.bf16.msra.mxu0 %v20579_v33  ;;  %16390 = vmatmul.mubr.bf16.vlgmr.msra.gmra.mrb[32].mxu1 %v24986_v58  ;;  %v20638_v33 = vld [vmem:[%s29049_s3 + $0xdbc] ss:$24 sps:$4 sm:$0xff]  }
 0x707   :  { %16399 = vmatpush1.bf16.msra.mxu1 %v20582_v7  ;;  %16430 = vmatprep.mubr.bf16.mxu1 %v24989_v60  ;;  %v20633_v7 = vld [vmem:[%s29049_s3 + $0x250] ss:$24 sps:$4 sm:$0xff]  }
 0x708   :  { %16734 = vmatprep.subr.bf16.mxu0 %v20587_v56  ;;  %16400 = vmatprep.subr.bf16.mxu1 %v20590_v2  ;;  %v20636_v56 = vld [vmem:[%s29049_s3 + $0xdb8] ss:$24 sps:$4 sm:$0xff]   ;;  %v20641_v2 = vld [vmem:[%s29049_s3 + $0x284] ss:$24 sps:$4 sm:$0xff]  }
 0x70a   :  { %16735 = vmatpush1.bf16.msra.mxu0 %v20585_v1  ;;  %v20644_v1 = vld [vmem:[%s29049_s3 + $0xdec] ss:$24 sps:$4 sm:$0xff]  }
 0x70b   :  { %16401 = vmatpush1.bf16.msra.mxu1 %v20588_v57  ;;  %16736 = vmatprep.subr.bf16.mxu0 %v20593_v44  ;;  %v20639_v57 = vld [vmem:[%s29049_s3 + $0x280] ss:$24 sps:$4 sm:$0xff]  }
 0x70c   :  { %16402 = vmatprep.subr.bf16.mxu1 %v20596_v19  ;;  %v20642_v44 = vld [vmem:[%s29049_s3 + $0xde8] ss:$24 sps:$4 sm:$0xff]   ;;  %v20647_v19 = vld [vmem:[%s29049_s3 + $0x2b4] ss:$24 sps:$4 sm:$0xff]  }
 0x70e   :  { %16737 = vmatpush1.bf16.msra.mxu0 %v20591_v36  ;;  %v20650_v36 = vld [vmem:[%s29049_s3 + $0xe1c] ss:$24 sps:$4 sm:$0xff]  }
 0x70f   :  { %16403 = vmatpush1.bf16.msra.mxu1 %v20594_v45  ;;  %16738 = vmatprep.subr.bf16.mxu0 %v20599_v15  ;;  %v20645_v45 = vld [vmem:[%s29049_s3 + $0x2b0] ss:$24 sps:$4 sm:$0xff]  }
 0x710   :  { %16404 = vmatprep.subr.bf16.mxu1 %v20602_v11  ;;  %v20648_v15 = vld [vmem:[%s29049_s3 + $0xe18] ss:$24 sps:$4 sm:$0xff]   ;;  %v20653_v11 = vld [vmem:[%s29049_s3 + $0x2e4] ss:$24 sps:$4 sm:$0xff]  }
 0x712   :  { %16739 = vmatpush1.bf16.msra.mxu0 %v20597_v62  ;;  %v20656_v62 = vld [vmem:[%s29049_s3 + $0xe4c] ss:$24 sps:$4 sm:$0xff]  }
 0x713   :  { %16405 = vmatpush1.bf16.msra.mxu1 %v20600_v52  ;;  %16740 = vmatprep.subr.bf16.mxu0 %v20605_v27  ;;  %v20651_v52 = vld [vmem:[%s29049_s3 + $0x2e0] ss:$24 sps:$4 sm:$0xff]  }
 0x714   :  { %16406 = vmatprep.subr.bf16.mxu1 %v20608_v63  ;;  %v20654_v27 = vld [vmem:[%s29049_s3 + $0xe48] ss:$24 sps:$4 sm:$0xff]   ;;  %v20659_v63 = vld [vmem:[%s29049_s3 + $0x314] ss:$24 sps:$4 sm:$0xff]  }
 0x716   :  { %16741 = vmatpush1.bf16.msra.mxu0 %v20603_v39  ;;  %v20662_v39 = vld [vmem:[%s29049_s3 + $0xe7c] ss:$24 sps:$4 sm:$0xff]  }
 0x717   :  { %16407 = vmatpush1.bf16.msra.mxu1 %v20606_v59  ;;  %16742 = vmatprep.subr.bf16.mxu0 %v20611_v24  ;;  %v20657_v59 = vld [vmem:[%s29049_s3 + $0x310] ss:$24 sps:$4 sm:$0xff]  }
 0x718   :  { %16408 = vmatprep.subr.bf16.mxu1 %v20614_v18  ;;  %v20660_v24 = vld [vmem:[%s29049_s3 + $0xe78] ss:$24 sps:$4 sm:$0xff]   ;;  %v20665_v18 = vld [vmem:[%s29049_s3 + $0x344] ss:$24 sps:$4 sm:$0xff]  }
 0x71a   :  { %16743 = vmatpush1.bf16.msra.mxu0 %v20609_v5  ;;  %v20668_v5 = vld [vmem:[%s29049_s3 + $0xeac] ss:$24 sps:$4 sm:$0xff]  }
 0x71b   :  { %16409 = vmatpush1.bf16.msra.mxu1 %v20612_v6  ;;  %16744 = vmatprep.subr.bf16.mxu0 %v20617_v26  ;;  %v20663_v6 = vld [vmem:[%s29049_s3 + $0x340] ss:$24 sps:$4 sm:$0xff]  }
 0x71c   :  { %16410 = vmatprep.subr.bf16.mxu1 %v20620_v21  ;;  %v20666_v26 = vld [vmem:[%s29049_s3 + $0xea8] ss:$24 sps:$4 sm:$0xff]   ;;  %v20671_v21 = vld [vmem:[%s29049_s3 + $0x374] ss:$24 sps:$4 sm:$0xff]  }
 0x71e   :  { %16745 = vmatpush1.bf16.msra.mxu0 %v20615_v41  ;;  %v20672_v41 = vld [vmem:[%s29049_s3 + $0xed8] ss:$24 sps:$4 sm:$0xff]  }
 0x71f   :  { %16411 = vmatpush1.bf16.msra.mxu1 %v20618_v25  ;;  %16746 = vmatprep.subr.bf16.mxu0 %v20623_v49  ;;  %v20677_v25 = vld [vmem:[%s29049_s3 + $0x3a4] ss:$24 sps:$4 sm:$0xff]  }
 0x720   :  { %16412 = vmatprep.subr.bf16.mxu1 %v20626_v23  ;;  %v20680_v49 = vld [vmem:[%s29049_s3 + $0xf0c] ss:$24 sps:$4 sm:$0xff]   ;;  %v20675_v23 = vld [vmem:[%s29049_s3 + $0x3a0] ss:$24 sps:$4 sm:$0xff]  }
 0x722   :  { %16747 = vmatpush1.bf16.msra.mxu0 %v20621_v30  ;;  %v20678_v30 = vld [vmem:[%s29049_s3 + $0xf08] ss:$24 sps:$4 sm:$0xff]  }
 0x723   :  { %16413 = vmatpush1.bf16.msra.mxu1 %v20624_v12  ;;  %16748 = vmatprep.subr.bf16.mxu0 %v20629_v22  ;;  %v20683_v12 = vld [vmem:[%s29049_s3 + $0x3d4] ss:$24 sps:$4 sm:$0xff]  }
 0x724   :  { %16414 = vmatprep.subr.bf16.mxu1 %v20632_v35  ;;  %v20686_v22 = vld [vmem:[%s29049_s3 + $0xf3c] ss:$24 sps:$4 sm:$0xff]   ;;  %v20681_v35 = vld [vmem:[%s29049_s3 + $0x3d0] ss:$24 sps:$4 sm:$0xff]  }
 0x726   :  { %16749 = vmatpush1.bf16.msra.mxu0 %v20627_v29  ;;  %v20684_v29 = vld [vmem:[%s29049_s3 + $0xf38] ss:$24 sps:$4 sm:$0xff]  }
 0x727   :  { %16415 = vmatpush1.bf16.msra.mxu1 %v20630_v38  ;;  %16750 = vmatprep.subr.bf16.mxu0 %v20635_v32  ;;  %v20689_v38 = vld [vmem:[%s29049_s3 + $0x404] ss:$24 sps:$4 sm:$0xff]  }
 0x728   :  { %16416 = vmatprep.subr.bf16.mxu1 %v20638_v33  ;;  %v20692_v32 = vld [vmem:[%s29049_s3 + $0xf6c] ss:$24 sps:$4 sm:$0xff]   ;;  %v20687_v33 = vld [vmem:[%s29049_s3 + $0x400] ss:$24 sps:$4 sm:$0xff]  }
 0x72a   :  { %16751 = vmatpush1.bf16.msra.mxu0 %v20633_v7  ;;  %v20690_v7 = vld [vmem:[%s29049_s3 + $0xf68] ss:$24 sps:$4 sm:$0xff]  }
 0x72b   :  { %16417 = vmatpush1.bf16.msra.mxu1 %v20636_v56  ;;  %16752 = vmatprep.subr.bf16.mxu0 %v20641_v2  ;;  %v20695_v56 = vld [vmem:[%s29049_s3 + $0x434] ss:$24 sps:$4 sm:$0xff]  }
 0x72c   :  { %16418 = vmatprep.subr.bf16.mxu1 %v20644_v1  ;;  %v20698_v2 = vld [vmem:[%s29049_s3 + $0xf9c] ss:$24 sps:$4 sm:$0xff]   ;;  %v20693_v1 = vld [vmem:[%s29049_s3 + $0x430] ss:$24 sps:$4 sm:$0xff]  }
 0x72e   :  { %16753 = vmatpush1.bf16.msra.mxu0 %v20639_v57  ;;  %v20696_v57 = vld [vmem:[%s29049_s3 + $0xf98] ss:$24 sps:$4 sm:$0xff]  }
 0x72f   :  { %16419 = vmatpush1.bf16.msra.mxu1 %v20642_v44  ;;  %16754 = vmatprep.subr.bf16.mxu0 %v20647_v19  ;;  %v20701_v44 = vld [vmem:[%s29049_s3 + $0x464] ss:$24 sps:$4 sm:$0xff]  }
 0x730   :  { %16420 = vmatprep.subr.bf16.mxu1 %v20650_v36  ;;  %v20704_v19 = vld [vmem:[%s29049_s3 + $0xfcc] ss:$24 sps:$4 sm:$0xff]   ;;  %v20699_v36 = vld [vmem:[%s29049_s3 + $0x460] ss:$24 sps:$4 sm:$0xff]  }
 0x732   :  { %16755 = vmatpush1.bf16.msra.mxu0 %v20645_v45  ;;  %v20702_v45 = vld [vmem:[%s29049_s3 + $0xfc8] ss:$24 sps:$4 sm:$0xff]  }
 0x733   :  { %16421 = vmatpush1.bf16.msra.mxu1 %v20648_v15  ;;  %16756 = vmatprep.subr.bf16.mxu0 %v20653_v11  ;;  %v20707_v15 = vld [vmem:[%s29049_s3 + $0x494] ss:$24 sps:$4 sm:$0xff]  }
 0x734   :  { %16422 = vmatprep.subr.bf16.mxu1 %v20656_v62  ;;  %v20710_v11 = vld [vmem:[%s29049_s3 + $0xffc] ss:$24 sps:$4 sm:$0xff]   ;;  %v20705_v62 = vld [vmem:[%s29049_s3 + $0x490] ss:$24 sps:$4 sm:$0xff]  }
 0x736   :  { %16757 = vmatpush1.bf16.msra.mxu0 %v20651_v52  ;;  %v20708_v52 = vld [vmem:[%s29049_s3 + $0xff8] ss:$24 sps:$4 sm:$0xff]  }
 0x737   :  { %16423 = vmatpush1.bf16.msra.mxu1 %v20654_v27  ;;  %16767 = vmatprep.subr.bf16.mxu0 %v20659_v63  ;;  %v20713_v27 = vld [vmem:[%s29049_s3 + $0x4c4] ss:$24 sps:$4 sm:$0xff]  }
 0x738   :  { %16424 = vmatprep.subr.bf16.mxu1 %v20662_v39  ;;  %v20716_v63 = vld [vmem:[%s29049_s3 + $0x102c] ss:$24 sps:$4 sm:$0xff]   ;;  %v20711_v39 = vld [vmem:[%s29049_s3 + $0x4c0] ss:$24 sps:$4 sm:$0xff]  }
 0x739   :  { %16759 = vmatmul.mubr.bf16.vlgmr.msra.gmra.mrb[20].mxu0 %v24292_v53  ;;  %v20674_v53 = vld [vmem:[%s29049_s3 + $0xedc] ss:$24 sps:$4 sm:$0xff]  }
 0x73a   :  { %16768 = vmatpush1.bf16.msra.mxu0 %v20657_v59  ;;  %16799 = vmatprep.mubr.bf16.mxu0 %v24301_v28  ;;  %v20669_v28 = vld [vmem:[%s29049_s3 + $0x370] ss:$24 sps:$4 sm:$0xff]  }
 0x73b   :  { %16425 = vmatpush1.bf16.msra.mxu1 %v20660_v24  ;;  %16769 = vmatprep.subr.bf16.mxu0 %v20665_v18  ;;  %v20714_v59 = vld [vmem:[%s29049_s3 + $0x1028] ss:$24 sps:$4 sm:$0xff]   ;;  %v20719_v24 = vld [vmem:[%s29049_s3 + $0x4f4] ss:$24 sps:$4 sm:$0xff]  }
 0x73c   :  { %16426 = vmatprep.subr.bf16.mxu1 %v20668_v5  ;;  %v20722_v18 = vld [vmem:[%s29049_s3 + $0x105c] ss:$24 sps:$4 sm:$0xff]   ;;  %v20717_v5 = vld [vmem:[%s29049_s3 + $0x4f0] ss:$24 sps:$4 sm:$0xff]  }
 0x73e   :  { %16770 = vmatpush1.bf16.msra.mxu0 %v20663_v6  ;;  %v20720_v6 = vld [vmem:[%s29049_s3 + $0x1058] ss:$24 sps:$4 sm:$0xff]  }
 0x73f   :  { %16427 = vmatpush1.bf16.msra.mxu1 %v20666_v26  ;;  %16771 = vmatprep.subr.bf16.mxu0 %v20671_v21  ;;  %v20725_v26 = vld [vmem:[%s29049_s3 + $0x524] ss:$24 sps:$4 sm:$0xff]  }
 0x740   :  { %16428 = vmatprep.subr.bf16.mxu1 %v20674_v53  ;;  %v20728_v21 = vld [vmem:[%s29049_s3 + $0x108c] ss:$24 sps:$4 sm:$0xff]   ;;  %v20723_v53 = vld [vmem:[%s29049_s3 + $0x520] ss:$24 sps:$4 sm:$0xff]  }
 0x742   :  { %16772 = vmatpush1.bf16.msra.mxu0 %v20669_v28  ;;  %v20726_v28 = vld [vmem:[%s29049_s3 + $0x1088] ss:$24 sps:$4 sm:$0xff]  }
 0x743   :  { %16429 = vmatpush1.bf16.msra.mxu1 %v20672_v41  ;;  %16773 = vmatprep.subr.bf16.mxu0 %v20677_v25  ;;  %v20731_v41 = vld [vmem:[%s29049_s3 + $0x554] ss:$24 sps:$4 sm:$0xff]  }
 0x744   :  { %16439 = vmatprep.subr.bf16.mxu1 %v20680_v49  ;;  %v20734_v25 = vld [vmem:[%s29049_s3 + $0x10bc] ss:$24 sps:$4 sm:$0xff]   ;;  %v20729_v49 = vld [vmem:[%s29049_s3 + $0x550] ss:$24 sps:$4 sm:$0xff]  }
 0x746   :  { %16774 = vmatpush1.bf16.msra.mxu0 %v20675_v23  ;;  %16431 = vmatmul.mubr.bf16.vlgmr.msra.gmra.mrb[32].mxu1 %v25196_v10  ;;  %v20732_v23 = vld [vmem:[%s29049_s3 + $0x10b8] ss:$24 sps:$4 sm:$0xff]  }
 0x747   :  { %16440 = vmatpush1.bf16.msra.mxu1 %v20678_v30  ;;  %16471 = vmatprep.mubr.bf16.mxu1 %v25480_v34  ;;  %v20737_v30 = vld [vmem:[%s29049_s3 + $0x584] ss:$24 sps:$4 sm:$0xff]  }
 0x748   :  { %16775 = vmatprep.subr.bf16.mxu0 %v20683_v12  ;;  %16441 = vmatprep.subr.bf16.mxu1 %v20686_v22  ;;  %v20740_v12 = vld [vmem:[%s29049_s3 + $0x10ec] ss:$24 sps:$4 sm:$0xff]   ;;  %v20735_v22 = vld [vmem:[%s29049_s3 + $0x580] ss:$24 sps:$4 sm:$0xff]  }
 0x74a   :  { %16776 = vmatpush1.bf16.msra.mxu0 %v20681_v35  ;;  %v20738_v35 = vld [vmem:[%s29049_s3 + $0x10e8] ss:$24 sps:$4 sm:$0xff]  }
 0x74b   :  { %16442 = vmatpush1.bf16.msra.mxu1 %v20684_v29  ;;  %16777 = vmatprep.subr.bf16.mxu0 %v20689_v38  ;;  %v20743_v29 = vld [vmem:[%s29049_s3 + $0x5b4] ss:$24 sps:$4 sm:$0xff]  }
 0x74c   :  { %16443 = vmatprep.subr.bf16.mxu1 %v20692_v32  ;;  %v20746_v38 = vld [vmem:[%s29049_s3 + $0x111c] ss:$24 sps:$4 sm:$0xff]   ;;  %v20741_v32 = vld [vmem:[%s29049_s3 + $0x5b0] ss:$24 sps:$4 sm:$0xff]  }
 0x74e   :  { %16778 = vmatpush1.bf16.msra.mxu0 %v20687_v33  ;;  %v20744_v33 = vld [vmem:[%s29049_s3 + $0x1118] ss:$24 sps:$4 sm:$0xff]  }
 0x74f   :  { %16444 = vmatpush1.bf16.msra.mxu1 %v20690_v7  ;;  %16779 = vmatprep.subr.bf16.mxu0 %v20695_v56  ;;  %v20749_v7 = vld [vmem:[%s29049_s3 + $0x5e4] ss:$24 sps:$4 sm:$0xff]  }
 0x750   :  { %16445 = vmatprep.subr.bf16.mxu1 %v20698_v2  ;;  %v20752_v56 = vld [vmem:[%s29049_s3 + $0x114c] ss:$24 sps:$4 sm:$0xff]   ;;  %v20747_v2 = vld [vmem:[%s29049_s3 + $0x5e0] ss:$24 sps:$4 sm:$0xff]  }
 0x752   :  { %16780 = vmatpush1.bf16.msra.mxu0 %v20693_v1  ;;  %v20750_v1 = vld [vmem:[%s29049_s3 + $0x1148] ss:$24 sps:$4 sm:$0xff]  }
 0x753   :  { %16446 = vmatpush1.bf16.msra.mxu1 %v20696_v57  ;;  %16781 = vmatprep.subr.bf16.mxu0 %v20701_v44  ;;  %v20755_v57 = vld [vmem:[%s29049_s3 + $0x614] ss:$24 sps:$4 sm:$0xff]  }
 0x754   :  { %16447 = vmatprep.subr.bf16.mxu1 %v20704_v19  ;;  %v20758_v44 = vld [vmem:[%s29049_s3 + $0x117c] ss:$24 sps:$4 sm:$0xff]   ;;  %v20753_v19 = vld [vmem:[%s29049_s3 + $0x610] ss:$24 sps:$4 sm:$0xff]  }
 0x756   :  { %16782 = vmatpush1.bf16.msra.mxu0 %v20699_v36  ;;  %v20756_v36 = vld [vmem:[%s29049_s3 + $0x1178] ss:$24 sps:$4 sm:$0xff]  }
 0x757   :  { %16448 = vmatpush1.bf16.msra.mxu1 %v20702_v45  ;;  %16783 = vmatprep.subr.bf16.mxu0 %v20707_v15  ;;  %v20761_v45 = vld [vmem:[%s29049_s3 + $0x644] ss:$24 sps:$4 sm:$0xff]  }
 0x758   :  { %16449 = vmatprep.subr.bf16.mxu1 %v20710_v11  ;;  %v20764_v15 = vld [vmem:[%s29049_s3 + $0x11ac] ss:$24 sps:$4 sm:$0xff]   ;;  %v20759_v11 = vld [vmem:[%s29049_s3 + $0x640] ss:$24 sps:$4 sm:$0xff]  }
 0x75a   :  { %16784 = vmatpush1.bf16.msra.mxu0 %v20705_v62  ;;  %v20762_v62 = vld [vmem:[%s29049_s3 + $0x11a8] ss:$24 sps:$4 sm:$0xff]  }
 0x75b   :  { %16450 = vmatpush1.bf16.msra.mxu1 %v20708_v52  ;;  %16785 = vmatprep.subr.bf16.mxu0 %v20713_v27  ;;  %v20767_v52 = vld [vmem:[%s29049_s3 + $0x674] ss:$24 sps:$4 sm:$0xff]   ;;  %v20768_v27 = vld [vmem:[%s29049_s3 + $0x11d8] ss:$24 sps:$4 sm:$0xff]  }
 0x75c   :  { %16451 = vmatprep.subr.bf16.mxu1 %v20716_v63  ;;  %v20773_v63 = vld [vmem:[%s29049_s3 + $0x6a4] ss:$24 sps:$4 sm:$0xff]  }
 0x75e   :  { %16786 = vmatpush1.bf16.msra.mxu0 %v20711_v39  ;;  %v20776_v39 = vld [vmem:[%s29049_s3 + $0x120c] ss:$24 sps:$4 sm:$0xff]  }
 0x75f   :  { %16452 = vmatpush1.bf16.msra.mxu1 %v20714_v59  ;;  %16787 = vmatprep.subr.bf16.mxu0 %v20719_v24  ;;  %v20771_v59 = vld [vmem:[%s29049_s3 + $0x6a0] ss:$24 sps:$4 sm:$0xff]  }
 0x760   :  { %16453 = vmatprep.subr.bf16.mxu1 %v20722_v18  ;;  %v20774_v24 = vld [vmem:[%s29049_s3 + $0x1208] ss:$24 sps:$4 sm:$0xff]   ;;  %v20779_v18 = vld [vmem:[%s29049_s3 + $0x6d4] ss:$24 sps:$4 sm:$0xff]  }
 0x762   :  { %16788 = vmatpush1.bf16.msra.mxu0 %v20717_v5  ;;  %v20782_v5 = vld [vmem:[%s29049_s3 + $0x123c] ss:$24 sps:$4 sm:$0xff]  }
 0x763   :  { %16454 = vmatpush1.bf16.msra.mxu1 %v20720_v6  ;;  %16789 = vmatprep.subr.bf16.mxu0 %v20725_v26  ;;  %v20777_v6 = vld [vmem:[%s29049_s3 + $0x6d0] ss:$24 sps:$4 sm:$0xff]  }
 0x764   :  { %16455 = vmatprep.subr.bf16.mxu1 %v20728_v21  ;;  %v20780_v26 = vld [vmem:[%s29049_s3 + $0x1238] ss:$24 sps:$4 sm:$0xff]   ;;  %v20785_v21 = vld [vmem:[%s29049_s3 + $0x704] ss:$24 sps:$4 sm:$0xff]  }
 0x766   :  { %16790 = vmatpush1.bf16.msra.mxu0 %v20723_v53  ;;  %v20788_v53 = vld [vmem:[%s29049_s3 + $0x126c] ss:$24 sps:$4 sm:$0xff]  }
 0x767   :  { %16456 = vmatpush1.bf16.msra.mxu1 %v20726_v28  ;;  %16791 = vmatprep.subr.bf16.mxu0 %v20731_v41  ;;  %v20783_v28 = vld [vmem:[%s29049_s3 + $0x700] ss:$24 sps:$4 sm:$0xff]  }
 0x768   :  { %16457 = vmatprep.subr.bf16.mxu1 %v20734_v25  ;;  %v20786_v41 = vld [vmem:[%s29049_s3 + $0x1268] ss:$24 sps:$4 sm:$0xff]   ;;  %v20791_v25 = vld [vmem:[%s29049_s3 + $0x734] ss:$24 sps:$4 sm:$0xff]  }
 0x76a   :  { %16792 = vmatpush1.bf16.msra.mxu0 %v20729_v49  ;;  %v20794_v49 = vld [vmem:[%s29049_s3 + $0x129c] ss:$24 sps:$4 sm:$0xff]  }
 0x76b   :  { %16458 = vmatpush1.bf16.msra.mxu1 %v20732_v23  ;;  %16793 = vmatprep.subr.bf16.mxu0 %v20737_v30  ;;  %v20789_v23 = vld [vmem:[%s29049_s3 + $0x730] ss:$24 sps:$4 sm:$0xff]  }
 0x76c   :  { %16459 = vmatprep.subr.bf16.mxu1 %v20740_v12  ;;  %v20792_v30 = vld [vmem:[%s29049_s3 + $0x1298] ss:$24 sps:$4 sm:$0xff]   ;;  %v20797_v12 = vld [vmem:[%s29049_s3 + $0x764] ss:$24 sps:$4 sm:$0xff]  }
 0x76e   :  { %16794 = vmatpush1.bf16.msra.mxu0 %v20735_v22  ;;  %v20800_v22 = vld [vmem:[%s29049_s3 + $0x12cc] ss:$24 sps:$4 sm:$0xff]  }
 0x76f   :  { %16460 = vmatpush1.bf16.msra.mxu1 %v20738_v35  ;;  %16795 = vmatprep.subr.bf16.mxu0 %v20743_v29  ;;  %v20795_v35 = vld [vmem:[%s29049_s3 + $0x760] ss:$24 sps:$4 sm:$0xff]  }
 0x770   :  { %16461 = vmatprep.subr.bf16.mxu1 %v20746_v38  ;;  %v20798_v29 = vld [vmem:[%s29049_s3 + $0x12c8] ss:$24 sps:$4 sm:$0xff]   ;;  %v20803_v38 = vld [vmem:[%s29049_s3 + $0x794] ss:$24 sps:$4 sm:$0xff]  }
 0x772   :  { %16796 = vmatpush1.bf16.msra.mxu0 %v20741_v32  ;;  %v20806_v32 = vld [vmem:[%s29049_s3 + $0x12fc] ss:$24 sps:$4 sm:$0xff]  }
 0x773   :  { %16462 = vmatpush1.bf16.msra.mxu1 %v20744_v33  ;;  %16797 = vmatprep.subr.bf16.mxu0 %v20749_v7  ;;  %v20801_v33 = vld [vmem:[%s29049_s3 + $0x790] ss:$24 sps:$4 sm:$0xff]  }
 0x774   :  { %16463 = vmatprep.subr.bf16.mxu1 %v20752_v56  ;;  %v20804_v7 = vld [vmem:[%s29049_s3 + $0x12f8] ss:$24 sps:$4 sm:$0xff]   ;;  %v20809_v56 = vld [vmem:[%s29049_s3 + $0x7c4] ss:$24 sps:$4 sm:$0xff]  }
 0x776   :  { %16798 = vmatpush1.bf16.msra.mxu0 %v20747_v2  ;;  %v20812_v2 = vld [vmem:[%s29049_s3 + $0x132c] ss:$24 sps:$4 sm:$0xff]  }
 0x777   :  { %16464 = vmatpush1.bf16.msra.mxu1 %v20750_v1  ;;  %16808 = vmatprep.subr.bf16.mxu0 %v20755_v57  ;;  %v20807_v1 = vld [vmem:[%s29049_s3 + $0x7c0] ss:$24 sps:$4 sm:$0xff]  }
 0x778   :  { %16465 = vmatprep.subr.bf16.mxu1 %v20758_v44  ;;  %v20810_v57 = vld [vmem:[%s29049_s3 + $0x1328] ss:$24 sps:$4 sm:$0xff]   ;;  %v20815_v44 = vld [vmem:[%s29049_s3 + $0x7f4] ss:$24 sps:$4 sm:$0xff]  }
 0x779   :  { %16800 = vmatmul.mubr.bf16.vlgmr.msra.gmra.mrb[20].mxu0 %v24529_v17  ;;  %v20770_v17 = vld [vmem:[%s29049_s3 + $0x11dc] ss:$24 sps:$4 sm:$0xff]  }
 0x77a   :  { %16809 = vmatpush1.bf16.msra.mxu0 %v20753_v19  ;;  %16840 = vmatprep.mubr.bf16.mxu0 %v24532_v20  ;;  %v20765_v20 = vld [vmem:[%s29049_s3 + $0x670] ss:$24 sps:$4 sm:$0xff]   ;;  %v20818_v19 = vld [vmem:[%s29049_s3 + $0x135c] ss:$24 sps:$4 sm:$0xff]  }
 0x77b   :  { %16466 = vmatpush1.bf16.msra.mxu1 %v20756_v36  ;;  %16810 = vmatprep.subr.bf16.mxu0 %v20761_v45  ;;  %v20813_v36 = vld [vmem:[%s29049_s3 + $0x7f0] ss:$24 sps:$4 sm:$0xff]  }
 0x77c   :  { %16467 = vmatprep.subr.bf16.mxu1 %v20764_v15  ;;  %v20816_v45 = vld [vmem:[%s29049_s3 + $0x1358] ss:$24 sps:$4 sm:$0xff]   ;;  %v20821_v15 = vld [vmem:[%s29049_s3 + $0x824] ss:$24 sps:$4 sm:$0xff]  }
 0x77e   :  { %16811 = vmatpush1.bf16.msra.mxu0 %v20759_v11  ;;  %v20824_v11 = vld [vmem:[%s29049_s3 + $0x138c] ss:$24 sps:$4 sm:$0xff]  }
 0x77f   :  { %16468 = vmatpush1.bf16.msra.mxu1 %v20762_v62  ;;  %16812 = vmatprep.subr.bf16.mxu0 %v20767_v52  ;;  %v20819_v62 = vld [vmem:[%s29049_s3 + $0x820] ss:$24 sps:$4 sm:$0xff]  }
 0x780   :  { %16469 = vmatprep.subr.bf16.mxu1 %v20770_v17  ;;  %v20822_v52 = vld [vmem:[%s29049_s3 + $0x1388] ss:$24 sps:$4 sm:$0xff]   ;;  %v20827_v17 = vld [vmem:[%s29049_s3 + $0x854] ss:$24 sps:$4 sm:$0xff]  }
 0x782   :  { %16813 = vmatpush1.bf16.msra.mxu0 %v20765_v20  ;;  %v20830_v20 = vld [vmem:[%s29049_s3 + $0x13bc] ss:$24 sps:$4 sm:$0xff]  }
 0x783   :  { %16470 = vmatpush1.bf16.msra.mxu1 %v20768_v27  ;;  %16814 = vmatprep.subr.bf16.mxu0 %v20773_v63  ;;  %v20825_v27 = vld [vmem:[%s29049_s3 + $0x850] ss:$24 sps:$4 sm:$0xff]  }
 0x784   :  { %16480 = vmatprep.subr.bf16.mxu1 %v20776_v39  ;;  %v20828_v63 = vld [vmem:[%s29049_s3 + $0x13b8] ss:$24 sps:$4 sm:$0xff]   ;;  %v20833_v39 = vld [vmem:[%s29049_s3 + $0x884] ss:$24 sps:$4 sm:$0xff]  }
 0x786   :  { %16815 = vmatpush1.bf16.msra.mxu0 %v20771_v59  ;;  %16472 = vmatmul.mubr.bf16.vlgmr.msra.gmra.mrb[32].mxu1 %v25485_v37  ;;  %v20836_v59 = vld [vmem:[%s29049_s3 + $0x13ec] ss:$24 sps:$4 sm:$0xff]  }
 0x787   :  { %16481 = vmatpush1.bf16.msra.mxu1 %v20774_v24  ;;  %16512 = vmatprep.mubr.bf16.mxu1 %v25491_v42  ;;  %v20831_v24 = vld [vmem:[%s29049_s3 + $0x880] ss:$24 sps:$4 sm:$0xff]  }
 0x788   :  { %16816 = vmatprep.subr.bf16.mxu0 %v20779_v18  ;;  %16482 = vmatprep.subr.bf16.mxu1 %v20782_v5  ;;  %v20834_v18 = vld [vmem:[%s29049_s3 + $0x13e8] ss:$24 sps:$4 sm:$0xff]   ;;  %v20839_v5 = vld [vmem:[%s29049_s3 + $0x8b4] ss:$24 sps:$4 sm:$0xff]  }
 0x78a   :  { %16817 = vmatpush1.bf16.msra.mxu0 %v20777_v6  ;;  %v20842_v6 = vld [vmem:[%s29049_s3 + $0x141c] ss:$24 sps:$4 sm:$0xff]  }
 0x78b   :  { %16483 = vmatpush1.bf16.msra.mxu1 %v20780_v26  ;;  %16818 = vmatprep.subr.bf16.mxu0 %v20785_v21  ;;  %v20837_v26 = vld [vmem:[%s29049_s3 + $0x8b0] ss:$24 sps:$4 sm:$0xff]  }
 0x78c   :  { %16484 = vmatprep.subr.bf16.mxu1 %v20788_v53  ;;  %v20840_v21 = vld [vmem:[%s29049_s3 + $0x1418] ss:$24 sps:$4 sm:$0xff]   ;;  %v20845_v53 = vld [vmem:[%s29049_s3 + $0x8e4] ss:$24 sps:$4 sm:$0xff]  }
 0x78e   :  { %16819 = vmatpush1.bf16.msra.mxu0 %v20783_v28  ;;  %v20848_v28 = vld [vmem:[%s29049_s3 + $0x144c] ss:$24 sps:$4 sm:$0xff]  }
 0x78f   :  { %16485 = vmatpush1.bf16.msra.mxu1 %v20786_v41  ;;  %16820 = vmatprep.subr.bf16.mxu0 %v20791_v25  ;;  %v20843_v41 = vld [vmem:[%s29049_s3 + $0x8e0] ss:$24 sps:$4 sm:$0xff]  }
 0x790   :  { %16486 = vmatprep.subr.bf16.mxu1 %v20794_v49  ;;  %v20846_v25 = vld [vmem:[%s29049_s3 + $0x1448] ss:$24 sps:$4 sm:$0xff]   ;;  %v20851_v49 = vld [vmem:[%s29049_s3 + $0x914] ss:$24 sps:$4 sm:$0xff]  }
 0x792   :  { %16821 = vmatpush1.bf16.msra.mxu0 %v20789_v23  ;;  %v20854_v23 = vld [vmem:[%s29049_s3 + $0x147c] ss:$24 sps:$4 sm:$0xff]  }
 0x793   :  { %16487 = vmatpush1.bf16.msra.mxu1 %v20792_v30  ;;  %16822 = vmatprep.subr.bf16.mxu0 %v20797_v12  ;;  %v20849_v30 = vld [vmem:[%s29049_s3 + $0x910] ss:$24 sps:$4 sm:$0xff]  }
 0x794   :  { %16488 = vmatprep.subr.bf16.mxu1 %v20800_v22  ;;  %v20852_v12 = vld [vmem:[%s29049_s3 + $0x1478] ss:$24 sps:$4 sm:$0xff]   ;;  %v20857_v22 = vld [vmem:[%s29049_s3 + $0x944] ss:$24 sps:$4 sm:$0xff]  }
 0x796   :  { %16823 = vmatpush1.bf16.msra.mxu0 %v20795_v35  ;;  %v20860_v35 = vld [vmem:[%s29049_s3 + $0x14ac] ss:$24 sps:$4 sm:$0xff]  }
 0x797   :  { %16489 = vmatpush1.bf16.msra.mxu1 %v20798_v29  ;;  %16824 = vmatprep.subr.bf16.mxu0 %v20803_v38  ;;  %v20855_v29 = vld [vmem:[%s29049_s3 + $0x940] ss:$24 sps:$4 sm:$0xff]  }
 0x798   :  { %16490 = vmatprep.subr.bf16.mxu1 %v20806_v32  ;;  %v20858_v38 = vld [vmem:[%s29049_s3 + $0x14a8] ss:$24 sps:$4 sm:$0xff]   ;;  %v20863_v32 = vld [vmem:[%s29049_s3 + $0x974] ss:$24 sps:$4 sm:$0xff]  }
 0x79a   :  { %16825 = vmatpush1.bf16.msra.mxu0 %v20801_v33  ;;  %v20864_v33 = vld [vmem:[%s29049_s3 + $0x14d8] ss:$24 sps:$4 sm:$0xff]  }
 0x79b   :  { %16491 = vmatpush1.bf16.msra.mxu1 %v20804_v7  ;;  %16826 = vmatprep.subr.bf16.mxu0 %v20809_v56  ;;  %v20869_v7 = vld [vmem:[%s29049_s3 + $0x9a4] ss:$24 sps:$4 sm:$0xff]  }
 0x79c   :  { %16492 = vmatprep.subr.bf16.mxu1 %v20812_v2  ;;  %v20872_v56 = vld [vmem:[%s29049_s3 + $0x150c] ss:$24 sps:$4 sm:$0xff]   ;;  %v20867_v2 = vld [vmem:[%s29049_s3 + $0x9a0] ss:$24 sps:$4 sm:$0xff]  }
 0x79e   :  { %16827 = vmatpush1.bf16.msra.mxu0 %v20807_v1  ;;  %v20870_v1 = vld [vmem:[%s29049_s3 + $0x1508] ss:$24 sps:$4 sm:$0xff]  }
 0x79f   :  { %16493 = vmatpush1.bf16.msra.mxu1 %v20810_v57  ;;  %16828 = vmatprep.subr.bf16.mxu0 %v20815_v44  ;;  %v20875_v57 = vld [vmem:[%s29049_s3 + $0x9d4] ss:$24 sps:$4 sm:$0xff]  }
 0x7a0   :  { %16494 = vmatprep.subr.bf16.mxu1 %v20818_v19  ;;  %v20878_v44 = vld [vmem:[%s29049_s3 + $0x153c] ss:$24 sps:$4 sm:$0xff]   ;;  %v20873_v19 = vld [vmem:[%s29049_s3 + $0x9d0] ss:$24 sps:$4 sm:$0xff]  }
 0x7a2   :  { %16829 = vmatpush1.bf16.msra.mxu0 %v20813_v36  ;;  %v9950_v36 = vld [vmem:[%s29051_s4] sm:$0x3f] }
 0x7a3   :  { %16495 = vmatpush1.bf16.msra.mxu1 %v20816_v45  ;;  %16830 = vmatprep.subr.bf16.mxu0 %v20821_v15  ;;  %v20876_v45 = vld [vmem:[%s29049_s3 + $0x1538] ss:$24 sps:$4 sm:$0xff]   ;;  %v20881_v15 = vld [vmem:[%s29049_s3 + $0xa04] ss:$24 sps:$4 sm:$0xff]  }
 0x7a4   :  { %16496 = vmatprep.subr.bf16.mxu1 %v20824_v11  ;;  %v20884_v11 = vld [vmem:[%s29049_s3 + $0x156c] ss:$24 sps:$4 sm:$0xff]  }
 0x7a6   :  { %16831 = vmatpush1.bf16.msra.mxu0 %v20819_v62  ;;  %v9955_v62 = vrot.slane %v9950_v36, %v24094_v47  ;;  %v20890_v47 = vld [vmem:[%s29049_s3 + $0x159c] ss:$24 sps:$4 sm:$0xff]  }
 0x7a7   :  { %16497 = vmatpush1.bf16.msra.mxu1 %v20822_v52  ;;  %16832 = vmatprep.subr.bf16.mxu0 %v20827_v17  ;;  %v20879_v52 = vld [vmem:[%s29049_s3 + $0xa00] ss:$24 sps:$4 sm:$0xff]   ;;  %v9959_v17 = vrot.slane %v9950_v36, %v23904_v13  ;;  %v20932_v36 = vld [vmem:[%s29049_s3 + $0x16ec] ss:$24 sps:$4 sm:$0xff]  }
 0x7a8   :  { %16498 = vmatprep.subr.bf16.mxu1 %v20830_v20  ;;  %v20882_v20 = vld [vmem:[%s29049_s3 + $0x1568] ss:$24 sps:$4 sm:$0xff]  }
 0x7aa   :  { %16833 = vmatpush1.bf16.msra.mxu0 %v20825_v27  ;;  %v20887_v27 = vld [vmem:[%s29049_s3 + $0xa34] ss:$24 sps:$4 sm:$0xff]  }
 0x7ab   :  { %16499 = vmatpush1.bf16.msra.mxu1 %v20828_v63  ;;  %16834 = vmatprep.subr.bf16.mxu0 %v20833_v39 }
 0x7ac   :  { %16500 = vmatprep.subr.bf16.mxu1 %v20836_v59 }
 0x7ae   :  { %16835 = vmatpush1.bf16.msra.mxu0 %v20831_v24 }
 0x7af   :  { %16501 = vmatpush1.bf16.msra.mxu1 %v20834_v18  ;;  %16836 = vmatprep.subr.bf16.mxu0 %v20839_v5  ;;  %v20885_v18 = vld [vmem:[%s29049_s3 + $0xa30] ss:$24 sps:$4 sm:$0xff]  }
 0x7b0   :  { %16502 = vmatprep.subr.bf16.mxu1 %v20842_v6  ;;  %v20888_v6 = vld [vmem:[%s29049_s3 + $0x1598] ss:$24 sps:$4 sm:$0xff]  }
 0x7b2   :  { %16837 = vmatpush1.bf16.msra.mxu0 %v20837_v26  ;;  %v20893_v26 = vld [vmem:[%s29049_s3 + $0xa64] ss:$24 sps:$4 sm:$0xff]  }
 0x7b3   :  { %16503 = vmatpush1.bf16.msra.mxu1 %v20840_v21  ;;  %16838 = vmatprep.subr.bf16.mxu0 %v20845_v53  ;;  %v20896_v21 = vld [vmem:[%s29049_s3 + $0x15cc] ss:$24 sps:$4 sm:$0xff]   ;;  %v20891_v53 = vld [vmem:[%s29049_s3 + $0xa60] ss:$24 sps:$4 sm:$0xff]  }
 0x7b4   :  { %16504 = vmatprep.subr.bf16.mxu1 %v20848_v28  ;;  %v20894_v28 = vld [vmem:[%s29049_s3 + $0x15c8] ss:$24 sps:$4 sm:$0xff]  }
 0x7b6   :  { %16839 = vmatpush1.bf16.msra.mxu0 %v20843_v41  ;;  %v20899_v41 = vld [vmem:[%s29049_s3 + $0xa94] ss:$24 sps:$4 sm:$0xff]  }
 0x7b7   :  { %16505 = vmatpush1.bf16.msra.mxu1 %v20846_v25  ;;  %16849 = vmatprep.subr.bf16.mxu0 %v20851_v49  ;;  %v20902_v25 = vld [vmem:[%s29049_s3 + $0x15fc] ss:$24 sps:$4 sm:$0xff]   ;;  %v20897_v49 = vld [vmem:[%s29049_s3 + $0xa90] ss:$24 sps:$4 sm:$0xff]  }
 0x7b8   :  { %16506 = vmatprep.subr.bf16.mxu1 %v20854_v23  ;;  %v20900_v23 = vld [vmem:[%s29049_s3 + $0x15f8] ss:$24 sps:$4 sm:$0xff]  }
 0x7b9   :  { %16841 = vmatmul.mubr.bf16.vlgmr.msra.gmra.mrb[20].mxu0 %v24742_v3  ;;  %v20866_v3 = vld [vmem:[%s29049_s3 + $0x14dc] ss:$24 sps:$4 sm:$0xff]  }
 0x7ba   :  { %16850 = vmatpush1.bf16.msra.mxu0 %v20849_v30  ;;  %16881 = vmatprep.mubr.bf16.mxu0 %v24933_v51  ;;  %v20861_v51 = vld [vmem:[%s29049_s3 + $0x970] ss:$24 sps:$4 sm:$0xff]   ;;  %v20905_v30 = vld [vmem:[%s29049_s3 + $0xac4] ss:$24 sps:$4 sm:$0xff]  }
 0x7bb   :  { %16507 = vmatpush1.bf16.msra.mxu1 %v20852_v12  ;;  %16851 = vmatprep.subr.bf16.mxu0 %v20857_v22  ;;  %v20908_v12 = vld [vmem:[%s29049_s3 + $0x162c] ss:$24 sps:$4 sm:$0xff]   ;;  %v20903_v22 = vld [vmem:[%s29049_s3 + $0xac0] ss:$24 sps:$4 sm:$0xff]  }
 0x7bc   :  { %16508 = vmatprep.subr.bf16.mxu1 %v20860_v35  ;;  %v20906_v35 = vld [vmem:[%s29049_s3 + $0x1628] ss:$24 sps:$4 sm:$0xff]  }
 0x7be   :  { %16852 = vmatpush1.bf16.msra.mxu0 %v20855_v29  ;;  %v20911_v29 = vld [vmem:[%s29049_s3 + $0xaf4] ss:$24 sps:$4 sm:$0xff]  }
 0x7bf   :  { %16509 = vmatpush1.bf16.msra.mxu1 %v20858_v38  ;;  %16853 = vmatprep.subr.bf16.mxu0 %v20863_v32  ;;  %v20914_v38 = vld [vmem:[%s29049_s3 + $0x165c] ss:$24 sps:$4 sm:$0xff]   ;;  %v20909_v32 = vld [vmem:[%s29049_s3 + $0xaf0] ss:$24 sps:$4 sm:$0xff]  }
 0x7c0   :  { %16510 = vmatprep.subr.bf16.mxu1 %v20866_v3  ;;  %v20912_v3 = vld [vmem:[%s29049_s3 + $0x1658] ss:$24 sps:$4 sm:$0xff]  }
 0x7c2   :  { %16854 = vmatpush1.bf16.msra.mxu0 %v20861_v51  ;;  %v20917_v51 = vld [vmem:[%s29049_s3 + $0xb24] ss:$24 sps:$4 sm:$0xff]  }
 0x7c3   :  { %16511 = vmatpush1.bf16.msra.mxu1 %v20864_v33  ;;  %16855 = vmatprep.subr.bf16.mxu0 %v20869_v7  ;;  %v20920_v33 = vld [vmem:[%s29049_s3 + $0x168c] ss:$24 sps:$4 sm:$0xff]   ;;  %v20915_v7 = vld [vmem:[%s29049_s3 + $0xb20] ss:$24 sps:$4 sm:$0xff]  }
 0x7c4   :  { %16521 = vmatprep.subr.bf16.mxu1 %v20872_v56  ;;  %v20918_v56 = vld [vmem:[%s29049_s3 + $0x1688] ss:$24 sps:$4 sm:$0xff]  }
 0x7c6   :  { %16856 = vmatpush1.bf16.msra.mxu0 %v20867_v2  ;;  %16513 = vmatmul.mubr.bf16.vlgmr.msra.gmra.mrb[32].mxu1 %v25696_v55  ;;  %v20923_v2 = vld [vmem:[%s29049_s3 + $0xb54] ss:$24 sps:$4 sm:$0xff]  }
 0x7c7   :  { %16522 = vmatpush1.bf16.msra.mxu1 %v20870_v1  ;;  %16553 = vmatprep.mubr.bf16.mxu1 %v26008_v0  ;;  %v20926_v1 = vld [vmem:[%s29049_s3 + $0x16bc] ss:$24 sps:$4 sm:$0xff]  }
 0x7c8   :  { %16857 = vmatprep.subr.bf16.mxu0 %v20875_v57  ;;  %16523 = vmatprep.subr.bf16.mxu1 %v20878_v44  ;;  %v20921_v57 = vld [vmem:[%s29049_s3 + $0xb50] ss:$24 sps:$4 sm:$0xff]  }
 0x7c9   :  { %v20924_v44 = vld [vmem:[%s29049_s3 + $0x16b8] ss:$24 sps:$4 sm:$0xff]  }
 0x7ca   :  { %16858 = vmatpush1.bf16.msra.mxu0 %v20873_v19  ;;  %v20929_v19 = vld [vmem:[%s29049_s3 + $0xb84] ss:$24 sps:$4 sm:$0xff]  }
 0x7cb   :  { %16524 = vmatpush1.bf16.msra.mxu1 %v20876_v45  ;;  %16859 = vmatprep.subr.bf16.mxu0 %v20881_v15  ;;  %v20927_v45 = vld [vmem:[%s29049_s3 + $0xb80] ss:$24 sps:$4 sm:$0xff]  }
 0x7cc   :  { %v16227_v63 = vpop.f32.mrb[16].mxu0  ;;  %16525 = vmatprep.subr.bf16.mxu1 %v20884_v11  ;;  %v20930_v15 = vld [vmem:[%s29049_s3 + $0x16e8] ss:$24 sps:$4 sm:$0xff]   ;;  %v20935_v11 = vld [vmem:[%s29049_s3 + $0xbb4] ss:$24 sps:$4 sm:$0xff]  }
 0x7cd   :  { %v19562_v39 = vadd.f32 %v16227_v63, %v9955_v62  ;;  %v16229_v59 = vpop.f32.mrb[17].mxu0  ;;  %v20938_v62 = vld [vmem:[%s29049_s3 + $0x171c] ss:$24 sps:$4 sm:$0xff]   ;;  %v20939_v63 = vld [vmem:[%s29049_s3 + $0xbe0] ss:$24 sps:$4 sm:$0xff]  }
 0x7ce   :  { %v19563_v24 = vadd.f32 %v16229_v59, %v9959_v17  ;;  %16860 = vmatpush1.bf16.msra.mxu0 %v20879_v52  ;;  %v16231_v13 = vpop.f32.mrb[18].mxu0  ;;  %v20933_v52 = vld [vmem:[%s29049_s3 + $0xbb0] ss:$24 sps:$4 sm:$0xff]   ;;  %v20950_v59 = vld [vmem:[%s29049_s3 + $0x177c] ss:$24 sps:$4 sm:$0xff]  }
 0x7cf   :  { %17218 = vst [vmem:[%s29052_s5] sm:$0xff] %v19562_v39  ;;  %v16232_v5 = vpop.f32.mrb[19].mxu0  ;;  %16526 = vmatpush1.bf16.msra.mxu1 %v20882_v20  ;;  %16861 = vmatprep.subr.bf16.mxu0 %v20887_v27  ;;  %v20936_v17 = vld [vmem:[%s29049_s3 + $0x1718] ss:$24 sps:$4 sm:$0xff]   ;;  %v20941_v20 = vld [vmem:[%s29049_s3 + $0xbe4] ss:$24 sps:$4 sm:$0xff]  }
 0x7d0   :  { %17219 = vst [vmem:[%s29052_s5 + $0x8] sm:$0xff] %v19563_v24  ;;  %16527 = vmatprep.subr.bf16.mxu1 %v20890_v47  ;;  %v20944_v27 = vld [vmem:[%s29049_s3 + $0x174c] ss:$24 sps:$4 sm:$0xff]   ;;  %v20942_v47 = vld [vmem:[%s29049_s3 + $0x1748] ss:$24 sps:$4 sm:$0xff]  }
 0x7d1   :  { %v20947_v39 = vld [vmem:[%s29049_s3 + $0xc14] ss:$24 sps:$4 sm:$0xff]   ;;  %v20945_v24 = vld [vmem:[%s29049_s3 + $0xc10] ss:$24 sps:$4 sm:$0xff]  }
 0x7d2   :  { %16862 = vmatpush1.bf16.msra.mxu0 %v20885_v18  ;;  %v20948_v13 = vld [vmem:[%s29049_s3 + $0x1778] ss:$24 sps:$4 sm:$0xff]   ;;  %v20953_v18 = vld [vmem:[%s29049_s3 + $0xc44] ss:$24 sps:$4 sm:$0xff]  }
 0x7d3   :  { %16528 = vmatpush1.bf16.msra.mxu1 %v20888_v6  ;;  %16863 = vmatprep.subr.bf16.mxu0 %v20893_v26  ;;  %v20956_v5 = vld [vmem:[%s29049_s3 + $0x17ac] ss:$24 sps:$4 sm:$0xff]   ;;  %v20951_v6 = vld [vmem:[%s29049_s3 + $0xc40] ss:$24 sps:$4 sm:$0xff]  }
 0x7d4   :  { %16529 = vmatprep.subr.bf16.mxu1 %v20896_v21  ;;  %v20954_v26 = vld [vmem:[%s29049_s3 + $0x17a8] ss:$24 sps:$4 sm:$0xff]   ;;  %v20959_v21 = vld [vmem:[%s29049_s3 + $0xc74] ss:$24 sps:$4 sm:$0xff]  }
 0x7d6   :  { %16864 = vmatpush1.bf16.msra.mxu0 %v20891_v53  ;;  %v20960_v53 = vld [vmem:[%s29049_s3 + $0x17d8] ss:$24 sps:$4 sm:$0xff]  }
 0x7d7   :  { %16530 = vmatpush1.bf16.msra.mxu1 %v20894_v28  ;;  %16865 = vmatprep.subr.bf16.mxu0 %v20899_v41  ;;  %v20965_v28 = vld [vmem:[%s29049_s3 + $0xca4] ss:$24 sps:$4 sm:$0xff]  }
 0x7d8   :  { %16531 = vmatprep.subr.bf16.mxu1 %v20902_v25  ;;  %v20968_v41 = vld [vmem:[%s29049_s3 + $0x180c] ss:$24 sps:$4 sm:$0xff]   ;;  %v20963_v25 = vld [vmem:[%s29049_s3 + $0xca0] ss:$24 sps:$4 sm:$0xff]  }
 0x7da   :  { %16866 = vmatpush1.bf16.msra.mxu0 %v20897_v49  ;;  %v20966_v49 = vld [vmem:[%s29049_s3 + $0x1808] ss:$24 sps:$4 sm:$0xff]  }
 0x7db   :  { %16532 = vmatpush1.bf16.msra.mxu1 %v20900_v23  ;;  %16867 = vmatprep.subr.bf16.mxu0 %v20905_v30  ;;  %v20971_v23 = vld [vmem:[%s29049_s3 + $0xcd4] ss:$24 sps:$4 sm:$0xff]  }
 0x7dc   :  { %16533 = vmatprep.subr.bf16.mxu1 %v20908_v12  ;;  %v20974_v30 = vld [vmem:[%s29049_s3 + $0x183c] ss:$24 sps:$4 sm:$0xff]   ;;  %v20969_v12 = vld [vmem:[%s29049_s3 + $0xcd0] ss:$24 sps:$4 sm:$0xff]  }
 0x7de   :  { %16868 = vmatpush1.bf16.msra.mxu0 %v20903_v22  ;;  %v20972_v22 = vld [vmem:[%s29049_s3 + $0x1838] ss:$24 sps:$4 sm:$0xff]  }
 0x7df   :  { %16534 = vmatpush1.bf16.msra.mxu1 %v20906_v35  ;;  %16869 = vmatprep.subr.bf16.mxu0 %v20911_v29  ;;  %v20977_v35 = vld [vmem:[%s29049_s3 + $0xd04] ss:$24 sps:$4 sm:$0xff]  }
 0x7e0   :  { %16535 = vmatprep.subr.bf16.mxu1 %v20914_v38  ;;  %v20980_v29 = vld [vmem:[%s29049_s3 + $0x186c] ss:$24 sps:$4 sm:$0xff]   ;;  %v20975_v38 = vld [vmem:[%s29049_s3 + $0xd00] ss:$24 sps:$4 sm:$0xff]  }
 0x7e2   :  { %16870 = vmatpush1.bf16.msra.mxu0 %v20909_v32  ;;  %v20978_v32 = vld [vmem:[%s29049_s3 + $0x1868] ss:$24 sps:$4 sm:$0xff]  }
 0x7e3   :  { %16536 = vmatpush1.bf16.msra.mxu1 %v20912_v3  ;;  %16871 = vmatprep.subr.bf16.mxu0 %v20917_v51  ;;  %v20983_v3 = vld [vmem:[%s29049_s3 + $0xd34] ss:$24 sps:$4 sm:$0xff]  }
 0x7e4   :  { %16537 = vmatprep.subr.bf16.mxu1 %v20920_v33  ;;  %v20986_v51 = vld [vmem:[%s29049_s3 + $0x189c] ss:$24 sps:$4 sm:$0xff]   ;;  %v20981_v33 = vld [vmem:[%s29049_s3 + $0xd30] ss:$24 sps:$4 sm:$0xff]  }
 0x7e6   :  { %16872 = vmatpush1.bf16.msra.mxu0 %v20915_v7  ;;  %v20984_v7 = vld [vmem:[%s29049_s3 + $0x1898] ss:$24 sps:$4 sm:$0xff]  }
 0x7e7   :  { %16538 = vmatpush1.bf16.msra.mxu1 %v20918_v56  ;;  %16873 = vmatprep.subr.bf16.mxu0 %v20923_v2  ;;  %v20989_v56 = vld [vmem:[%s29049_s3 + $0xd64] ss:$24 sps:$4 sm:$0xff]  }
 0x7e8   :  { %16539 = vmatprep.subr.bf16.mxu1 %v20926_v1  ;;  %v20992_v2 = vld [vmem:[%s29049_s3 + $0x18cc] ss:$24 sps:$4 sm:$0xff]   ;;  %v20987_v1 = vld [vmem:[%s29049_s3 + $0xd60] ss:$24 sps:$4 sm:$0xff]  }
 0x7ea   :  { %16874 = vmatpush1.bf16.msra.mxu0 %v20921_v57  ;;  %v20990_v57 = vld [vmem:[%s29049_s3 + $0x18c8] ss:$24 sps:$4 sm:$0xff]  }
 0x7eb   :  { %16540 = vmatpush1.bf16.msra.mxu1 %v20924_v44  ;;  %16875 = vmatprep.subr.bf16.mxu0 %v20929_v19  ;;  %v20995_v44 = vld [vmem:[%s29049_s3 + $0xd94] ss:$24 sps:$4 sm:$0xff]  }
 0x7ec   :  { %16541 = vmatprep.subr.bf16.mxu1 %v20932_v36  ;;  %v20998_v19 = vld [vmem:[%s29049_s3 + $0x18fc] ss:$24 sps:$4 sm:$0xff]   ;;  %v20993_v36 = vld [vmem:[%s29049_s3 + $0xd90] ss:$24 sps:$4 sm:$0xff]  }
 0x7ee   :  { %16876 = vmatpush1.bf16.msra.mxu0 %v20927_v45  ;;  %v20996_v45 = vld [vmem:[%s29049_s3 + $0x18f8] ss:$24 sps:$4 sm:$0xff]  }
 0x7ef   :  { %16542 = vmatpush1.bf16.msra.mxu1 %v20930_v15  ;;  %16877 = vmatprep.subr.bf16.mxu0 %v20935_v11  ;;  %v21001_v15 = vld [vmem:[%s29049_s3 + $0xdc4] ss:$24 sps:$4 sm:$0xff]  }
 0x7f0   :  { %16543 = vmatprep.subr.bf16.mxu1 %v20938_v62  ;;  %v21004_v11 = vld [vmem:[%s29049_s3 + $0x192c] ss:$24 sps:$4 sm:$0xff]   ;;  %v20999_v62 = vld [vmem:[%s29049_s3 + $0xdc0] ss:$24 sps:$4 sm:$0xff]  }
 0x7f2   :  { %16878 = vmatpush1.bf16.msra.mxu0 %v20933_v52  ;;  %v21002_v52 = vld [vmem:[%s29049_s3 + $0x1928] ss:$24 sps:$4 sm:$0xff]  }
 0x7f3   :  { %16544 = vmatpush1.bf16.msra.mxu1 %v20936_v17  ;;  %16879 = vmatprep.subr.bf16.mxu0 %v20941_v20  ;;  %v21007_v17 = vld [vmem:[%s29049_s3 + $0xdf4] ss:$24 sps:$4 sm:$0xff]  }
 0x7f4   :  { %16545 = vmatprep.subr.bf16.mxu1 %v20944_v27  ;;  %v21010_v20 = vld [vmem:[%s29049_s3 + $0x195c] ss:$24 sps:$4 sm:$0xff]   ;;  %v21005_v27 = vld [vmem:[%s29049_s3 + $0xdf0] ss:$24 sps:$4 sm:$0xff]  }
 0x7f6   :  { %16880 = vmatpush1.bf16.msra.mxu0 %v20939_v63  ;;  %v21008_v63 = vld [vmem:[%s29049_s3 + $0x1958] ss:$24 sps:$4 sm:$0xff]  }
 0x7f7   :  { %16546 = vmatpush1.bf16.msra.mxu1 %v20942_v47  ;;  %16890 = vmatprep.subr.bf16.mxu0 %v20947_v39  ;;  %v21013_v47 = vld [vmem:[%s29049_s3 + $0xe24] ss:$24 sps:$4 sm:$0xff]  }
 0x7f8   :  { %16547 = vmatprep.subr.bf16.mxu1 %v20950_v59  ;;  %v21016_v39 = vld [vmem:[%s29049_s3 + $0x198c] ss:$24 sps:$4 sm:$0xff]   ;;  %v21011_v59 = vld [vmem:[%s29049_s3 + $0xe20] ss:$24 sps:$4 sm:$0xff]  }
 0x7f9   :  { %16882 = vmatmul.mubr.bf16.vlgmr.msra.gmra.mrb[20].mxu0 %v24986_v58  ;;  %v20962_v58 = vld [vmem:[%s29049_s3 + $0x17dc] ss:$24 sps:$4 sm:$0xff]  }
 0x7fa   :  { %16891 = vmatpush1.bf16.msra.mxu0 %v20945_v24  ;;  %16922 = vmatprep.mubr.bf16.mxu0 %v24989_v60  ;;  %v20957_v60 = vld [vmem:[%s29049_s3 + $0xc70] ss:$24 sps:$4 sm:$0xff]  }
 0x7fb   :  { %16548 = vmatpush1.bf16.msra.mxu1 %v20948_v13  ;;  %16892 = vmatprep.subr.bf16.mxu0 %v20953_v18  ;;  %v21014_v24 = vld [vmem:[%s29049_s3 + $0x1988] ss:$24 sps:$4 sm:$0xff]   ;;  %v21019_v13 = vld [vmem:[%s29049_s3 + $0xe54] ss:$24 sps:$4 sm:$0xff]  }
 0x7fc   :  { %16549 = vmatprep.subr.bf16.mxu1 %v20956_v5  ;;  %v21022_v18 = vld [vmem:[%s29049_s3 + $0x19bc] ss:$24 sps:$4 sm:$0xff]   ;;  %v21017_v5 = vld [vmem:[%s29049_s3 + $0xe50] ss:$24 sps:$4 sm:$0xff]  }
 0x7fe   :  { %16893 = vmatpush1.bf16.msra.mxu0 %v20951_v6  ;;  %v21020_v6 = vld [vmem:[%s29049_s3 + $0x19b8] ss:$24 sps:$4 sm:$0xff]  }
 0x7ff   :  { %16550 = vmatpush1.bf16.msra.mxu1 %v20954_v26  ;;  %16894 = vmatprep.subr.bf16.mxu0 %v20959_v21  ;;  %v21025_v26 = vld [vmem:[%s29049_s3 + $0xe84] ss:$24 sps:$4 sm:$0xff]  }
 0x800   :  { %16551 = vmatprep.subr.bf16.mxu1 %v20962_v58  ;;  %v21028_v21 = vld [vmem:[%s29049_s3 + $0x19ec] ss:$24 sps:$4 sm:$0xff]   ;;  %v21023_v58 = vld [vmem:[%s29049_s3 + $0xe80] ss:$24 sps:$4 sm:$0xff]  }
 0x802   :  { %16895 = vmatpush1.bf16.msra.mxu0 %v20957_v60  ;;  %v21026_v60 = vld [vmem:[%s29049_s3 + $0x19e8] ss:$24 sps:$4 sm:$0xff]  }
 0x803   :  { %16552 = vmatpush1.bf16.msra.mxu1 %v20960_v53  ;;  %16896 = vmatprep.subr.bf16.mxu0 %v20965_v28  ;;  %v21031_v53 = vld [vmem:[%s29049_s3 + $0xeb4] ss:$24 sps:$4 sm:$0xff]  }
 0x804   :  { %16562 = vmatprep.subr.bf16.mxu1 %v20968_v41  ;;  %v21034_v28 = vld [vmem:[%s29049_s3 + $0x1a1c] ss:$24 sps:$4 sm:$0xff]   ;;  %v21029_v41 = vld [vmem:[%s29049_s3 + $0xeb0] ss:$24 sps:$4 sm:$0xff]  }
 0x806   :  { %16897 = vmatpush1.bf16.msra.mxu0 %v20963_v25  ;;  %16554 = vmatmul.mubr.bf16.vlgmr.msra.gmra.mrb[32].mxu1 %v26013_v8  ;;  %v21032_v25 = vld [vmem:[%s29049_s3 + $0x1a18] ss:$24 sps:$4 sm:$0xff]  }
 0x807   :  { %16563 = vmatpush1.bf16.msra.mxu1 %v20966_v49  ;;  %16594 = vmatprep.mubr.bf16.mxu1 %v26019_v61  ;;  %v21037_v49 = vld [vmem:[%s29049_s3 + $0xee4] ss:$24 sps:$4 sm:$0xff]  }
 0x808   :  { %16898 = vmatprep.subr.bf16.mxu0 %v20971_v23  ;;  %16564 = vmatprep.subr.bf16.mxu1 %v20974_v30  ;;  %v21040_v23 = vld [vmem:[%s29049_s3 + $0x1a4c] ss:$24 sps:$4 sm:$0xff]   ;;  %v21035_v30 = vld [vmem:[%s29049_s3 + $0xee0] ss:$24 sps:$4 sm:$0xff]  }
 0x80a   :  { %16899 = vmatpush1.bf16.msra.mxu0 %v20969_v12  ;;  %v21038_v12 = vld [vmem:[%s29049_s3 + $0x1a48] ss:$24 sps:$4 sm:$0xff]  }
 0x80b   :  { %16565 = vmatpush1.bf16.msra.mxu1 %v20972_v22  ;;  %16900 = vmatprep.subr.bf16.mxu0 %v20977_v35  ;;  %v21043_v22 = vld [vmem:[%s29049_s3 + $0xf14] ss:$24 sps:$4 sm:$0xff]  }
 0x80c   :  { %16566 = vmatprep.subr.bf16.mxu1 %v20980_v29  ;;  %v21046_v35 = vld [vmem:[%s29049_s3 + $0x1a7c] ss:$24 sps:$4 sm:$0xff]   ;;  %v21041_v29 = vld [vmem:[%s29049_s3 + $0xf10] ss:$24 sps:$4 sm:$0xff]  }
 0x80e   :  { %16901 = vmatpush1.bf16.msra.mxu0 %v20975_v38  ;;  %v21044_v38 = vld [vmem:[%s29049_s3 + $0x1a78] ss:$24 sps:$4 sm:$0xff]  }
 0x80f   :  { %16567 = vmatpush1.bf16.msra.mxu1 %v20978_v32  ;;  %16902 = vmatprep.subr.bf16.mxu0 %v20983_v3  ;;  %v21049_v32 = vld [vmem:[%s29049_s3 + $0xf44] ss:$24 sps:$4 sm:$0xff]  }
 0x810   :  { %16568 = vmatprep.subr.bf16.mxu1 %v20986_v51  ;;  %v21052_v3 = vld [vmem:[%s29049_s3 + $0x1aac] ss:$24 sps:$4 sm:$0xff]   ;;  %v21047_v51 = vld [vmem:[%s29049_s3 + $0xf40] ss:$24 sps:$4 sm:$0xff]  }
 0x812   :  { %16903 = vmatpush1.bf16.msra.mxu0 %v20981_v33  ;;  %v21050_v33 = vld [vmem:[%s29049_s3 + $0x1aa8] ss:$24 sps:$4 sm:$0xff]  }
 0x813   :  { %16569 = vmatpush1.bf16.msra.mxu1 %v20984_v7  ;;  %16904 = vmatprep.subr.bf16.mxu0 %v20989_v56  ;;  %v21055_v7 = vld [vmem:[%s29049_s3 + $0xf74] ss:$24 sps:$4 sm:$0xff]   ;;  %v21056_v56 = vld [vmem:[%s29049_s3 + $0x1ad8] ss:$24 sps:$4 sm:$0xff]  }
 0x814   :  { %16570 = vmatprep.subr.bf16.mxu1 %v20992_v2  ;;  %v21061_v2 = vld [vmem:[%s29049_s3 + $0xfa4] ss:$24 sps:$4 sm:$0xff]  }
 0x816   :  { %16905 = vmatpush1.bf16.msra.mxu0 %v20987_v1  ;;  %v21064_v1 = vld [vmem:[%s29049_s3 + $0x1b0c] ss:$24 sps:$4 sm:$0xff]  }
 0x817   :  { %16571 = vmatpush1.bf16.msra.mxu1 %v20990_v57  ;;  %16906 = vmatprep.subr.bf16.mxu0 %v20995_v44  ;;  %v21059_v57 = vld [vmem:[%s29049_s3 + $0xfa0] ss:$24 sps:$4 sm:$0xff]  }
 0x818   :  { %16572 = vmatprep.subr.bf16.mxu1 %v20998_v19  ;;  %v21062_v44 = vld [vmem:[%s29049_s3 + $0x1b08] ss:$24 sps:$4 sm:$0xff]   ;;  %v21067_v19 = vld [vmem:[%s29049_s3 + $0xfd4] ss:$24 sps:$4 sm:$0xff]  }
 0x81a   :  { %16907 = vmatpush1.bf16.msra.mxu0 %v20993_v36  ;;  %v21070_v36 = vld [vmem:[%s29049_s3 + $0x1b3c] ss:$24 sps:$4 sm:$0xff]  }
 0x81b   :  { %16573 = vmatpush1.bf16.msra.mxu1 %v20996_v45  ;;  %16908 = vmatprep.subr.bf16.mxu0 %v21001_v15  ;;  %v21065_v45 = vld [vmem:[%s29049_s3 + $0xfd0] ss:$24 sps:$4 sm:$0xff]  }
 0x81c   :  { %16574 = vmatprep.subr.bf16.mxu1 %v21004_v11  ;;  %v21068_v15 = vld [vmem:[%s29049_s3 + $0x1b38] ss:$24 sps:$4 sm:$0xff]   ;;  %v21073_v11 = vld [vmem:[%s29049_s3 + $0x1004] ss:$24 sps:$4 sm:$0xff]  }
 0x81e   :  { %16909 = vmatpush1.bf16.msra.mxu0 %v20999_v62  ;;  %v21076_v62 = vld [vmem:[%s29049_s3 + $0x1b6c] ss:$24 sps:$4 sm:$0xff]  }
 0x81f   :  { %16575 = vmatpush1.bf16.msra.mxu1 %v21002_v52  ;;  %16910 = vmatprep.subr.bf16.mxu0 %v21007_v17  ;;  %v21071_v52 = vld [vmem:[%s29049_s3 + $0x1000] ss:$24 sps:$4 sm:$0xff]  }
 0x820   :  { %16576 = vmatprep.subr.bf16.mxu1 %v21010_v20  ;;  %v21074_v17 = vld [vmem:[%s29049_s3 + $0x1b68] ss:$24 sps:$4 sm:$0xff]   ;;  %v21079_v20 = vld [vmem:[%s29049_s3 + $0x1034] ss:$24 sps:$4 sm:$0xff]  }
 0x822   :  { %16911 = vmatpush1.bf16.msra.mxu0 %v21005_v27  ;;  %v21082_v27 = vld [vmem:[%s29049_s3 + $0x1b9c] ss:$24 sps:$4 sm:$0xff]  }
 0x823   :  { %16577 = vmatpush1.bf16.msra.mxu1 %v21008_v63  ;;  %16912 = vmatprep.subr.bf16.mxu0 %v21013_v47  ;;  %v21077_v63 = vld [vmem:[%s29049_s3 + $0x1030] ss:$24 sps:$4 sm:$0xff]  }
 0x824   :  { %16578 = vmatprep.subr.bf16.mxu1 %v21016_v39  ;;  %v21080_v47 = vld [vmem:[%s29049_s3 + $0x1b98] ss:$24 sps:$4 sm:$0xff]   ;;  %v21085_v39 = vld [vmem:[%s29049_s3 + $0x1064] ss:$24 sps:$4 sm:$0xff]  }
 0x826   :  { %16913 = vmatpush1.bf16.msra.mxu0 %v21011_v59  ;;  %v21088_v59 = vld [vmem:[%s29049_s3 + $0x1bcc] ss:$24 sps:$4 sm:$0xff]  }
 0x827   :  { %16579 = vmatpush1.bf16.msra.mxu1 %v21014_v24  ;;  %16914 = vmatprep.subr.bf16.mxu0 %v21019_v13  ;;  %v21083_v24 = vld [vmem:[%s29049_s3 + $0x1060] ss:$24 sps:$4 sm:$0xff]  }
 0x828   :  { %16580 = vmatprep.subr.bf16.mxu1 %v21022_v18  ;;  %v21086_v13 = vld [vmem:[%s29049_s3 + $0x1bc8] ss:$24 sps:$4 sm:$0xff]   ;;  %v21091_v18 = vld [vmem:[%s29049_s3 + $0x1094] ss:$24 sps:$4 sm:$0xff]  }
 0x82a   :  { %16915 = vmatpush1.bf16.msra.mxu0 %v21017_v5  ;;  %v21094_v5 = vld [vmem:[%s29049_s3 + $0x1bfc] ss:$24 sps:$4 sm:$0xff]  }
 0x82b   :  { %16581 = vmatpush1.bf16.msra.mxu1 %v21020_v6  ;;  %16916 = vmatprep.subr.bf16.mxu0 %v21025_v26  ;;  %v21089_v6 = vld [vmem:[%s29049_s3 + $0x1090] ss:$24 sps:$4 sm:$0xff]  }
 0x82c   :  { %16582 = vmatprep.subr.bf16.mxu1 %v21028_v21  ;;  %v21092_v26 = vld [vmem:[%s29049_s3 + $0x1bf8] ss:$24 sps:$4 sm:$0xff]   ;;  %v21097_v21 = vld [vmem:[%s29049_s3 + $0x10c4] ss:$24 sps:$4 sm:$0xff]  }
 0x82e   :  { %16917 = vmatpush1.bf16.msra.mxu0 %v21023_v58  ;;  %v21100_v58 = vld [vmem:[%s29049_s3 + $0x1c2c] ss:$24 sps:$4 sm:$0xff]  }
 0x82f   :  { %16583 = vmatpush1.bf16.msra.mxu1 %v21026_v60  ;;  %16918 = vmatprep.subr.bf16.mxu0 %v21031_v53  ;;  %v21095_v60 = vld [vmem:[%s29049_s3 + $0x10c0] ss:$24 sps:$4 sm:$0xff]  }
 0x830   :  { %16584 = vmatprep.subr.bf16.mxu1 %v21034_v28  ;;  %v21098_v53 = vld [vmem:[%s29049_s3 + $0x1c28] ss:$24 sps:$4 sm:$0xff]   ;;  %v21103_v28 = vld [vmem:[%s29049_s3 + $0x10f4] ss:$24 sps:$4 sm:$0xff]  }
 0x832   :  { %16919 = vmatpush1.bf16.msra.mxu0 %v21029_v41  ;;  %v21106_v41 = vld [vmem:[%s29049_s3 + $0x1c5c] ss:$24 sps:$4 sm:$0xff]  }
 0x833   :  { %16585 = vmatpush1.bf16.msra.mxu1 %v21032_v25  ;;  %16920 = vmatprep.subr.bf16.mxu0 %v21037_v49  ;;  %v21101_v25 = vld [vmem:[%s29049_s3 + $0x10f0] ss:$24 sps:$4 sm:$0xff]  }
 0x834   :  { %16586 = vmatprep.subr.bf16.mxu1 %v21040_v23  ;;  %v21104_v49 = vld [vmem:[%s29049_s3 + $0x1c58] ss:$24 sps:$4 sm:$0xff]   ;;  %v21109_v23 = vld [vmem:[%s29049_s3 + $0x1124] ss:$24 sps:$4 sm:$0xff]  }
 0x836   :  { %16921 = vmatpush1.bf16.msra.mxu0 %v21035_v30  ;;  %v21112_v30 = vld [vmem:[%s29049_s3 + $0x1c8c] ss:$24 sps:$4 sm:$0xff]  }
 0x837   :  { %16587 = vmatpush1.bf16.msra.mxu1 %v21038_v12  ;;  %16931 = vmatprep.subr.bf16.mxu0 %v21043_v22  ;;  %v21107_v12 = vld [vmem:[%s29049_s3 + $0x1120] ss:$24 sps:$4 sm:$0xff]  }
 0x838   :  { %16588 = vmatprep.subr.bf16.mxu1 %v21046_v35  ;;  %v21110_v22 = vld [vmem:[%s29049_s3 + $0x1c88] ss:$24 sps:$4 sm:$0xff]   ;;  %v21115_v35 = vld [vmem:[%s29049_s3 + $0x1154] ss:$24 sps:$4 sm:$0xff]  }
 0x839   :  { %16923 = vmatmul.mubr.bf16.vlgmr.msra.gmra.mrb[20].mxu0 %v25196_v10  ;;  %v21058_v10 = vld [vmem:[%s29049_s3 + $0x1adc] ss:$24 sps:$4 sm:$0xff]  }
 0x83a   :  { %16932 = vmatpush1.bf16.msra.mxu0 %v21041_v29  ;;  %16963 = vmatprep.mubr.bf16.mxu0 %v25480_v34  ;;  %v21053_v34 = vld [vmem:[%s29049_s3 + $0xf70] ss:$24 sps:$4 sm:$0xff]   ;;  %v21118_v29 = vld [vmem:[%s29049_s3 + $0x1cbc] ss:$24 sps:$4 sm:$0xff]  }
 0x83b   :  { %16589 = vmatpush1.bf16.msra.mxu1 %v21044_v38  ;;  %16933 = vmatprep.subr.bf16.mxu0 %v21049_v32  ;;  %v21113_v38 = vld [vmem:[%s29049_s3 + $0x1150] ss:$24 sps:$4 sm:$0xff]  }
 0x83c   :  { %16590 = vmatprep.subr.bf16.mxu1 %v21052_v3  ;;  %v21116_v32 = vld [vmem:[%s29049_s3 + $0x1cb8] ss:$24 sps:$4 sm:$0xff]   ;;  %v21121_v3 = vld [vmem:[%s29049_s3 + $0x1184] ss:$24 sps:$4 sm:$0xff]  }
 0x83e   :  { %16934 = vmatpush1.bf16.msra.mxu0 %v21047_v51  ;;  %v21124_v51 = vld [vmem:[%s29049_s3 + $0x1cec] ss:$24 sps:$4 sm:$0xff]  }
 0x83f   :  { %16591 = vmatpush1.bf16.msra.mxu1 %v21050_v33  ;;  %16935 = vmatprep.subr.bf16.mxu0 %v21055_v7  ;;  %v21119_v33 = vld [vmem:[%s29049_s3 + $0x1180] ss:$24 sps:$4 sm:$0xff]  }
 0x840   :  { %16592 = vmatprep.subr.bf16.mxu1 %v21058_v10  ;;  %v21122_v7 = vld [vmem:[%s29049_s3 + $0x1ce8] ss:$24 sps:$4 sm:$0xff]   ;;  %v21127_v10 = vld [vmem:[%s29049_s3 + $0x11b4] ss:$24 sps:$4 sm:$0xff]  }
 0x842   :  { %16936 = vmatpush1.bf16.msra.mxu0 %v21053_v34  ;;  %v21130_v34 = vld [vmem:[%s29049_s3 + $0x1d1c] ss:$24 sps:$4 sm:$0xff]  }
 0x843   :  { %16593 = vmatpush1.bf16.msra.mxu1 %v21056_v56  ;;  %16937 = vmatprep.subr.bf16.mxu0 %v21061_v2  ;;  %v21125_v56 = vld [vmem:[%s29049_s3 + $0x11b0] ss:$24 sps:$4 sm:$0xff]  }
 0x844   :  { %16603 = vmatprep.subr.bf16.mxu1 %v21064_v1  ;;  %v21128_v2 = vld [vmem:[%s29049_s3 + $0x1d18] ss:$24 sps:$4 sm:$0xff]   ;;  %v21133_v1 = vld [vmem:[%s29049_s3 + $0x11e4] ss:$24 sps:$4 sm:$0xff]  }
 0x846   :  { %16938 = vmatpush1.bf16.msra.mxu0 %v21059_v57  ;;  %16595 = vmatmul.mubr.bf16.vlgmr.msra.gmra.mrb[32].mxu1 %v26224_v4  ;;  %v21136_v57 = vld [vmem:[%s29049_s3 + $0x1d4c] ss:$24 sps:$4 sm:$0xff]  }
 0x847   :  { %16604 = vmatpush1.bf16.msra.mxu1 %v21062_v44  ;;  %16635 = vmatprep.mubr.bf16.mxu1 %v26521_v46  ;;  %v21131_v44 = vld [vmem:[%s29049_s3 + $0x11e0] ss:$24 sps:$4 sm:$0xff]  }
 0x848   :  { %16939 = vmatprep.subr.bf16.mxu0 %v21067_v19  ;;  %16605 = vmatprep.subr.bf16.mxu1 %v21070_v36  ;;  %v21134_v19 = vld [vmem:[%s29049_s3 + $0x1d48] ss:$24 sps:$4 sm:$0xff]   ;;  %v21139_v36 = vld [vmem:[%s29049_s3 + $0x1214] ss:$24 sps:$4 sm:$0xff]  }
 0x84a   :  { %16940 = vmatpush1.bf16.msra.mxu0 %v21065_v45  ;;  %v21142_v45 = vld [vmem:[%s29049_s3 + $0x1d7c] ss:$24 sps:$4 sm:$0xff]  }
 0x84b   :  { %16606 = vmatpush1.bf16.msra.mxu1 %v21068_v15  ;;  %16941 = vmatprep.subr.bf16.mxu0 %v21073_v11  ;;  %v21137_v15 = vld [vmem:[%s29049_s3 + $0x1210] ss:$24 sps:$4 sm:$0xff]  }
 0x84c   :  { %16607 = vmatprep.subr.bf16.mxu1 %v21076_v62  ;;  %v21140_v11 = vld [vmem:[%s29049_s3 + $0x1d78] ss:$24 sps:$4 sm:$0xff]   ;;  %v21145_v62 = vld [vmem:[%s29049_s3 + $0x1244] ss:$24 sps:$4 sm:$0xff]  }
 0x84e   :  { %16942 = vmatpush1.bf16.msra.mxu0 %v21071_v52  ;;  %v21148_v52 = vld [vmem:[%s29049_s3 + $0x1dac] ss:$24 sps:$4 sm:$0xff]  }
 0x84f   :  { %16608 = vmatpush1.bf16.msra.mxu1 %v21074_v17  ;;  %16943 = vmatprep.subr.bf16.mxu0 %v21079_v20  ;;  %v21143_v17 = vld [vmem:[%s29049_s3 + $0x1240] ss:$24 sps:$4 sm:$0xff]  }
 0x850   :  { %16609 = vmatprep.subr.bf16.mxu1 %v21082_v27  ;;  %v21146_v20 = vld [vmem:[%s29049_s3 + $0x1da8] ss:$24 sps:$4 sm:$0xff]   ;;  %v21151_v27 = vld [vmem:[%s29049_s3 + $0x1274] ss:$24 sps:$4 sm:$0xff]  }
 0x852   :  { %16944 = vmatpush1.bf16.msra.mxu0 %v21077_v63  ;;  %v21152_v63 = vld [vmem:[%s29049_s3 + $0x1dd8] ss:$24 sps:$4 sm:$0xff]  }
 0x853   :  { %16610 = vmatpush1.bf16.msra.mxu1 %v21080_v47  ;;  %16945 = vmatprep.subr.bf16.mxu0 %v21085_v39  ;;  %v21157_v47 = vld [vmem:[%s29049_s3 + $0x12a4] ss:$24 sps:$4 sm:$0xff]  }
 0x854   :  { %16611 = vmatprep.subr.bf16.mxu1 %v21088_v59  ;;  %v21160_v39 = vld [vmem:[%s29049_s3 + $0x1e0c] ss:$24 sps:$4 sm:$0xff]   ;;  %v21155_v59 = vld [vmem:[%s29049_s3 + $0x12a0] ss:$24 sps:$4 sm:$0xff]  }
 0x856   :  { %16946 = vmatpush1.bf16.msra.mxu0 %v21083_v24  ;;  %v21158_v24 = vld [vmem:[%s29049_s3 + $0x1e08] ss:$24 sps:$4 sm:$0xff]  }
 0x857   :  { %16612 = vmatpush1.bf16.msra.mxu1 %v21086_v13  ;;  %16947 = vmatprep.subr.bf16.mxu0 %v21091_v18  ;;  %v21163_v13 = vld [vmem:[%s29049_s3 + $0x12d4] ss:$24 sps:$4 sm:$0xff]  }
 0x858   :  { %16613 = vmatprep.subr.bf16.mxu1 %v21094_v5  ;;  %v21166_v18 = vld [vmem:[%s29049_s3 + $0x1e3c] ss:$24 sps:$4 sm:$0xff]   ;;  %v21161_v5 = vld [vmem:[%s29049_s3 + $0x12d0] ss:$24 sps:$4 sm:$0xff]  }
 0x85a   :  { %16948 = vmatpush1.bf16.msra.mxu0 %v21089_v6  ;;  %v21164_v6 = vld [vmem:[%s29049_s3 + $0x1e38] ss:$24 sps:$4 sm:$0xff]  }
 0x85b   :  { %16614 = vmatpush1.bf16.msra.mxu1 %v21092_v26  ;;  %16949 = vmatprep.subr.bf16.mxu0 %v21097_v21  ;;  %v21169_v26 = vld [vmem:[%s29049_s3 + $0x1304] ss:$24 sps:$4 sm:$0xff]  }
 0x85c   :  { %16615 = vmatprep.subr.bf16.mxu1 %v21100_v58  ;;  %v21172_v21 = vld [vmem:[%s29049_s3 + $0x1e6c] ss:$24 sps:$4 sm:$0xff]   ;;  %v21167_v58 = vld [vmem:[%s29049_s3 + $0x1300] ss:$24 sps:$4 sm:$0xff]  }
 0x85e   :  { %16950 = vmatpush1.bf16.msra.mxu0 %v21095_v60  ;;  %v21170_v60 = vld [vmem:[%s29049_s3 + $0x1e68] ss:$24 sps:$4 sm:$0xff]  }
 0x85f   :  { %16616 = vmatpush1.bf16.msra.mxu1 %v21098_v53  ;;  %16951 = vmatprep.subr.bf16.mxu0 %v21103_v28  ;;  %v21175_v53 = vld [vmem:[%s29049_s3 + $0x1334] ss:$24 sps:$4 sm:$0xff]  }
 0x860   :  { %16617 = vmatprep.subr.bf16.mxu1 %v21106_v41  ;;  %v21178_v28 = vld [vmem:[%s29049_s3 + $0x1e9c] ss:$24 sps:$4 sm:$0xff]   ;;  %v21173_v41 = vld [vmem:[%s29049_s3 + $0x1330] ss:$24 sps:$4 sm:$0xff]  }
 0x862   :  { %16952 = vmatpush1.bf16.msra.mxu0 %v21101_v25  ;;  %v21176_v25 = vld [vmem:[%s29049_s3 + $0x1e98] ss:$24 sps:$4 sm:$0xff]  }
 0x863   :  { %16618 = vmatpush1.bf16.msra.mxu1 %v21104_v49  ;;  %16953 = vmatprep.subr.bf16.mxu0 %v21109_v23  ;;  %v21181_v49 = vld [vmem:[%s29049_s3 + $0x1364] ss:$24 sps:$4 sm:$0xff]  }
 0x864   :  { %16619 = vmatprep.subr.bf16.mxu1 %v21112_v30  ;;  %v21184_v23 = vld [vmem:[%s29049_s3 + $0x1ecc] ss:$24 sps:$4 sm:$0xff]   ;;  %v21179_v30 = vld [vmem:[%s29049_s3 + $0x1360] ss:$24 sps:$4 sm:$0xff]  }
 0x866   :  { %16954 = vmatpush1.bf16.msra.mxu0 %v21107_v12  ;;  %v21182_v12 = vld [vmem:[%s29049_s3 + $0x1ec8] ss:$24 sps:$4 sm:$0xff]  }
 0x867   :  { %16620 = vmatpush1.bf16.msra.mxu1 %v21110_v22  ;;  %16955 = vmatprep.subr.bf16.mxu0 %v21115_v35  ;;  %v21187_v22 = vld [vmem:[%s29049_s3 + $0x1394] ss:$24 sps:$4 sm:$0xff]  }
 0x868   :  { %16621 = vmatprep.subr.bf16.mxu1 %v21118_v29  ;;  %v21190_v35 = vld [vmem:[%s29049_s3 + $0x1efc] ss:$24 sps:$4 sm:$0xff]   ;;  %v21185_v29 = vld [vmem:[%s29049_s3 + $0x1390] ss:$24 sps:$4 sm:$0xff]  }
 0x86a   :  { %16956 = vmatpush1.bf16.msra.mxu0 %v21113_v38  ;;  %v21188_v38 = vld [vmem:[%s29049_s3 + $0x1ef8] ss:$24 sps:$4 sm:$0xff]  }
 0x86b   :  { %16622 = vmatpush1.bf16.msra.mxu1 %v21116_v32  ;;  %16957 = vmatprep.subr.bf16.mxu0 %v21121_v3  ;;  %v21193_v32 = vld [vmem:[%s29049_s3 + $0x13c4] ss:$24 sps:$4 sm:$0xff]  }
 0x86c   :  { %16623 = vmatprep.subr.bf16.mxu1 %v21124_v51  ;;  %v21196_v3 = vld [vmem:[%s29049_s3 + $0x1f2c] ss:$24 sps:$4 sm:$0xff]   ;;  %v21191_v51 = vld [vmem:[%s29049_s3 + $0x13c0] ss:$24 sps:$4 sm:$0xff]  }
 0x86e   :  { %16958 = vmatpush1.bf16.msra.mxu0 %v21119_v33  ;;  %v21194_v33 = vld [vmem:[%s29049_s3 + $0x1f28] ss:$24 sps:$4 sm:$0xff]  }
 0x86f   :  { %16624 = vmatpush1.bf16.msra.mxu1 %v21122_v7  ;;  %16959 = vmatprep.subr.bf16.mxu0 %v21127_v10  ;;  %v21199_v7 = vld [vmem:[%s29049_s3 + $0x13f4] ss:$24 sps:$4 sm:$0xff]  }
 0x870   :  { %16625 = vmatprep.subr.bf16.mxu1 %v21130_v34  ;;  %v21202_v10 = vld [vmem:[%s29049_s3 + $0x1f5c] ss:$24 sps:$4 sm:$0xff]   ;;  %v21197_v34 = vld [vmem:[%s29049_s3 + $0x13f0] ss:$24 sps:$4 sm:$0xff]  }
 0x872   :  { %16960 = vmatpush1.bf16.msra.mxu0 %v21125_v56  ;;  %v21200_v56 = vld [vmem:[%s29049_s3 + $0x1f58] ss:$24 sps:$4 sm:$0xff]  }
 0x873   :  { %16626 = vmatpush1.bf16.msra.mxu1 %v21128_v2  ;;  %16961 = vmatprep.subr.bf16.mxu0 %v21133_v1  ;;  %v21205_v2 = vld [vmem:[%s29049_s3 + $0x1424] ss:$24 sps:$4 sm:$0xff]  }
 0x874   :  { %16627 = vmatprep.subr.bf16.mxu1 %v21136_v57  ;;  %v21208_v1 = vld [vmem:[%s29049_s3 + $0x1f8c] ss:$24 sps:$4 sm:$0xff]   ;;  %v21203_v57 = vld [vmem:[%s29049_s3 + $0x1420] ss:$24 sps:$4 sm:$0xff]  }
 0x876   :  { %16962 = vmatpush1.bf16.msra.mxu0 %v21131_v44  ;;  %v21206_v44 = vld [vmem:[%s29049_s3 + $0x1f88] ss:$24 sps:$4 sm:$0xff]  }
 0x877   :  { %16628 = vmatpush1.bf16.msra.mxu1 %v21134_v19  ;;  %16972 = vmatprep.subr.bf16.mxu0 %v21139_v36  ;;  %v21211_v19 = vld [vmem:[%s29049_s3 + $0x1454] ss:$24 sps:$4 sm:$0xff]  }
 0x878   :  { %16629 = vmatprep.subr.bf16.mxu1 %v21142_v45  ;;  %v21214_v36 = vld [vmem:[%s29049_s3 + $0x1fbc] ss:$24 sps:$4 sm:$0xff]   ;;  %v21209_v45 = vld [vmem:[%s29049_s3 + $0x1450] ss:$24 sps:$4 sm:$0xff]  }
 0x879   :  { %16964 = vmatmul.mubr.bf16.vlgmr.msra.gmra.mrb[20].mxu0 %v25485_v37  ;;  %v21154_v37 = vld [vmem:[%s29049_s3 + $0x1ddc] ss:$24 sps:$4 sm:$0xff]  }
 0x87a   :  { %16973 = vmatpush1.bf16.msra.mxu0 %v21137_v15  ;;  %17004 = vmatprep.mubr.bf16.mxu0 %v25491_v42  ;;  %v21149_v42 = vld [vmem:[%s29049_s3 + $0x1270] ss:$24 sps:$4 sm:$0xff]  }
 0x87b   :  { %16630 = vmatpush1.bf16.msra.mxu1 %v21140_v11  ;;  %16974 = vmatprep.subr.bf16.mxu0 %v21145_v62  ;;  %v21212_v15 = vld [vmem:[%s29049_s3 + $0x1fb8] ss:$24 sps:$4 sm:$0xff]   ;;  %v21217_v11 = vld [vmem:[%s29049_s3 + $0x1484] ss:$24 sps:$4 sm:$0xff]  }
 0x87c   :  { %16631 = vmatprep.subr.bf16.mxu1 %v21148_v52  ;;  %v21220_v62 = vld [vmem:[%s29049_s3 + $0x1fec] ss:$24 sps:$4 sm:$0xff]   ;;  %v21215_v52 = vld [vmem:[%s29049_s3 + $0x1480] ss:$24 sps:$4 sm:$0xff]  }
 0x87e   :  { %16975 = vmatpush1.bf16.msra.mxu0 %v21143_v17  ;;  %v21218_v17 = vld [vmem:[%s29049_s3 + $0x1fe8] ss:$24 sps:$4 sm:$0xff]  }
 0x87f   :  { %16632 = vmatpush1.bf16.msra.mxu1 %v21146_v20  ;;  %16976 = vmatprep.subr.bf16.mxu0 %v21151_v27  ;;  %v21223_v20 = vld [vmem:[%s29049_s3 + $0x14b4] ss:$24 sps:$4 sm:$0xff]  }
 0x880   :  { %16633 = vmatprep.subr.bf16.mxu1 %v21154_v37  ;;  %v21226_v27 = vld [vmem:[%s29049_s3 + $0x201c] ss:$24 sps:$4 sm:$0xff]   ;;  %v21221_v37 = vld [vmem:[%s29049_s3 + $0x14b0] ss:$24 sps:$4 sm:$0xff]  }
 0x882   :  { %16977 = vmatpush1.bf16.msra.mxu0 %v21149_v42  ;;  %v21224_v42 = vld [vmem:[%s29049_s3 + $0x2018] ss:$24 sps:$4 sm:$0xff]  }
 0x883   :  { %16634 = vmatpush1.bf16.msra.mxu1 %v21152_v63  ;;  %16978 = vmatprep.subr.bf16.mxu0 %v21157_v47  ;;  %v21229_v63 = vld [vmem:[%s29049_s3 + $0x14e4] ss:$24 sps:$4 sm:$0xff]  }
 0x884   :  { %16644 = vmatprep.subr.bf16.mxu1 %v21160_v39  ;;  %v21232_v47 = vld [vmem:[%s29049_s3 + $0x204c] ss:$24 sps:$4 sm:$0xff]   ;;  %v21227_v39 = vld [vmem:[%s29049_s3 + $0x14e0] ss:$24 sps:$4 sm:$0xff]  }
 0x886   :  { %16979 = vmatpush1.bf16.msra.mxu0 %v21155_v59  ;;  %16636 = vmatmul.mubr.bf16.vlgmr.msra.gmra.mrb[32].mxu1 %v26526_v14  ;;  %v21230_v59 = vld [vmem:[%s29049_s3 + $0x2048] ss:$24 sps:$4 sm:$0xff]  }
 0x887   :  { %16645 = vmatpush1.bf16.msra.mxu1 %v21158_v24  ;;  %16676 = vmatprep.mubr.bf16.mxu1 %v26535_v31  ;;  %v21235_v24 = vld [vmem:[%s29049_s3 + $0x1514] ss:$24 sps:$4 sm:$0xff]  }
 0x888   :  { %16980 = vmatprep.subr.bf16.mxu0 %v21163_v13  ;;  %16646 = vmatprep.subr.bf16.mxu1 %v21166_v18  ;;  %v21238_v13 = vld [vmem:[%s29049_s3 + $0x207c] ss:$24 sps:$4 sm:$0xff]   ;;  %v21233_v18 = vld [vmem:[%s29049_s3 + $0x1510] ss:$24 sps:$4 sm:$0xff]  }
 0x88a   :  { %16981 = vmatpush1.bf16.msra.mxu0 %v21161_v5  ;;  %v21236_v5 = vld [vmem:[%s29049_s3 + $0x2078] ss:$24 sps:$4 sm:$0xff]  }
 0x88b   :  { %16647 = vmatpush1.bf16.msra.mxu1 %v21164_v6  ;;  %16982 = vmatprep.subr.bf16.mxu0 %v21169_v26  ;;  %v21241_v6 = vld [vmem:[%s29049_s3 + $0x1544] ss:$24 sps:$4 sm:$0xff]  }
 0x88c   :  { %16648 = vmatprep.subr.bf16.mxu1 %v21172_v21  ;;  %v21244_v26 = vld [vmem:[%s29049_s3 + $0x20ac] ss:$24 sps:$4 sm:$0xff]   ;;  %v21239_v21 = vld [vmem:[%s29049_s3 + $0x1540] ss:$24 sps:$4 sm:$0xff]  }
 0x88e   :  { %16983 = vmatpush1.bf16.msra.mxu0 %v21167_v58  ;;  %v21242_v58 = vld [vmem:[%s29049_s3 + $0x20a8] ss:$24 sps:$4 sm:$0xff]  }
 0x88f   :  { %16649 = vmatpush1.bf16.msra.mxu1 %v21170_v60  ;;  %16984 = vmatprep.subr.bf16.mxu0 %v21175_v53  ;;  %v21247_v60 = vld [vmem:[%s29049_s3 + $0x1574] ss:$24 sps:$4 sm:$0xff]   ;;  %v21248_v53 = vld [vmem:[%s29049_s3 + $0x20d8] ss:$24 sps:$4 sm:$0xff]  }
 0x890   :  { %16650 = vmatprep.subr.bf16.mxu1 %v21178_v28  ;;  %v21253_v28 = vld [vmem:[%s29049_s3 + $0x15a4] ss:$24 sps:$4 sm:$0xff]  }
 0x892   :  { %16985 = vmatpush1.bf16.msra.mxu0 %v21173_v41  ;;  %v21256_v41 = vld [vmem:[%s29049_s3 + $0x210c] ss:$24 sps:$4 sm:$0xff]  }
 0x893   :  { %16651 = vmatpush1.bf16.msra.mxu1 %v21176_v25  ;;  %16986 = vmatprep.subr.bf16.mxu0 %v21181_v49  ;;  %v21251_v25 = vld [vmem:[%s29049_s3 + $0x15a0] ss:$24 sps:$4 sm:$0xff]  }
 0x894   :  { %16652 = vmatprep.subr.bf16.mxu1 %v21184_v23  ;;  %v21254_v49 = vld [vmem:[%s29049_s3 + $0x2108] ss:$24 sps:$4 sm:$0xff]   ;;  %v21259_v23 = vld [vmem:[%s29049_s3 + $0x15d4] ss:$24 sps:$4 sm:$0xff]  }
 0x896   :  { %16987 = vmatpush1.bf16.msra.mxu0 %v21179_v30  ;;  %v21262_v30 = vld [vmem:[%s29049_s3 + $0x213c] ss:$24 sps:$4 sm:$0xff]  }
 0x897   :  { %16653 = vmatpush1.bf16.msra.mxu1 %v21182_v12  ;;  %16988 = vmatprep.subr.bf16.mxu0 %v21187_v22  ;;  %v21257_v12 = vld [vmem:[%s29049_s3 + $0x15d0] ss:$24 sps:$4 sm:$0xff]  }
 0x898   :  { %16654 = vmatprep.subr.bf16.mxu1 %v21190_v35  ;;  %v21260_v22 = vld [vmem:[%s29049_s3 + $0x2138] ss:$24 sps:$4 sm:$0xff]   ;;  %v21265_v35 = vld [vmem:[%s29049_s3 + $0x1604] ss:$24 sps:$4 sm:$0xff]  }
 0x89a   :  { %16989 = vmatpush1.bf16.msra.mxu0 %v21185_v29  ;;  %v21268_v29 = vld [vmem:[%s29049_s3 + $0x216c] ss:$24 sps:$4 sm:$0xff]  }
 0x89b   :  { %16655 = vmatpush1.bf16.msra.mxu1 %v21188_v38  ;;  %16990 = vmatprep.subr.bf16.mxu0 %v21193_v32  ;;  %v21263_v38 = vld [vmem:[%s29049_s3 + $0x1600] ss:$24 sps:$4 sm:$0xff]  }
 0x89c   :  { %16656 = vmatprep.subr.bf16.mxu1 %v21196_v3  ;;  %v21266_v32 = vld [vmem:[%s29049_s3 + $0x2168] ss:$24 sps:$4 sm:$0xff]   ;;  %v21271_v3 = vld [vmem:[%s29049_s3 + $0x1634] ss:$24 sps:$4 sm:$0xff]  }
 0x89e   :  { %16991 = vmatpush1.bf16.msra.mxu0 %v21191_v51  ;;  %v21274_v51 = vld [vmem:[%s29049_s3 + $0x219c] ss:$24 sps:$4 sm:$0xff]  }
 0x89f   :  { %16657 = vmatpush1.bf16.msra.mxu1 %v21194_v33  ;;  %16992 = vmatprep.subr.bf16.mxu0 %v21199_v7  ;;  %v21269_v33 = vld [vmem:[%s29049_s3 + $0x1630] ss:$24 sps:$4 sm:$0xff]  }
 0x8a0   :  { %16658 = vmatprep.subr.bf16.mxu1 %v21202_v10  ;;  %v21272_v7 = vld [vmem:[%s29049_s3 + $0x2198] ss:$24 sps:$4 sm:$0xff]   ;;  %v21277_v10 = vld [vmem:[%s29049_s3 + $0x1664] ss:$24 sps:$4 sm:$0xff]  }
 0x8a2   :  { %16993 = vmatpush1.bf16.msra.mxu0 %v21197_v34  ;;  %v21280_v34 = vld [vmem:[%s29049_s3 + $0x21cc] ss:$24 sps:$4 sm:$0xff]  }
 0x8a3   :  { %16659 = vmatpush1.bf16.msra.mxu1 %v21200_v56  ;;  %16994 = vmatprep.subr.bf16.mxu0 %v21205_v2  ;;  %v21275_v56 = vld [vmem:[%s29049_s3 + $0x1660] ss:$24 sps:$4 sm:$0xff]  }
 0x8a4   :  { %16660 = vmatprep.subr.bf16.mxu1 %v21208_v1  ;;  %v21278_v2 = vld [vmem:[%s29049_s3 + $0x21c8] ss:$24 sps:$4 sm:$0xff]   ;;  %v21283_v1 = vld [vmem:[%s29049_s3 + $0x1694] ss:$24 sps:$4 sm:$0xff]  }
 0x8a6   :  { %16995 = vmatpush1.bf16.msra.mxu0 %v21203_v57  ;;  %v21286_v57 = vld [vmem:[%s29049_s3 + $0x21fc] ss:$24 sps:$4 sm:$0xff]  }
 0x8a7   :  { %16661 = vmatpush1.bf16.msra.mxu1 %v21206_v44  ;;  %16996 = vmatprep.subr.bf16.mxu0 %v21211_v19  ;;  %v21281_v44 = vld [vmem:[%s29049_s3 + $0x1690] ss:$24 sps:$4 sm:$0xff]  }
 0x8a8   :  { %16662 = vmatprep.subr.bf16.mxu1 %v21214_v36  ;;  %v21284_v19 = vld [vmem:[%s29049_s3 + $0x21f8] ss:$24 sps:$4 sm:$0xff]   ;;  %v21289_v36 = vld [vmem:[%s29049_s3 + $0x16c4] ss:$24 sps:$4 sm:$0xff]  }
 0x8aa   :  { %16997 = vmatpush1.bf16.msra.mxu0 %v21209_v45  ;;  %v21292_v45 = vld [vmem:[%s29049_s3 + $0x222c] ss:$24 sps:$4 sm:$0xff]  }
 0x8ab   :  { %16663 = vmatpush1.bf16.msra.mxu1 %v21212_v15  ;;  %16998 = vmatprep.subr.bf16.mxu0 %v21217_v11  ;;  %v21287_v15 = vld [vmem:[%s29049_s3 + $0x16c0] ss:$24 sps:$4 sm:$0xff]  }
 0x8ac   :  { %16664 = vmatprep.subr.bf16.mxu1 %v21220_v62  ;;  %v21290_v11 = vld [vmem:[%s29049_s3 + $0x2228] ss:$24 sps:$4 sm:$0xff]   ;;  %v21295_v62 = vld [vmem:[%s29049_s3 + $0x16f4] ss:$24 sps:$4 sm:$0xff]  }
 0x8ae   :  { %16999 = vmatpush1.bf16.msra.mxu0 %v21215_v52  ;;  %v21298_v52 = vld [vmem:[%s29049_s3 + $0x225c] ss:$24 sps:$4 sm:$0xff]  }
 0x8af   :  { %16665 = vmatpush1.bf16.msra.mxu1 %v21218_v17  ;;  %17000 = vmatprep.subr.bf16.mxu0 %v21223_v20  ;;  %v21293_v17 = vld [vmem:[%s29049_s3 + $0x16f0] ss:$24 sps:$4 sm:$0xff]  }
 0x8b0   :  { %16666 = vmatprep.subr.bf16.mxu1 %v21226_v27  ;;  %v21296_v20 = vld [vmem:[%s29049_s3 + $0x2258] ss:$24 sps:$4 sm:$0xff]   ;;  %v21301_v27 = vld [vmem:[%s29049_s3 + $0x1724] ss:$24 sps:$4 sm:$0xff]  }
 0x8b2   :  { %17001 = vmatpush1.bf16.msra.mxu0 %v21221_v37  ;;  %v21304_v37 = vld [vmem:[%s29049_s3 + $0x228c] ss:$24 sps:$4 sm:$0xff]  }
 0x8b3   :  { %16667 = vmatpush1.bf16.msra.mxu1 %v21224_v42  ;;  %17002 = vmatprep.subr.bf16.mxu0 %v21229_v63  ;;  %v21299_v42 = vld [vmem:[%s29049_s3 + $0x1720] ss:$24 sps:$4 sm:$0xff]  }
 0x8b4   :  { %16668 = vmatprep.subr.bf16.mxu1 %v21232_v47  ;;  %v21302_v63 = vld [vmem:[%s29049_s3 + $0x2288] ss:$24 sps:$4 sm:$0xff]   ;;  %v21307_v47 = vld [vmem:[%s29049_s3 + $0x1754] ss:$24 sps:$4 sm:$0xff]  }
 0x8b6   :  { %17003 = vmatpush1.bf16.msra.mxu0 %v21227_v39  ;;  %v21310_v39 = vld [vmem:[%s29049_s3 + $0x22bc] ss:$24 sps:$4 sm:$0xff]  }
 0x8b7   :  { %16669 = vmatpush1.bf16.msra.mxu1 %v21230_v59  ;;  %17013 = vmatprep.subr.bf16.mxu0 %v21235_v24  ;;  %v21305_v59 = vld [vmem:[%s29049_s3 + $0x1750] ss:$24 sps:$4 sm:$0xff]  }
 0x8b8   :  { %16670 = vmatprep.subr.bf16.mxu1 %v21238_v13  ;;  %v21308_v24 = vld [vmem:[%s29049_s3 + $0x22b8] ss:$24 sps:$4 sm:$0xff]   ;;  %v21313_v13 = vld [vmem:[%s29049_s3 + $0x1784] ss:$24 sps:$4 sm:$0xff]  }
 0x8b9   :  { %17005 = vmatmul.mubr.bf16.vlgmr.msra.gmra.mrb[20].mxu0 %v25696_v55  ;;  %v21250_v55 = vld [vmem:[%s29049_s3 + $0x20dc] ss:$24 sps:$4 sm:$0xff]  }
 0x8ba   :  { %17014 = vmatpush1.bf16.msra.mxu0 %v21233_v18  ;;  %17045 = vmatprep.mubr.bf16.mxu0 %v26008_v0  ;;  %v21245_v0 = vld [vmem:[%s29049_s3 + $0x1570] ss:$24 sps:$4 sm:$0xff]   ;;  %v21316_v18 = vld [vmem:[%s29049_s3 + $0x22ec] ss:$24 sps:$4 sm:$0xff]  }
 0x8bb   :  { %16671 = vmatpush1.bf16.msra.mxu1 %v21236_v5  ;;  %17015 = vmatprep.subr.bf16.mxu0 %v21241_v6  ;;  %v21311_v5 = vld [vmem:[%s29049_s3 + $0x1780] ss:$24 sps:$4 sm:$0xff]  }
 0x8bc   :  { %16672 = vmatprep.subr.bf16.mxu1 %v21244_v26  ;;  %v21314_v6 = vld [vmem:[%s29049_s3 + $0x22e8] ss:$24 sps:$4 sm:$0xff]   ;;  %v21319_v26 = vld [vmem:[%s29049_s3 + $0x17b4] ss:$24 sps:$4 sm:$0xff]  }
 0x8be   :  { %17016 = vmatpush1.bf16.msra.mxu0 %v21239_v21  ;;  %v21322_v21 = vld [vmem:[%s29049_s3 + $0x231c] ss:$24 sps:$4 sm:$0xff]  }
 0x8bf   :  { %16673 = vmatpush1.bf16.msra.mxu1 %v21242_v58  ;;  %17017 = vmatprep.subr.bf16.mxu0 %v21247_v60  ;;  %v21317_v58 = vld [vmem:[%s29049_s3 + $0x17b0] ss:$24 sps:$4 sm:$0xff]  }
 0x8c0   :  { %16674 = vmatprep.subr.bf16.mxu1 %v21250_v55  ;;  %v21320_v60 = vld [vmem:[%s29049_s3 + $0x2318] ss:$24 sps:$4 sm:$0xff]   ;;  %v21325_v55 = vld [vmem:[%s29049_s3 + $0x17e4] ss:$24 sps:$4 sm:$0xff]  }
 0x8c2   :  { %17018 = vmatpush1.bf16.msra.mxu0 %v21245_v0  ;;  %v21328_v0 = vld [vmem:[%s29049_s3 + $0x234c] ss:$24 sps:$4 sm:$0xff]  }
 0x8c3   :  { %16675 = vmatpush1.bf16.msra.mxu1 %v21248_v53  ;;  %17019 = vmatprep.subr.bf16.mxu0 %v21253_v28  ;;  %v21323_v53 = vld [vmem:[%s29049_s3 + $0x17e0] ss:$24 sps:$4 sm:$0xff]  }
 0x8c4   :  { %16685 = vmatprep.subr.bf16.mxu1 %v21256_v41  ;;  %v21326_v28 = vld [vmem:[%s29049_s3 + $0x2348] ss:$24 sps:$4 sm:$0xff]   ;;  %v21331_v41 = vld [vmem:[%s29049_s3 + $0x1814] ss:$24 sps:$4 sm:$0xff]  }
 0x8c6   :  { %17020 = vmatpush1.bf16.msra.mxu0 %v21251_v25  ;;  %16677 = vmatmul.mubr.bf16.vlgmr.msra.gmra.mrb[32].mxu1 %v26742_v40  ;;  %v21334_v25 = vld [vmem:[%s29049_s3 + $0x237c] ss:$24 sps:$4 sm:$0xff]  }
 0x8c7   :  { %16686 = vmatpush1.bf16.msra.mxu1 %v21254_v49  ;;  %16717 = vmatprep.mubr.bf16.mxu1 %v27038_v9  ;;  %v21329_v49 = vld [vmem:[%s29049_s3 + $0x1810] ss:$24 sps:$4 sm:$0xff]  }
 0x8c8   :  { %17021 = vmatprep.subr.bf16.mxu0 %v21259_v23  ;;  %16687 = vmatprep.subr.bf16.mxu1 %v21262_v30  ;;  %v21332_v23 = vld [vmem:[%s29049_s3 + $0x2378] ss:$24 sps:$4 sm:$0xff]   ;;  %v21337_v30 = vld [vmem:[%s29049_s3 + $0x1844] ss:$24 sps:$4 sm:$0xff]  }
 0x8ca   :  { %17022 = vmatpush1.bf16.msra.mxu0 %v21257_v12  ;;  %v21340_v12 = vld [vmem:[%s29049_s3 + $0x23ac] ss:$24 sps:$4 sm:$0xff]  }
 0x8cb   :  { %16688 = vmatpush1.bf16.msra.mxu1 %v21260_v22  ;;  %17023 = vmatprep.subr.bf16.mxu0 %v21265_v35  ;;  %v21335_v22 = vld [vmem:[%s29049_s3 + $0x1840] ss:$24 sps:$4 sm:$0xff]  }
 0x8cc   :  { %16689 = vmatprep.subr.bf16.mxu1 %v21268_v29  ;;  %v21338_v35 = vld [vmem:[%s29049_s3 + $0x23a8] ss:$24 sps:$4 sm:$0xff]   ;;  %v21343_v29 = vld [vmem:[%s29049_s3 + $0x1874] ss:$24 sps:$4 sm:$0xff]  }
 0x8ce   :  { %17024 = vmatpush1.bf16.msra.mxu0 %v21263_v38  ;;  %v21344_v38 = vld [vmem:[%s29049_s3 + $0x23d8] ss:$24 sps:$4 sm:$0xff]  }
 0x8cf   :  { %16690 = vmatpush1.bf16.msra.mxu1 %v21266_v32  ;;  %17025 = vmatprep.subr.bf16.mxu0 %v21271_v3  ;;  %v21349_v32 = vld [vmem:[%s29049_s3 + $0x18a4] ss:$24 sps:$4 sm:$0xff]   ;;  %v21347_v3 = vld [vmem:[%s29049_s3 + $0x18a0] ss:$24 sps:$4 sm:$0xff]  }
 0x8d0   :  { %16691 = vmatprep.subr.bf16.mxu1 %v21274_v51  ;;  %v21352_v51 = vld [vmem:[%s29049_s3 + $0x18d4] ss:$24 sps:$4 sm:$0xff]  }
 0x8d2   :  { %17026 = vmatpush1.bf16.msra.mxu0 %v21269_v33  ;;  %v21350_v33 = vld [vmem:[%s29049_s3 + $0x18d0] ss:$24 sps:$4 sm:$0xff]  }
 0x8d3   :  { %16692 = vmatpush1.bf16.msra.mxu1 %v21272_v7  ;;  %17027 = vmatprep.subr.bf16.mxu0 %v21277_v10  ;;  %v21355_v7 = vld [vmem:[%s29049_s3 + $0x1904] ss:$24 sps:$4 sm:$0xff]   ;;  %v21353_v10 = vld [vmem:[%s29049_s3 + $0x1900] ss:$24 sps:$4 sm:$0xff]  }
 0x8d4   :  { %16693 = vmatprep.subr.bf16.mxu1 %v21280_v34  ;;  %v21358_v34 = vld [vmem:[%s29049_s3 + $0x1934] ss:$24 sps:$4 sm:$0xff]  }
 0x8d6   :  { %17028 = vmatpush1.bf16.msra.mxu0 %v21275_v56  ;;  %v21356_v56 = vld [vmem:[%s29049_s3 + $0x1930] ss:$24 sps:$4 sm:$0xff]  }
 0x8d7   :  { %16694 = vmatpush1.bf16.msra.mxu1 %v21278_v2  ;;  %17029 = vmatprep.subr.bf16.mxu0 %v21283_v1  ;;  %v21361_v2 = vld [vmem:[%s29049_s3 + $0x1964] ss:$24 sps:$4 sm:$0xff]   ;;  %v21359_v1 = vld [vmem:[%s29049_s3 + $0x1960] ss:$24 sps:$4 sm:$0xff]  }
 0x8d8   :  { %16695 = vmatprep.subr.bf16.mxu1 %v21286_v57  ;;  %v21364_v57 = vld [vmem:[%s29049_s3 + $0x1994] ss:$24 sps:$4 sm:$0xff]  }
 0x8da   :  { %17030 = vmatpush1.bf16.msra.mxu0 %v21281_v44  ;;  %v21362_v44 = vld [vmem:[%s29049_s3 + $0x1990] ss:$24 sps:$4 sm:$0xff]  }
 0x8db   :  { %16696 = vmatpush1.bf16.msra.mxu1 %v21284_v19  ;;  %17031 = vmatprep.subr.bf16.mxu0 %v21289_v36  ;;  %v21367_v19 = vld [vmem:[%s29049_s3 + $0x19c4] ss:$24 sps:$4 sm:$0xff]   ;;  %v21365_v36 = vld [vmem:[%s29049_s3 + $0x19c0] ss:$24 sps:$4 sm:$0xff]  }
 0x8dc   :  { %16697 = vmatprep.subr.bf16.mxu1 %v21292_v45  ;;  %v21370_v45 = vld [vmem:[%s29049_s3 + $0x19f4] ss:$24 sps:$4 sm:$0xff]  }
 0x8de   :  { %17032 = vmatpush1.bf16.msra.mxu0 %v21287_v15  ;;  %v21368_v15 = vld [vmem:[%s29049_s3 + $0x19f0] ss:$24 sps:$4 sm:$0xff]  }
 0x8df   :  { %16698 = vmatpush1.bf16.msra.mxu1 %v21290_v11  ;;  %17033 = vmatprep.subr.bf16.mxu0 %v21295_v62  ;;  %v21373_v11 = vld [vmem:[%s29049_s3 + $0x1a24] ss:$24 sps:$4 sm:$0xff]   ;;  %v21371_v62 = vld [vmem:[%s29049_s3 + $0x1a20] ss:$24 sps:$4 sm:$0xff]  }
 0x8e0   :  { %16699 = vmatprep.subr.bf16.mxu1 %v21298_v52  ;;  %v21376_v52 = vld [vmem:[%s29049_s3 + $0x1a54] ss:$24 sps:$4 sm:$0xff]  }
 0x8e2   :  { %17034 = vmatpush1.bf16.msra.mxu0 %v21293_v17  ;;  %v21374_v17 = vld [vmem:[%s29049_s3 + $0x1a50] ss:$24 sps:$4 sm:$0xff]  }
 0x8e3   :  { %16700 = vmatpush1.bf16.msra.mxu1 %v21296_v20  ;;  %17035 = vmatprep.subr.bf16.mxu0 %v21301_v27  ;;  %v21379_v20 = vld [vmem:[%s29049_s3 + $0x1a84] ss:$24 sps:$4 sm:$0xff]   ;;  %v21377_v27 = vld [vmem:[%s29049_s3 + $0x1a80] ss:$24 sps:$4 sm:$0xff]  }
 0x8e4   :  { %16701 = vmatprep.subr.bf16.mxu1 %v21304_v37  ;;  %v21382_v37 = vld [vmem:[%s29049_s3 + $0x1ab4] ss:$24 sps:$4 sm:$0xff]  }
 0x8e6   :  { %17036 = vmatpush1.bf16.msra.mxu0 %v21299_v42  ;;  %v21380_v42 = vld [vmem:[%s29049_s3 + $0x1ab0] ss:$24 sps:$4 sm:$0xff]  }
 0x8e7   :  { %16702 = vmatpush1.bf16.msra.mxu1 %v21302_v63  ;;  %17037 = vmatprep.subr.bf16.mxu0 %v21307_v47  ;;  %v21385_v63 = vld [vmem:[%s29049_s3 + $0x1ae4] ss:$24 sps:$4 sm:$0xff]   ;;  %v21383_v47 = vld [vmem:[%s29049_s3 + $0x1ae0] ss:$24 sps:$4 sm:$0xff]  }
 0x8e8   :  { %16703 = vmatprep.subr.bf16.mxu1 %v21310_v39  ;;  %v21388_v39 = vld [vmem:[%s29049_s3 + $0x1b14] ss:$24 sps:$4 sm:$0xff]  }
 0x8ea   :  { %17038 = vmatpush1.bf16.msra.mxu0 %v21305_v59  ;;  %v21386_v59 = vld [vmem:[%s29049_s3 + $0x1b10] ss:$24 sps:$4 sm:$0xff]  }
 0x8eb   :  { %16704 = vmatpush1.bf16.msra.mxu1 %v21308_v24  ;;  %17039 = vmatprep.subr.bf16.mxu0 %v21313_v13  ;;  %v21391_v24 = vld [vmem:[%s29049_s3 + $0x1b44] ss:$24 sps:$4 sm:$0xff]   ;;  %v21389_v13 = vld [vmem:[%s29049_s3 + $0x1b40] ss:$24 sps:$4 sm:$0xff]  }
 0x8ec   :  { %16705 = vmatprep.subr.bf16.mxu1 %v21316_v18  ;;  %v21394_v18 = vld [vmem:[%s29049_s3 + $0x1b74] ss:$24 sps:$4 sm:$0xff]  }
 0x8ee   :  { %17040 = vmatpush1.bf16.msra.mxu0 %v21311_v5  ;;  %v21392_v5 = vld [vmem:[%s29049_s3 + $0x1b70] ss:$24 sps:$4 sm:$0xff]  }
 0x8ef   :  { %16706 = vmatpush1.bf16.msra.mxu1 %v21314_v6  ;;  %17041 = vmatprep.subr.bf16.mxu0 %v21319_v26  ;;  %v21400_v6 = vld [vmem:[%s29049_s3 + $0x1bd4] ss:$24 sps:$4 sm:$0xff]   ;;  %v21398_v26 = vld [vmem:[%s29049_s3 + $0x1bd0] ss:$24 sps:$4 sm:$0xff]  }
 0x8f0   :  { %16707 = vmatprep.subr.bf16.mxu1 %v21322_v21  ;;  %v21403_v21 = vld [vmem:[%s29049_s3 + $0x1c04] ss:$24 sps:$4 sm:$0xff]  }
 0x8f2   :  { %17042 = vmatpush1.bf16.msra.mxu0 %v21317_v58  ;;  %v21401_v58 = vld [vmem:[%s29049_s3 + $0x1c00] ss:$24 sps:$4 sm:$0xff]  }
 0x8f3   :  { %16708 = vmatpush1.bf16.msra.mxu1 %v21320_v60  ;;  %17043 = vmatprep.subr.bf16.mxu0 %v21325_v55  ;;  %v21406_v60 = vld [vmem:[%s29049_s3 + $0x1c34] ss:$24 sps:$4 sm:$0xff]   ;;  %v21404_v55 = vld [vmem:[%s29049_s3 + $0x1c30] ss:$24 sps:$4 sm:$0xff]  }
 0x8f4   :  { %16709 = vmatprep.subr.bf16.mxu1 %v21328_v0  ;;  %v21409_v0 = vld [vmem:[%s29049_s3 + $0x1c64] ss:$24 sps:$4 sm:$0xff]  }
 0x8f6   :  { %17044 = vmatpush1.bf16.msra.mxu0 %v21323_v53  ;;  %v21407_v53 = vld [vmem:[%s29049_s3 + $0x1c60] ss:$24 sps:$4 sm:$0xff]  }
 0x8f7   :  { %16710 = vmatpush1.bf16.msra.mxu1 %v21326_v28  ;;  %17054 = vmatprep.subr.bf16.mxu0 %v21331_v41  ;;  %v21412_v28 = vld [vmem:[%s29049_s3 + $0x1c94] ss:$24 sps:$4 sm:$0xff]   ;;  %v21410_v41 = vld [vmem:[%s29049_s3 + $0x1c90] ss:$24 sps:$4 sm:$0xff]  }
 0x8f8   :  { %16711 = vmatprep.subr.bf16.mxu1 %v21334_v25  ;;  %v21415_v25 = vld [vmem:[%s29049_s3 + $0x1cc4] ss:$24 sps:$4 sm:$0xff]  }
 0x8f9   :  { %17046 = vmatmul.mubr.bf16.vlgmr.msra.gmra.mrb[20].mxu0 %v26013_v8  ;;  %v21346_v8 = vld [vmem:[%s29049_s3 + $0x23dc] ss:$24 sps:$4 sm:$0xff]  }
 0x8fa   :  { %17055 = vmatpush1.bf16.msra.mxu0 %v21329_v49  ;;  %17086 = vmatprep.mubr.bf16.mxu0 %v26019_v61  ;;  %v21341_v61 = vld [vmem:[%s29049_s3 + $0x1870] ss:$24 sps:$4 sm:$0xff]   ;;  %v21413_v49 = vld [vmem:[%s29049_s3 + $0x1cc0] ss:$24 sps:$4 sm:$0xff]  }
 0x8fb   :  { %16712 = vmatpush1.bf16.msra.mxu1 %v21332_v23  ;;  %17056 = vmatprep.subr.bf16.mxu0 %v21337_v30  ;;  %v21418_v23 = vld [vmem:[%s29049_s3 + $0x1cf4] ss:$24 sps:$4 sm:$0xff]   ;;  %v21416_v30 = vld [vmem:[%s29049_s3 + $0x1cf0] ss:$24 sps:$4 sm:$0xff]  }
 0x8fc   :  { %16713 = vmatprep.subr.bf16.mxu1 %v21340_v12  ;;  %v21421_v12 = vld [vmem:[%s29049_s3 + $0x1d24] ss:$24 sps:$4 sm:$0xff]  }
 0x8fe   :  { %17057 = vmatpush1.bf16.msra.mxu0 %v21335_v22  ;;  %v21419_v22 = vld [vmem:[%s29049_s3 + $0x1d20] ss:$24 sps:$4 sm:$0xff]  }
 0x8ff   :  { %16714 = vmatpush1.bf16.msra.mxu1 %v21338_v35  ;;  %17058 = vmatprep.subr.bf16.mxu0 %v21343_v29  ;;  %v21424_v35 = vld [vmem:[%s29049_s3 + $0x1d54] ss:$24 sps:$4 sm:$0xff]   ;;  %v21422_v29 = vld [vmem:[%s29049_s3 + $0x1d50] ss:$24 sps:$4 sm:$0xff]  }
 0x900   :  { %16715 = vmatprep.subr.bf16.mxu1 %v21346_v8  ;;  %v21427_v8 = vld [vmem:[%s29049_s3 + $0x1d84] ss:$24 sps:$4 sm:$0xff]  }
 0x902   :  { %17059 = vmatpush1.bf16.msra.mxu0 %v21341_v61  ;;  %v21425_v61 = vld [vmem:[%s29049_s3 + $0x1d80] ss:$24 sps:$4 sm:$0xff]  }
 0x903   :  { %16716 = vmatpush1.bf16.msra.mxu1 %v21344_v38  ;;  %17060 = vmatprep.subr.bf16.mxu0 %v21349_v32  ;;  %v21430_v38 = vld [vmem:[%s29049_s3 + $0x1db4] ss:$24 sps:$4 sm:$0xff]   ;;  %v21428_v32 = vld [vmem:[%s29049_s3 + $0x1db0] ss:$24 sps:$4 sm:$0xff]  }
 0x906   :  { %17061 = vmatpush1.bf16.msra.mxu0 %v21347_v3  ;;  %16718 = vmatmul.mubr.bf16.vlgmr.msra.gmra.mrb[32].mxu1 %v27043_v16  ;;  %v21433_v3 = vld [vmem:[%s29049_s3 + $0x1de4] ss:$24 sps:$4 sm:$0xff]  }
 0x907   :  { %17062 = vmatprep.subr.bf16.mxu0 %v21352_v51  ;;  %v21431_v51 = vld [vmem:[%s29049_s3 + $0x1de0] ss:$24 sps:$4 sm:$0xff]  }
 0x90a   :  { %17063 = vmatpush1.bf16.msra.mxu0 %v21350_v33  ;;  %v21436_v33 = vld [vmem:[%s29049_s3 + $0x1e14] ss:$24 sps:$4 sm:$0xff]  }
 0x90b   :  { %17064 = vmatprep.subr.bf16.mxu0 %v21355_v7  ;;  %v21434_v7 = vld [vmem:[%s29049_s3 + $0x1e10] ss:$24 sps:$4 sm:$0xff]  }
 0x90e   :  { %17065 = vmatpush1.bf16.msra.mxu0 %v21353_v10  ;;  %v21439_v10 = vld [vmem:[%s29049_s3 + $0x1e44] ss:$24 sps:$4 sm:$0xff]  }
 0x90f   :  { %17066 = vmatprep.subr.bf16.mxu0 %v21358_v34  ;;  %v21437_v34 = vld [vmem:[%s29049_s3 + $0x1e40] ss:$24 sps:$4 sm:$0xff]  }
 0x912   :  { %17067 = vmatpush1.bf16.msra.mxu0 %v21356_v56  ;;  %v21442_v56 = vld [vmem:[%s29049_s3 + $0x1e74] ss:$24 sps:$4 sm:$0xff]  }
 0x913   :  { %17068 = vmatprep.subr.bf16.mxu0 %v21361_v2  ;;  %v21440_v2 = vld [vmem:[%s29049_s3 + $0x1e70] ss:$24 sps:$4 sm:$0xff]  }
 0x916   :  { %17069 = vmatpush1.bf16.msra.mxu0 %v21359_v1  ;;  %v21448_v1 = vld [vmem:[%s29049_s3 + $0x1ed4] ss:$24 sps:$4 sm:$0xff]  }
 0x917   :  { %17070 = vmatprep.subr.bf16.mxu0 %v21364_v57  ;;  %v21446_v57 = vld [vmem:[%s29049_s3 + $0x1ed0] ss:$24 sps:$4 sm:$0xff]  }
 0x91a   :  { %17071 = vmatpush1.bf16.msra.mxu0 %v21362_v44  ;;  %v21451_v44 = vld [vmem:[%s29049_s3 + $0x1f04] ss:$24 sps:$4 sm:$0xff]  }
 0x91b   :  { %17072 = vmatprep.subr.bf16.mxu0 %v21367_v19  ;;  %v21449_v19 = vld [vmem:[%s29049_s3 + $0x1f00] ss:$24 sps:$4 sm:$0xff]  }
 0x91e   :  { %17073 = vmatpush1.bf16.msra.mxu0 %v21365_v36  ;;  %v21454_v36 = vld [vmem:[%s29049_s3 + $0x1f34] ss:$24 sps:$4 sm:$0xff]  }
 0x91f   :  { %17074 = vmatprep.subr.bf16.mxu0 %v21370_v45  ;;  %v21452_v45 = vld [vmem:[%s29049_s3 + $0x1f30] ss:$24 sps:$4 sm:$0xff]  }
 0x922   :  { %17075 = vmatpush1.bf16.msra.mxu0 %v21368_v15  ;;  %v21457_v15 = vld [vmem:[%s29049_s3 + $0x1f64] ss:$24 sps:$4 sm:$0xff]  }
 0x923   :  { %17076 = vmatprep.subr.bf16.mxu0 %v21373_v11  ;;  %v21455_v11 = vld [vmem:[%s29049_s3 + $0x1f60] ss:$24 sps:$4 sm:$0xff]  }
 0x926   :  { %17077 = vmatpush1.bf16.msra.mxu0 %v21371_v62  ;;  %v21460_v62 = vld [vmem:[%s29049_s3 + $0x1f94] ss:$24 sps:$4 sm:$0xff]  }
 0x927   :  { %17078 = vmatprep.subr.bf16.mxu0 %v21376_v52  ;;  %v21458_v52 = vld [vmem:[%s29049_s3 + $0x1f90] ss:$24 sps:$4 sm:$0xff]  }
 0x92a   :  { %17079 = vmatpush1.bf16.msra.mxu0 %v21374_v17  ;;  %v21463_v17 = vld [vmem:[%s29049_s3 + $0x1fc4] ss:$24 sps:$4 sm:$0xff]  }
 0x92b   :  { %17080 = vmatprep.subr.bf16.mxu0 %v21379_v20  ;;  %v21461_v20 = vld [vmem:[%s29049_s3 + $0x1fc0] ss:$24 sps:$4 sm:$0xff]  }
 0x92e   :  { %17081 = vmatpush1.bf16.msra.mxu0 %v21377_v27  ;;  %v21466_v27 = vld [vmem:[%s29049_s3 + $0x1ff4] ss:$24 sps:$4 sm:$0xff]  }
 0x92f   :  { %17082 = vmatprep.subr.bf16.mxu0 %v21382_v37  ;;  %v21464_v37 = vld [vmem:[%s29049_s3 + $0x1ff0] ss:$24 sps:$4 sm:$0xff]  }
 0x932   :  { %17083 = vmatpush1.bf16.msra.mxu0 %v21380_v42  ;;  %v21469_v42 = vld [vmem:[%s29049_s3 + $0x2024] ss:$24 sps:$4 sm:$0xff]  }
 0x933   :  { %17084 = vmatprep.subr.bf16.mxu0 %v21385_v63  ;;  %v21467_v63 = vld [vmem:[%s29049_s3 + $0x2020] ss:$24 sps:$4 sm:$0xff]  }
 0x936   :  { %17085 = vmatpush1.bf16.msra.mxu0 %v21383_v47  ;;  %v21472_v47 = vld [vmem:[%s29049_s3 + $0x2054] ss:$24 sps:$4 sm:$0xff]  }
 0x937   :  { %17095 = vmatprep.subr.bf16.mxu0 %v21388_v39  ;;  %v21470_v39 = vld [vmem:[%s29049_s3 + $0x2050] ss:$24 sps:$4 sm:$0xff]  }
 0x939   :  { %17087 = vmatmul.mubr.bf16.vlgmr.msra.gmra.mrb[20].mxu0 %v26224_v4  ;;  %v21397_v4 = vld [vmem:[%s29049_s3 + $0x1ba4] ss:$24 sps:$4 sm:$0xff]  }
 0x93a   :  { %17096 = vmatpush1.bf16.msra.mxu0 %v21386_v59  ;;  %17127 = vmatprep.mubr.bf16.mxu0 %v26521_v46  ;;  %v21395_v46 = vld [vmem:[%s29049_s3 + $0x1ba0] ss:$24 sps:$4 sm:$0xff]   ;;  %v21475_v59 = vld [vmem:[%s29049_s3 + $0x2084] ss:$24 sps:$4 sm:$0xff]  }
 0x93b   :  { %17097 = vmatprep.subr.bf16.mxu0 %v21391_v24  ;;  %v21473_v24 = vld [vmem:[%s29049_s3 + $0x2080] ss:$24 sps:$4 sm:$0xff]  }
 0x93e   :  { %17098 = vmatpush1.bf16.msra.mxu0 %v21389_v13  ;;  %v21478_v13 = vld [vmem:[%s29049_s3 + $0x20b4] ss:$24 sps:$4 sm:$0xff]  }
 0x93f   :  { %17099 = vmatprep.subr.bf16.mxu0 %v21394_v18  ;;  %v21476_v18 = vld [vmem:[%s29049_s3 + $0x20b0] ss:$24 sps:$4 sm:$0xff]  }
 0x942   :  { %17100 = vmatpush1.bf16.msra.mxu0 %v21392_v5  ;;  %v21481_v5 = vld [vmem:[%s29049_s3 + $0x20e4] ss:$24 sps:$4 sm:$0xff]  }
 0x943   :  { %17101 = vmatprep.subr.bf16.mxu0 %v21397_v4  ;;  %v21479_v4 = vld [vmem:[%s29049_s3 + $0x20e0] ss:$24 sps:$4 sm:$0xff]  }
 0x946   :  { %17102 = vmatpush1.bf16.msra.mxu0 %v21395_v46  ;;  %v21484_v46 = vld [vmem:[%s29049_s3 + $0x2114] ss:$24 sps:$4 sm:$0xff]  }
 0x947   :  { %17103 = vmatprep.subr.bf16.mxu0 %v21400_v6  ;;  %v21482_v6 = vld [vmem:[%s29049_s3 + $0x2110] ss:$24 sps:$4 sm:$0xff]  }
 0x94a   :  { %17104 = vmatpush1.bf16.msra.mxu0 %v21398_v26  ;;  %v21487_v26 = vld [vmem:[%s29049_s3 + $0x2144] ss:$24 sps:$4 sm:$0xff]  }
 0x94b   :  { %17105 = vmatprep.subr.bf16.mxu0 %v21403_v21  ;;  %v21485_v21 = vld [vmem:[%s29049_s3 + $0x2140] ss:$24 sps:$4 sm:$0xff]  }
 0x94e   :  { %17106 = vmatpush1.bf16.msra.mxu0 %v21401_v58  ;;  %v21490_v58 = vld [vmem:[%s29049_s3 + $0x2174] ss:$24 sps:$4 sm:$0xff]  }
 0x94f   :  { %17107 = vmatprep.subr.bf16.mxu0 %v21406_v60  ;;  %v21488_v60 = vld [vmem:[%s29049_s3 + $0x2170] ss:$24 sps:$4 sm:$0xff]  }
 0x952   :  { %17108 = vmatpush1.bf16.msra.mxu0 %v21404_v55  ;;  %v21496_v55 = vld [vmem:[%s29049_s3 + $0x21d4] ss:$24 sps:$4 sm:$0xff]  }
 0x953   :  { %17109 = vmatprep.subr.bf16.mxu0 %v21409_v0  ;;  %v21494_v0 = vld [vmem:[%s29049_s3 + $0x21d0] ss:$24 sps:$4 sm:$0xff]  }
 0x956   :  { %17110 = vmatpush1.bf16.msra.mxu0 %v21407_v53  ;;  %v21499_v53 = vld [vmem:[%s29049_s3 + $0x2204] ss:$24 sps:$4 sm:$0xff]  }
 0x957   :  { %17111 = vmatprep.subr.bf16.mxu0 %v21412_v28  ;;  %v21497_v28 = vld [vmem:[%s29049_s3 + $0x2200] ss:$24 sps:$4 sm:$0xff]  }
 0x95a   :  { %17112 = vmatpush1.bf16.msra.mxu0 %v21410_v41  ;;  %v21502_v41 = vld [vmem:[%s29049_s3 + $0x2234] ss:$24 sps:$4 sm:$0xff]  }
 0x95b   :  { %17113 = vmatprep.subr.bf16.mxu0 %v21415_v25  ;;  %v21500_v25 = vld [vmem:[%s29049_s3 + $0x2230] ss:$24 sps:$4 sm:$0xff]  }
 0x95e   :  { %17114 = vmatpush1.bf16.msra.mxu0 %v21413_v49  ;;  %v21505_v49 = vld [vmem:[%s29049_s3 + $0x2264] ss:$24 sps:$4 sm:$0xff]  }
 0x95f   :  { %17115 = vmatprep.subr.bf16.mxu0 %v21418_v23  ;;  %v21503_v23 = vld [vmem:[%s29049_s3 + $0x2260] ss:$24 sps:$4 sm:$0xff]  }
 0x962   :  { %17116 = vmatpush1.bf16.msra.mxu0 %v21416_v30  ;;  %v21508_v30 = vld [vmem:[%s29049_s3 + $0x2294] ss:$24 sps:$4 sm:$0xff]  }
 0x963   :  { %17117 = vmatprep.subr.bf16.mxu0 %v21421_v12  ;;  %v21506_v12 = vld [vmem:[%s29049_s3 + $0x2290] ss:$24 sps:$4 sm:$0xff]  }
 0x966   :  { %17118 = vmatpush1.bf16.msra.mxu0 %v21419_v22  ;;  %v21583_v22 = vld [vmem:[%s29051_s4] sm:$0x3f] }
 0x967   :  { %17119 = vmatprep.subr.bf16.mxu0 %v21424_v35  ;;  %v9963_v35 = vrot.slane %v21583_v22, %v24331_v43  ;;  %v21514_v43 = vld [vmem:[%s29049_s3 + $0x22f4] ss:$24 sps:$4 sm:$0xff]  }
 0x96a   :  { %17120 = vmatpush1.bf16.msra.mxu0 %v21422_v29  ;;  %v9967_v29 = vrot.slane %v21583_v22, %v24100_v50 }
 0x96b   :  { %17121 = vmatprep.subr.bf16.mxu0 %v21427_v8  ;;  %v21511_v8 = vld [vmem:[%s29049_s3 + $0x22c4] ss:$24 sps:$4 sm:$0xff]  }
 0x96e   :  { %17122 = vmatpush1.bf16.msra.mxu0 %v21425_v61 }
 0x96f   :  { %17123 = vmatprep.subr.bf16.mxu0 %v21430_v38 }
 0x972   :  { %17124 = vmatpush1.bf16.msra.mxu0 %v21428_v32 }
 0x973   :  { %17125 = vmatprep.subr.bf16.mxu0 %v21433_v3  ;;  %v21509_v3 = vld [vmem:[%s29049_s3 + $0x22c0] ss:$24 sps:$4 sm:$0xff]  }
 0x976   :  { %17126 = vmatpush1.bf16.msra.mxu0 %v21431_v51 }
 0x977   :  { %17136 = vmatprep.subr.bf16.mxu0 %v21436_v33 }
 0x979   :  { %17128 = vmatmul.mubr.bf16.vlgmr.msra.gmra.mrb[20].mxu0 %v26526_v14  ;;  %v21445_v14 = vld [vmem:[%s29049_s3 + $0x1ea4] ss:$24 sps:$4 sm:$0xff]  }
 0x97a   :  { %17137 = vmatpush1.bf16.msra.mxu0 %v21434_v7  ;;  %17168 = vmatprep.mubr.bf16.mxu0 %v26535_v31  ;;  %v21443_v31 = vld [vmem:[%s29049_s3 + $0x1ea0] ss:$24 sps:$4 sm:$0xff]   ;;  %v21512_v7 = vld [vmem:[%s29049_s3 + $0x22f0] ss:$24 sps:$4 sm:$0xff]  }
 0x97b   :  { %17138 = vmatprep.subr.bf16.mxu0 %v21439_v10  ;;  %v21517_v10 = vld [vmem:[%s29049_s3 + $0x2324] ss:$24 sps:$4 sm:$0xff]  }
 0x97e   :  { %17139 = vmatpush1.bf16.msra.mxu0 %v21437_v34  ;;  %v21515_v34 = vld [vmem:[%s29049_s3 + $0x2320] ss:$24 sps:$4 sm:$0xff]  }
 0x97f   :  { %17140 = vmatprep.subr.bf16.mxu0 %v21442_v56  ;;  %v21520_v56 = vld [vmem:[%s29049_s3 + $0x2354] ss:$24 sps:$4 sm:$0xff]  }
 0x982   :  { %17141 = vmatpush1.bf16.msra.mxu0 %v21440_v2  ;;  %v21518_v2 = vld [vmem:[%s29049_s3 + $0x2350] ss:$24 sps:$4 sm:$0xff]  }
 0x983   :  { %17142 = vmatprep.subr.bf16.mxu0 %v21445_v14  ;;  %v21523_v14 = vld [vmem:[%s29049_s3 + $0x2384] ss:$24 sps:$4 sm:$0xff]  }
 0x986   :  { %17143 = vmatpush1.bf16.msra.mxu0 %v21443_v31  ;;  %v21521_v31 = vld [vmem:[%s29049_s3 + $0x2380] ss:$24 sps:$4 sm:$0xff]  }
 0x987   :  { %17144 = vmatprep.subr.bf16.mxu0 %v21448_v1  ;;  %v21526_v1 = vld [vmem:[%s29049_s3 + $0x23b4] ss:$24 sps:$4 sm:$0xff]  }
 0x98a   :  { %17145 = vmatpush1.bf16.msra.mxu0 %v21446_v57  ;;  %v21524_v57 = vld [vmem:[%s29049_s3 + $0x23b0] ss:$24 sps:$4 sm:$0xff]  }
 0x98b   :  { %17146 = vmatprep.subr.bf16.mxu0 %v21451_v44  ;;  %v21529_v44 = vld [vmem:[%s29049_s3 + $0x23e4] ss:$24 sps:$4 sm:$0xff]  }
 0x98e   :  { %17147 = vmatpush1.bf16.msra.mxu0 %v21449_v19  ;;  %v21527_v19 = vld [vmem:[%s29049_s3 + $0x23e0] ss:$24 sps:$4 sm:$0xff]  }
 0x98f   :  { %17148 = vmatprep.subr.bf16.mxu0 %v21454_v36  ;;  %v9971_v36 = vrot.slane %v21583_v22, %v24571_v48 }
 0x992   :  { %17149 = vmatpush1.bf16.msra.mxu0 %v21452_v45  ;;  %v9975_v45 = vrot.slane %v21583_v22, %v24353_v54 }
 0x993   :  { %17150 = vmatprep.subr.bf16.mxu0 %v21457_v15 }
 0x996   :  { %17151 = vmatpush1.bf16.msra.mxu0 %v21455_v11 }
 0x997   :  { %17152 = vmatprep.subr.bf16.mxu0 %v21460_v62 }
 0x99a   :  { %17153 = vmatpush1.bf16.msra.mxu0 %v21458_v52 }
 0x99b   :  { %17154 = vmatprep.subr.bf16.mxu0 %v21463_v17 }
 0x99e   :  { %17155 = vmatpush1.bf16.msra.mxu0 %v21461_v20 }
 0x99f   :  { %17156 = vmatprep.subr.bf16.mxu0 %v21466_v27 }
 0x9a2   :  { %17157 = vmatpush1.bf16.msra.mxu0 %v21464_v37 }
 0x9a3   :  { %17158 = vmatprep.subr.bf16.mxu0 %v21469_v42 }
 0x9a6   :  { %17159 = vmatpush1.bf16.msra.mxu0 %v21467_v63 }
 0x9a7   :  { %17160 = vmatprep.subr.bf16.mxu0 %v21472_v47 }
 0x9aa   :  { %17161 = vmatpush1.bf16.msra.mxu0 %v21470_v39 }
 0x9ab   :  { %17162 = vmatprep.subr.bf16.mxu0 %v21475_v59 }
 0x9ae   :  { %17163 = vmatpush1.bf16.msra.mxu0 %v21473_v24 }
 0x9af   :  { %17164 = vmatprep.subr.bf16.mxu0 %v21478_v13 }
 0x9b2   :  { %17165 = vmatpush1.bf16.msra.mxu0 %v21476_v18 }
 0x9b3   :  { %17166 = vmatprep.subr.bf16.mxu0 %v21481_v5 }
 0x9b6   :  { %17167 = vmatpush1.bf16.msra.mxu0 %v21479_v4 }
 0x9b7   :  { %17177 = vmatprep.subr.bf16.mxu0 %v21484_v46 }
 0x9b9   :  { %17169 = vmatmul.mubr.bf16.vlgmr.msra.gmra.mrb[20].mxu0 %v26742_v40  ;;  %v21493_v40 = vld [vmem:[%s29049_s3 + $0x21a4] ss:$24 sps:$4 sm:$0xff]  }
 0x9ba   :  { %17178 = vmatpush1.bf16.msra.mxu0 %v21482_v6  ;;  %17209 = vmatprep.mubr.bf16.mxu0 %v27038_v9  ;;  %v21491_v9 = vld [vmem:[%s29049_s3 + $0x21a0] ss:$24 sps:$4 sm:$0xff]  }
 0x9bb   :  { %17179 = vmatprep.subr.bf16.mxu0 %v21487_v26 }
 0x9be   :  { %17180 = vmatpush1.bf16.msra.mxu0 %v21485_v21 }
 0x9bf   :  { %17181 = vmatprep.subr.bf16.mxu0 %v21490_v58 }
 0x9c2   :  { %17182 = vmatpush1.bf16.msra.mxu0 %v21488_v60 }
 0x9c3   :  { %17183 = vmatprep.subr.bf16.mxu0 %v21493_v40 }
 0x9c6   :  { %17184 = vmatpush1.bf16.msra.mxu0 %v21491_v9 }
 0x9c7   :  { %17185 = vmatprep.subr.bf16.mxu0 %v21496_v55 }
 0x9ca   :  { %17186 = vmatpush1.bf16.msra.mxu0 %v21494_v0 }
 0x9cb   :  { %17187 = vmatprep.subr.bf16.mxu0 %v21499_v53 }
 0x9ce   :  { %17188 = vmatpush1.bf16.msra.mxu0 %v21497_v28 }
 0x9cf   :  { %17189 = vmatprep.subr.bf16.mxu0 %v21502_v41 }
 0x9d2   :  { %17190 = vmatpush1.bf16.msra.mxu0 %v21500_v25 }
 0x9d3   :  { %17191 = vmatprep.subr.bf16.mxu0 %v21505_v49 }
 0x9d6   :  { %17192 = vmatpush1.bf16.msra.mxu0 %v21503_v23 }
 0x9d7   :  { %17193 = vmatprep.subr.bf16.mxu0 %v21508_v30 }
 0x9d9   :  { %v16719_v61 = vpop.f32.mrb[32].mxu1 }
 0x9da   :  { %v19564_v38 = vadd.f32 %v16719_v61, %v9963_v35  ;;  %17194 = vmatpush1.bf16.msra.mxu0 %v21506_v12  ;;  %v16721_v32 = vpop.f32.mrb[33].mxu1 }
 0x9db   :  { %v19565_v51 = vadd.f32 %v16721_v32, %v9967_v29  ;;  %v16723_v33 = vpop.f32.mrb[34].mxu1  ;;  %17195 = vmatprep.subr.bf16.mxu0 %v21511_v8 }
 0x9dc   :  { %17220 = vst [vmem:[%s29052_s5 + $0x10] sm:$0xff] %v19564_v38  ;;  %v16724_v50 = vpop.f32.mrb[35].mxu1 }
 0x9dd   :  { %17221 = vst [vmem:[%s29052_s5 + $0x18] sm:$0xff] %v19565_v51 }
 0x9de   :  { %17196 = vmatpush1.bf16.msra.mxu0 %v21509_v3 }
 0x9df   :  { %17197 = vmatprep.subr.bf16.mxu0 %v21514_v43 }
 0x9e2   :  { %17198 = vmatpush1.bf16.msra.mxu0 %v21512_v7 }
 0x9e3   :  { %17199 = vmatprep.subr.bf16.mxu0 %v21517_v10 }
 0x9e6   :  { %17200 = vmatpush1.bf16.msra.mxu0 %v21515_v34 }
 0x9e7   :  { %17201 = vmatprep.subr.bf16.mxu0 %v21520_v56 }
 0x9ea   :  { %17202 = vmatpush1.bf16.msra.mxu0 %v21518_v2 }
 0x9eb   :  { %17203 = vmatprep.subr.bf16.mxu0 %v21523_v14 }
 0x9ee   :  { %17204 = vmatpush1.bf16.msra.mxu0 %v21521_v31 }
 0x9ef   :  { %17205 = vmatprep.subr.bf16.mxu0 %v21526_v1 }
 0x9f2   :  { %17206 = vmatpush1.bf16.msra.mxu0 %v21524_v57 }
 0x9f3   :  { %17207 = vmatprep.subr.bf16.mxu0 %v21529_v44 }
 0x9f6   :  { %17208 = vmatpush1.bf16.msra.mxu0 %v21527_v19 }
 0x9f9   :  { %17210 = vmatmul.mubr.bf16.vlgmr.msra.gmra.mrb[20].mxu0 %v27043_v16 }
 0xacc   :  { %v17211_v15 = vpop.f32.mrb[20].mxu0 }
 0xacd   :  { %v19566_v11 = vadd.f32 %v17211_v15, %v9971_v36  ;;  %v17213_v62 = vpop.f32.mrb[21].mxu0 }
 0xace   :  { %v19567_v52 = vadd.f32 %v17213_v62, %v9975_v45  ;;  %v17215_v17 = vpop.f32.mrb[22].mxu0 }
 0xacf   :  { %17222 = vst [vmem:[%s29052_s5 + $0x20] sm:$0xff] %v19566_v11  ;;  %v17216_v20 = vpop.f32.mrb[23].mxu0 }
 0xad0   :  { %17223 = vst [vmem:[%s29052_s5 + $0x28] sm:$0xff] %v19567_v52 }

</bundles_post_ra>
